<compile_context>
chip_gen: v6e
topology: v6e:2x2x1
jax: 0.10.0
libtpu: 0.0.40
codegen_flags: <defaults>
</compile_context>

<pallas_src>
import functools
import math

import numpy as np
import jax
import jax.numpy as jnp
from jax.experimental import pallas as pl
from jax.experimental.pallas import tpu as pltpu

# ----------------------------- config ---------------------------------------
B_SIZE = 2
SEQ_LEN = 16          # configs.seq_len
ENC_IN = 4            # configs.enc_in
MARK_IN = 4           # time-feature width of x_mark_enc
D_MODEL = 32          # configs.d_model
D_FF = 64             # configs.d_ff (also the mask inner_size)
N_HEADS = 4           # configs.n_heads
FACTOR = 8            # configs.factor -> d_k = d_v = bottleneck channels
E_LAYERS = 2          # configs.e_layers
WINDOW_SIZE = [2, 2]  # configs.detail_freq_list

D_K = FACTOR
D_V = FACTOR

ALL_SIZE = [SEQ_LEN]
for _w in WINDOW_SIZE:
    ALL_SIZE.append(ALL_SIZE[-1] // _w)
L_TOT = sum(ALL_SIZE)                    # 16 + 8 + 4 = 28
L_PAD = ((L_TOT + 7) // 8) * 8           # 32 : per-batch pyramid padded to 8-mult
L_B = B_SIZE * SEQ_LEN                   # 32 : batch folded into rows
L_ALL = B_SIZE * L_PAD                   # 64 : rows seen by the encoder layers

MAT_COLS = 64                            # lane width of the packed matrix slab
VEC_COLS = 64                            # lane width of the packed bias-row slab


# ----------------------------- packed-slab layout (static) -------------------
def _round8(n):
    return ((n + 7) // 8) * 8


def _mat_layout():
    entries = [
        ("dn", (L_B, L_B)),                              # block-diag shift: y[t-1]
        ("up", (L_B, L_B)),                              # block-diag shift: y[t+1]
        ("emb_w", (3 * ENC_IN + MARK_IN, D_MODEL)),      # [tok0;tok1;tok2;temp]
        ("pos", (L_B, D_MODEL)),                         # PE tiled per batch (+bias)
        ("down_w", (D_MODEL, FACTOR)),
    ]
    for i in range(len(WINDOW_SIZE)):
        entries += [(f"conv{i}_ev", (FACTOR, FACTOR)),
                    (f"conv{i}_od", (FACTOR, FACTOR))]
    entries.append(("up_w", (FACTOR, D_MODEL)))
    for l in range(E_LAYERS):
        entries += [
            (f"l{l}_wq", (D_MODEL, N_HEADS * D_K)),
            (f"l{l}_wk", (D_MODEL, N_HEADS * D_K)),
            (f"l{l}_wv", (D_MODEL, N_HEADS * D_V)),
            (f"l{l}_fc", (N_HEADS * D_V, D_MODEL)),
            (f"l{l}_w1", (D_MODEL, D_FF)),
            (f"l{l}_w2", (D_FF, D_MODEL)),
        ]
    entries.append(("mask_bias", (L_ALL, L_ALL)))
    off, cur = {}, 0
    for name, (r, c) in entries:
        assert c <= MAT_COLS
        off[name] = (cur, r, c)
        cur += _round8(r)                 # every block starts on an 8-row boundary
    return off, cur


MAT_OFF, MAT_ROWS = _mat_layout()


def _vec_layout():
    entries = [("down_b", FACTOR)]
    for i in range(len(WINDOW_SIZE)):
        entries += [(f"conv{i}_s", FACTOR), (f"conv{i}_t", FACTOR)]
    entries += [("up_b", D_MODEL), ("bln_g", D_MODEL), ("bln_b", D_MODEL)]
    for l in range(E_LAYERS):
        entries += [(f"l{l}_fc_b", D_MODEL),
                    (f"l{l}_ln1_g", D_MODEL), (f"l{l}_ln1_b", D_MODEL),
                    (f"l{l}_b1", D_FF), (f"l{l}_b2", D_MODEL),
                    (f"l{l}_ln2_g", D_MODEL), (f"l{l}_ln2_b", D_MODEL)]
    off = {}
    for i, (name, c) in enumerate(entries):
        assert c <= VEC_COLS
        off[name] = (i, c)
    return off, len(entries)


VEC_OFF, VEC_ROWS = _vec_layout()


# ----------------------------- in-kernel helpers -----------------------------
def _gelu(x):
    # tanh-approximation GELU: one EUP tanh instead of a long erf polynomial.
    c = 0.7978845608028654
    return 0.5 * x * (1.0 + jnp.tanh(c * (x + 0.044715 * x * x * x)))


def _elu(x):
    return jnp.where(x > 0.0, x, jnp.exp(jnp.minimum(x, 0.0)) - 1.0)


def _layer_norm(x, g, b, eps):
    mu = jnp.mean(x, axis=-1, keepdims=True)
    xc = x - mu
    var = jnp.mean(xc * xc, axis=-1, keepdims=True)
    return xc * jax.lax.rsqrt(var + eps) * g + b


def _pool_selectors(n_out):
    """Even/odd row selectors (n_out, 2*n_out) for the stride-2 bottleneck conv.

    With the batch folded contiguously into rows, pooled global row r always
    reads source rows 2r and 2r+1, so the selectors are batch-layout agnostic."""
    r = jax.lax.broadcasted_iota(jnp.int32, (n_out, 2 * n_out), 0)
    c = jax.lax.broadcasted_iota(jnp.int32, (n_out, 2 * n_out), 1)
    ev = jnp.where(c == 2 * r, 1.0, 0.0)
    od = jnp.where(c == 2 * r + 1, 1.0, 0.0)
    return ev, od


# ----------------------------- the fused kernel ------------------------------
def _encoder_kernel(x_ref, xm_ref, mat_ref, vec_ref, o_ref, x_scr):
    f32 = jnp.float32
    dot = functools.partial(jnp.dot, preferred_element_type=f32)

    def M(name):                             # static slice of the matrix slab
        r0, r, c = MAT_OFF[name]
        return mat_ref[r0:r0 + r, 0:c]

    def V(name):                             # static 1-row slice of the bias slab
        r0, c = VEC_OFF[name]
        return vec_ref[r0:r0 + 1, 0:c]

    x_in = x_ref[...]                        # (L_B, ENC_IN)   batch folded in rows
    xm = xm_ref[...]                         # (L_B, MARK_IN)

    # --- DataEmbedding: circular Conv1d(k=3) + time-feature linear + PE ------
    # Per-batch circular wrap is baked into the block-diagonal dn/up matrices.
    xl = dot(M("dn"), x_in)                  # x[t-1]
    xr = dot(M("up"), x_in)                  # x[t+1]
    lhs = jnp.concatenate([xl, x_in, xr, xm], axis=-1)      # (L_B, 16)
    emb = dot(lhs, M("emb_w")) + M("pos")                   # (L_B, D_MODEL)
    # dropout: identity (eval)

    # --- Bottleneck_Construct ------------------------------------------------
    cur = dot(emb, M("down_w")) + V("down_b")               # (L_B, FACTOR)
    ups = []
    lc = L_B
    for i in range(len(WINDOW_SIZE)):                       # window == 2
        lo = lc // 2
        ev, od = _pool_selectors(lo)                        # (lo, lc)
        pooled = (dot(dot(ev, cur), M(f"conv{i}_ev"))       # Conv1d(k=2, s=2)
                  + dot(dot(od, cur), M(f"conv{i}_od")))
        cur = _elu(pooled * V(f"conv{i}_s") + V(f"conv{i}_t"))   # folded eval-BN + ELU
        ups.append(dot(cur, M("up_w")) + V("up_b"))         # (lo, D_MODEL)
        lc = lo

    # Assemble the padded, batch-folded pyramid: per batch [fine, mid, coarse, pad].
    x_scr[...] = jnp.zeros_like(x_scr)                      # zero padded rows
    for b in range(B_SIZE):
        base = b * L_PAD
        x_scr[base:base + SEQ_LEN, :] = emb[b * SEQ_LEN:(b + 1) * SEQ_LEN, :]
        off = base + SEQ_LEN
        for i, sz in enumerate(ALL_SIZE[1:]):
            x_scr[off:off + sz, :] = ups[i][b * sz:(b + 1) * sz, :]
            off += sz
    x = _layer_norm(x_scr[...], V("bln_g"), V("bln_b"), 1e-5)    # (L_ALL, D)

    # --- Encoder layers (post-norm, normalize_before=False) ------------------
    mask_bias = M("mask_bias")               # (L_ALL, L_ALL): block-diag, -1e9 pads
    for l in range(E_LAYERS):
        # fused QKV matmuls; 1/sqrt(d_k) already folded into wq at pack time
        q = dot(x, M(f"l{l}_wq"))            # (L_ALL, H*D_K)
        k = dot(x, M(f"l{l}_wk"))
        v = dot(x, M(f"l{l}_wv"))
        heads = []
        for h in range(N_HEADS):
            lo_, hi_ = h * D_K, (h + 1) * D_K
            s = jax.lax.dot_general(q[:, lo_:hi_], k[:, lo_:hi_],
                                    (((1,), (1,)), ((), ())),
                                    preferred_element_type=f32) + mask_bias
            s = s - jnp.max(s, axis=-1, keepdims=True)
            p = jnp.exp(s)
            p = p / jnp.sum(p, axis=-1, keepdims=True)      # exact (torch parity)
            heads.append(dot(p, v[:, lo_:hi_]))             # (L_ALL, D_V)
        attn = jnp.concatenate(heads, axis=-1)              # (L_ALL, H*D_V)
        o = dot(attn, M(f"l{l}_fc")) + V(f"l{l}_fc_b")      # single output proj
        x = _layer_norm(o + x, V(f"l{l}_ln1_g"), V(f"l{l}_ln1_b"), 1e-6)
        hid = _gelu(dot(x, M(f"l{l}_w1")) + V(f"l{l}_b1"))  # (L_ALL, D_FF)
        ffn = dot(hid, M(f"l{l}_w2")) + V(f"l{l}_b2")       # (L_ALL, D_MODEL)
        x = _layer_norm(ffn + x, V(f"l{l}_ln2_g"), V(f"l{l}_ln2_b"), 1e-6)

    # decoder == 'attention' and truncate: keep only the finest scale per batch.
    for b in range(B_SIZE):
        o_ref[b] = x[b * L_PAD: b * L_PAD + SEQ_LEN, :]
    # TODO(synk): the 'FC' decoder branch (refer_points + torch.gather) is a
    # different config path and is not implemented here.


# ----------------------------- host-side glue --------------------------------
def get_mask(input_size, window_size, inner_size):
    """Pyraformer PAM mask. Returns (float mask: 1.0 == masked, all_size)."""
    all_size = [input_size]
    for w in window_size:
        all_size.append(math.floor(all_size[-1] / w))
    seq_length = sum(all_size)
    mask = np.zeros((seq_length, seq_length), dtype=np.float32)

    inner_window = inner_size // 2
    for layer_idx in range(len(all_size)):
        start = sum(all_size[:layer_idx])
        for i in range(start, start + all_size[layer_idx]):
            left = max(i - inner_window, start)
            right = min(i + inner_window + 1, start + all_size[layer_idx])
            mask[i, left:right] = 1

    for layer_idx in range(1, len(all_size)):
        start = sum(all_size[:layer_idx])
        for i in range(start, start + all_size[layer_idx]):
            left = (start - all_size[layer_idx - 1]) + (i - start) * window_size[layer_idx - 1]
            if i == (start + all_size[layer_idx] - 1):
                right = start
            else:
                right = (start - all_size[layer_idx - 1]) + (i - start + 1) * window_size[layer_idx - 1]
            mask[i, left:right] = 1
            mask[left:right, i] = 1

    return (1.0 - mask), all_size


def positional_embedding(L, d_model):
    pe = np.zeros((L, d_model), dtype=np.float32)
    position = np.arange(L, dtype=np.float32)[:, None]
    div_term = np.exp(np.arange(0, d_model, 2, dtype=np.float32)
                      * -(math.log(10000.0) / d_model))
    pe[:, 0::2] = np.sin(position * div_term)
    pe[:, 1::2] = np.cos(position * div_term)
    return pe


def _block_circ_shifts(nb, s):
    """Block-diagonal circular shifts for nb batches of s rows each.
    (dn @ y)[r] = y[r-1 within its batch, circular]; (up @ y)[r] = y[r+1]."""
    L = nb * s
    dn = np.zeros((L, L), np.float32)
    up = np.zeros((L, L), np.float32)
    for b in range(nb):
        for t in range(s):
            r = b * s + t
            dn[r, b * s + (t - 1) % s] = 1.0
            up[r, b * s + (t + 1) % s] = 1.0
    return dn, up


def init_params(key, seq_len):
    """Raw (torch-layout) parameters."""
    p = {}
    keys = iter(jax.random.split(key, 64))

    def nrm(shape, scale):
        return scale * jax.random.normal(next(keys), shape, jnp.float32)

    # DataEmbedding: TokenEmbedding (circular Conv1d k=3, no bias),
    # TimeFeatureEmbedding (Linear 4->d_model), PositionalEmbedding (fixed).
    p["tok_w"] = nrm((D_MODEL, ENC_IN, 3), 1.0 / math.sqrt(3 * ENC_IN))
    p["temp_w"] = nrm((D_MODEL, MARK_IN), 1.0 / math.sqrt(MARK_IN))
    p["temp_b"] = nrm((D_MODEL,), 0.02)

    # Bottleneck_Construct
    p["down_w"] = nrm((FACTOR, D_MODEL), 1.0 / math.sqrt(D_MODEL))
    p["down_b"] = jnp.zeros((FACTOR,), jnp.float32)
    for i, w in enumerate(WINDOW_SIZE):
        p[f"conv{i}_w"] = nrm((FACTOR, FACTOR, w), 1.0 / math.sqrt(FACTOR * w))
        p[f"conv{i}_b"] = nrm((FACTOR,), 0.02)
        p[f"bn{i}_g"] = 1.0 + nrm((FACTOR,), 0.05)
        p[f"bn{i}_b"] = nrm((FACTOR,), 0.05)
        p[f"bn{i}_m"] = nrm((FACTOR,), 0.1)
        p[f"bn{i}_v"] = 0.9 + 0.2 * jax.random.uniform(next(keys), (FACTOR,), jnp.float32)
    p["up_w"] = nrm((D_MODEL, FACTOR), 1.0 / math.sqrt(FACTOR))
    p["up_b"] = jnp.zeros((D_MODEL,), jnp.float32)
    p["bneck_ln_g"] = jnp.ones((D_MODEL,), jnp.float32)
    p["bneck_ln_b"] = jnp.zeros((D_MODEL,), jnp.float32)

    # Encoder layers
    H, dk, dv = N_HEADS, D_K, D_V
    for l in range(E_LAYERS):
        p[f"l{l}_wq"] = nrm((H * dk, D_MODEL), 1.0 / math.sqrt(D_MODEL))
        p[f"l{l}_wk"] = nrm((H * dk, D_MODEL), 1.0 / math.sqrt(D_MODEL))
        p[f"l{l}_wv"] = nrm((H * dv, D_MODEL), 1.0 / math.sqrt(D_MODEL))
        p[f"l{l}_fc_w"] = nrm((D_MODEL, H * dv), 1.0 / math.sqrt(H * dv))
        p[f"l{l}_fc_b"] = jnp.zeros((D_MODEL,), jnp.float32)
        p[f"l{l}_ln1_g"] = jnp.ones((D_MODEL,), jnp.float32)
        p[f"l{l}_ln1_b"] = jnp.zeros((D_MODEL,), jnp.float32)
        p[f"l{l}_w1"] = nrm((D_FF, D_MODEL), 1.0 / math.sqrt(D_MODEL))
        p[f"l{l}_b1"] = nrm((D_FF,), 0.02)
        p[f"l{l}_w2"] = nrm((D_MODEL, D_FF), 1.0 / math.sqrt(D_FF))
        p[f"l{l}_b2"] = nrm((D_MODEL,), 0.02)
        p[f"l{l}_ln2_g"] = jnp.ones((D_MODEL,), jnp.float32)
        p[f"l{l}_ln2_b"] = jnp.zeros((D_MODEL,), jnp.float32)
    return p


def pack_params(p, mask_np):
    """One-time weight preprocessing: pack everything into two lane-padded slabs."""
    f32 = np.float32
    mats = np.zeros((MAT_ROWS, MAT_COLS), f32)
    vecs = np.zeros((VEC_ROWS, VEC_COLS), f32)

    def put_m(name, arr):
        arr = np.asarray(arr, f32)
        r0, r, c = MAT_OFF[name]
        assert arr.shape == (r, c), (name, arr.shape, (r, c))
        mats[r0:r0 + r, 0:c] = arr

    def put_v(name, arr):
        arr = np.asarray(arr, f32).reshape(-1)
        r0, c = VEC_OFF[name]
        assert arr.shape == (c,), (name, arr.shape, c)
        vecs[r0, 0:c] = arr

    dn, up = _block_circ_shifts(B_SIZE, SEQ_LEN)
    put_m("dn", dn)
    put_m("up", up)

    tok = np.asarray(p["tok_w"], f32)                    # (D, C_in, 3) Conv1d layout
    emb_w = np.concatenate([tok[:, :, 0].T, tok[:, :, 1].T, tok[:, :, 2].T,
                            np.asarray(p["temp_w"], f32).T], axis=0)   # (16, D)
    put_m("emb_w", emb_w)
    pos = positional_embedding(SEQ_LEN, D_MODEL) + np.asarray(p["temp_b"], f32)[None, :]
    put_m("pos", np.tile(pos, (B_SIZE, 1)))              # PE (+ temporal bias) per batch

    put_m("down_w", np.asarray(p["down_w"], f32).T)
    put_v("down_b", p["down_b"])
    for i in range(len(WINDOW_SIZE)):
        W = np.asarray(p[f"conv{i}_w"], f32)             # (c, c, 2)
        put_m(f"conv{i}_ev", W[:, :, 0].T)
        put_m(f"conv{i}_od", W[:, :, 1].T)
        g = np.asarray(p[f"bn{i}_g"], f32); bb = np.asarray(p[f"bn{i}_b"], f32)
        m = np.asarray(p[f"bn{i}_m"], f32); vv = np.asarray(p[f"bn{i}_v"], f32)
        cb = np.asarray(p[f"conv{i}_b"], f32)
        s = g / np.sqrt(vv + 1e-5)                       # eval-mode BN fold
        t = cb * s + bb - m * s                          # conv bias folded in
        put_v(f"conv{i}_s", s)
        put_v(f"conv{i}_t", t)
    put_m("up_w", np.asarray(p["up_w"], f32).T)
    put_v("up_b", p["up_b"])
    put_v("bln_g", p["bneck_ln_g"])
    put_v("bln_b", p["bneck_ln_b"])

    inv_temp = 1.0 / math.sqrt(float(D_K))
    for l in range(E_LAYERS):
        put_m(f"l{l}_wq", np.asarray(p[f"l{l}_wq"], f32).T * inv_temp)  # fold 1/sqrt(dk)
        put_m(f"l{l}_wk", np.asarray(p[f"l{l}_wk"], f32).T)
        put_m(f"l{l}_wv", np.asarray(p[f"l{l}_wv"], f32).T)
        put_m(f"l{l}_fc", np.asarray(p[f"l{l}_fc_w"], f32).T)
        put_m(f"l{l}_w1", np.asarray(p[f"l{l}_w1"], f32).T)
        put_m(f"l{l}_w2", np.asarray(p[f"l{l}_w2"], f32).T)
        put_v(f"l{l}_fc_b", p[f"l{l}_fc_b"])
        put_v(f"l{l}_ln1_g", p[f"l{l}_ln1_g"]); put_v(f"l{l}_ln1_b", p[f"l{l}_ln1_b"])
        put_v(f"l{l}_b1", p[f"l{l}_b1"]); put_v(f"l{l}_b2", p[f"l{l}_b2"])
        put_v(f"l{l}_ln2_g", p[f"l{l}_ln2_g"]); put_v(f"l{l}_ln2_b", p[f"l{l}_ln2_b"])

    # Block-diagonal additive mask: cross-batch blocks and the 4 padded key
    # columns of each batch block are -1e9; masked in-block entries are -1e9.
    mask_bias = np.full((L_ALL, L_ALL), -1e9, f32)
    for b in range(B_SIZE):
        o = b * L_PAD
        mask_bias[o:o + L_TOT, o:o + L_TOT] = np.asarray(mask_np, f32) * f32(-1e9)
    put_m("mask_bias", mask_bias)

    return {"mats": jnp.asarray(mats), "vecs": jnp.asarray(vecs)}


def pyraformer_encoder_forward(mats, vecs, x_enc, x_mark_enc):
    assert x_enc.shape == (B_SIZE, SEQ_LEN, ENC_IN)
    assert x_mark_enc.shape == (B_SIZE, SEQ_LEN, MARK_IN)
    x2d = x_enc.reshape(L_B, ENC_IN).astype(jnp.float32)          # batch folded
    xm2d = x_mark_enc.reshape(L_B, MARK_IN).astype(jnp.float32)

    return pl.pallas_call(
        _encoder_kernel,
        grid=(1,),                       # single step: no per-step overhead replay
        in_specs=[pl.BlockSpec((L_B, ENC_IN), lambda i: (0, 0)),
                  pl.BlockSpec((L_B, MARK_IN), lambda i: (0, 0)),
                  pl.BlockSpec((MAT_ROWS, MAT_COLS), lambda i: (0, 0)),
                  pl.BlockSpec((VEC_ROWS, VEC_COLS), lambda i: (0, 0))],
        out_specs=pl.BlockSpec((B_SIZE, SEQ_LEN, D_MODEL), lambda i: (0, 0, 0)),
        out_shape=jax.ShapeDtypeStruct((B_SIZE, SEQ_LEN, D_MODEL), jnp.float32),
        scratch_shapes=[pltpu.VMEM((L_ALL, D_MODEL), jnp.float32)],
        compiler_params=pltpu.CompilerParams(dimension_semantics=("arbitrary",)),
    )(x2d, xm2d, mats, vecs)


# ----------------------------- main ------------------------------------------
if __name__ == "__main__":
    key = jax.random.PRNGKey(0)
    kx, km, kp = jax.random.split(key, 3)
    x_enc = jax.random.normal(kx, (B_SIZE, SEQ_LEN, ENC_IN), jnp.float32)
    x_mark_enc = jax.random.normal(km, (B_SIZE, SEQ_LEN, MARK_IN), jnp.float32)

    mask_np, all_size = get_mask(SEQ_LEN, WINDOW_SIZE, D_FF)
    assert list(all_size) == ALL_SIZE

    raw_params = init_params(kp, SEQ_LEN)
    packed = pack_params(raw_params, mask_np)      # one-time weight prep

    fwd = jax.jit(pyraformer_encoder_forward)
    out = fwd(packed["mats"], packed["vecs"], x_enc, x_mark_enc)
    out = jax.block_until_ready(out)

    assert out.shape == (B_SIZE, SEQ_LEN, D_MODEL), out.shape
    assert bool(jnp.all(jnp.isfinite(out)))
    print("KERNEL_OK")
</pallas_src>

<mosaic_0001>
module attributes {stable_mosaic.version = 11 : i64} {
  func.func @_encoder_kernel(%arg0: i32, %arg1: memref<32x4xf32, #tpu.memory_space<vmem>>, %arg2: memref<32x4xf32, #tpu.memory_space<vmem>>, %arg3: memref<696x64xf32, #tpu.memory_space<vmem>>, %arg4: memref<22x64xf32, #tpu.memory_space<vmem>>, %arg5: memref<2x16x32xf32, #tpu.memory_space<vmem>>, %arg6: memref<64x32xf32, #tpu.memory_space<vmem>>) attributes {dimension_semantics = [#tpu.dimension_semantics<arbitrary>], iteration_bounds = array<i64: 1>, scalar_prefetch = 0 : i64, scratch_operands = 1 : i64, tpu.core_type = #tpu.core_type<tc>, window_params = [{pipeline_mode = #tpu.pipeline_mode<synchronous>, transform_indices = @transform_0, window_bounds = array<i64: 32, 4>}, {pipeline_mode = #tpu.pipeline_mode<synchronous>, transform_indices = @transform_1, window_bounds = array<i64: 32, 4>}, {pipeline_mode = #tpu.pipeline_mode<synchronous>, transform_indices = @transform_2, window_bounds = array<i64: 696, 64>}, {pipeline_mode = #tpu.pipeline_mode<synchronous>, transform_indices = @transform_3, window_bounds = array<i64: 22, 64>}, {pipeline_mode = #tpu.pipeline_mode<synchronous>, transform_indices = @transform_4, window_bounds = array<i64: 2, 16, 32>}]} {
    %c0 = arith.constant 0 : index
    %c0_0 = arith.constant 0 : index
    %0 = vector.load %arg1[%c0, %c0_0] : memref<32x4xf32, #tpu.memory_space<vmem>>, vector<32x4xf32>
    %c0_1 = arith.constant 0 : index
    %c0_2 = arith.constant 0 : index
    %1 = vector.load %arg2[%c0_1, %c0_2] : memref<32x4xf32, #tpu.memory_space<vmem>>, vector<32x4xf32>
    %c0_3 = arith.constant 0 : index
    %c0_4 = arith.constant 0 : index
    %2 = vector.load %arg3[%c0_3, %c0_4] : memref<696x64xf32, #tpu.memory_space<vmem>>, vector<32x32xf32>
    %cst = arith.constant dense<0.000000e+00> : vector<32x4xf32>
    %3 = tpu.matmul %2, %0, %cst {dimension_numbers = #tpu.dot_dimension_numbers<[1], [0], [0], [1], [0, 0, 1, 1], [], []>} : vector<32x32xf32>, vector<32x4xf32>, vector<32x4xf32> -> vector<32x4xf32>
    %c32 = arith.constant 32 : index
    %c0_5 = arith.constant 0 : index
    %4 = vector.load %arg3[%c32, %c0_5] : memref<696x64xf32, #tpu.memory_space<vmem>>, vector<32x32xf32>
    %cst_6 = arith.constant dense<0.000000e+00> : vector<32x4xf32>
    %5 = tpu.matmul %4, %0, %cst_6 {dimension_numbers = #tpu.dot_dimension_numbers<[1], [0], [0], [1], [0, 0, 1, 1], [], []>} : vector<32x32xf32>, vector<32x4xf32>, vector<32x4xf32> -> vector<32x4xf32>
    %6 = tpu.concatenate %3, %0, %5, %1 in 1 : vector<32x4xf32>, vector<32x4xf32>, vector<32x4xf32>, vector<32x4xf32> -> vector<32x16xf32>
    %c64 = arith.constant 64 : index
    %c0_7 = arith.constant 0 : index
    %7 = vector.load %arg3[%c64, %c0_7] : memref<696x64xf32, #tpu.memory_space<vmem>>, vector<16x32xf32>
    %cst_8 = arith.constant dense<0.000000e+00> : vector<32x32xf32>
    %8 = tpu.matmul %6, %7, %cst_8 {dimension_numbers = #tpu.dot_dimension_numbers<[1], [0], [0], [1], [0, 0, 1, 1], [], []>} : vector<32x16xf32>, vector<16x32xf32>, vector<32x32xf32> -> vector<32x32xf32>
    %c80 = arith.constant 80 : index
    %c0_9 = arith.constant 0 : index
    %9 = vector.load %arg3[%c80, %c0_9] : memref<696x64xf32, #tpu.memory_space<vmem>>, vector<32x32xf32>
    %10 = arith.addf %8, %9 : vector<32x32xf32>
    %c112 = arith.constant 112 : index
    %c0_10 = arith.constant 0 : index
    %11 = vector.load %arg3[%c112, %c0_10] : memref<696x64xf32, #tpu.memory_space<vmem>>, vector<32x8xf32>
    %cst_11 = arith.constant dense<0.000000e+00> : vector<32x8xf32>
    %12 = tpu.matmul %10, %11, %cst_11 {dimension_numbers = #tpu.dot_dimension_numbers<[1], [0], [0], [1], [0, 0, 1, 1], [], []>} : vector<32x32xf32>, vector<32x8xf32>, vector<32x8xf32> -> vector<32x8xf32>
    %c0_12 = arith.constant 0 : index
    %c0_13 = arith.constant 0 : index
    %13 = vector.load %arg4[%c0_12, %c0_13] : memref<22x64xf32, #tpu.memory_space<vmem>>, vector<1x8xf32>
    %14 = vector.broadcast %13 : vector<1x8xf32> to vector<32x8xf32>
    %15 = arith.addf %12, %14 : vector<32x8xf32>
    %16 = tpu.iota {dimensions = array<i32: 0>} : vector<16x32xi32>
    %17 = tpu.iota {dimensions = array<i32: 1>} : vector<16x32xi32>
    %c2_i32 = arith.constant 2 : i32
    %18 = vector.broadcast %c2_i32 : i32 to vector<16x32xi32>
    %19 = arith.muli %18, %16 : vector<16x32xi32>
    %20 = arith.cmpi eq, %17, %19 : vector<16x32xi32>
    %cst_14 = arith.constant 1.000000e+00 : f32
    %cst_15 = arith.constant 0.000000e+00 : f32
    %21 = vector.broadcast %cst_14 : f32 to vector<16x32xf32>
    %22 = vector.broadcast %cst_15 : f32 to vector<16x32xf32>
    %23 = arith.select %20, %21, %22 : vector<16x32xi1>, vector<16x32xf32>
    %c2_i32_16 = arith.constant 2 : i32
    %24 = vector.broadcast %c2_i32_16 : i32 to vector<16x32xi32>
    %25 = arith.muli %24, %16 : vector<16x32xi32>
    %c1_i32 = arith.constant 1 : i32
    %26 = vector.broadcast %c1_i32 : i32 to vector<16x32xi32>
    %27 = arith.addi %25, %26 : vector<16x32xi32>
    %28 = arith.cmpi eq, %17, %27 : vector<16x32xi32>
    %cst_17 = arith.constant 1.000000e+00 : f32
    %cst_18 = arith.constant 0.000000e+00 : f32
    %29 = vector.broadcast %cst_17 : f32 to vector<16x32xf32>
    %30 = vector.broadcast %cst_18 : f32 to vector<16x32xf32>
    %31 = arith.select %28, %29, %30 : vector<16x32xi1>, vector<16x32xf32>
    %cst_19 = arith.constant dense<0.000000e+00> : vector<16x8xf32>
    %32 = tpu.matmul %23, %15, %cst_19 {dimension_numbers = #tpu.dot_dimension_numbers<[1], [0], [0], [1], [0, 0, 1, 1], [], []>} : vector<16x32xf32>, vector<32x8xf32>, vector<16x8xf32> -> vector<16x8xf32>
    %c144 = arith.constant 144 : index
    %c0_20 = arith.constant 0 : index
    %33 = vector.load %arg3[%c144, %c0_20] : memref<696x64xf32, #tpu.memory_space<vmem>>, vector<8x8xf32>
    %cst_21 = arith.constant dense<0.000000e+00> : vector<16x8xf32>
    %34 = tpu.matmul %32, %33, %cst_21 {dimension_numbers = #tpu.dot_dimension_numbers<[1], [0], [0], [1], [0, 0, 1, 1], [], []>} : vector<16x8xf32>, vector<8x8xf32>, vector<16x8xf32> -> vector<16x8xf32>
    %cst_22 = arith.constant dense<0.000000e+00> : vector<16x8xf32>
    %35 = tpu.matmul %31, %15, %cst_22 {dimension_numbers = #tpu.dot_dimension_numbers<[1], [0], [0], [1], [0, 0, 1, 1], [], []>} : vector<16x32xf32>, vector<32x8xf32>, vector<16x8xf32> -> vector<16x8xf32>
    %c152 = arith.constant 152 : index
    %c0_23 = arith.constant 0 : index
    %36 = vector.load %arg3[%c152, %c0_23] : memref<696x64xf32, #tpu.memory_space<vmem>>, vector<8x8xf32>
    %cst_24 = arith.constant dense<0.000000e+00> : vector<16x8xf32>
    %37 = tpu.matmul %35, %36, %cst_24 {dimension_numbers = #tpu.dot_dimension_numbers<[1], [0], [0], [1], [0, 0, 1, 1], [], []>} : vector<16x8xf32>, vector<8x8xf32>, vector<16x8xf32> -> vector<16x8xf32>
    %38 = arith.addf %34, %37 : vector<16x8xf32>
    %c1 = arith.constant 1 : index
    %c0_25 = arith.constant 0 : index
    %39 = vector.load %arg4[%c1, %c0_25] : memref<22x64xf32, #tpu.memory_space<vmem>>, vector<1x8xf32>
    %40 = vector.broadcast %39 : vector<1x8xf32> to vector<16x8xf32>
    %41 = arith.mulf %38, %40 : vector<16x8xf32>
    %c2 = arith.constant 2 : index
    %c0_26 = arith.constant 0 : index
    %42 = vector.load %arg4[%c2, %c0_26] : memref<22x64xf32, #tpu.memory_space<vmem>>, vector<1x8xf32>
    %43 = vector.broadcast %42 : vector<1x8xf32> to vector<16x8xf32>
    %44 = arith.addf %41, %43 : vector<16x8xf32>
    %cst_27 = arith.constant 0.000000e+00 : f32
    %45 = vector.broadcast %cst_27 : f32 to vector<16x8xf32>
    %46 = arith.cmpf ogt, %44, %45 : vector<16x8xf32>
    %cst_28 = arith.constant 0.000000e+00 : f32
    %47 = vector.broadcast %cst_28 : f32 to vector<16x8xf32>
    %48 = arith.minimumf %44, %47 : vector<16x8xf32>
    %49 = math.exp %48 : vector<16x8xf32>
    %cst_29 = arith.constant 1.000000e+00 : f32
    %50 = vector.broadcast %cst_29 : f32 to vector<16x8xf32>
    %51 = arith.subf %49, %50 : vector<16x8xf32>
    %52 = arith.select %46, %44, %51 : vector<16x8xi1>, vector<16x8xf32>
    %c176 = arith.constant 176 : index
    %c0_30 = arith.constant 0 : index
    %53 = vector.load %arg3[%c176, %c0_30] : memref<696x64xf32, #tpu.memory_space<vmem>>, vector<8x32xf32>
    %cst_31 = arith.constant dense<0.000000e+00> : vector<16x32xf32>
    %54 = tpu.matmul %52, %53, %cst_31 {dimension_numbers = #tpu.dot_dimension_numbers<[1], [0], [0], [1], [0, 0, 1, 1], [], []>} : vector<16x8xf32>, vector<8x32xf32>, vector<16x32xf32> -> vector<16x32xf32>
    %c5 = arith.constant 5 : index
    %c0_32 = arith.constant 0 : index
    %55 = vector.load %arg4[%c5, %c0_32] : memref<22x64xf32, #tpu.memory_space<vmem>>, vector<1x32xf32>
    %56 = vector.broadcast %55 : vector<1x32xf32> to vector<16x32xf32>
    %57 = arith.addf %54, %56 : vector<16x32xf32>
    %58 = tpu.iota {dimensions = array<i32: 0>} : vector<8x16xi32>
    %59 = tpu.iota {dimensions = array<i32: 1>} : vector<8x16xi32>
    %c2_i32_33 = arith.constant 2 : i32
    %60 = vector.broadcast %c2_i32_33 : i32 to vector<8x16xi32>
    %61 = arith.muli %60, %58 : vector<8x16xi32>
    %62 = arith.cmpi eq, %59, %61 : vector<8x16xi32>
    %cst_34 = arith.constant 1.000000e+00 : f32
    %cst_35 = arith.constant 0.000000e+00 : f32
    %63 = vector.broadcast %cst_34 : f32 to vector<8x16xf32>
    %64 = vector.broadcast %cst_35 : f32 to vector<8x16xf32>
    %65 = arith.select %62, %63, %64 : vector<8x16xi1>, vector<8x16xf32>
    %c2_i32_36 = arith.constant 2 : i32
    %66 = vector.broadcast %c2_i32_36 : i32 to vector<8x16xi32>
    %67 = arith.muli %66, %58 : vector<8x16xi32>
    %c1_i32_37 = arith.constant 1 : i32
    %68 = vector.broadcast %c1_i32_37 : i32 to vector<8x16xi32>
    %69 = arith.addi %67, %68 : vector<8x16xi32>
    %70 = arith.cmpi eq, %59, %69 : vector<8x16xi32>
    %cst_38 = arith.constant 1.000000e+00 : f32
    %cst_39 = arith.constant 0.000000e+00 : f32
    %71 = vector.broadcast %cst_38 : f32 to vector<8x16xf32>
    %72 = vector.broadcast %cst_39 : f32 to vector<8x16xf32>
    %73 = arith.select %70, %71, %72 : vector<8x16xi1>, vector<8x16xf32>
    %cst_40 = arith.constant dense<0.000000e+00> : vector<8x8xf32>
    %74 = tpu.matmul %65, %52, %cst_40 {dimension_numbers = #tpu.dot_dimension_numbers<[1], [0], [0], [1], [0, 0, 1, 1], [], []>} : vector<8x16xf32>, vector<16x8xf32>, vector<8x8xf32> -> vector<8x8xf32>
    %c160 = arith.constant 160 : index
    %c0_41 = arith.constant 0 : index
    %75 = vector.load %arg3[%c160, %c0_41] : memref<696x64xf32, #tpu.memory_space<vmem>>, vector<8x8xf32>
    %cst_42 = arith.constant dense<0.000000e+00> : vector<8x8xf32>
    %76 = tpu.matmul %74, %75, %cst_42 {dimension_numbers = #tpu.dot_dimension_numbers<[1], [0], [0], [1], [0, 0, 1, 1], [], []>} : vector<8x8xf32>, vector<8x8xf32>, vector<8x8xf32> -> vector<8x8xf32>
    %cst_43 = arith.constant dense<0.000000e+00> : vector<8x8xf32>
    %77 = tpu.matmul %73, %52, %cst_43 {dimension_numbers = #tpu.dot_dimension_numbers<[1], [0], [0], [1], [0, 0, 1, 1], [], []>} : vector<8x16xf32>, vector<16x8xf32>, vector<8x8xf32> -> vector<8x8xf32>
    %c168 = arith.constant 168 : index
    %c0_44 = arith.constant 0 : index
    %78 = vector.load %arg3[%c168, %c0_44] : memref<696x64xf32, #tpu.memory_space<vmem>>, vector<8x8xf32>
    %cst_45 = arith.constant dense<0.000000e+00> : vector<8x8xf32>
    %79 = tpu.matmul %77, %78, %cst_45 {dimension_numbers = #tpu.dot_dimension_numbers<[1], [0], [0], [1], [0, 0, 1, 1], [], []>} : vector<8x8xf32>, vector<8x8xf32>, vector<8x8xf32> -> vector<8x8xf32>
    %80 = arith.addf %76, %79 : vector<8x8xf32>
    %c3 = arith.constant 3 : index
    %c0_46 = arith.constant 0 : index
    %81 = vector.load %arg4[%c3, %c0_46] : memref<22x64xf32, #tpu.memory_space<vmem>>, vector<1x8xf32>
    %82 = vector.broadcast %81 : vector<1x8xf32> to vector<8x8xf32>
    %83 = arith.mulf %80, %82 : vector<8x8xf32>
    %c4 = arith.constant 4 : index
    %c0_47 = arith.constant 0 : index
    %84 = vector.load %arg4[%c4, %c0_47] : memref<22x64xf32, #tpu.memory_space<vmem>>, vector<1x8xf32>
    %85 = vector.broadcast %84 : vector<1x8xf32> to vector<8x8xf32>
    %86 = arith.addf %83, %85 : vector<8x8xf32>
    %cst_48 = arith.constant 0.000000e+00 : f32
    %87 = vector.broadcast %cst_48 : f32 to vector<8x8xf32>
    %88 = arith.cmpf ogt, %86, %87 : vector<8x8xf32>
    %cst_49 = arith.constant 0.000000e+00 : f32
    %89 = vector.broadcast %cst_49 : f32 to vector<8x8xf32>
    %90 = arith.minimumf %86, %89 : vector<8x8xf32>
    %91 = math.exp %90 : vector<8x8xf32>
    %cst_50 = arith.constant 1.000000e+00 : f32
    %92 = vector.broadcast %cst_50 : f32 to vector<8x8xf32>
    %93 = arith.subf %91, %92 : vector<8x8xf32>
    %94 = arith.select %88, %86, %93 : vector<8x8xi1>, vector<8x8xf32>
    %c176_51 = arith.constant 176 : index
    %c0_52 = arith.constant 0 : index
    %95 = vector.load %arg3[%c176_51, %c0_52] : memref<696x64xf32, #tpu.memory_space<vmem>>, vector<8x32xf32>
    %cst_53 = arith.constant dense<0.000000e+00> : vector<8x32xf32>
    %96 = tpu.matmul %94, %95, %cst_53 {dimension_numbers = #tpu.dot_dimension_numbers<[1], [0], [0], [1], [0, 0, 1, 1], [], []>} : vector<8x8xf32>, vector<8x32xf32>, vector<8x32xf32> -> vector<8x32xf32>
    %c5_54 = arith.constant 5 : index
    %c0_55 = arith.constant 0 : index
    %97 = vector.load %arg4[%c5_54, %c0_55] : memref<22x64xf32, #tpu.memory_space<vmem>>, vector<1x32xf32>
    %98 = vector.broadcast %97 : vector<1x32xf32> to vector<8x32xf32>
    %99 = arith.addf %96, %98 : vector<8x32xf32>
    %cst_56 = arith.constant 0.000000e+00 : f32
    %100 = vector.broadcast %cst_56 : f32 to vector<64x32xf32>
    %c0_57 = arith.constant 0 : index
    %c0_58 = arith.constant 0 : index
    %101 = vector.load %arg6[%c0_57, %c0_58] : memref<64x32xf32, #tpu.memory_space<vmem>>, vector<64x32xf32>
    tpu.vector_store %arg6[%c0_57, %c0_58], %100 {strides = array<i32>} : memref<64x32xf32, #tpu.memory_space<vmem>>, vector<64x32xf32>,
    %102 = vector.extract_strided_slice %10 {offsets = [0, 0], sizes = [16, 32], strides = [1, 1]} : vector<32x32xf32> to vector<16x32xf32>
    %c0_59 = arith.constant 0 : index
    %c0_60 = arith.constant 0 : index
    %103 = vector.load %arg6[%c0_59, %c0_60] : memref<64x32xf32, #tpu.memory_space<vmem>>, vector<16x32xf32>
    tpu.vector_store %arg6[%c0_59, %c0_60], %102 {strides = array<i32>} : memref<64x32xf32, #tpu.memory_space<vmem>>, vector<16x32xf32>,
    %104 = vector.extract_strided_slice %57 {offsets = [0, 0], sizes = [8, 32], strides = [1, 1]} : vector<16x32xf32> to vector<8x32xf32>
    %c16 = arith.constant 16 : index
    %c0_61 = arith.constant 0 : index
    %105 = vector.load %arg6[%c16, %c0_61] : memref<64x32xf32, #tpu.memory_space<vmem>>, vector<8x32xf32>
    tpu.vector_store %arg6[%c16, %c0_61], %104 {strides = array<i32>} : memref<64x32xf32, #tpu.memory_space<vmem>>, vector<8x32xf32>,
    %106 = vector.extract_strided_slice %99 {offsets = [0, 0], sizes = [4, 32], strides = [1, 1]} : vector<8x32xf32> to vector<4x32xf32>
    %c24 = arith.constant 24 : index
    %c0_62 = arith.constant 0 : index
    %107 = vector.load %arg6[%c24, %c0_62] : memref<64x32xf32, #tpu.memory_space<vmem>>, vector<4x32xf32>
    tpu.vector_store %arg6[%c24, %c0_62], %106 {strides = array<i32>} : memref<64x32xf32, #tpu.memory_space<vmem>>, vector<4x32xf32>,
    %108 = vector.extract_strided_slice %10 {offsets = [16, 0], sizes = [16, 32], strides = [1, 1]} : vector<32x32xf32> to vector<16x32xf32>
    %c32_63 = arith.constant 32 : index
    %c0_64 = arith.constant 0 : index
    %109 = vector.load %arg6[%c32_63, %c0_64] : memref<64x32xf32, #tpu.memory_space<vmem>>, vector<16x32xf32>
    tpu.vector_store %arg6[%c32_63, %c0_64], %108 {strides = array<i32>} : memref<64x32xf32, #tpu.memory_space<vmem>>, vector<16x32xf32>,
    %110 = vector.extract_strided_slice %57 {offsets = [8, 0], sizes = [8, 32], strides = [1, 1]} : vector<16x32xf32> to vector<8x32xf32>
    %c48 = arith.constant 48 : index
    %c0_65 = arith.constant 0 : index
    %111 = vector.load %arg6[%c48, %c0_65] : memref<64x32xf32, #tpu.memory_space<vmem>>, vector<8x32xf32>
    tpu.vector_store %arg6[%c48, %c0_65], %110 {strides = array<i32>} : memref<64x32xf32, #tpu.memory_space<vmem>>, vector<8x32xf32>,
    %112 = vector.extract_strided_slice %99 {offsets = [4, 0], sizes = [4, 32], strides = [1, 1]} : vector<8x32xf32> to vector<4x32xf32>
    %c56 = arith.constant 56 : index
    %c0_66 = arith.constant 0 : index
    %113 = vector.load %arg6[%c56, %c0_66] : memref<64x32xf32, #tpu.memory_space<vmem>>, vector<4x32xf32>
    tpu.vector_store %arg6[%c56, %c0_66], %112 {strides = array<i32>} : memref<64x32xf32, #tpu.memory_space<vmem>>, vector<4x32xf32>,
    %c0_67 = arith.constant 0 : index
    %c0_68 = arith.constant 0 : index
    %114 = vector.load %arg6[%c0_67, %c0_68] : memref<64x32xf32, #tpu.memory_space<vmem>>, vector<64x32xf32>
    %c6 = arith.constant 6 : index
    %c0_69 = arith.constant 0 : index
    %115 = vector.load %arg4[%c6, %c0_69] : memref<22x64xf32, #tpu.memory_space<vmem>>, vector<1x32xf32>
    %c7 = arith.constant 7 : index
    %c0_70 = arith.constant 0 : index
    %116 = vector.load %arg4[%c7, %c0_70] : memref<22x64xf32, #tpu.memory_space<vmem>>, vector<1x32xf32>
    %cst_71 = arith.constant dense<0.000000e+00> : vector<64xf32>
    %117 = vector.multi_reduction <add>, %114, %cst_71 [1] : vector<64x32xf32> to vector<64xf32>
    %118 = vector.shape_cast %117 : vector<64xf32> to vector<64x1xf32>
    %cst_72 = arith.constant 3.200000e+01 : f32
    %119 = vector.broadcast %cst_72 : f32 to vector<64x1xf32>
    %120 = arith.divf %118, %119 : vector<64x1xf32>
    %121 = vector.broadcast %120 : vector<64x1xf32> to vector<64x32xf32>
    %122 = arith.subf %114, %121 : vector<64x32xf32>
    %123 = arith.mulf %122, %122 : vector<64x32xf32>
    %cst_73 = arith.constant dense<0.000000e+00> : vector<64xf32>
    %124 = vector.multi_reduction <add>, %123, %cst_73 [1] : vector<64x32xf32> to vector<64xf32>
    %125 = vector.shape_cast %124 : vector<64xf32> to vector<64x1xf32>
    %cst_74 = arith.constant 3.200000e+01 : f32
    %126 = vector.broadcast %cst_74 : f32 to vector<64x1xf32>
    %127 = arith.divf %125, %126 : vector<64x1xf32>
    %cst_75 = arith.constant 9.99999974E-6 : f32
    %128 = vector.broadcast %cst_75 : f32 to vector<64x1xf32>
    %129 = arith.addf %127, %128 : vector<64x1xf32>
    %130 = math.rsqrt %129 : vector<64x1xf32>
    %131 = vector.broadcast %130 : vector<64x1xf32> to vector<64x32xf32>
    %132 = arith.mulf %122, %131 : vector<64x32xf32>
    %133 = vector.broadcast %115 : vector<1x32xf32> to vector<64x32xf32>
    %134 = arith.mulf %132, %133 : vector<64x32xf32>
    %135 = vector.broadcast %116 : vector<1x32xf32> to vector<64x32xf32>
    %136 = arith.addf %134, %135 : vector<64x32xf32>
    %c632 = arith.constant 632 : index
    %c0_76 = arith.constant 0 : index
    %137 = vector.load %arg3[%c632, %c0_76] : memref<696x64xf32, #tpu.memory_space<vmem>>, vector<64x64xf32>
    %c184 = arith.constant 184 : index
    %c0_77 = arith.constant 0 : index
    %138 = vector.load %arg3[%c184, %c0_77] : memref<696x64xf32, #tpu.memory_space<vmem>>, vector<32x32xf32>
    %cst_78 = arith.constant dense<0.000000e+00> : vector<64x32xf32>
    %139 = tpu.matmul %136, %138, %cst_78 {dimension_numbers = #tpu.dot_dimension_numbers<[1], [0], [0], [1], [0, 0, 1, 1], [], []>} : vector<64x32xf32>, vector<32x32xf32>, vector<64x32xf32> -> vector<64x32xf32>
    %c216 = arith.constant 216 : index
    %c0_79 = arith.constant 0 : index
    %140 = vector.load %arg3[%c216, %c0_79] : memref<696x64xf32, #tpu.memory_space<vmem>>, vector<32x32xf32>
    %cst_80 = arith.constant dense<0.000000e+00> : vector<64x32xf32>
    %141 = tpu.matmul %136, %140, %cst_80 {dimension_numbers = #tpu.dot_dimension_numbers<[1], [0], [0], [1], [0, 0, 1, 1], [], []>} : vector<64x32xf32>, vector<32x32xf32>, vector<64x32xf32> -> vector<64x32xf32>
    %c248 = arith.constant 248 : index
    %c0_81 = arith.constant 0 : index
    %142 = vector.load %arg3[%c248, %c0_81] : memref<696x64xf32, #tpu.memory_space<vmem>>, vector<32x32xf32>
    %cst_82 = arith.constant dense<0.000000e+00> : vector<64x32xf32>
    %143 = tpu.matmul %136, %142, %cst_82 {dimension_numbers = #tpu.dot_dimension_numbers<[1], [0], [0], [1], [0, 0, 1, 1], [], []>} : vector<64x32xf32>, vector<32x32xf32>, vector<64x32xf32> -> vector<64x32xf32>
    %144 = vector.extract_strided_slice %139 {offsets = [0, 0], sizes = [64, 8], strides = [1, 1]} : vector<64x32xf32> to vector<64x8xf32>
    %145 = vector.extract_strided_slice %141 {offsets = [0, 0], sizes = [64, 8], strides = [1, 1]} : vector<64x32xf32> to vector<64x8xf32>
    %cst_83 = arith.constant dense<0.000000e+00> : vector<64x64xf32>
    %146 = tpu.matmul %144, %145, %cst_83 {dimension_numbers = #tpu.dot_dimension_numbers<[1], [1], [0], [0], [0, 0, 1, 0], [], []>} : vector<64x8xf32>, vector<64x8xf32>, vector<64x64xf32> -> vector<64x64xf32>
    %147 = arith.addf %146, %137 : vector<64x64xf32>
    %cst_84 = arith.constant dense<0xFF800000> : vector<64xf32>
    %148 = vector.multi_reduction <maximumf>, %147, %cst_84 [1] : vector<64x64xf32> to vector<64xf32>
    %149 = vector.shape_cast %148 : vector<64xf32> to vector<64x1xf32>
    %150 = vector.broadcast %149 : vector<64x1xf32> to vector<64x64xf32>
    %151 = arith.subf %147, %150 : vector<64x64xf32>
    %152 = math.exp %151 : vector<64x64xf32>
    %cst_85 = arith.constant dense<0.000000e+00> : vector<64xf32>
    %153 = vector.multi_reduction <add>, %152, %cst_85 [1] : vector<64x64xf32> to vector<64xf32>
    %154 = vector.shape_cast %153 : vector<64xf32> to vector<64x1xf32>
    %155 = vector.broadcast %154 : vector<64x1xf32> to vector<64x64xf32>
    %156 = arith.divf %152, %155 : vector<64x64xf32>
    %157 = vector.extract_strided_slice %143 {offsets = [0, 0], sizes = [64, 8], strides = [1, 1]} : vector<64x32xf32> to vector<64x8xf32>
    %cst_86 = arith.constant dense<0.000000e+00> : vector<64x8xf32>
    %158 = tpu.matmul %156, %157, %cst_86 {dimension_numbers = #tpu.dot_dimension_numbers<[1], [0], [0], [1], [0, 0, 1, 1], [], []>} : vector<64x64xf32>, vector<64x8xf32>, vector<64x8xf32> -> vector<64x8xf32>
    %159 = vector.extract_strided_slice %139 {offsets = [0, 8], sizes = [64, 8], strides = [1, 1]} : vector<64x32xf32> to vector<64x8xf32>
    %160 = vector.extract_strided_slice %141 {offsets = [0, 8], sizes = [64, 8], strides = [1, 1]} : vector<64x32xf32> to vector<64x8xf32>
    %cst_87 = arith.constant dense<0.000000e+00> : vector<64x64xf32>
    %161 = tpu.matmul %159, %160, %cst_87 {dimension_numbers = #tpu.dot_dimension_numbers<[1], [1], [0], [0], [0, 0, 1, 0], [], []>} : vector<64x8xf32>, vector<64x8xf32>, vector<64x64xf32> -> vector<64x64xf32>
    %162 = arith.addf %161, %137 : vector<64x64xf32>
    %cst_88 = arith.constant dense<0xFF800000> : vector<64xf32>
    %163 = vector.multi_reduction <maximumf>, %162, %cst_88 [1] : vector<64x64xf32> to vector<64xf32>
    %164 = vector.shape_cast %163 : vector<64xf32> to vector<64x1xf32>
    %165 = vector.broadcast %164 : vector<64x1xf32> to vector<64x64xf32>
    %166 = arith.subf %162, %165 : vector<64x64xf32>
    %167 = math.exp %166 : vector<64x64xf32>
    %cst_89 = arith.constant dense<0.000000e+00> : vector<64xf32>
    %168 = vector.multi_reduction <add>, %167, %cst_89 [1] : vector<64x64xf32> to vector<64xf32>
    %169 = vector.shape_cast %168 : vector<64xf32> to vector<64x1xf32>
    %170 = vector.broadcast %169 : vector<64x1xf32> to vector<64x64xf32>
    %171 = arith.divf %167, %170 : vector<64x64xf32>
    %172 = vector.extract_strided_slice %143 {offsets = [0, 8], sizes = [64, 8], strides = [1, 1]} : vector<64x32xf32> to vector<64x8xf32>
    %cst_90 = arith.constant dense<0.000000e+00> : vector<64x8xf32>
    %173 = tpu.matmul %171, %172, %cst_90 {dimension_numbers = #tpu.dot_dimension_numbers<[1], [0], [0], [1], [0, 0, 1, 1], [], []>} : vector<64x64xf32>, vector<64x8xf32>, vector<64x8xf32> -> vector<64x8xf32>
    %174 = vector.extract_strided_slice %139 {offsets = [0, 16], sizes = [64, 8], strides = [1, 1]} : vector<64x32xf32> to vector<64x8xf32>
    %175 = vector.extract_strided_slice %141 {offsets = [0, 16], sizes = [64, 8], strides = [1, 1]} : vector<64x32xf32> to vector<64x8xf32>
    %cst_91 = arith.constant dense<0.000000e+00> : vector<64x64xf32>
    %176 = tpu.matmul %174, %175, %cst_91 {dimension_numbers = #tpu.dot_dimension_numbers<[1], [1], [0], [0], [0, 0, 1, 0], [], []>} : vector<64x8xf32>, vector<64x8xf32>, vector<64x64xf32> -> vector<64x64xf32>
    %177 = arith.addf %176, %137 : vector<64x64xf32>
    %cst_92 = arith.constant dense<0xFF800000> : vector<64xf32>
    %178 = vector.multi_reduction <maximumf>, %177, %cst_92 [1] : vector<64x64xf32> to vector<64xf32>
    %179 = vector.shape_cast %178 : vector<64xf32> to vector<64x1xf32>
    %180 = vector.broadcast %179 : vector<64x1xf32> to vector<64x64xf32>
    %181 = arith.subf %177, %180 : vector<64x64xf32>
    %182 = math.exp %181 : vector<64x64xf32>
    %cst_93 = arith.constant dense<0.000000e+00> : vector<64xf32>
    %183 = vector.multi_reduction <add>, %182, %cst_93 [1] : vector<64x64xf32> to vector<64xf32>
    %184 = vector.shape_cast %183 : vector<64xf32> to vector<64x1xf32>
    %185 = vector.broadcast %184 : vector<64x1xf32> to vector<64x64xf32>
    %186 = arith.divf %182, %185 : vector<64x64xf32>
    %187 = vector.extract_strided_slice %143 {offsets = [0, 16], sizes = [64, 8], strides = [1, 1]} : vector<64x32xf32> to vector<64x8xf32>
    %cst_94 = arith.constant dense<0.000000e+00> : vector<64x8xf32>
    %188 = tpu.matmul %186, %187, %cst_94 {dimension_numbers = #tpu.dot_dimension_numbers<[1], [0], [0], [1], [0, 0, 1, 1], [], []>} : vector<64x64xf32>, vector<64x8xf32>, vector<64x8xf32> -> vector<64x8xf32>
    %189 = vector.extract_strided_slice %139 {offsets = [0, 24], sizes = [64, 8], strides = [1, 1]} : vector<64x32xf32> to vector<64x8xf32>
    %190 = vector.extract_strided_slice %141 {offsets = [0, 24], sizes = [64, 8], strides = [1, 1]} : vector<64x32xf32> to vector<64x8xf32>
    %cst_95 = arith.constant dense<0.000000e+00> : vector<64x64xf32>
    %191 = tpu.matmul %189, %190, %cst_95 {dimension_numbers = #tpu.dot_dimension_numbers<[1], [1], [0], [0], [0, 0, 1, 0], [], []>} : vector<64x8xf32>, vector<64x8xf32>, vector<64x64xf32> -> vector<64x64xf32>
    %192 = arith.addf %191, %137 : vector<64x64xf32>
    %cst_96 = arith.constant dense<0xFF800000> : vector<64xf32>
    %193 = vector.multi_reduction <maximumf>, %192, %cst_96 [1] : vector<64x64xf32> to vector<64xf32>
    %194 = vector.shape_cast %193 : vector<64xf32> to vector<64x1xf32>
    %195 = vector.broadcast %194 : vector<64x1xf32> to vector<64x64xf32>
    %196 = arith.subf %192, %195 : vector<64x64xf32>
    %197 = math.exp %196 : vector<64x64xf32>
    %cst_97 = arith.constant dense<0.000000e+00> : vector<64xf32>
    %198 = vector.multi_reduction <add>, %197, %cst_97 [1] : vector<64x64xf32> to vector<64xf32>
    %199 = vector.shape_cast %198 : vector<64xf32> to vector<64x1xf32>
    %200 = vector.broadcast %199 : vector<64x1xf32> to vector<64x64xf32>
    %201 = arith.divf %197, %200 : vector<64x64xf32>
    %202 = vector.extract_strided_slice %143 {offsets = [0, 24], sizes = [64, 8], strides = [1, 1]} : vector<64x32xf32> to vector<64x8xf32>
    %cst_98 = arith.constant dense<0.000000e+00> : vector<64x8xf32>
    %203 = tpu.matmul %201, %202, %cst_98 {dimension_numbers = #tpu.dot_dimension_numbers<[1], [0], [0], [1], [0, 0, 1, 1], [], []>} : vector<64x64xf32>, vector<64x8xf32>, vector<64x8xf32> -> vector<64x8xf32>
    %204 = tpu.concatenate %158, %173, %188, %203 in 1 : vector<64x8xf32>, vector<64x8xf32>, vector<64x8xf32>, vector<64x8xf32> -> vector<64x32xf32>
    %c280 = arith.constant 280 : index
    %c0_99 = arith.constant 0 : index
    %205 = vector.load %arg3[%c280, %c0_99] : memref<696x64xf32, #tpu.memory_space<vmem>>, vector<32x32xf32>
    %cst_100 = arith.constant dense<0.000000e+00> : vector<64x32xf32>
    %206 = tpu.matmul %204, %205, %cst_100 {dimension_numbers = #tpu.dot_dimension_numbers<[1], [0], [0], [1], [0, 0, 1, 1], [], []>} : vector<64x32xf32>, vector<32x32xf32>, vector<64x32xf32> -> vector<64x32xf32>
    %c8 = arith.constant 8 : index
    %c0_101 = arith.constant 0 : index
    %207 = vector.load %arg4[%c8, %c0_101] : memref<22x64xf32, #tpu.memory_space<vmem>>, vector<1x32xf32>
    %208 = vector.broadcast %207 : vector<1x32xf32> to vector<64x32xf32>
    %209 = arith.addf %206, %208 : vector<64x32xf32>
    %210 = arith.addf %209, %136 : vector<64x32xf32>
    %c9 = arith.constant 9 : index
    %c0_102 = arith.constant 0 : index
    %211 = vector.load %arg4[%c9, %c0_102] : memref<22x64xf32, #tpu.memory_space<vmem>>, vector<1x32xf32>
    %c10 = arith.constant 10 : index
    %c0_103 = arith.constant 0 : index
    %212 = vector.load %arg4[%c10, %c0_103] : memref<22x64xf32, #tpu.memory_space<vmem>>, vector<1x32xf32>
    %cst_104 = arith.constant dense<0.000000e+00> : vector<64xf32>
    %213 = vector.multi_reduction <add>, %210, %cst_104 [1] : vector<64x32xf32> to vector<64xf32>
    %214 = vector.shape_cast %213 : vector<64xf32> to vector<64x1xf32>
    %cst_105 = arith.constant 3.200000e+01 : f32
    %215 = vector.broadcast %cst_105 : f32 to vector<64x1xf32>
    %216 = arith.divf %214, %215 : vector<64x1xf32>
    %217 = vector.broadcast %216 : vector<64x1xf32> to vector<64x32xf32>
    %218 = arith.subf %210, %217 : vector<64x32xf32>
    %219 = arith.mulf %218, %218 : vector<64x32xf32>
    %cst_106 = arith.constant dense<0.000000e+00> : vector<64xf32>
    %220 = vector.multi_reduction <add>, %219, %cst_106 [1] : vector<64x32xf32> to vector<64xf32>
    %221 = vector.shape_cast %220 : vector<64xf32> to vector<64x1xf32>
    %cst_107 = arith.constant 3.200000e+01 : f32
    %222 = vector.broadcast %cst_107 : f32 to vector<64x1xf32>
    %223 = arith.divf %221, %222 : vector<64x1xf32>
    %cst_108 = arith.constant 9.99999997E-7 : f32
    %224 = vector.broadcast %cst_108 : f32 to vector<64x1xf32>
    %225 = arith.addf %223, %224 : vector<64x1xf32>
    %226 = math.rsqrt %225 : vector<64x1xf32>
    %227 = vector.broadcast %226 : vector<64x1xf32> to vector<64x32xf32>
    %228 = arith.mulf %218, %227 : vector<64x32xf32>
    %229 = vector.broadcast %211 : vector<1x32xf32> to vector<64x32xf32>
    %230 = arith.mulf %228, %229 : vector<64x32xf32>
    %231 = vector.broadcast %212 : vector<1x32xf32> to vector<64x32xf32>
    %232 = arith.addf %230, %231 : vector<64x32xf32>
    %c312 = arith.constant 312 : index
    %c0_109 = arith.constant 0 : index
    %233 = vector.load %arg3[%c312, %c0_109] : memref<696x64xf32, #tpu.memory_space<vmem>>, vector<32x64xf32>
    %cst_110 = arith.constant dense<0.000000e+00> : vector<64x64xf32>
    %234 = tpu.matmul %232, %233, %cst_110 {dimension_numbers = #tpu.dot_dimension_numbers<[1], [0], [0], [1], [0, 0, 1, 1], [], []>} : vector<64x32xf32>, vector<32x64xf32>, vector<64x64xf32> -> vector<64x64xf32>
    %c11 = arith.constant 11 : index
    %c0_111 = arith.constant 0 : index
    %235 = vector.load %arg4[%c11, %c0_111] : memref<22x64xf32, #tpu.memory_space<vmem>>, vector<1x64xf32>
    %236 = vector.broadcast %235 : vector<1x64xf32> to vector<64x64xf32>
    %237 = arith.addf %234, %236 : vector<64x64xf32>
    %cst_112 = arith.constant 5.000000e-01 : f32
    %238 = vector.broadcast %cst_112 : f32 to vector<64x64xf32>
    %239 = arith.mulf %238, %237 : vector<64x64xf32>
    %cst_113 = arith.constant 4.471500e-02 : f32
    %240 = vector.broadcast %cst_113 : f32 to vector<64x64xf32>
    %241 = arith.mulf %240, %237 : vector<64x64xf32>
    %242 = arith.mulf %241, %237 : vector<64x64xf32>
    %243 = arith.mulf %242, %237 : vector<64x64xf32>
    %244 = arith.addf %237, %243 : vector<64x64xf32>
    %cst_114 = arith.constant 0.797884583 : f32
    %245 = vector.broadcast %cst_114 : f32 to vector<64x64xf32>
    %246 = arith.mulf %245, %244 : vector<64x64xf32>
    %247 = math.tanh %246 : vector<64x64xf32>
    %cst_115 = arith.constant 1.000000e+00 : f32
    %248 = vector.broadcast %cst_115 : f32 to vector<64x64xf32>
    %249 = arith.addf %248, %247 : vector<64x64xf32>
    %250 = arith.mulf %239, %249 : vector<64x64xf32>
    %c344 = arith.constant 344 : index
    %c0_116 = arith.constant 0 : index
    %251 = vector.load %arg3[%c344, %c0_116] : memref<696x64xf32, #tpu.memory_space<vmem>>, vector<64x32xf32>
    %cst_117 = arith.constant dense<0.000000e+00> : vector<64x32xf32>
    %252 = tpu.matmul %250, %251, %cst_117 {dimension_numbers = #tpu.dot_dimension_numbers<[1], [0], [0], [1], [0, 0, 1, 1], [], []>} : vector<64x64xf32>, vector<64x32xf32>, vector<64x32xf32> -> vector<64x32xf32>
    %c12 = arith.constant 12 : index
    %c0_118 = arith.constant 0 : index
    %253 = vector.load %arg4[%c12, %c0_118] : memref<22x64xf32, #tpu.memory_space<vmem>>, vector<1x32xf32>
    %254 = vector.broadcast %253 : vector<1x32xf32> to vector<64x32xf32>
    %255 = arith.addf %252, %254 : vector<64x32xf32>
    %256 = arith.addf %255, %232 : vector<64x32xf32>
    %c13 = arith.constant 13 : index
    %c0_119 = arith.constant 0 : index
    %257 = vector.load %arg4[%c13, %c0_119] : memref<22x64xf32, #tpu.memory_space<vmem>>, vector<1x32xf32>
    %c14 = arith.constant 14 : index
    %c0_120 = arith.constant 0 : index
    %258 = vector.load %arg4[%c14, %c0_120] : memref<22x64xf32, #tpu.memory_space<vmem>>, vector<1x32xf32>
    %cst_121 = arith.constant dense<0.000000e+00> : vector<64xf32>
    %259 = vector.multi_reduction <add>, %256, %cst_121 [1] : vector<64x32xf32> to vector<64xf32>
    %260 = vector.shape_cast %259 : vector<64xf32> to vector<64x1xf32>
    %cst_122 = arith.constant 3.200000e+01 : f32
    %261 = vector.broadcast %cst_122 : f32 to vector<64x1xf32>
    %262 = arith.divf %260, %261 : vector<64x1xf32>
    %263 = vector.broadcast %262 : vector<64x1xf32> to vector<64x32xf32>
    %264 = arith.subf %256, %263 : vector<64x32xf32>
    %265 = arith.mulf %264, %264 : vector<64x32xf32>
    %cst_123 = arith.constant dense<0.000000e+00> : vector<64xf32>
    %266 = vector.multi_reduction <add>, %265, %cst_123 [1] : vector<64x32xf32> to vector<64xf32>
    %267 = vector.shape_cast %266 : vector<64xf32> to vector<64x1xf32>
    %cst_124 = arith.constant 3.200000e+01 : f32
    %268 = vector.broadcast %cst_124 : f32 to vector<64x1xf32>
    %269 = arith.divf %267, %268 : vector<64x1xf32>
    %cst_125 = arith.constant 9.99999997E-7 : f32
    %270 = vector.broadcast %cst_125 : f32 to vector<64x1xf32>
    %271 = arith.addf %269, %270 : vector<64x1xf32>
    %272 = math.rsqrt %271 : vector<64x1xf32>
    %273 = vector.broadcast %272 : vector<64x1xf32> to vector<64x32xf32>
    %274 = arith.mulf %264, %273 : vector<64x32xf32>
    %275 = vector.broadcast %257 : vector<1x32xf32> to vector<64x32xf32>
    %276 = arith.mulf %274, %275 : vector<64x32xf32>
    %277 = vector.broadcast %258 : vector<1x32xf32> to vector<64x32xf32>
    %278 = arith.addf %276, %277 : vector<64x32xf32>
    %c408 = arith.constant 408 : index
    %c0_126 = arith.constant 0 : index
    %279 = vector.load %arg3[%c408, %c0_126] : memref<696x64xf32, #tpu.memory_space<vmem>>, vector<32x32xf32>
    %cst_127 = arith.constant dense<0.000000e+00> : vector<64x32xf32>
    %280 = tpu.matmul %278, %279, %cst_127 {dimension_numbers = #tpu.dot_dimension_numbers<[1], [0], [0], [1], [0, 0, 1, 1], [], []>} : vector<64x32xf32>, vector<32x32xf32>, vector<64x32xf32> -> vector<64x32xf32>
    %c440 = arith.constant 440 : index
    %c0_128 = arith.constant 0 : index
    %281 = vector.load %arg3[%c440, %c0_128] : memref<696x64xf32, #tpu.memory_space<vmem>>, vector<32x32xf32>
    %cst_129 = arith.constant dense<0.000000e+00> : vector<64x32xf32>
    %282 = tpu.matmul %278, %281, %cst_129 {dimension_numbers = #tpu.dot_dimension_numbers<[1], [0], [0], [1], [0, 0, 1, 1], [], []>} : vector<64x32xf32>, vector<32x32xf32>, vector<64x32xf32> -> vector<64x32xf32>
    %c472 = arith.constant 472 : index
    %c0_130 = arith.constant 0 : index
    %283 = vector.load %arg3[%c472, %c0_130] : memref<696x64xf32, #tpu.memory_space<vmem>>, vector<32x32xf32>
    %cst_131 = arith.constant dense<0.000000e+00> : vector<64x32xf32>
    %284 = tpu.matmul %278, %283, %cst_131 {dimension_numbers = #tpu.dot_dimension_numbers<[1], [0], [0], [1], [0, 0, 1, 1], [], []>} : vector<64x32xf32>, vector<32x32xf32>, vector<64x32xf32> -> vector<64x32xf32>
    %285 = vector.extract_strided_slice %280 {offsets = [0, 0], sizes = [64, 8], strides = [1, 1]} : vector<64x32xf32> to vector<64x8xf32>
    %286 = vector.extract_strided_slice %282 {offsets = [0, 0], sizes = [64, 8], strides = [1, 1]} : vector<64x32xf32> to vector<64x8xf32>
    %cst_132 = arith.constant dense<0.000000e+00> : vector<64x64xf32>
    %287 = tpu.matmul %285, %286, %cst_132 {dimension_numbers = #tpu.dot_dimension_numbers<[1], [1], [0], [0], [0, 0, 1, 0], [], []>} : vector<64x8xf32>, vector<64x8xf32>, vector<64x64xf32> -> vector<64x64xf32>
    %288 = arith.addf %287, %137 : vector<64x64xf32>
    %cst_133 = arith.constant dense<0xFF800000> : vector<64xf32>
    %289 = vector.multi_reduction <maximumf>, %288, %cst_133 [1] : vector<64x64xf32> to vector<64xf32>
    %290 = vector.shape_cast %289 : vector<64xf32> to vector<64x1xf32>
    %291 = vector.broadcast %290 : vector<64x1xf32> to vector<64x64xf32>
    %292 = arith.subf %288, %291 : vector<64x64xf32>
    %293 = math.exp %292 : vector<64x64xf32>
    %cst_134 = arith.constant dense<0.000000e+00> : vector<64xf32>
    %294 = vector.multi_reduction <add>, %293, %cst_134 [1] : vector<64x64xf32> to vector<64xf32>
    %295 = vector.shape_cast %294 : vector<64xf32> to vector<64x1xf32>
    %296 = vector.broadcast %295 : vector<64x1xf32> to vector<64x64xf32>
    %297 = arith.divf %293, %296 : vector<64x64xf32>
    %298 = vector.extract_strided_slice %284 {offsets = [0, 0], sizes = [64, 8], strides = [1, 1]} : vector<64x32xf32> to vector<64x8xf32>
    %cst_135 = arith.constant dense<0.000000e+00> : vector<64x8xf32>
    %299 = tpu.matmul %297, %298, %cst_135 {dimension_numbers = #tpu.dot_dimension_numbers<[1], [0], [0], [1], [0, 0, 1, 1], [], []>} : vector<64x64xf32>, vector<64x8xf32>, vector<64x8xf32> -> vector<64x8xf32>
    %300 = vector.extract_strided_slice %280 {offsets = [0, 8], sizes = [64, 8], strides = [1, 1]} : vector<64x32xf32> to vector<64x8xf32>
    %301 = vector.extract_strided_slice %282 {offsets = [0, 8], sizes = [64, 8], strides = [1, 1]} : vector<64x32xf32> to vector<64x8xf32>
    %cst_136 = arith.constant dense<0.000000e+00> : vector<64x64xf32>
    %302 = tpu.matmul %300, %301, %cst_136 {dimension_numbers = #tpu.dot_dimension_numbers<[1], [1], [0], [0], [0, 0, 1, 0], [], []>} : vector<64x8xf32>, vector<64x8xf32>, vector<64x64xf32> -> vector<64x64xf32>
    %303 = arith.addf %302, %137 : vector<64x64xf32>
    %cst_137 = arith.constant dense<0xFF800000> : vector<64xf32>
    %304 = vector.multi_reduction <maximumf>, %303, %cst_137 [1] : vector<64x64xf32> to vector<64xf32>
    %305 = vector.shape_cast %304 : vector<64xf32> to vector<64x1xf32>
    %306 = vector.broadcast %305 : vector<64x1xf32> to vector<64x64xf32>
    %307 = arith.subf %303, %306 : vector<64x64xf32>
    %308 = math.exp %307 : vector<64x64xf32>
    %cst_138 = arith.constant dense<0.000000e+00> : vector<64xf32>
    %309 = vector.multi_reduction <add>, %308, %cst_138 [1] : vector<64x64xf32> to vector<64xf32>
    %310 = vector.shape_cast %309 : vector<64xf32> to vector<64x1xf32>
    %311 = vector.broadcast %310 : vector<64x1xf32> to vector<64x64xf32>
    %312 = arith.divf %308, %311 : vector<64x64xf32>
    %313 = vector.extract_strided_slice %284 {offsets = [0, 8], sizes = [64, 8], strides = [1, 1]} : vector<64x32xf32> to vector<64x8xf32>
    %cst_139 = arith.constant dense<0.000000e+00> : vector<64x8xf32>
    %314 = tpu.matmul %312, %313, %cst_139 {dimension_numbers = #tpu.dot_dimension_numbers<[1], [0], [0], [1], [0, 0, 1, 1], [], []>} : vector<64x64xf32>, vector<64x8xf32>, vector<64x8xf32> -> vector<64x8xf32>
    %315 = vector.extract_strided_slice %280 {offsets = [0, 16], sizes = [64, 8], strides = [1, 1]} : vector<64x32xf32> to vector<64x8xf32>
    %316 = vector.extract_strided_slice %282 {offsets = [0, 16], sizes = [64, 8], strides = [1, 1]} : vector<64x32xf32> to vector<64x8xf32>
    %cst_140 = arith.constant dense<0.000000e+00> : vector<64x64xf32>
    %317 = tpu.matmul %315, %316, %cst_140 {dimension_numbers = #tpu.dot_dimension_numbers<[1], [1], [0], [0], [0, 0, 1, 0], [], []>} : vector<64x8xf32>, vector<64x8xf32>, vector<64x64xf32> -> vector<64x64xf32>
    %318 = arith.addf %317, %137 : vector<64x64xf32>
    %cst_141 = arith.constant dense<0xFF800000> : vector<64xf32>
    %319 = vector.multi_reduction <maximumf>, %318, %cst_141 [1] : vector<64x64xf32> to vector<64xf32>
    %320 = vector.shape_cast %319 : vector<64xf32> to vector<64x1xf32>
    %321 = vector.broadcast %320 : vector<64x1xf32> to vector<64x64xf32>
    %322 = arith.subf %318, %321 : vector<64x64xf32>
    %323 = math.exp %322 : vector<64x64xf32>
    %cst_142 = arith.constant dense<0.000000e+00> : vector<64xf32>
    %324 = vector.multi_reduction <add>, %323, %cst_142 [1] : vector<64x64xf32> to vector<64xf32>
    %325 = vector.shape_cast %324 : vector<64xf32> to vector<64x1xf32>
    %326 = vector.broadcast %325 : vector<64x1xf32> to vector<64x64xf32>
    %327 = arith.divf %323, %326 : vector<64x64xf32>
    %328 = vector.extract_strided_slice %284 {offsets = [0, 16], sizes = [64, 8], strides = [1, 1]} : vector<64x32xf32> to vector<64x8xf32>
    %cst_143 = arith.constant dense<0.000000e+00> : vector<64x8xf32>
    %329 = tpu.matmul %327, %328, %cst_143 {dimension_numbers = #tpu.dot_dimension_numbers<[1], [0], [0], [1], [0, 0, 1, 1], [], []>} : vector<64x64xf32>, vector<64x8xf32>, vector<64x8xf32> -> vector<64x8xf32>
    %330 = vector.extract_strided_slice %280 {offsets = [0, 24], sizes = [64, 8], strides = [1, 1]} : vector<64x32xf32> to vector<64x8xf32>
    %331 = vector.extract_strided_slice %282 {offsets = [0, 24], sizes = [64, 8], strides = [1, 1]} : vector<64x32xf32> to vector<64x8xf32>
    %cst_144 = arith.constant dense<0.000000e+00> : vector<64x64xf32>
    %332 = tpu.matmul %330, %331, %cst_144 {dimension_numbers = #tpu.dot_dimension_numbers<[1], [1], [0], [0], [0, 0, 1, 0], [], []>} : vector<64x8xf32>, vector<64x8xf32>, vector<64x64xf32> -> vector<64x64xf32>
    %333 = arith.addf %332, %137 : vector<64x64xf32>
    %cst_145 = arith.constant dense<0xFF800000> : vector<64xf32>
    %334 = vector.multi_reduction <maximumf>, %333, %cst_145 [1] : vector<64x64xf32> to vector<64xf32>
    %335 = vector.shape_cast %334 : vector<64xf32> to vector<64x1xf32>
    %336 = vector.broadcast %335 : vector<64x1xf32> to vector<64x64xf32>
    %337 = arith.subf %333, %336 : vector<64x64xf32>
    %338 = math.exp %337 : vector<64x64xf32>
    %cst_146 = arith.constant dense<0.000000e+00> : vector<64xf32>
    %339 = vector.multi_reduction <add>, %338, %cst_146 [1] : vector<64x64xf32> to vector<64xf32>
    %340 = vector.shape_cast %339 : vector<64xf32> to vector<64x1xf32>
    %341 = vector.broadcast %340 : vector<64x1xf32> to vector<64x64xf32>
    %342 = arith.divf %338, %341 : vector<64x64xf32>
    %343 = vector.extract_strided_slice %284 {offsets = [0, 24], sizes = [64, 8], strides = [1, 1]} : vector<64x32xf32> to vector<64x8xf32>
    %cst_147 = arith.constant dense<0.000000e+00> : vector<64x8xf32>
    %344 = tpu.matmul %342, %343, %cst_147 {dimension_numbers = #tpu.dot_dimension_numbers<[1], [0], [0], [1], [0, 0, 1, 1], [], []>} : vector<64x64xf32>, vector<64x8xf32>, vector<64x8xf32> -> vector<64x8xf32>
    %345 = tpu.concatenate %299, %314, %329, %344 in 1 : vector<64x8xf32>, vector<64x8xf32>, vector<64x8xf32>, vector<64x8xf32> -> vector<64x32xf32>
    %c504 = arith.constant 504 : index
    %c0_148 = arith.constant 0 : index
    %346 = vector.load %arg3[%c504, %c0_148] : memref<696x64xf32, #tpu.memory_space<vmem>>, vector<32x32xf32>
    %cst_149 = arith.constant dense<0.000000e+00> : vector<64x32xf32>
    %347 = tpu.matmul %345, %346, %cst_149 {dimension_numbers = #tpu.dot_dimension_numbers<[1], [0], [0], [1], [0, 0, 1, 1], [], []>} : vector<64x32xf32>, vector<32x32xf32>, vector<64x32xf32> -> vector<64x32xf32>
    %c15 = arith.constant 15 : index
    %c0_150 = arith.constant 0 : index
    %348 = vector.load %arg4[%c15, %c0_150] : memref<22x64xf32, #tpu.memory_space<vmem>>, vector<1x32xf32>
    %349 = vector.broadcast %348 : vector<1x32xf32> to vector<64x32xf32>
    %350 = arith.addf %347, %349 : vector<64x32xf32>
    %351 = arith.addf %350, %278 : vector<64x32xf32>
    %c16_151 = arith.constant 16 : index
    %c0_152 = arith.constant 0 : index
    %352 = vector.load %arg4[%c16_151, %c0_152] : memref<22x64xf32, #tpu.memory_space<vmem>>, vector<1x32xf32>
    %c17 = arith.constant 17 : index
    %c0_153 = arith.constant 0 : index
    %353 = vector.load %arg4[%c17, %c0_153] : memref<22x64xf32, #tpu.memory_space<vmem>>, vector<1x32xf32>
    %cst_154 = arith.constant dense<0.000000e+00> : vector<64xf32>
    %354 = vector.multi_reduction <add>, %351, %cst_154 [1] : vector<64x32xf32> to vector<64xf32>
    %355 = vector.shape_cast %354 : vector<64xf32> to vector<64x1xf32>
    %cst_155 = arith.constant 3.200000e+01 : f32
    %356 = vector.broadcast %cst_155 : f32 to vector<64x1xf32>
    %357 = arith.divf %355, %356 : vector<64x1xf32>
    %358 = vector.broadcast %357 : vector<64x1xf32> to vector<64x32xf32>
    %359 = arith.subf %351, %358 : vector<64x32xf32>
    %360 = arith.mulf %359, %359 : vector<64x32xf32>
    %cst_156 = arith.constant dense<0.000000e+00> : vector<64xf32>
    %361 = vector.multi_reduction <add>, %360, %cst_156 [1] : vector<64x32xf32> to vector<64xf32>
    %362 = vector.shape_cast %361 : vector<64xf32> to vector<64x1xf32>
    %cst_157 = arith.constant 3.200000e+01 : f32
    %363 = vector.broadcast %cst_157 : f32 to vector<64x1xf32>
    %364 = arith.divf %362, %363 : vector<64x1xf32>
    %cst_158 = arith.constant 9.99999997E-7 : f32
    %365 = vector.broadcast %cst_158 : f32 to vector<64x1xf32>
    %366 = arith.addf %364, %365 : vector<64x1xf32>
    %367 = math.rsqrt %366 : vector<64x1xf32>
    %368 = vector.broadcast %367 : vector<64x1xf32> to vector<64x32xf32>
    %369 = arith.mulf %359, %368 : vector<64x32xf32>
    %370 = vector.broadcast %352 : vector<1x32xf32> to vector<64x32xf32>
    %371 = arith.mulf %369, %370 : vector<64x32xf32>
    %372 = vector.broadcast %353 : vector<1x32xf32> to vector<64x32xf32>
    %373 = arith.addf %371, %372 : vector<64x32xf32>
    %c536 = arith.constant 536 : index
    %c0_159 = arith.constant 0 : index
    %374 = vector.load %arg3[%c536, %c0_159] : memref<696x64xf32, #tpu.memory_space<vmem>>, vector<32x64xf32>
    %cst_160 = arith.constant dense<0.000000e+00> : vector<64x64xf32>
    %375 = tpu.matmul %373, %374, %cst_160 {dimension_numbers = #tpu.dot_dimension_numbers<[1], [0], [0], [1], [0, 0, 1, 1], [], []>} : vector<64x32xf32>, vector<32x64xf32>, vector<64x64xf32> -> vector<64x64xf32>
    %c18 = arith.constant 18 : index
    %c0_161 = arith.constant 0 : index
    %376 = vector.load %arg4[%c18, %c0_161] : memref<22x64xf32, #tpu.memory_space<vmem>>, vector<1x64xf32>
    %377 = vector.broadcast %376 : vector<1x64xf32> to vector<64x64xf32>
    %378 = arith.addf %375, %377 : vector<64x64xf32>
    %cst_162 = arith.constant 5.000000e-01 : f32
    %379 = vector.broadcast %cst_162 : f32 to vector<64x64xf32>
    %380 = arith.mulf %379, %378 : vector<64x64xf32>
    %cst_163 = arith.constant 4.471500e-02 : f32
    %381 = vector.broadcast %cst_163 : f32 to vector<64x64xf32>
    %382 = arith.mulf %381, %378 : vector<64x64xf32>
    %383 = arith.mulf %382, %378 : vector<64x64xf32>
    %384 = arith.mulf %383, %378 : vector<64x64xf32>
    %385 = arith.addf %378, %384 : vector<64x64xf32>
    %cst_164 = arith.constant 0.797884583 : f32
    %386 = vector.broadcast %cst_164 : f32 to vector<64x64xf32>
    %387 = arith.mulf %386, %385 : vector<64x64xf32>
    %388 = math.tanh %387 : vector<64x64xf32>
    %cst_165 = arith.constant 1.000000e+00 : f32
    %389 = vector.broadcast %cst_165 : f32 to vector<64x64xf32>
    %390 = arith.addf %389, %388 : vector<64x64xf32>
    %391 = arith.mulf %380, %390 : vector<64x64xf32>
    %c568 = arith.constant 568 : index
    %c0_166 = arith.constant 0 : index
    %392 = vector.load %arg3[%c568, %c0_166] : memref<696x64xf32, #tpu.memory_space<vmem>>, vector<64x32xf32>
    %cst_167 = arith.constant dense<0.000000e+00> : vector<64x32xf32>
    %393 = tpu.matmul %391, %392, %cst_167 {dimension_numbers = #tpu.dot_dimension_numbers<[1], [0], [0], [1], [0, 0, 1, 1], [], []>} : vector<64x64xf32>, vector<64x32xf32>, vector<64x32xf32> -> vector<64x32xf32>
    %c19 = arith.constant 19 : index
    %c0_168 = arith.constant 0 : index
    %394 = vector.load %arg4[%c19, %c0_168] : memref<22x64xf32, #tpu.memory_space<vmem>>, vector<1x32xf32>
    %395 = vector.broadcast %394 : vector<1x32xf32> to vector<64x32xf32>
    %396 = arith.addf %393, %395 : vector<64x32xf32>
    %397 = arith.addf %396, %373 : vector<64x32xf32>
    %c20 = arith.constant 20 : index
    %c0_169 = arith.constant 0 : index
    %398 = vector.load %arg4[%c20, %c0_169] : memref<22x64xf32, #tpu.memory_space<vmem>>, vector<1x32xf32>
    %c21 = arith.constant 21 : index
    %c0_170 = arith.constant 0 : index
    %399 = vector.load %arg4[%c21, %c0_170] : memref<22x64xf32, #tpu.memory_space<vmem>>, vector<1x32xf32>
    %cst_171 = arith.constant dense<0.000000e+00> : vector<64xf32>
    %400 = vector.multi_reduction <add>, %397, %cst_171 [1] : vector<64x32xf32> to vector<64xf32>
    %401 = vector.shape_cast %400 : vector<64xf32> to vector<64x1xf32>
    %cst_172 = arith.constant 3.200000e+01 : f32
    %402 = vector.broadcast %cst_172 : f32 to vector<64x1xf32>
    %403 = arith.divf %401, %402 : vector<64x1xf32>
    %404 = vector.broadcast %403 : vector<64x1xf32> to vector<64x32xf32>
    %405 = arith.subf %397, %404 : vector<64x32xf32>
    %406 = arith.mulf %405, %405 : vector<64x32xf32>
    %cst_173 = arith.constant dense<0.000000e+00> : vector<64xf32>
    %407 = vector.multi_reduction <add>, %406, %cst_173 [1] : vector<64x32xf32> to vector<64xf32>
    %408 = vector.shape_cast %407 : vector<64xf32> to vector<64x1xf32>
    %cst_174 = arith.constant 3.200000e+01 : f32
    %409 = vector.broadcast %cst_174 : f32 to vector<64x1xf32>
    %410 = arith.divf %408, %409 : vector<64x1xf32>
    %cst_175 = arith.constant 9.99999997E-7 : f32
    %411 = vector.broadcast %cst_175 : f32 to vector<64x1xf32>
    %412 = arith.addf %410, %411 : vector<64x1xf32>
    %413 = math.rsqrt %412 : vector<64x1xf32>
    %414 = vector.broadcast %413 : vector<64x1xf32> to vector<64x32xf32>
    %415 = arith.mulf %405, %414 : vector<64x32xf32>
    %416 = vector.broadcast %398 : vector<1x32xf32> to vector<64x32xf32>
    %417 = arith.mulf %415, %416 : vector<64x32xf32>
    %418 = vector.broadcast %399 : vector<1x32xf32> to vector<64x32xf32>
    %419 = arith.addf %417, %418 : vector<64x32xf32>
    %420 = vector.extract_strided_slice %419 {offsets = [0, 0], sizes = [16, 32], strides = [1, 1]} : vector<64x32xf32> to vector<16x32xf32>
    %c0_176 = arith.constant 0 : index
    %c0_177 = arith.constant 0 : index
    %c0_178 = arith.constant 0 : index
    %421 = vector.load %arg5[%c0_176, %c0_177, %c0_178] : memref<2x16x32xf32, #tpu.memory_space<vmem>>, vector<1x16x32xf32>
    %422 = vector.shape_cast %421 : vector<1x16x32xf32> to vector<16x32xf32>
    %423 = vector.shape_cast %420 : vector<16x32xf32> to vector<1x16x32xf32>
    tpu.vector_store %arg5[%c0_176, %c0_177, %c0_178], %423 {strides = array<i32>} : memref<2x16x32xf32, #tpu.memory_space<vmem>>, vector<1x16x32xf32>,
    %424 = vector.extract_strided_slice %419 {offsets = [32, 0], sizes = [16, 32], strides = [1, 1]} : vector<64x32xf32> to vector<16x32xf32>
    %c1_179 = arith.constant 1 : index
    %c0_180 = arith.constant 0 : index
    %c0_181 = arith.constant 0 : index
    %425 = vector.load %arg5[%c1_179, %c0_180, %c0_181] : memref<2x16x32xf32, #tpu.memory_space<vmem>>, vector<1x16x32xf32>
    %426 = vector.shape_cast %425 : vector<1x16x32xf32> to vector<16x32xf32>
    %427 = vector.shape_cast %424 : vector<16x32xf32> to vector<1x16x32xf32>
    tpu.vector_store %arg5[%c1_179, %c0_180, %c0_181], %427 {strides = array<i32>} : memref<2x16x32xf32, #tpu.memory_space<vmem>>, vector<1x16x32xf32>,
    return
  }
  func.func @transform_0(%arg0: i32) -> (i32, i32) {
    %c0_i32 = arith.constant 0 : i32
    %c0_i32_0 = arith.constant 0 : i32
    %c0_i32_1 = arith.constant 0 : i32
    return %c0_i32, %c0_i32_0 : i32, i32
  }
  func.func @transform_1(%arg0: i32) -> (i32, i32) {
    %c0_i32 = arith.constant 0 : i32
    %c0_i32_0 = arith.constant 0 : i32
    %c0_i32_1 = arith.constant 0 : i32
    return %c0_i32, %c0_i32_0 : i32, i32
  }
  func.func @transform_2(%arg0: i32) -> (i32, i32) {
    %c0_i32 = arith.constant 0 : i32
    %c0_i32_0 = arith.constant 0 : i32
    %c0_i32_1 = arith.constant 0 : i32
    return %c0_i32, %c0_i32_0 : i32, i32
  }
  func.func @transform_3(%arg0: i32) -> (i32, i32) {
    %c0_i32 = arith.constant 0 : i32
    %c0_i32_0 = arith.constant 0 : i32
    %c0_i32_1 = arith.constant 0 : i32
    return %c0_i32, %c0_i32_0 : i32, i32
  }
  func.func @transform_4(%arg0: i32) -> (i32, i32, i32) {
    %c0_i32 = arith.constant 0 : i32
    %c0_i32_0 = arith.constant 0 : i32
    %c0_i32_1 = arith.constant 0 : i32
    %c0_i32_2 = arith.constant 0 : i32
    return %c0_i32, %c0_i32_0, %c0_i32_1 : i32, i32, i32
  }
}

</mosaic_0001>

<bundles_post_ra>
// kernel: pyraformer_encoder_forward.1
= control target key start
LH: loop header
LB: loop body
LE: loop exit
PB: predicated region body
PF: predicated region fallthrough
CT: control target
= control target key end

     0   :  { %vm30_vm0 = vcmask 261120   ;;  %s11839_s0 = inlined_call_operand.vmem [shape: f32[32,4], index: 0, kind: input, shape index: {}]   ;;  %s11840_s1 = inlined_call_operand.vmem [shape: f32[32,4], index: 1, kind: input, shape index: {}]   ;;  %s11841_s2 = inlined_call_operand.vmem [shape: f32[696,64], index: 2, kind: input, shape index: {}]   ;;  %s11842_s3 = inlined_call_operand.vmem [shape: f32[22,64], index: 3, kind: input, shape index: {}]   ;;  %s11843_s4 = inlined_call_operand.hbm [shape: f32[2,16,32], index: 4, kind: output, shape index: {}]  }
   0x1   :  { %v21_v0 = vld [vmem:[%s11839_s0 + $0x18] sm:$0xff]  ;;  %v20_v1 = vld [vmem:[%s11839_s0 + $0x10] sm:$0xff]  ;;  %v128_v2 = vld [vmem:[%s11841_s2 + $0x20] sm:$0xff] }
   0x2   :  { %7980 = vmatprep.subr.mxu1 %v21_v0  ;;  %7966 = vmatprep.subr.mxu0 %v21_v0  ;;  %v19_v3 = vld [vmem:[%s11839_s0 + $0x8] sm:$0xff]  ;;  %v18_v4 = vld [vmem:[%s11839_s0] sm:$0xff] }
   0x3   :  { %7981 = vmatpush3.msra.mxu1 %v21_v0  ;;  %7988 = vmatprep.mubr.msk.f32.mxu1 %vm30_vm0, %v128_v2 }
   0x4   :  { %7982 = vmatprep.subr.mxu1 %v20_v1  ;;  %7967 = vmatpush3.msra.mxu0 %v21_v0 }
   0x5   :  { %7983 = vmatpush3.msra.mxu1 %v20_v1  ;;  %7968 = vmatprep.subr.mxu0 %v20_v1 }
   0x6   :  { %9 = vsyncpa [#allocation4], 0  ;;  %7984 = vmatprep.subr.mxu1 %v19_v3  ;;  %7969 = vmatpush3.msra.mxu0 %v20_v1  ;;  %v129_v5 = vld [vmem:[%s11841_s2 + $0x28] sm:$0xff]  ;;  %v130_v6 = vld [vmem:[%s11841_s2 + $0x30] sm:$0xff]  ;;  %s9212_s12 = smov 4   ;;  %s9213_s15 = smov 12  }
   0x7   :  { %7985 = vmatpush3.msra.mxu1 %v19_v3  ;;  %7970 = vmatprep.subr.mxu0 %v19_v3  ;;  %v26_v7 = vld [vmem:[%s11841_s2] sm:$0xff]  ;;  %v27_v8 = vld [vmem:[%s11841_s2 + $0x8] sm:$0xff]  ;;  %v28_v9 = vld [vmem:[%s11841_s2 + $0x10] sm:$0xff]  ;;  %s9214_s22 = smov 8   ;;  %vm277_vm1 = vcmask 31744   ;;  %vm282_vm2 = vcmask 64512  }
   0x8   :  { %7986 = vmatprep.subr.mxu1 %v18_v4  ;;  %7971 = vmatpush3.msra.mxu0 %v19_v3  ;;  %v23_v10 = vld [vmem:[%s11840_s1 + $0x8] sm:$0xff]  ;;  %v131_v11 = vld [vmem:[%s11841_s2 + $0x38] sm:$0xff]  ;;  %v22_v13 = vld [vmem:[%s11840_s1] sm:$0xff]  ;;  %vm287_vm3 = vcmask 97280   ;;  %vm298_vm4 = vcmask 130048   ;;  %v9215_v53 = vmov 0.0  }
   0x9   :  { %7987 = vmatpush3.msra.mxu1 %v18_v4  ;;  %7972 = vmatprep.subr.mxu0 %v18_v4  ;;  %v29_v12 = vld [vmem:[%s11841_s2 + $0x18] sm:$0xff]  ;;  %v293_v14 = vld [vmem:[%s11841_s2 + $0x48] sm:$0xff]  ;;  %v292_v15 = vld [vmem:[%s11841_s2 + $0x40] sm:$0xff]  ;;  %1342 = vst.msk [vmem:[#allocation2 + $0x8] sm:$0xff] %vm30_vm0, %v9215_v53  ;;  %vm9216_vm9 = vmmov 0   ;;  %vm1352_vm13 = vcmask 257024  }
   0xa   :  { %7989 = vmatmul.mubr.msk.f32.vlgmr.msra.gmra.mxu1 %vm30_vm0, %v129_v5  ;;  %7973 = vmatpush3.msra.mxu0 %v18_v4  ;;  %v399_v17 = vld [vmem:[%s11841_s2 + $0x88] sm:$0xff]  ;;  %v24_v21 = vld [vmem:[%s11840_s1 + $0x10] sm:$0xff]  ;;  %v25_v22 = vld [vmem:[%s11840_s1 + $0x18] sm:$0xff]  ;;  %1341 = vst.msk [vmem:[#allocation2] sm:$0xff] %vm30_vm0, %v9215_v53  ;;  %vm1357_vm14 = vcmask 261124   ;;  %s9217_s11 = smov 120  }
   0xb   :  { %7991 = vmatprep.mubr.msk.f32.mxu1 %vm30_vm0, %v130_v6  ;;  %7974 = vmatprep.mubr.msk.f32.mxu0 %vm30_vm0, %v26_v7  ;;  %v398_v51 = vld [vmem:[%s11841_s2 + $0x80] sm:$0xff]  ;;  %v397_v52 = vld [vmem:[%s11841_s2 + $0x78] sm:$0xff]  ;;  %1343 = vst.msk [vmem:[#allocation2 + $0x10] sm:$0xff] %vm30_vm0, %v9215_v53  ;;  %1344 = vst.msk [vmem:[#allocation2 + $0x18] sm:$0xff] %vm30_vm0, %v9215_v53  ;;  %vm2010_vm15 = vcmask 523264   ;;  %s9218_s1 = smov 112  }
   0xc   :  { %7975 = vmatmul.mubr.msk.f32.vlgmr.msra.gmra.mxu0 %vm30_vm0, %v27_v8  ;;  %233 = vrot.lane.b32.xlu0 %v18_v4, %s9212_s12  ;;  %1345 = vst.msk [vmem:[#allocation2 + $0x20] sm:$0xff] %vm30_vm0, %v9215_v53  ;;  %1346 = vst.msk [vmem:[#allocation2 + $0x28] sm:$0xff] %vm30_vm0, %v9215_v53  ;;  %v396_v54 = vld [vmem:[%s11841_s2 + $0x70] sm:$0xff]  ;;  %v295_v55 = vld [vmem:[%s11841_s2 + $0x58] sm:$0xff]  ;;  %s9219_s29 = smov 104   ;;  %s9220_s20 = smov 16  }
   0xd   :  { %7977 = vmatprep.mubr.msk.f32.mxu0 %vm30_vm0, %v28_v9  ;;  %267 = vrot.lane.b32.xlu1 %v23_v10, %s9213_s15  ;;  %1347 = vst.msk [vmem:[#allocation2 + $0x30] sm:$0xff] %vm30_vm0, %v9215_v53  ;;  %1348 = vst.msk [vmem:[#allocation2 + $0x38] sm:$0xff] %vm30_vm0, %v9215_v53  ;;  %v294_v57 = vld [vmem:[%s11841_s2 + $0x50] sm:$0xff]  ;;  %v297_v61 = vld [vmem:[%s11841_s2 + $0x68] sm:$0xff]  ;;  %v502_v9 = vlaneseq  ;;  %s9221_s0 = smov 24   ;;  %s9222_s25 = smov [#allocation3]  }
   0xe   :  { %7992 = vmatmul.mubr.msk.f32.gmra.mxu1 %vm30_vm0, %v131_v11  ;;  %7994 = vmatprep.subr.mxu0 %v293_v14  ;;  %v296_v63 = vld [vmem:[%s11841_s2 + $0x60] sm:$0xff]  ;;  %s7140_s26 = sshll.u32 %s9222_s25, 4  ;;  %s7141_s26 = int_to_ptr.vmem [resolvable:$true] %s7140_s26 }
   0xf   :  { %7995 = vmatpush3.msra.mxu0 %v293_v14  ;;  %8004 = vmatprep.subr.mxu1 %v399_v17  ;;  %v503_v10 = vshrl.u32 %v502_v9, 7  ;;  %v506_v14 = vand.u32 127, %v502_v9  ;;  %p9195_p1 = scmp.lt.s32.totalorder %s7141_s26, %s7141_s26 }
  0x10   :  { %7978 = vmatmul.mubr.msk.f32.gmra.mxu0 %vm30_vm0, %v29_v12  ;;  %235 = vrot.lane.b32.xlu0 %v19_v3, %s9212_s12 }
  0x11   :  { %239 = vrot.lane.b32.xlu1 %v21_v0, %s9212_s12  ;;  %7996 = vmatprep.subr.mxu0 %v292_v15  ;;  %v504_v11 = vadd.s32 8, %v503_v10  ;;  %v507_v12 = vmul.u32 2, %v503_v10 }
  0x12   :  { %7997 = vmatpush3.msra.mxu0 %v292_v15  ;;  %8005 = vmatpush3.msra.mxu1 %v399_v17 }
  0x13   :  { %8006 = vmatprep.subr.mxu1 %v398_v51  ;;  %v513_v15 = vadd.s32 1, %v507_v12  ;;  %vm509_vm5 = vcmp.eq.s32.totalorder %v506_v14, %v507_v12 }
  0x14   :  { %265 = vrot.lane.b32.xlu0 %v22_v13, %s9213_s15  ;;  %8007 = vmatpush3.msra.mxu1 %v398_v51  ;;  %v508_v13 = vmul.u32 2, %v504_v11  ;;  %v9392_v17 = vsel %vm509_vm5, 1.0, %v9215_v53 }
  0x15   :  { %8008 = vmatprep.subr.mxu1 %v397_v52  ;;  %vm515_vm6 = vcmp.eq.s32.totalorder %v506_v14, %v513_v15 }
  0x16   :  { %8009 = vmatpush3.msra.mxu1 %v397_v52  ;;  %vm9397_vm7 = vcmp.eq.s32.totalorder %v506_v14, %v508_v13 }
  0x17   :  { %8010 = vmatprep.subr.mxu1 %v396_v54 }
  0x18   :  { %237 = vrot.lane.b32.xlu0 %v20_v1, %s9212_s12  ;;  %8011 = vmatpush3.msra.mxu1 %v396_v54 }
  0x7e   :  { %v234_v23 = vpop.permute.xlu0 %233 }
  0x7f   :  { %v268_v24 = vpop.permute.xlu1 %267 }
  0x82   :  { %v236_v25 = vpop.permute.xlu0 %235 }
  0x83   :  { %v240_v26 = vpop.permute.xlu1 %239 }
  0x86   :  { %v266_v27 = vpop.permute.xlu0 %265 }
  0x8a   :  { %v238_v30 = vpop.permute.xlu0 %237 }
  0xca   :  { %v7990_v16 = vpop.f32.mrf.mxu1 }
  0xcb   :  { %251 = vrot.lane.b32.xlu1 %v7990_v16, %s9214_s22  ;;  %v514_v16 = vadd.s32 1, %v508_v13 }
  0xcc   :  { %v210_v18 = vpop.f32.mrf.mxu1  ;;  %v7976_v28 = vpop.f32.mrf.mxu0 }
  0xcd   :  { %v279_v32 = vsel %vm277_vm1, %v7976_v28, %v236_v25  ;;  %vm516_vm8 = vcmp.eq.s32.totalorder %v506_v14, %v514_v16 }
  0xce   :  { %v7993_v19 = vpop.f32.mrf.mxu1  ;;  %v109_v31 = vpop.f32.mrf.mxu0 }
  0xcf   :  { %249 = vrot.lane.b32.xlu1 %v210_v18, %s9214_s22  ;;  %v278_v33 = vsel %vm277_vm1, %v109_v31, %v234_v23  ;;  %v9395_v18 = vsel %vm515_vm6, 1.0, %v9215_v53  ;;  %v682_v31 = vld [vmem:[%s11841_s2 + $0x98] sm:$0xff] }
  0xd0   :  { %v220_v20 = vpop.f32.mrf.mxu1  ;;  %v7979_v34 = vpop.f32.mrf.mxu0 }
  0xd1   :  { %253 = vrot.lane.b32.xlu0 %v220_v20, %s9214_s22  ;;  %v281_v46 = vsel %vm277_vm1, %v7979_v34, %v240_v26 }
  0xd2   :  { %v119_v38 = vpop.f32.mrf.mxu0 }
  0xd3   :  { %255 = vrot.lane.b32.xlu1 %v7993_v19, %s9214_s22  ;;  %v280_v43 = vsel %vm277_vm1, %v119_v38, %v238_v30  ;;  %v518_v30 = vsel %vm516_vm8, 1.0, %v9215_v53  ;;  %vm3578_vm1 = vcmask 195584  }
  0xd5   :  { %269 = vrot.lane.b32.xlu0 %v24_v21, %s9213_s15 }
  0xd7   :  { %271 = vrot.lane.b32.xlu1 %v25_v22, %s9213_s15  ;;  %v7163_v22 = vld [vmem:[%s11842_s3] ss:$0 sm:$0xff] }
 0x13d   :  { %v252_v29 = vpop.permute.xlu1 %251 }
 0x13e   :  { %v284_v35 = vsel %vm282_vm2, %v279_v32, %v252_v29  ;;  %v512_v29 = vsel %vm9397_vm7, 1.0, %v9215_v53  ;;  %v600_v32 = vld [vmem:[%s11841_s2 + $0x90] sm:$0xff] }
 0x13f   :  { %v289_v41 = vsel %vm287_vm3, %v284_v35, %v268_v24 }
 0x141   :  { %v250_v36 = vpop.permute.xlu1 %249 }
 0x142   :  { %v283_v37 = vsel %vm282_vm2, %v278_v33, %v250_v36 }
 0x143   :  { %v254_v39 = vpop.permute.xlu0 %253  ;;  %v288_v40 = vsel %vm287_vm3, %v283_v37, %v266_v27  ;;  %v9429_v37 = vld [vmem:[%s11841_s2 + $0xb0] sm:$0xff] }
 0x144   :  { %7998 = vmatprep.mubr.msk.f32.mxu0 %vm298_vm4, %v288_v40  ;;  %v285_v44 = vsel %vm282_vm2, %v280_v43, %v254_v39  ;;  %v7176_v40 = vld [vmem:[%s11842_s3 + $0x1] ss:$0 sm:$0xff] }
 0x145   :  { %v256_v42 = vpop.permute.xlu1 %255  ;;  %7999 = vmatmul.mubr.msk.f32.vlgmr.msra.gmra.mxu0 %vm298_vm4, %v289_v41 }
 0x146   :  { %v286_v48 = vsel %vm282_vm2, %v281_v46, %v256_v42  ;;  %v7177_v42 = vld [vmem:[%s11842_s3 + $0x2] ss:$0 sm:$0xff] }
 0x147   :  { %v270_v45 = vpop.permute.xlu0 %269 }
 0x148   :  { %v290_v47 = vsel %vm287_vm3, %v285_v44, %v270_v45 }
 0x149   :  { %v272_v49 = vpop.permute.xlu1 %271  ;;  %8001 = vmatprep.mubr.msk.f32.mxu0 %vm298_vm4, %v290_v47 }
 0x14a   :  { %v291_v50 = vsel %vm287_vm3, %v286_v48, %v272_v49 }
 0x14b   :  { %8002 = vmatmul.mubr.msk.f32.gmra.mxu0 %vm298_vm4, %v291_v50 }
 0x14c   :  { %8026 = vmatprep.mubr.msk.f32.mxu0 %vm30_vm0, %v9392_v17 }
 0x205   :  { %v8000_v56 = vpop.f32.mrf.mxu0 }
 0x206   :  { %v383_v58 = vadd.f32 %v8000_v56, %v295_v55 }
 0x207   :  { %v377_v59 = vpop.f32.mrf.mxu0 }
 0x208   :  { %1350 = vst.msk [vmem:[#allocation2 + $0x8] sm:$0xff] %vm30_vm0, %v383_v58  ;;  %v378_v60 = vadd.f32 %v377_v59, %v294_v57 }
 0x20a   :  { %1349 = vst.msk [vmem:[#allocation2] sm:$0xff] %vm30_vm0, %v378_v60  ;;  %8012 = vmatprep.mubr.msk.f32.mxu1 %vm30_vm0, %v378_v60 }
 0x20b   :  { %v8003_v62 = vpop.f32.mrf.mxu0  ;;  %8013 = vmatmul.mubr.msk.f32.vlgmr.msra.gmra.mxu1 %vm30_vm0, %v383_v58 }
 0x20c   :  { %v393_v0 = vadd.f32 %v8003_v62, %v297_v61  ;;  %v1030_v61 = vld [vmem:[%s11841_s2 + $0xa0] sm:$0xff]  ;;  %v1103_v62 = vld [vmem:[%s11841_s2 + $0xa8] sm:$0xff] }
 0x20d   :  { %v387_v1 = vpop.f32.mrf.mxu0 }
 0x20e   :  { %1355 = vst.msk [vmem:[#allocation2 + $0x28] sm:$0xff] %vm30_vm0, %v393_v0  ;;  %v388_v2 = vadd.f32 %v387_v1, %v296_v63  ;;  %v9468_v63 = vld [vmem:[%s11842_s3 + $0x5] ss:$0 sm:$0xff] }
 0x20f   :  { %v9376_v3 = vld [vmem:[#allocation2 + $0x8] sm:$0xff] }
 0x210   :  { %1354 = vst.msk [vmem:[#allocation2 + $0x20] sm:$0xff] %vm30_vm0, %v388_v2  ;;  %8015 = vmatprep.mubr.msk.f32.mxu1 %vm30_vm0, %v388_v2  ;;  %v1372_v4 = vsel %vm30_vm0, %v9376_v3, 0.0 }
 0x211   :  { %1373 = vadd.xlane.f32.xlu1 %v1372_v4  ;;  %8016 = vmatmul.mubr.msk.f32.gmra.mxu1 %vm30_vm0, %v393_v0  ;;  %v9383_v5 = vld [vmem:[#allocation2] sm:$0xff] }
 0x212   :  { %v1369_v6 = vsel %vm30_vm0, %v9383_v5, 0.0  ;;  %8037 = vmatprep.mubr.msk.f32.mxu1 %vm30_vm0, %v9395_v18 }
 0x213   :  { %1370 = vadd.xlane.f32.xlu0 %v1369_v6 }
 0x217   :  { %v9387_v7 = vld [vmem:[#allocation2 + $0x20] sm:$0xff] }
 0x218   :  { %v1381_v8 = vsel %vm30_vm0, %v9387_v7, 0.0 }
 0x219   :  { %1382 = vadd.xlane.f32.xlu1 %v1381_v8 }
 0x29c   :  { %v1371_v0 = vpop.xlane.xlu0 %1370 }
 0x29d   :  { %v1394_v9 = vmul.f32 0.03125, %v1371_v0  ;;  %v1364_v0 = vld [vmem:[#allocation2 + $0x28] sm:$0xff] }
 0x29f   :  { %v1402_v13 = vsub.f32 %v9383_v5, %v1394_v9  ;;  %v1509_v9 = vld [vmem:[%s11841_s2 + $0xd0] sm:$0xff] }
 0x2a1   :  { %v1410_v16 = vmul.f32 %v1402_v13, %v1402_v13 }
 0x2a3   :  { %v1418_v19 = vsel %vm30_vm0, %v1410_v16, 0.0 }
 0x2cb   :  { %v8014_v20 = vpop.f32.mrf.mxu1 }
 0x2cc   :  { %v489_v27 = vadd.f32 %v8014_v20, %v7163_v22  ;;  %v1374_v20 = vpop.xlane.xlu1 %1373 }
 0x2cd   :  { %v483_v21 = vpop.f32.mrf.mxu1 }
 0x2ce   :  { %v484_v28 = vadd.f32 %v7163_v22, %v483_v21 }
 0x2d0   :  { %v1383_v21 = vpop.xlane.xlu1 %1382 }
 0x2d1   :  { %v8017_v23 = vpop.f32.mrf.mxu1 }
 0x2d2   :  { %v499_v24 = vadd.f32 %v8017_v23, %v7163_v22  ;;  %v1398_v23 = vmul.f32 0.03125, %v1383_v21 }
 0x2d3   :  { %v493_v25 = vpop.f32.mrf.mxu1 }
 0x2d4   :  { %v494_v26 = vadd.f32 %v7163_v22, %v493_v25  ;;  %8018 = vmatprep.subr.mxu0 %v499_v24  ;;  %8029 = vmatprep.subr.mxu1 %v499_v24  ;;  %v9484_v5 = vsub.f32 %v9387_v7, %v1398_v23 }
 0x2d5   :  { %8019 = vmatpush3.msra.mxu0 %v499_v24  ;;  %8030 = vmatpush3.msra.mxu1 %v499_v24 }
 0x2d6   :  { %8020 = vmatprep.subr.mxu0 %v494_v26  ;;  %8031 = vmatprep.subr.mxu1 %v494_v26 }
 0x2d7   :  { %8021 = vmatpush3.msra.mxu0 %v494_v26  ;;  %8032 = vmatpush3.msra.mxu1 %v494_v26 }
 0x2d8   :  { %8022 = vmatprep.subr.mxu0 %v489_v27  ;;  %8033 = vmatprep.subr.mxu1 %v489_v27 }
 0x2d9   :  { %8023 = vmatpush3.msra.mxu0 %v489_v27  ;;  %8034 = vmatpush3.msra.mxu1 %v489_v27 }
 0x2da   :  { %8024 = vmatprep.subr.mxu0 %v484_v28  ;;  %8035 = vmatprep.subr.mxu1 %v484_v28 }
 0x2db   :  { %8025 = vmatpush3.msra.mxu0 %v484_v28  ;;  %8036 = vmatpush3.msra.mxu1 %v484_v28 }
 0x2dc   :  { %8027 = vmatmul.mubr.msk.f32.vlgmr.msra.gmra.mxu0 %vm30_vm0, %v512_v29  ;;  %8038 = vmatmul.mubr.msk.f32.vlgmr.msra.gmra.mxu1 %vm30_vm0, %v518_v30 }
 0x2dd   :  { %8040 = vmatprep.subr.mxu0 %v682_v31  ;;  %8045 = vmatprep.subr.mxu1 %v600_v32 }
 0x2de   :  { %8041 = vmatpush3.msra.mxu0 %v682_v31  ;;  %8046 = vmatpush3.msra.mxu1 %v600_v32 }
 0x2df   :  { %8055 = vmatprep.subr.mxu1 %v9215_v53  ;;  %8050 = vmatprep.subr.mxu0 %v9429_v37 }
 0x39c   :  { %v8028_v33 = vpop.f32.mrf.mxu0  ;;  %v8039_v34 = vpop.f32.mrf.mxu1 }
 0x39e   :  { %v591_v35 = vpop.f32.mrf.mxu0  ;;  %v673_v36 = vpop.f32.mrf.mxu1 }
 0x39f   :  { %8042 = vmatprep.mubr.msk.f32.mxu0 %vm282_vm2, %v673_v36  ;;  %8047 = vmatprep.mubr.msk.f32.mxu1 %vm282_vm2, %v591_v35 }
 0x3a0   :  { %8043 = vmatmul.mubr.msk.f32.vlgmr.msra.gmra.mxu0 %vm282_vm2, %v8039_v34  ;;  %8048 = vmatmul.mubr.msk.f32.vlgmr.msra.gmra.mxu1 %vm282_vm2, %v8028_v33  ;;  %v1414_v33 = vmul.f32 %v9484_v5, %v9484_v5 }
 0x3a1   :  { %8051 = vmatpush3.msra.mxu0 %v9429_v37  ;;  %8059 = vmatprep.mubr.msk.f32.mxu1 %vm9216_vm9, %v9215_v53 }
 0x3a2   :  { %8062 = vmatprep.subr.mxu0 %v9215_v53  ;;  %v1430_v7 = vsel %vm30_vm0, %v1414_v33, 0.0 }
 0x460   :  { %v8044_v38 = vpop.f32.mrf.mxu0  ;;  %v8049_v39 = vpop.f32.mrf.mxu1 }
 0x461   :  { %v842_v41 = vadd.f32 %v8049_v39, %v8044_v38  ;;  %v9507_v39 = vld [vmem:[%s11842_s3 + $0x7] ss:$0 sm:$0xff] }
 0x462   :  { %v755_v43 = vpop.f32.mrf.mxu0  ;;  %v836_v44 = vpop.f32.mrf.mxu1 }
 0x463   :  { %v851_v45 = vmul.f32 %v7176_v40, %v842_v41  ;;  %v837_v46 = vadd.f32 %v836_v44, %v755_v43 }
 0x465   :  { %v858_v47 = vadd.f32 %v7177_v42, %v851_v45  ;;  %v850_v48 = vmul.f32 %v7176_v40, %v837_v46  ;;  %v7187_v45 = vld [vmem:[%s11842_s3 + $0x3] ss:$0 sm:$0xff] }
 0x467   :  { %v862_v49 = vmin.f32 %v858_v47, 0.0  ;;  %v857_v50 = vadd.f32 %v7177_v42, %v850_v48  ;;  %vm860_vm10 = vcmp.gt.f32.partialorder %v858_v47, 0.0 }
 0x469   :  { %v865_v51 = vmul.f32 1.442695, %v862_v49  ;;  %v861_v52 = vmin.f32 %v857_v50, 0.0  ;;  %vm859_vm11 = vcmp.gt.f32.partialorder %v857_v50, 0.0 }
 0x46b   :  { %8800 = vpow2.f32 %v865_v51  ;;  %v863_v54 = vmul.f32 1.442695, %v861_v52 }
 0x46d   :  { %8802 = vpow2.f32 %v863_v54 }
 0x478   :  { %v8801_v55 = vpop.eup %8800 }
 0x479   :  { %v7179_v56 = vadd.f32 -1.0, %v8801_v55 }
 0x47a   :  { %v8803_v57 = vpop.eup %8802 }
 0x47b   :  { %v870_v58 = vsel %vm860_vm10, %v858_v47, %v7179_v56  ;;  %v7178_v59 = vadd.f32 -1.0, %v8803_v57  ;;  %v7188_v47 = vld [vmem:[%s11842_s3 + $0x4] ss:$0 sm:$0xff] }
 0x47c   :  { %8056 = vmatpush3.msra.mxu1 %v870_v58 }
 0x47d   :  { %8057 = vmatprep.subr.mxu1 %v9215_v53  ;;  %v869_v60 = vsel %vm859_vm11, %v857_v50, %v7178_v59 }
 0x47e   :  { %8052 = vmatprep.mubr.msk.f32.mxu0 %vm282_vm2, %v869_v60  ;;  %8058 = vmatpush3.msra.mxu1 %v869_v60 }
 0x47f   :  { %8053 = vmatmul.mubr.msk.f32.vlgmr.msra.gmra.mxu0 %vm282_vm2, %v870_v58  ;;  %8060 = vmatmul.mubr.msk.f32.vlgmr.msra.gmra.mxu1 %vm298_vm4, %v9392_v17 }
 0x480   :  { %8063 = vmatpush3.msra.mxu0 %v870_v58  ;;  %8066 = vmatprep.mubr.msk.f32.mxu0 %vm9216_vm9, %v9215_v53 }
 0x481   :  { %8064 = vmatprep.subr.mxu0 %v9215_v53  ;;  %8069 = vmatprep.subr.mxu1 %v9215_v53 }
 0x482   :  { %8065 = vmatpush3.msra.mxu0 %v869_v60  ;;  %8071 = vmatprep.mubr.msk.f32.mxu1 %vm9216_vm9, %v9215_v53 }
 0x483   :  { %8067 = vmatmul.mubr.msk.f32.vlgmr.msra.gmra.mxu0 %vm298_vm4, %v9395_v18  ;;  %8074 = vmatprep.subr.mxu0 %v9215_v53 }
 0x484   :  { %8076 = vmatprep.mubr.msk.f32.mxu0 %vm9216_vm9, %v9215_v53  ;;  %8075 = vmatpush3.msra.mxu0 %v1030_v61  ;;  %v1395_v61 = vmul.f32 0.03125, %v1374_v20 }
 0x485   :  { %8070 = vmatpush3.msra.mxu1 %v1103_v62  ;;  %8084 = vmatprep.subr.mxu0 %v1509_v9 }
 0x486   :  { %8079 = vmatprep.subr.mxu1 %v9215_v53 }
 0x53f   :  { %v8054_v1 = vpop.f32.mrf.mxu0  ;;  %v1026_v2 = vpop.f32.mrf.mxu1 }
 0x540   :  { %v955_v4 = vadd.f32 %v8054_v1, %v9468_v63  ;;  %8077 = vmatmul.mubr.msk.f32.vlgmr.msra.gmra.mxu0 %vm282_vm2, %v1026_v2  ;;  %v1403_v1 = vsub.f32 %v9376_v3, %v1395_v61  ;;  %v1384_v2 = vsel %vm30_vm0, %v1364_v0, 0.0  ;;  %v1508_v3 = vld [vmem:[%s11841_s2 + $0xc8] sm:$0xff] }
 0x541   :  { %v949_v6 = vpop.f32.mrf.mxu0  ;;  %v8061_v8 = vpop.f32.mrf.mxu1  ;;  %8085 = vmatpush3.msra.mxu0 %v1509_v9 }
 0x542   :  { %1356 = vst.msk [vmem:[#allocation2 + $0x30] sm:$0xff] %vm30_vm0, %v955_v4  ;;  %v950_v10 = vadd.f32 %v9468_v63, %v949_v6  ;;  %v1411_v8 = vmul.f32 %v1403_v1, %v1403_v1  ;;  %8086 = vmatprep.subr.mxu0 %v1508_v3 }
 0x543   :  { %v1099_v11 = vpop.f32.mrf.mxu0  ;;  %8087 = vmatpush3.msra.mxu0 %v1508_v3 }
 0x544   :  { %1351 = vst.msk [vmem:[#allocation2 + $0x10] sm:$0xff] %vm30_vm0, %v950_v10  ;;  %8072 = vmatmul.mubr.msk.f32.vlgmr.msra.gmra.mxu1 %vm282_vm2, %v1099_v11  ;;  %v1642_v10 = vld [vmem:[%s11841_s2 + $0xf0] sm:$0xff]  ;;  %v1641_v11 = vld [vmem:[%s11841_s2 + $0xe8] sm:$0xff] }
 0x545   :  { %v8068_v12 = vpop.f32.mrf.mxu0  ;;  %8080 = vmatpush3.msra.mxu1 %v9429_v37  ;;  %8081 = vmatprep.mubr.msk.f32.mxu1 %vm9216_vm9, %v9215_v53  ;;  %v9502_v37 = vld [vmem:[%s11842_s3 + $0x6] ss:$0 sm:$0xff] }
 0x546   :  { %8104 = vmatprep.subr.mxu1 %v1642_v10  ;;  %v1507_v12 = vld [vmem:[%s11841_s2 + $0xc0] sm:$0xff] }
 0x547   :  { %8088 = vmatprep.subr.mxu0 %v1507_v12 }
 0x548   :  { %8089 = vmatpush3.msra.mxu0 %v1507_v12 }
 0x549   :  { %v1365_v14 = vld [vmem:[#allocation2 + $0x30] sm:$0xff] }
 0x54a   :  { %v1387_v15 = vsel %vm30_vm0, %v1365_v14, 0.0 }
 0x54b   :  { %1388 = vadd.xlane.f32.xlu1 %v1387_v15  ;;  %v1361_v17 = vld [vmem:[#allocation2 + $0x10] sm:$0xff]  ;;  %v1639_v15 = vld [vmem:[%s11841_s2 + $0xd8] sm:$0xff] }
 0x54c   :  { %v1375_v18 = vsel %vm30_vm0, %v1361_v17, 0.0 }
 0x54d   :  { %1376 = vadd.xlane.f32.xlu0 %v1375_v18 }
 0x54f   :  { %1419 = vadd.xlane.f32.xlu1 %v1418_v19 }
 0x5d4   :  { %v1389_v22 = vpop.xlane.xlu1 %1388 }
 0x5d5   :  { %v1400_v26 = vmul.f32 0.03125, %v1389_v22 }
 0x5d6   :  { %v1377_v24 = vpop.xlane.xlu0 %1376 }
 0x5d7   :  { %v1396_v53 = vmul.f32 0.03125, %v1377_v24  ;;  %v9490_v31 = vsub.f32 %v1365_v14, %v1400_v26  ;;  %v1506_v14 = vld [vmem:[%s11841_s2 + $0xb8] sm:$0xff] }
 0x5d8   :  { %v1420_v25 = vpop.xlane.xlu1 %1419  ;;  %8090 = vmatprep.subr.mxu0 %v1506_v14 }
 0x5d9   :  { %v9486_v27 = vsub.f32 %v1361_v17, %v1396_v53  ;;  %v1442_v28 = vmul.f32 0.03125, %v1420_v25  ;;  %v1416_v34 = vmul.f32 %v9490_v31, %v9490_v31  ;;  %8091 = vmatpush3.msra.mxu0 %v1506_v14 }
 0x5db   :  { %v1450_v29 = vadd.f32 1e-05, %v1442_v28  ;;  %v1412_v30 = vmul.f32 %v9486_v27, %v9486_v27  ;;  %v1436_v35 = vsel %vm30_vm0, %v1416_v34, 0.0 }
 0x5dd   :  { %8804 = vrsqrt.f32 %v1450_v29  ;;  %v1424_v32 = vsel %vm30_vm0, %v1412_v30, 0.0 }
 0x5de   :  { %1425 = vadd.xlane.f32.xlu1 %v1424_v32 }
 0x5e2   :  { %1431 = vadd.xlane.f32.xlu1 %v1430_v7 }
 0x5e6   :  { %1437 = vadd.xlane.f32.xlu1 %v1436_v35 }
 0x5ea   :  { %v8805_v36 = vpop.eup %8804 }
 0x5eb   :  { %v1466_v38 = vmul.f32 %v8805_v36, %v1402_v13  ;;  %v1640_v13 = vld [vmem:[%s11841_s2 + $0xe0] sm:$0xff] }
 0x5ed   :  { %v1478_v40 = vmul.f32 %v9502_v37, %v1466_v38 }
 0x5ef   :  { %v9511_v41 = vadd.f32 %v9507_v39, %v1478_v40 }
 0x5f1   :  { %11862 = vst [vmem:[#allocation6_spill] sm:$0xff] %v9511_v41  ;;  %8092 = vmatprep.mubr.msk.f32.mxu0 %vm30_vm0, %v9511_v41 }
 0x600   :  { %v1246_v42 = vpop.f32.mrf.mxu0 }
 0x602   :  { %v8078_v43 = vpop.f32.mrf.mxu0 }
 0x604   :  { %v1173_v44 = vpop.f32.mrf.mxu1 }
 0x605   :  { %v1247_v46 = vadd.f32 %v1246_v42, %v1173_v44 }
 0x606   :  { %v8073_v48 = vpop.f32.mrf.mxu1 }
 0x607   :  { %v1255_v49 = vmul.f32 %v7187_v45, %v1247_v46  ;;  %v1750_v48 = vld [vmem:[%s11841_s2 + $0x108] sm:$0xff] }
 0x609   :  { %v1261_v50 = vadd.f32 %v7188_v47, %v1255_v49  ;;  %v1749_v49 = vld [vmem:[%s11841_s2 + $0x100] sm:$0xff] }
 0x60b   :  { %v1263_v51 = vmin.f32 %v1261_v50, 0.0  ;;  %vm1262_vm12 = vcmp.gt.f32.partialorder %v1261_v50, 0.0 }
 0x60d   :  { %v1264_v52 = vmul.f32 1.442695, %v1263_v51 }
 0x60f   :  { %8806 = vpow2.f32 %v1264_v52 }
 0x61c   :  { %v8807_v54 = vpop.eup %8806 }
 0x61d   :  { %v7189_v55 = vadd.f32 -1.0, %v8807_v54 }
 0x61f   :  { %v1267_v56 = vsel %vm1262_vm12, %v1261_v50, %v7189_v55  ;;  %v1748_v50 = vld [vmem:[%s11841_s2 + $0xf8] sm:$0xff] }
 0x620   :  { %8082 = vmatmul.mubr.msk.f32.vlgmr.msra.gmra.mxu1 %vm282_vm2, %v1267_v56 }
 0x621   :  { %8112 = vmatprep.mubr.msk.f32.mxu1 %vm30_vm0, %v9511_v41  ;;  %8105 = vmatpush3.msra.mxu1 %v1642_v10 }
 0x622   :  { %8106 = vmatprep.subr.mxu1 %v1641_v11 }
 0x623   :  { %8107 = vmatpush3.msra.mxu1 %v1641_v11 }
 0x624   :  { %8108 = vmatprep.subr.mxu1 %v1640_v13 }
 0x625   :  { %8109 = vmatpush3.msra.mxu1 %v1640_v13 }
 0x626   :  { %8110 = vmatprep.subr.mxu1 %v1639_v15 }
 0x627   :  { %8111 = vmatpush3.msra.mxu1 %v1639_v15 }
 0x667   :  { %v1426_v17 = vpop.xlane.xlu1 %1425 }
 0x668   :  { %v1444_v20 = vmul.f32 0.03125, %v1426_v17 }
 0x66a   :  { %v1452_v25 = vadd.f32 1e-05, %v1444_v20 }
 0x66b   :  { %v1432_v51 = vpop.xlane.xlu1 %1431 }
 0x66c   :  { %8808 = vrsqrt.f32 %v1452_v25  ;;  %v1446_v52 = vmul.f32 0.03125, %v1432_v51 }
 0x66e   :  { %v1454_v55 = vadd.f32 1e-05, %v1446_v52  ;;  %v9790_v52 = vld [vmem:[%s11841_s2 + $0x280] sm:$0xff] }
 0x66f   :  { %v1438_v54 = vpop.xlane.xlu1 %1437 }
 0x670   :  { %v1448_v56 = vmul.f32 0.03125, %v1438_v54 }
 0x679   :  { %v8809_v38 = vpop.eup %8808 }
 0x67a   :  { %v1468_v40 = vmul.f32 %v8809_v38, %v9486_v27  ;;  %v1751_v27 = vld [vmem:[%s11841_s2 + $0x110] sm:$0xff] }
 0x67b   :  { %8124 = vmatprep.subr.mxu0 %v1751_v27 }
 0x67c   :  { %v1480_v44 = vmul.f32 %v9502_v37, %v1468_v40 }
 0x67e   :  { %v9576_v47 = vadd.f32 %v9507_v39, %v1480_v44 }
 0x680   :  { %11864 = vst [vmem:[#allocation8_spill] sm:$0xff] %v9576_v47 }
 0x6e0   :  { %v1337_v57 = vpop.f32.mrf.mxu1 }
 0x6e1   :  { %v1338_v58 = vadd.f32 %v9468_v63, %v1337_v57  ;;  %v1421_v63 = vsel %vm30_vm0, %v1411_v8, 0.0  ;;  %v1456_v57 = vadd.f32 1e-05, %v1448_v56 }
 0x6e2   :  { %v8083_v59 = vpop.f32.mrf.mxu1 }
 0x6e3   :  { %1353 = vst.msk [vmem:[#allocation2 + $0x18] sm:$0xf] %vm1352_vm13, %v1338_v58 }
 0x6e4   :  { %1358 = vst.msk [vmem:[#allocation2 + $0x34] sm:$0xf0] %vm1357_vm14, %v1338_v58 }
 0x6ea   :  { %v1362_v60 = vld [vmem:[#allocation2 + $0x18] sm:$0xff] }
 0x6eb   :  { %v1378_v62 = vsel %vm30_vm0, %v1362_v60, 0.0  ;;  %v1366_v4 = vld [vmem:[#allocation2 + $0x38] sm:$0xff] }
 0x6ec   :  { %1379 = vadd.xlane.f32.xlu0 %v1378_v62  ;;  %v1390_v6 = vsel %vm30_vm0, %v1366_v4, 0.0 }
 0x6f0   :  { %1385 = vadd.xlane.f32.xlu0 %v1384_v2 }
 0x6f4   :  { %1391 = vadd.xlane.f32.xlu0 %v1390_v6 }
 0x6f8   :  { %1422 = vadd.xlane.f32.xlu0 %v1421_v63 }
 0x775   :  { %v1380_v16 = vpop.xlane.xlu0 %1379 }
 0x776   :  { %v1397_v18 = vmul.f32 0.03125, %v1380_v16 }
 0x778   :  { %v9554_v19 = vsub.f32 %v1362_v60, %v1397_v18 }
 0x779   :  { %v1386_v21 = vpop.xlane.xlu0 %1385 }
 0x77a   :  { %v1399_v22 = vmul.f32 0.03125, %v1386_v21  ;;  %v1413_v23 = vmul.f32 %v9554_v19, %v9554_v19 }
 0x77c   :  { %v9558_v24 = vsub.f32 %v1364_v0, %v1399_v22  ;;  %v1427_v53 = vsel %vm30_vm0, %v1413_v23, 0.0 }
 0x77d   :  { %1428 = vadd.xlane.f32.xlu0 %v1427_v53  ;;  %v1392_v26 = vpop.xlane.xlu0 %1391 }
 0x77e   :  { %v1401_v28 = vmul.f32 0.03125, %v1392_v26  ;;  %v1415_v29 = vmul.f32 %v9558_v24, %v9558_v24 }
 0x780   :  { %v9563_v30 = vsub.f32 %v1366_v4, %v1401_v28  ;;  %v1433_v32 = vsel %vm30_vm0, %v1415_v29, 0.0 }
 0x781   :  { %1434 = vadd.xlane.f32.xlu0 %v1433_v32  ;;  %v1423_v33 = vpop.xlane.xlu0 %1422 }
 0x782   :  { %v1443_v7 = vmul.f32 0.03125, %v1423_v33  ;;  %v1417_v34 = vmul.f32 %v9563_v30, %v9563_v30 }
 0x784   :  { %v1451_v35 = vadd.f32 1e-05, %v1443_v7  ;;  %v1439_v36 = vsel %vm30_vm0, %v1417_v34, 0.0 }
 0x785   :  { %1440 = vadd.xlane.f32.xlu0 %v1439_v36 }
 0x786   :  { %8810 = vrsqrt.f32 %v1451_v35 }
 0x787   :  { %8812 = vrsqrt.f32 %v1454_v55  ;;  %v9795_v55 = vld [vmem:[%s11841_s2 + $0x278] sm:$0xff] }
 0x788   :  { %8814 = vrsqrt.f32 %v1456_v57 }
 0x793   :  { %v8811_v42 = vpop.eup %8810 }
 0x794   :  { %v1467_v43 = vmul.f32 %v8811_v42, %v1403_v1  ;;  %v8813_v6 = vpop.eup %8812 }
 0x795   :  { %v1470_v8 = vmul.f32 %v8813_v6, %v9484_v5  ;;  %v8815_v63 = vpop.eup %8814 }
 0x796   :  { %v1479_v45 = vmul.f32 %v9502_v37, %v1467_v43  ;;  %v1472_v11 = vmul.f32 %v8815_v63, %v9490_v31 }
 0x797   :  { %v1482_v3 = vmul.f32 %v9502_v37, %v1470_v8 }
 0x798   :  { %v9573_v46 = vadd.f32 %v9507_v39, %v1479_v45  ;;  %v1484_v5 = vmul.f32 %v9502_v37, %v1472_v11 }
 0x799   :  { %v9608_v16 = vadd.f32 %v9507_v39, %v1482_v3 }
 0x79a   :  { %11863 = vst [vmem:[#allocation7_spill] sm:$0xff] %v9573_v46  ;;  %8093 = vmatmul.mubr.msk.f32.vlgmr.msra.gmra.mxu0 %vm30_vm0, %v9573_v46  ;;  %8113 = vmatmul.mubr.msk.f32.vlgmr.msra.gmra.mxu1 %vm30_vm0, %v9573_v46  ;;  %v9625_v20 = vadd.f32 %v9507_v39, %v1484_v5 }
 0x79b   :  { %8095 = vmatprep.mubr.msk.f32.mxu0 %vm30_vm0, %v9576_v47  ;;  %8115 = vmatprep.mubr.msk.f32.mxu1 %vm30_vm0, %v9576_v47  ;;  %11866 = vst [vmem:[#allocation10_spill] sm:$0xff] %v9608_v16 }
 0x79c   :  { %8125 = vmatpush3.msra.mxu0 %v1751_v27  ;;  %11868 = vst [vmem:[#allocation12_spill] sm:$0xff] %v9625_v20 }
 0x79d   :  { %8126 = vmatprep.subr.mxu0 %v1750_v48 }
 0x79e   :  { %8127 = vmatpush3.msra.mxu0 %v1750_v48 }
 0x79f   :  { %8128 = vmatprep.subr.mxu0 %v1749_v49 }
 0x7a0   :  { %8129 = vmatpush3.msra.mxu0 %v1749_v49 }
 0x7a1   :  { %8130 = vmatprep.subr.mxu0 %v1748_v50 }
 0x7a2   :  { %8131 = vmatpush3.msra.mxu0 %v1748_v50 }
 0x806   :  { %v1429_v58 = vpop.xlane.xlu0 %1428 }
 0x807   :  { %v1445_v59 = vmul.f32 0.03125, %v1429_v58  ;;  %v9801_v58 = vld [vmem:[%s11841_s2 + $0x290] sm:$0xff] }
 0x809   :  { %v1453_v60 = vadd.f32 1e-05, %v1445_v59 }
 0x80a   :  { %v1435_v61 = vpop.xlane.xlu0 %1434 }
 0x80b   :  { %8816 = vrsqrt.f32 %v1453_v60  ;;  %v1447_v62 = vmul.f32 0.03125, %v1435_v61 }
 0x80d   :  { %v1455_v0 = vadd.f32 1e-05, %v1447_v62  ;;  %v9808_v62 = vld [vmem:[%s11841_s2 + $0x288] sm:$0xff] }
 0x80e   :  { %v1441_v1 = vpop.xlane.xlu0 %1440 }
 0x80f   :  { %8818 = vrsqrt.f32 %v1455_v0  ;;  %v1449_v2 = vmul.f32 0.03125, %v1441_v1 }
 0x811   :  { %v1457_v4 = vadd.f32 1e-05, %v1449_v2 }
 0x813   :  { %8820 = vrsqrt.f32 %v1457_v4  ;;  %v9815_v4 = vld [vmem:[%s11841_s2 + $0x2a0] sm:$0xff] }
 0x818   :  { %v8817_v9 = vpop.eup %8816 }
 0x819   :  { %v1469_v10 = vmul.f32 %v8817_v9, %v9554_v19  ;;  %v9822_v9 = vld [vmem:[%s11841_s2 + $0x298] sm:$0xff] }
 0x81b   :  { %v1481_v12 = vmul.f32 %v9502_v37, %v1469_v10 }
 0x81c   :  { %v8819_v13 = vpop.eup %8818 }
 0x81d   :  { %v9604_v14 = vadd.f32 %v9507_v39, %v1481_v12  ;;  %v1471_v15 = vmul.f32 %v8819_v13, %v9558_v24  ;;  %v9829_v12 = vld [vmem:[%s11841_s2 + $0x2b0] sm:$0xff] }
 0x81f   :  { %11865 = vst [vmem:[#allocation9_spill] sm:$0xff] %v9604_v14  ;;  %8096 = vmatmul.mubr.msk.f32.gmra.mxu0 %vm30_vm0, %v9604_v14  ;;  %8116 = vmatmul.mubr.msk.f32.gmra.mxu1 %vm30_vm0, %v9604_v14  ;;  %v1483_v31 = vmul.f32 %v9502_v37, %v1471_v15 }
 0x820   :  { %v8821_v17 = vpop.eup %8820  ;;  %8098 = vmatprep.mubr.msk.f32.mxu0 %vm30_vm0, %v9608_v16  ;;  %8118 = vmatprep.mubr.msk.f32.mxu1 %vm30_vm0, %v9608_v16 }
 0x821   :  { %v9621_v18 = vadd.f32 %v9507_v39, %v1483_v31  ;;  %v1473_v19 = vmul.f32 %v8821_v17, %v9563_v30  ;;  %v9836_v31 = vld [vmem:[%s11841_s2 + $0x2a8] sm:$0xff] }
 0x823   :  { %11867 = vst [vmem:[#allocation11_spill] sm:$0xff] %v9621_v18  ;;  %8099 = vmatmul.mubr.msk.f32.gmra.mxu0 %vm30_vm0, %v9621_v18  ;;  %8119 = vmatmul.mubr.msk.f32.gmra.mxu1 %vm30_vm0, %v9621_v18  ;;  %v1485_v21 = vmul.f32 %v9502_v37, %v1473_v19 }
 0x824   :  { %8101 = vmatprep.mubr.msk.f32.mxu0 %vm30_vm0, %v9625_v20  ;;  %8121 = vmatprep.mubr.msk.f32.mxu1 %vm30_vm0, %v9625_v20 }
 0x825   :  { %v9637_v22 = vadd.f32 %v9507_v39, %v1485_v21 }
 0x827   :  { %11869 = vst [vmem:[#allocation13_spill] sm:$0xff] %v9637_v22  ;;  %8102 = vmatmul.mubr.msk.f32.gmra.mxu0 %vm30_vm0, %v9637_v22  ;;  %8122 = vmatmul.mubr.msk.f32.gmra.mxu1 %vm30_vm0, %v9637_v22 }
 0x828   :  { %8132 = vmatprep.mubr.msk.f32.mxu0 %vm30_vm0, %v9511_v41 }
 0x82b   :  { %8133 = vmatmul.mubr.msk.f32.vlgmr.msra.gmra.mxu0 %vm30_vm0, %v9573_v46 }
 0x82c   :  { %8135 = vmatprep.mubr.msk.f32.mxu0 %vm30_vm0, %v9576_v47 }
 0x82f   :  { %8136 = vmatmul.mubr.msk.f32.gmra.mxu0 %vm30_vm0, %v9604_v14 }
 0x830   :  { %8138 = vmatprep.mubr.msk.f32.mxu0 %vm30_vm0, %v9608_v16 }
 0x833   :  { %8139 = vmatmul.mubr.msk.f32.gmra.mxu0 %vm30_vm0, %v9621_v18 }
 0x834   :  { %8141 = vmatprep.mubr.msk.f32.mxu0 %vm30_vm0, %v9625_v20 }
 0x837   :  { %8142 = vmatmul.mubr.msk.f32.gmra.mxu0 %vm30_vm0, %v9637_v22 }
 0x85a   :  { %v9659_v37 = vpop.f32.mrf.mxu0  ;;  %v9665_v23 = vpop.f32.mrf.mxu1 }
 0x85c   :  { %v9661_v39 = vpop.f32.mrf.mxu0  ;;  %v9667_v24 = vpop.f32.mrf.mxu1 }
 0x85d   :  { %8160 = vmatprep.mubr.msk.f32.mxu1 %vm282_vm2, %v9661_v39 }
 0x8df   :  { %v9669_v53 = vpop.f32.mrf.mxu0  ;;  %v9671_v25 = vpop.f32.mrf.mxu1 }
 0x8e1   :  { %v9673_v26 = vpop.f32.mrf.mxu0  ;;  %v9675_v28 = vpop.f32.mrf.mxu1 }
 0x8e3   :  { %v9677_v29 = vpop.f32.mrf.mxu0  ;;  %v9679_v30 = vpop.f32.mrf.mxu1 }
 0x8e4   :  { %2254 = vrot.lane.b32.xlu1 %v9679_v30, %s9217_s11 }
 0x8e5   :  { %v9683_v32 = vpop.f32.mrf.mxu0  ;;  %v9685_v33 = vpop.f32.mrf.mxu1 }
 0x8e7   :  { %v9687_v7 = vpop.f32.mrf.mxu0  ;;  %v9689_v34 = vpop.f32.mrf.mxu1 }
 0x8e8   :  { %2252 = vrot.lane.b32.xlu1 %v9685_v33, %s9217_s11  ;;  %8144 = vmatprep.subr.msk.mxu1 %vm282_vm2, %v9689_v34 }
 0x8e9   :  { %v9695_v35 = vpop.f32.mrf.mxu0  ;;  %v9697_v36 = vpop.f32.mrf.mxu1  ;;  %8145 = vmatpush3.xpose.msk.msra.mxu1 %vm282_vm2, %v9689_v34 }
 0x8ea   :  { %2256 = vrot.lane.b32.xlu0 %v9697_v36, %s9217_s11  ;;  %8146 = vmatprep.subr.msk.mxu1 %vm282_vm2, %v9697_v36 }
 0x8eb   :  { %v9705_v38 = vpop.f32.mrf.mxu0 }
 0x8ec   :  { %2258 = vrot.lane.b32.xlu1 %v9689_v34, %s9217_s11 }
 0x8ed   :  { %v9709_v40 = vpop.f32.mrf.mxu0  ;;  %8147 = vmatpush3.xpose.msk.msra.mxu1 %vm282_vm2, %v9697_v36 }
 0x8ee   :  { %8148 = vmatprep.subr.msk.mxu1 %vm282_vm2, %v9679_v30 }
 0x8ef   :  { %v9715_v42 = vpop.f32.mrf.mxu0 }
 0x8f1   :  { %v9717_v43 = vpop.f32.mrf.mxu0  ;;  %8149 = vmatpush3.xpose.msk.msra.mxu1 %vm282_vm2, %v9679_v30 }
 0x8f2   :  { %8150 = vmatprep.subr.msk.mxu1 %vm282_vm2, %v9685_v33 }
 0x8f3   :  { %v9723_v44 = vpop.f32.mrf.mxu0 }
 0x8f5   :  { %v9725_v45 = vpop.f32.mrf.mxu0  ;;  %8151 = vmatpush3.xpose.msk.msra.mxu1 %vm282_vm2, %v9685_v33 }
 0x8f6   :  { %8152 = vmatprep.subr.msk.mxu1 %vm282_vm2, %v9671_v25 }
 0x8f7   :  { %v9731_v27 = vpop.f32.mrf.mxu0 }
 0x8f8   :  { %8172 = vmatprep.subr.mxu0 %v9731_v27 }
 0x8f9   :  { %v9734_v48 = vpop.f32.mrf.mxu0  ;;  %8153 = vmatpush3.xpose.msk.msra.mxu1 %vm282_vm2, %v9671_v25  ;;  %8173 = vmatpush3.msra.mxu0 %v9731_v27 }
 0x8fa   :  { %8154 = vmatprep.subr.msk.mxu1 %vm282_vm2, %v9675_v28  ;;  %8174 = vmatprep.subr.mxu0 %v9734_v48 }
 0x8fb   :  { %8175 = vmatpush3.msra.mxu0 %v9734_v48 }
 0x8fc   :  { %8176 = vmatprep.subr.mxu0 %v9723_v44 }
 0x8fd   :  { %8155 = vmatpush3.xpose.msk.msra.mxu1 %vm282_vm2, %v9675_v28  ;;  %8177 = vmatpush3.msra.mxu0 %v9723_v44 }
 0x8fe   :  { %8156 = vmatprep.subr.msk.mxu1 %vm282_vm2, %v9665_v23  ;;  %8178 = vmatprep.subr.mxu0 %v9725_v45 }
 0x8ff   :  { %8179 = vmatpush3.msra.mxu0 %v9725_v45 }
 0x900   :  { %8180 = vmatprep.subr.mxu0 %v9715_v42 }
 0x901   :  { %8157 = vmatpush3.xpose.msk.msra.mxu1 %vm282_vm2, %v9665_v23  ;;  %8181 = vmatpush3.msra.mxu0 %v9715_v42 }
 0x902   :  { %8158 = vmatprep.subr.msk.mxu1 %vm282_vm2, %v9667_v24  ;;  %8182 = vmatprep.subr.mxu0 %v9717_v43 }
 0x903   :  { %8183 = vmatpush3.msra.mxu0 %v9717_v43 }
 0x904   :  { %8184 = vmatprep.subr.mxu0 %v9705_v38 }
 0x905   :  { %8159 = vmatpush3.xpose.msk.msra.mxu1 %vm282_vm2, %v9667_v24  ;;  %8185 = vmatpush3.msra.mxu0 %v9705_v38 }
 0x906   :  { %8186 = vmatprep.subr.mxu0 %v9709_v40 }
 0x907   :  { %8187 = vmatpush3.msra.mxu0 %v9709_v40 }
 0x908   :  { %8161 = vmatmul.mubr.msk.f32.vlgmr.msra.gmra.mxu1 %vm282_vm2, %v9659_v37 }
 0x909   :  { %8163 = vmatprep.mubr.msk.f32.mxu1 %vm282_vm2, %v9673_v26 }
 0x90c   :  { %8164 = vmatmul.mubr.msk.f32.gmra.mxu1 %vm282_vm2, %v9669_v53 }
 0x90d   :  { %8166 = vmatprep.mubr.msk.f32.mxu1 %vm282_vm2, %v9683_v32 }
 0x910   :  { %8167 = vmatmul.mubr.msk.f32.gmra.mxu1 %vm282_vm2, %v9677_v29 }
 0x911   :  { %8169 = vmatprep.mubr.msk.f32.mxu1 %vm282_vm2, %v9695_v35 }
 0x914   :  { %8170 = vmatmul.mubr.msk.f32.gmra.mxu1 %vm282_vm2, %v9687_v7 }
 0x956   :  { %v9779_v49 = vpop.permute.xlu1 %2254 }
 0x95a   :  { %v9781_v50 = vpop.permute.xlu1 %2252 }
 0x95e   :  { %v9783_v51 = vpop.permute.xlu1 %2258 }
 0x95f   :  { %8200 = vmatprep.subr.msk.mxu0 %vm282_vm2, %v9783_v51 }
 0x9c8   :  { %v8162_v54 = vpop.f32.mrf.mxu1 }
 0x9c9   :  { %v1977_v56 = vadd.f32 %v8162_v54, %v9790_v52 }
 0x9ca   :  { %v1971_v57 = vpop.f32.mrf.mxu1 }
 0x9cb   :  { %v1972_v59 = vadd.f32 %v1971_v57, %v9795_v55  ;;  %v2014_v60 = vsel %vm2010_vm15, %v1977_v56, -inf }
 0x9cc   :  { %2015 = vmax.xlane.f32.xlu0 %v2014_v60  ;;  %v8165_v61 = vpop.f32.mrf.mxu1 }
 0x9cd   :  { %v1987_v0 = vadd.f32 %v8165_v61, %v9801_v58  ;;  %v2011_v1 = vsel %vm2010_vm15, %v1972_v59, -inf  ;;  %v9847_v61 = vpop.permute.xlu0 %2256 }
 0x9ce   :  { %v1981_v2 = vpop.f32.mrf.mxu1  ;;  %2012 = vmax.xlane.f32.xlu1 %v2011_v1 }
 0x9cf   :  { %v1982_v6 = vadd.f32 %v1981_v2, %v9808_v62  ;;  %v2020_v8 = vsel %vm2010_vm15, %v1987_v0, -inf }
 0x9d0   :  { %2021 = vmax.xlane.f32.xlu0 %v2020_v8  ;;  %v8168_v63 = vpop.f32.mrf.mxu1 }
 0x9d1   :  { %v1997_v10 = vadd.f32 %v8168_v63, %v9815_v4  ;;  %v2017_v3 = vsel %vm2010_vm15, %v1982_v6, -inf }
 0x9d2   :  { %v1991_v11 = vpop.f32.mrf.mxu1  ;;  %2018 = vmax.xlane.f32.xlu1 %v2017_v3 }
 0x9d3   :  { %v1992_v13 = vadd.f32 %v1991_v11, %v9822_v9  ;;  %v2026_v15 = vsel %vm2010_vm15, %v1997_v10, -inf }
 0x9d4   :  { %2027 = vmax.xlane.f32.xlu0 %v2026_v15  ;;  %v8171_v5 = vpop.f32.mrf.mxu1 }
 0x9d5   :  { %v2007_v17 = vadd.f32 %v8171_v5, %v9829_v12  ;;  %v2023_v19 = vsel %vm2010_vm15, %v1992_v13, -inf }
 0x9d6   :  { %2024 = vmax.xlane.f32.xlu1 %v2023_v19  ;;  %v2001_v21 = vpop.f32.mrf.mxu1 }
 0x9d7   :  { %v2002_v54 = vadd.f32 %v2001_v21, %v9836_v31  ;;  %v2032_v57 = vsel %vm2010_vm15, %v2007_v17, -inf }
 0x9d8   :  { %2033 = vmax.xlane.f32.xlu0 %v2032_v57 }
 0x9d9   :  { %v2029_v60 = vsel %vm2010_vm15, %v2002_v54, -inf }
 0x9da   :  { %2030 = vmax.xlane.f32.xlu1 %v2029_v60 }
 0x9eb   :  { %2248 = vrot.lane.b32.xlu1 %v9675_v28, %s9217_s11 }
 0x9ee   :  { %2250 = vrot.lane.b32.xlu0 %v9671_v25, %s9217_s11 }
 0xa55   :  { %v2016_v1 = vpop.xlane.xlu0 %2015 }
 0xa56   :  { %v2036_v2 = vsub.f32 %v1977_v56, %v2016_v1 }
 0xa57   :  { %v2013_v8 = vpop.xlane.xlu1 %2012 }
 0xa58   :  { %v2045_v63 = vmul.f32 1.442695, %v2036_v2  ;;  %v2035_v3 = vsub.f32 %v1972_v59, %v2013_v8 }
 0xa59   :  { %v2022_v56 = vpop.xlane.xlu0 %2021 }
 0xa5a   :  { %8822 = vpow2.f32 %v2045_v63  ;;  %v2043_v11 = vmul.f32 1.442695, %v2035_v3  ;;  %v2038_v60 = vsub.f32 %v1987_v0, %v2022_v56 }
 0xa5b   :  { %v2019_v59 = vpop.xlane.xlu1 %2018 }
 0xa5c   :  { %8824 = vpow2.f32 %v2043_v11  ;;  %v2037_v2 = vsub.f32 %v1982_v6, %v2019_v59  ;;  %v2049_v8 = vmul.f32 1.442695, %v2038_v60 }
 0xa5d   :  { %v2028_v57 = vpop.xlane.xlu0 %2027 }
 0xa5e   :  { %v2040_v63 = vsub.f32 %v1997_v10, %v2028_v57  ;;  %v2047_v11 = vmul.f32 1.442695, %v2037_v2  ;;  %8826 = vpow2.f32 %v2049_v8 }
 0xa5f   :  { %v2025_v1 = vpop.xlane.xlu1 %2024 }
 0xa60   :  { %8828 = vpow2.f32 %v2047_v11 }
 0xa61   :  { %v2034_v3 = vpop.xlane.xlu0 %2033 }
 0xa62   :  { %v2042_v20 = vsub.f32 %v2007_v17, %v2034_v3 }
 0xa63   :  { %v2031_v22 = vpop.xlane.xlu1 %2030 }
 0xa64   :  { %v2041_v16 = vsub.f32 %v2002_v54, %v2031_v22  ;;  %v2057_v14 = vmul.f32 1.442695, %v2042_v20 }
 0xa65   :  { %v2251_v56 = vpop.permute.xlu0 %2250 }
 0xa66   :  { %v2055_v47 = vmul.f32 1.442695, %v2041_v16 }
 0xa67   :  { %v9849_v15 = vpop.eup %8822  ;;  %v2249_v59 = vpop.permute.xlu1 %2248 }
 0xa68   :  { %v2062_v5 = vsel %vm2010_vm15, %v9849_v15, 0.0 }
 0xa69   :  { %v9853_v19 = vpop.eup %8824  ;;  %2063 = vadd.xlane.f32.xlu0 %v2062_v5  ;;  %v2039_v5 = vsub.f32 %v1992_v13, %v2025_v1 }
 0xa6a   :  { %v2059_v21 = vsel %vm2010_vm15, %v9853_v19, 0.0 }
 0xa6b   :  { %2060 = vadd.xlane.f32.xlu1 %v2059_v21  ;;  %v2053_v21 = vmul.f32 1.442695, %v2040_v63  ;;  %v2051_v18 = vmul.f32 1.442695, %v2039_v5  ;;  %v9861_v0 = vpop.eup %8826 }
 0xa6c   :  { %v2068_v10 = vsel %vm2010_vm15, %v9861_v0, 0.0 }
 0xa6d   :  { %8830 = vpow2.f32 %v2053_v21  ;;  %v9863_v6 = vpop.eup %8828 }
 0xa6e   :  { %8832 = vpow2.f32 %v2051_v18  ;;  %v2065_v17 = vsel %vm2010_vm15, %v9863_v6, 0.0 }
 0xa6f   :  { %8834 = vpow2.f32 %v2057_v14 }
 0xa70   :  { %8836 = vpow2.f32 %v2055_v47 }
 0xa7a   :  { %v9867_v13 = vpop.eup %8830 }
 0xa7b   :  { %v9871_v22 = vpop.eup %8832  ;;  %v2074_v14 = vsel %vm2010_vm15, %v9867_v13, 0.0 }
 0xa7c   :  { %2244 = vrot.lane.b32.xlu1 %v9667_v24, %s9217_s11  ;;  %v9875_v47 = vpop.eup %8834  ;;  %v2071_v16 = vsel %vm2010_vm15, %v9871_v22, 0.0 }
 0xa7d   :  { %v9879_v18 = vpop.eup %8836  ;;  %v2080_v20 = vsel %vm2010_vm15, %v9875_v47, 0.0 }
 0xa7e   :  { %v2077_v54 = vsel %vm2010_vm15, %v9879_v18, 0.0 }
 0xa7f   :  { %2246 = vrot.lane.b32.xlu0 %v9665_v23, %s9217_s11 }
 0xa9e   :  { %2069 = vadd.xlane.f32.xlu0 %v2068_v10 }
 0xaa0   :  { %2066 = vadd.xlane.f32.xlu1 %v2065_v17 }
 0xaa2   :  { %2075 = vadd.xlane.f32.xlu0 %v2074_v14 }
 0xaa4   :  { %2072 = vadd.xlane.f32.xlu1 %v2071_v16 }
 0xaa6   :  { %2081 = vadd.xlane.f32.xlu0 %v2080_v20 }
 0xaa8   :  { %2078 = vadd.xlane.f32.xlu1 %v2077_v54 }
 0xab9   :  { %2230 = vrot.lane.b32.xlu1 %v9659_v37, %s9217_s11 }
 0xabc   :  { %2228 = vrot.lane.b32.xlu0 %v9661_v39, %s9217_s11 }
 0xabd   :  { %2234 = vrot.lane.b32.xlu1 %v9669_v53, %s9217_s11 }
 0xac0   :  { %2232 = vrot.lane.b32.xlu0 %v9673_v26, %s9217_s11 }
 0xac1   :  { %2238 = vrot.lane.b32.xlu1 %v9677_v29, %s9217_s11 }
 0xac4   :  { %2236 = vrot.lane.b32.xlu0 %v9683_v32, %s9217_s11 }
 0xac5   :  { %2242 = vrot.lane.b32.xlu1 %v9687_v7, %s9217_s11 }
 0xac8   :  { %2240 = vrot.lane.b32.xlu0 %v9695_v35, %s9217_s11 }
 0xac9   :  { %2507 = vrot.lane.b32.xlu1 %v9731_v27, %s9217_s11 }
 0xacc   :  { %2505 = vrot.lane.b32.xlu0 %v9734_v48, %s9217_s11 }
 0xacd   :  { %2503 = vrot.lane.b32.xlu1 %v9723_v44, %s9217_s11 }
 0xad0   :  { %2499 = vrot.lane.b32.xlu0 %v9715_v42, %s9217_s11 }
 0xad1   :  { %2501 = vrot.lane.b32.xlu1 %v9725_v45, %s9217_s11 }
 0xad4   :  { %2495 = vrot.lane.b32.xlu0 %v9705_v38, %s9217_s11 }
 0xad5   :  { %2497 = vrot.lane.b32.xlu1 %v9717_v43, %s9217_s11 }
 0xad8   :  { %2676 = vrot.lane.b32.xlu0 %v9689_v34, %s9218_s1 }
 0xad9   :  { %2493 = vrot.lane.b32.xlu1 %v9709_v40, %s9217_s11 }
 0xadd   :  { %2674 = vrot.lane.b32.xlu1 %v9697_v36, %s9218_s1 }
 0xaf2   :  { %v2064_v57 = vpop.xlane.xlu0 %2063 }
 0xaf3   :  { %8838 = vrcp.f32 %v2064_v57 }
 0xaf4   :  { %v2061_v60 = vpop.xlane.xlu1 %2060 }
 0xaf5   :  { %8840 = vrcp.f32 %v2061_v60 }
 0xb00   :  { %v8839_v1 = vpop.eup %8838 }
 0xb01   :  { %v2086_v63 = vmul.f32 %v8839_v1, %v9849_v15 }
 0xb02   :  { %v8841_v2 = vpop.eup %8840 }
 0xb03   :  { %v2084_v8 = vmul.f32 %v8841_v2, %v9853_v19 }
 0xb05   :  { %8188 = vmatprep.mubr.msk.f32.mxu0 %vm2010_vm15, %v2084_v8 }
 0xb06   :  { %8189 = vmatmul.mubr.msk.f32.vlgmr.msra.gmra.mxu0 %vm2010_vm15, %v2086_v63 }
 0xb07   :  { %8201 = vmatpush3.xpose.msk.msra.mxu0 %vm282_vm2, %v9783_v51  ;;  %v2247_v51 = vpop.permute.xlu0 %2246 }
 0xb08   :  { %8202 = vmatprep.subr.msk.mxu0 %vm282_vm2, %v9847_v61 }
 0xb0b   :  { %8203 = vmatpush3.xpose.msk.msra.mxu0 %vm282_vm2, %v9847_v61  ;;  %v2245_v61 = vpop.permute.xlu1 %2244 }
 0xb0c   :  { %8204 = vmatprep.subr.msk.mxu0 %vm282_vm2, %v9779_v49 }
 0xb0f   :  { %8205 = vmatpush3.xpose.msk.msra.mxu0 %vm282_vm2, %v9779_v49 }
 0xb10   :  { %8206 = vmatprep.subr.msk.mxu0 %vm282_vm2, %v9781_v50 }
 0xb13   :  { %8207 = vmatpush3.xpose.msk.msra.mxu0 %vm282_vm2, %v9781_v50 }
 0xb14   :  { %8208 = vmatprep.subr.msk.mxu0 %vm282_vm2, %v2251_v56 }
 0xb17   :  { %8209 = vmatpush3.xpose.msk.msra.mxu0 %vm282_vm2, %v2251_v56 }
 0xb18   :  { %8210 = vmatprep.subr.msk.mxu0 %vm282_vm2, %v2249_v59 }
 0xb1b   :  { %8211 = vmatpush3.xpose.msk.msra.mxu0 %vm282_vm2, %v2249_v59 }
 0xb1c   :  { %8212 = vmatprep.subr.msk.mxu0 %vm282_vm2, %v2247_v51 }
 0xb1f   :  { %8213 = vmatpush3.xpose.msk.msra.mxu0 %vm282_vm2, %v2247_v51 }
 0xb20   :  { %8214 = vmatprep.subr.msk.mxu0 %vm282_vm2, %v2245_v61 }
 0xb23   :  { %8215 = vmatpush3.xpose.msk.msra.mxu0 %vm282_vm2, %v2245_v61 }
 0xb27   :  { %v2070_v49 = vpop.xlane.xlu0 %2069 }
 0xb28   :  { %8842 = vrcp.f32 %v2070_v49 }
 0xb29   :  { %v2067_v50 = vpop.xlane.xlu1 %2066 }
 0xb2a   :  { %8844 = vrcp.f32 %v2067_v50 }
 0xb2b   :  { %v2076_v15 = vpop.xlane.xlu0 %2075 }
 0xb2c   :  { %8846 = vrcp.f32 %v2076_v15 }
 0xb2d   :  { %v2073_v19 = vpop.xlane.xlu1 %2072 }
 0xb2e   :  { %8848 = vrcp.f32 %v2073_v19 }
 0xb2f   :  { %v2082_v3 = vpop.xlane.xlu0 %2081 }
 0xb30   :  { %8850 = vrcp.f32 %v2082_v3 }
 0xb31   :  { %v2079_v11 = vpop.xlane.xlu1 %2078 }
 0xb32   :  { %8852 = vrcp.f32 %v2079_v11 }
 0xb33   :  { %v2229_v5 = vpop.permute.xlu0 %2228 }
 0xb35   :  { %v2231_v21 = vpop.permute.xlu1 %2230  ;;  %v8843_v10 = vpop.eup %8842 }
 0xb36   :  { %v2090_v54 = vmul.f32 %v8843_v10, %v9861_v0 }
 0xb37   :  { %v8845_v17 = vpop.eup %8844  ;;  %v2233_v14 = vpop.permute.xlu0 %2232 }
 0xb38   :  { %v2088_v16 = vmul.f32 %v8845_v17, %v9863_v6 }
 0xb39   :  { %v2235_v20 = vpop.permute.xlu1 %2234  ;;  %v8847_v56 = vpop.eup %8846 }
 0xb3a   :  { %8191 = vmatprep.mubr.msk.f32.mxu0 %vm2010_vm15, %v2088_v16  ;;  %v2094_v2 = vmul.f32 %v8847_v56, %v9867_v13 }
 0xb3b   :  { %v8849_v59 = vpop.eup %8848  ;;  %v2237_v57 = vpop.permute.xlu0 %2236  ;;  %8192 = vmatmul.mubr.msk.f32.gmra.mxu0 %vm2010_vm15, %v2090_v54 }
 0xb3c   :  { %v2092_v60 = vmul.f32 %v8849_v59, %v9871_v22 }
 0xb3d   :  { %v2239_v1 = vpop.permute.xlu1 %2238  ;;  %v8851_v8 = vpop.eup %8850 }
 0xb3e   :  { %8194 = vmatprep.mubr.msk.f32.mxu0 %vm2010_vm15, %v2092_v60  ;;  %v2098_v61 = vmul.f32 %v8851_v8, %v9875_v47 }
 0xb3f   :  { %v8853_v63 = vpop.eup %8852  ;;  %v2241_v6 = vpop.permute.xlu0 %2240  ;;  %8195 = vmatmul.mubr.msk.f32.gmra.mxu0 %vm2010_vm15, %v2094_v2 }
 0xb40   :  { %v2096_v0 = vmul.f32 %v8853_v63, %v9879_v18 }
 0xb41   :  { %v2243_v51 = vpop.permute.xlu1 %2242 }
 0xb42   :  { %8197 = vmatprep.mubr.msk.f32.mxu0 %vm2010_vm15, %v2096_v0 }
 0xb43   :  { %8198 = vmatmul.mubr.msk.f32.gmra.mxu0 %vm2010_vm15, %v2098_v61  ;;  %v2506_v22 = vpop.permute.xlu0 %2505 }
 0xb44   :  { %8216 = vmatprep.mubr.msk.f32.mxu0 %vm282_vm2, %v2229_v5 }
 0xb45   :  { %v2508_v13 = vpop.permute.xlu1 %2507 }
 0xb46   :  { %8228 = vmatprep.subr.mxu1 %v2508_v13 }
 0xb47   :  { %8229 = vmatpush3.msra.mxu1 %v2508_v13  ;;  %8217 = vmatmul.mubr.msk.f32.vlgmr.msra.gmra.mxu0 %vm282_vm2, %v2231_v21  ;;  %v2500_v18 = vpop.permute.xlu0 %2499 }
 0xb48   :  { %8219 = vmatprep.mubr.msk.f32.mxu0 %vm282_vm2, %v2233_v14  ;;  %8230 = vmatprep.subr.mxu1 %v2506_v22 }
 0xb49   :  { %v2504_v49 = vpop.permute.xlu1 %2503  ;;  %8231 = vmatpush3.msra.mxu1 %v2506_v22 }
 0xb4a   :  { %8232 = vmatprep.subr.mxu1 %v2504_v49 }
 0xb4b   :  { %8233 = vmatpush3.msra.mxu1 %v2504_v49  ;;  %8220 = vmatmul.mubr.msk.f32.gmra.mxu0 %vm282_vm2, %v2235_v20  ;;  %v2496_v50 = vpop.permute.xlu0 %2495 }
 0xb4c   :  { %8222 = vmatprep.mubr.msk.f32.mxu0 %vm282_vm2, %v2237_v57 }
 0xb4d   :  { %v2502_v47 = vpop.permute.xlu1 %2501 }
 0xb4e   :  { %8234 = vmatprep.subr.mxu1 %v2502_v47 }
 0xb4f   :  { %8235 = vmatpush3.msra.mxu1 %v2502_v47  ;;  %8223 = vmatmul.mubr.msk.f32.gmra.mxu0 %vm282_vm2, %v2239_v1  ;;  %v9967_v3 = vpop.permute.xlu0 %2676 }
 0xb50   :  { %8225 = vmatprep.mubr.msk.f32.mxu0 %vm282_vm2, %v2241_v6  ;;  %8236 = vmatprep.subr.mxu1 %v2500_v18 }
 0xb51   :  { %v2498_v15 = vpop.permute.xlu1 %2497  ;;  %8237 = vmatpush3.msra.mxu1 %v2500_v18 }
 0xb52   :  { %8238 = vmatprep.subr.mxu1 %v2498_v15 }
 0xb53   :  { %8226 = vmatmul.mubr.msk.f32.gmra.mxu0 %vm282_vm2, %v2243_v51  ;;  %8239 = vmatpush3.msra.mxu1 %v2498_v15 }
 0xb54   :  { %8240 = vmatprep.subr.mxu1 %v2496_v50 }
 0xb55   :  { %v2494_v19 = vpop.permute.xlu1 %2493  ;;  %8241 = vmatpush3.msra.mxu1 %v2496_v50 }
 0xb56   :  { %8242 = vmatprep.subr.mxu1 %v2494_v19 }
 0xb57   :  { %8243 = vmatpush3.msra.mxu1 %v2494_v19 }
 0xb58   :  { %8256 = vmatprep.subr.msk.mxu1 %vm282_vm2, %v9967_v3 }
 0xbc6   :  { %v9971_v11 = vpop.f32.mrf.mxu0 }
 0xbc8   :  { %v9973_v5 = vpop.f32.mrf.mxu0 }
 0xbfb   :  { %v9975_v21 = vpop.f32.mrf.mxu0 }
 0xbfd   :  { %v9977_v10 = vpop.f32.mrf.mxu0 }
 0xbff   :  { %v9979_v17 = vpop.f32.mrf.mxu0 }
 0xc00   :  { %11870 = vst [vmem:[#allocation14_spill] sm:$0xff] %v9979_v17 }
 0xc01   :  { %v9981_v14 = vpop.f32.mrf.mxu0 }
 0xc02   :  { %11871 = vst [vmem:[#allocation15_spill] sm:$0xff] %v9981_v14 }
 0xc03   :  { %v9983_v16 = vpop.f32.mrf.mxu0 }
 0xc04   :  { %11872 = vst [vmem:[#allocation16_spill] sm:$0xff] %v9983_v16 }
 0xc05   :  { %v9985_v20 = vpop.f32.mrf.mxu0 }
 0xc06   :  { %11873 = vst [vmem:[#allocation17_spill] sm:$0xff] %v9985_v20 }
 0xc07   :  { %v8218_v54 = vpop.f32.mrf.mxu0 }
 0xc08   :  { %v2364_v56 = vadd.f32 %v8218_v54, %v9790_v52 }
 0xc09   :  { %v2358_v59 = vpop.f32.mrf.mxu0 }
 0xc0a   :  { %v2359_v57 = vadd.f32 %v2358_v59, %v9795_v55  ;;  %v2400_v60 = vsel %vm2010_vm15, %v2364_v56, -inf }
 0xc0b   :  { %2401 = vmax.xlane.f32.xlu1 %v2400_v60  ;;  %v8221_v1 = vpop.f32.mrf.mxu0 }
 0xc0c   :  { %v2374_v2 = vadd.f32 %v8221_v1, %v9801_v58  ;;  %v2397_v8 = vsel %vm2010_vm15, %v2359_v57, -inf  ;;  %v10007_v1 = vpop.permute.xlu1 %2674 }
 0xc0d   :  { %v2368_v63 = vpop.f32.mrf.mxu0  ;;  %2398 = vmax.xlane.f32.xlu0 %v2397_v8 }
 0xc0e   :  { %v2369_v0 = vadd.f32 %v2368_v63, %v9808_v62  ;;  %v2406_v51 = vsel %vm2010_vm15, %v2374_v2, -inf }
 0xc0f   :  { %v8224_v6 = vpop.f32.mrf.mxu0 }
 0xc10   :  { %v2384_v49 = vadd.f32 %v8224_v6, %v9815_v4  ;;  %v2403_v47 = vsel %vm2010_vm15, %v2369_v0, -inf }
 0xc11   :  { %v2378_v61 = vpop.f32.mrf.mxu0  ;;  %2407 = vmax.xlane.f32.xlu0 %v2406_v51 }
 0xc12   :  { %v2379_v22 = vadd.f32 %v2378_v61, %v9822_v9  ;;  %v2412_v59 = vsel %vm2010_vm15, %v2384_v49, -inf }
 0xc13   :  { %v8227_v13 = vpop.f32.mrf.mxu0 }
 0xc14   :  { %v2409_v18 = vsel %vm2010_vm15, %v2379_v22, -inf  ;;  %v2394_v19 = vadd.f32 %v8227_v13, %v9829_v12 }
 0xc15   :  { %v2388_v50 = vpop.f32.mrf.mxu0  ;;  %2410 = vmax.xlane.f32.xlu1 %v2409_v18  ;;  %2404 = vmax.xlane.f32.xlu0 %v2403_v47 }
 0xc16   :  { %v2389_v15 = vadd.f32 %v2388_v50, %v9836_v31  ;;  %v2418_v60 = vsel %vm2010_vm15, %v2394_v19, -inf }
 0xc18   :  { %v2415_v54 = vsel %vm2010_vm15, %v2389_v15, -inf }
 0xc19   :  { %2416 = vmax.xlane.f32.xlu1 %v2415_v54  ;;  %2413 = vmax.xlane.f32.xlu0 %v2412_v59 }
 0xc1d   :  { %2419 = vmax.xlane.f32.xlu0 %v2418_v60 }
 0xc2a   :  { %2670 = vrot.lane.b32.xlu1 %v9685_v33, %s9218_s1 }
 0xc33   :  { %2672 = vrot.lane.b32.xlu0 %v9679_v30, %s9218_s1 }
 0xc94   :  { %v2402_v8 = vpop.xlane.xlu1 %2401 }
 0xc95   :  { %v2422_v63 = vsub.f32 %v2364_v56, %v2402_v8 }
 0xc96   :  { %v2399_v6 = vpop.xlane.xlu0 %2398 }
 0xc97   :  { %v2431_v51 = vmul.f32 1.442695, %v2422_v63  ;;  %v2421_v61 = vsub.f32 %v2359_v57, %v2399_v6 }
 0xc99   :  { %8854 = vpow2.f32 %v2431_v51  ;;  %v2429_v13 = vmul.f32 1.442695, %v2421_v61 }
 0xc9a   :  { %v2408_v59 = vpop.xlane.xlu0 %2407 }
 0xc9b   :  { %8856 = vpow2.f32 %v2429_v13  ;;  %v2424_v63 = vsub.f32 %v2374_v2, %v2408_v59 }
 0xc9d   :  { %v2435_v13 = vmul.f32 1.442695, %v2424_v63 }
 0xc9e   :  { %v2405_v56 = vpop.xlane.xlu0 %2404  ;;  %v2411_v57 = vpop.xlane.xlu1 %2410 }
 0xc9f   :  { %v2423_v60 = vsub.f32 %v2369_v0, %v2405_v56  ;;  %v2425_v6 = vsub.f32 %v2379_v22, %v2411_v57 }
 0xca1   :  { %v2433_v51 = vmul.f32 1.442695, %v2423_v60  ;;  %v2437_v46 = vmul.f32 1.442695, %v2425_v6 }
 0xca2   :  { %v2414_v8 = vpop.xlane.xlu0 %2413  ;;  %v2417_v61 = vpop.xlane.xlu1 %2416 }
 0xca3   :  { %8858 = vpow2.f32 %v2433_v51 }
 0xca4   :  { %8860 = vpow2.f32 %v2435_v13 }
 0xca5   :  { %8862 = vpow2.f32 %v2437_v46 }
 0xca6   :  { %v10009_v18 = vpop.eup %8854  ;;  %v2420_v41 = vpop.xlane.xlu0 %2419 }
 0xca7   :  { %v2448_v47 = vsel %vm2010_vm15, %v10009_v18, 0.0  ;;  %v2428_v20 = vsub.f32 %v2394_v19, %v2420_v41  ;;  %v2671_v56 = vpop.permute.xlu1 %2670 }
 0xca8   :  { %v10013_v50 = vpop.eup %8856  ;;  %2449 = vadd.xlane.f32.xlu0 %v2448_v47  ;;  %v2426_v47 = vsub.f32 %v2384_v49, %v2414_v8 }
 0xca9   :  { %v2445_v54 = vsel %vm2010_vm15, %v10013_v50, 0.0  ;;  %v2443_v14 = vmul.f32 1.442695, %v2428_v20 }
 0xcaa   :  { %2446 = vadd.xlane.f32.xlu1 %v2445_v54  ;;  %v2427_v54 = vsub.f32 %v2389_v15, %v2417_v61  ;;  %v2439_v16 = vmul.f32 1.442695, %v2426_v47  ;;  %v2673_v59 = vpop.permute.xlu0 %2672 }
 0xcac   :  { %v2441_v17 = vmul.f32 1.442695, %v2427_v54  ;;  %8864 = vpow2.f32 %v2439_v16 }
 0xcae   :  { %8866 = vpow2.f32 %v2441_v17 }
 0xcaf   :  { %8868 = vpow2.f32 %v2443_v14 }
 0xcb0   :  { %v10021_v0 = vpop.eup %8858 }
 0xcb1   :  { %v10023_v2 = vpop.eup %8860  ;;  %v2451_v22 = vsel %vm2010_vm15, %v10021_v0, 0.0 }
 0xcb2   :  { %v10027_v49 = vpop.eup %8862  ;;  %v2454_v15 = vsel %vm2010_vm15, %v10023_v2, 0.0 }
 0xcb3   :  { %v2457_v46 = vsel %vm2010_vm15, %v10027_v49, 0.0 }
 0xcb9   :  { %v10031_v41 = vpop.eup %8864 }
 0xcba   :  { %v2460_v14 = vsel %vm2010_vm15, %v10031_v41, 0.0 }
 0xcbb   :  { %2666 = vrot.lane.b32.xlu1 %v9675_v28, %s9218_s1  ;;  %v10035_v17 = vpop.eup %8866 }
 0xcbc   :  { %v10039_v16 = vpop.eup %8868  ;;  %v2463_v20 = vsel %vm2010_vm15, %v10035_v17, 0.0 }
 0xcbd   :  { %v2466_v19 = vsel %vm2010_vm15, %v10039_v16, 0.0 }
 0xcbe   :  { %2668 = vrot.lane.b32.xlu0 %v9671_v25, %s9218_s1 }
 0xcdd   :  { %2452 = vadd.xlane.f32.xlu0 %v2451_v22 }
 0xcdf   :  { %2455 = vadd.xlane.f32.xlu1 %v2454_v15 }
 0xce1   :  { %2458 = vadd.xlane.f32.xlu0 %v2457_v46 }
 0xce3   :  { %2461 = vadd.xlane.f32.xlu1 %v2460_v14 }
 0xce5   :  { %2464 = vadd.xlane.f32.xlu0 %v2463_v20 }
 0xce7   :  { %2467 = vadd.xlane.f32.xlu1 %v2466_v19 }
 0xcf8   :  { %2662 = vrot.lane.b32.xlu1 %v9667_v24, %s9218_s1 }
 0xcfb   :  { %2664 = vrot.lane.b32.xlu0 %v9665_v23, %s9218_s1 }
 0xcfc   :  { %2648 = vrot.lane.b32.xlu1 %v9659_v37, %s9218_s1 }
 0xcff   :  { %2646 = vrot.lane.b32.xlu0 %v9661_v39, %s9218_s1 }
 0xd00   :  { %2652 = vrot.lane.b32.xlu1 %v9669_v53, %s9218_s1 }
 0xd03   :  { %2650 = vrot.lane.b32.xlu0 %v9673_v26, %s9218_s1 }
 0xd04   :  { %2656 = vrot.lane.b32.xlu1 %v9677_v29, %s9218_s1 }
 0xd07   :  { %2654 = vrot.lane.b32.xlu0 %v9683_v32, %s9218_s1 }
 0xd08   :  { %2660 = vrot.lane.b32.xlu1 %v9687_v7, %s9218_s1 }
 0xd0b   :  { %2658 = vrot.lane.b32.xlu0 %v9695_v35, %s9218_s1 }
 0xd0c   :  { %2917 = vrot.lane.b32.xlu1 %v9731_v27, %s9218_s1 }
 0xd0f   :  { %2915 = vrot.lane.b32.xlu0 %v9734_v48, %s9218_s1 }
 0xd10   :  { %2913 = vrot.lane.b32.xlu1 %v9723_v44, %s9218_s1 }
 0xd13   :  { %2909 = vrot.lane.b32.xlu0 %v9715_v42, %s9218_s1 }
 0xd14   :  { %2911 = vrot.lane.b32.xlu1 %v9725_v45, %s9218_s1 }
 0xd17   :  { %2905 = vrot.lane.b32.xlu0 %v9705_v38, %s9218_s1 }
 0xd18   :  { %2907 = vrot.lane.b32.xlu1 %v9717_v43, %s9218_s1 }
 0xd1b   :  { %3086 = vrot.lane.b32.xlu0 %v9689_v34, %s9219_s29 }
 0xd1c   :  { %2903 = vrot.lane.b32.xlu1 %v9709_v40, %s9218_s1 }
 0xd20   :  { %3084 = vrot.lane.b32.xlu1 %v9697_v36, %s9219_s29 }
 0xd31   :  { %v2450_v57 = vpop.xlane.xlu0 %2449 }
 0xd32   :  { %8870 = vrcp.f32 %v2450_v57 }
 0xd33   :  { %v2447_v60 = vpop.xlane.xlu1 %2446 }
 0xd34   :  { %8872 = vrcp.f32 %v2447_v60 }
 0xd35   :  { %v2669_v34 = vpop.permute.xlu0 %2668 }
 0xd37   :  { %v2667_v36 = vpop.permute.xlu1 %2666 }
 0xd3f   :  { %v8871_v8 = vpop.eup %8870 }
 0xd40   :  { %v2472_v51 = vmul.f32 %v8871_v8, %v10009_v18 }
 0xd41   :  { %v8873_v63 = vpop.eup %8872 }
 0xd42   :  { %v2470_v6 = vmul.f32 %v8873_v63, %v10013_v50 }
 0xd44   :  { %8244 = vmatprep.mubr.msk.f32.mxu1 %vm2010_vm15, %v2470_v6 }
 0xd45   :  { %8245 = vmatmul.mubr.msk.f32.vlgmr.msra.gmra.mxu1 %vm2010_vm15, %v2472_v51 }
 0xd46   :  { %8257 = vmatpush3.xpose.msk.msra.mxu1 %vm282_vm2, %v9967_v3 }
 0xd47   :  { %8258 = vmatprep.subr.msk.mxu1 %vm282_vm2, %v10007_v1 }
 0xd4a   :  { %8259 = vmatpush3.xpose.msk.msra.mxu1 %vm282_vm2, %v10007_v1 }
 0xd4b   :  { %8260 = vmatprep.subr.msk.mxu1 %vm282_vm2, %v2673_v59 }
 0xd4e   :  { %8261 = vmatpush3.xpose.msk.msra.mxu1 %vm282_vm2, %v2673_v59 }
 0xd4f   :  { %8262 = vmatprep.subr.msk.mxu1 %vm282_vm2, %v2671_v56 }
 0xd52   :  { %8263 = vmatpush3.xpose.msk.msra.mxu1 %vm282_vm2, %v2671_v56 }
 0xd53   :  { %8264 = vmatprep.subr.msk.mxu1 %vm282_vm2, %v2669_v34 }
 0xd56   :  { %8265 = vmatpush3.xpose.msk.msra.mxu1 %vm282_vm2, %v2669_v34 }
 0xd57   :  { %8266 = vmatprep.subr.msk.mxu1 %vm282_vm2, %v2667_v36 }
 0xd5a   :  { %8267 = vmatpush3.xpose.msk.msra.mxu1 %vm282_vm2, %v2667_v36 }
 0xd66   :  { %v2453_v3 = vpop.xlane.xlu0 %2452 }
 0xd67   :  { %8874 = vrcp.f32 %v2453_v3 }
 0xd68   :  { %v2456_v1 = vpop.xlane.xlu1 %2455 }
 0xd69   :  { %8876 = vrcp.f32 %v2456_v1 }
 0xd6a   :  { %v2459_v18 = vpop.xlane.xlu0 %2458 }
 0xd6b   :  { %8878 = vrcp.f32 %v2459_v18 }
 0xd6c   :  { %v2462_v50 = vpop.xlane.xlu1 %2461 }
 0xd6d   :  { %8880 = vrcp.f32 %v2462_v50 }
 0xd6e   :  { %v2465_v61 = vpop.xlane.xlu0 %2464 }
 0xd6f   :  { %8882 = vrcp.f32 %v2465_v61 }
 0xd70   :  { %v2468_v13 = vpop.xlane.xlu1 %2467 }
 0xd71   :  { %8884 = vrcp.f32 %v2468_v13 }
 0xd72   :  { %v2665_v47 = vpop.permute.xlu0 %2664 }
 0xd73   :  { %8268 = vmatprep.subr.msk.mxu1 %vm282_vm2, %v2665_v47 }
 0xd74   :  { %v8875_v54 = vpop.eup %8874  ;;  %v2663_v22 = vpop.permute.xlu1 %2662  ;;  %8269 = vmatpush3.xpose.msk.msra.mxu1 %vm282_vm2, %v2665_v47 }
 0xd75   :  { %8270 = vmatprep.subr.msk.mxu1 %vm282_vm2, %v2663_v22  ;;  %v2474_v15 = vmul.f32 %v8875_v54, %v10021_v0 }
 0xd76   :  { %v8877_v46 = vpop.eup %8876  ;;  %v2647_v14 = vpop.permute.xlu0 %2646 }
 0xd77   :  { %8247 = vmatprep.mubr.msk.f32.mxu1 %vm2010_vm15, %v2474_v15  ;;  %v2476_v20 = vmul.f32 %v8877_v46, %v10023_v2 }
 0xd78   :  { %v8879_v19 = vpop.eup %8878  ;;  %v2649_v59 = vpop.permute.xlu1 %2648  ;;  %8271 = vmatpush3.xpose.msk.msra.mxu1 %vm282_vm2, %v2663_v22 }
 0xd79   :  { %8248 = vmatmul.mubr.msk.f32.gmra.mxu1 %vm2010_vm15, %v2476_v20  ;;  %v2478_v56 = vmul.f32 %v8879_v19, %v10027_v49 }
 0xd7a   :  { %v8881_v57 = vpop.eup %8880  ;;  %v2651_v60 = vpop.permute.xlu0 %2650 }
 0xd7b   :  { %8250 = vmatprep.mubr.msk.f32.mxu1 %vm2010_vm15, %v2478_v56  ;;  %v2480_v0 = vmul.f32 %v8881_v57, %v10031_v41 }
 0xd7c   :  { %v8883_v8 = vpop.eup %8882  ;;  %v2653_v63 = vpop.permute.xlu1 %2652 }
 0xd7d   :  { %8251 = vmatmul.mubr.msk.f32.gmra.mxu1 %vm2010_vm15, %v2480_v0  ;;  %v2482_v2 = vmul.f32 %v8883_v8, %v10035_v17 }
 0xd7e   :  { %v8885_v6 = vpop.eup %8884  ;;  %v2655_v51 = vpop.permute.xlu0 %2654 }
 0xd7f   :  { %8253 = vmatprep.mubr.msk.f32.mxu1 %vm2010_vm15, %v2482_v2  ;;  %v2484_v34 = vmul.f32 %v8885_v6, %v10039_v16 }
 0xd80   :  { %v2657_v36 = vpop.permute.xlu1 %2656 }
 0xd81   :  { %8254 = vmatmul.mubr.msk.f32.gmra.mxu1 %vm2010_vm15, %v2484_v34 }
 0xd82   :  { %8272 = vmatprep.mubr.msk.f32.mxu1 %vm282_vm2, %v2647_v14  ;;  %v2659_v49 = vpop.permute.xlu0 %2658 }
 0xd84   :  { %v2661_v3 = vpop.permute.xlu1 %2660 }
 0xd85   :  { %8273 = vmatmul.mubr.msk.f32.vlgmr.msra.gmra.mxu1 %vm282_vm2, %v2649_v59 }
 0xd86   :  { %8275 = vmatprep.mubr.msk.f32.mxu1 %vm282_vm2, %v2651_v60  ;;  %v2916_v41 = vpop.permute.xlu0 %2915 }
 0xd88   :  { %v2918_v1 = vpop.permute.xlu1 %2917 }
 0xd89   :  { %8276 = vmatmul.mubr.msk.f32.gmra.mxu1 %vm282_vm2, %v2653_v63  ;;  %8284 = vmatprep.subr.mxu0 %v2918_v1 }
 0xd8a   :  { %8278 = vmatprep.mubr.msk.f32.mxu1 %vm282_vm2, %v2655_v51  ;;  %8285 = vmatpush3.msra.mxu0 %v2918_v1  ;;  %v2910_v16 = vpop.permute.xlu0 %2909 }
 0xd8b   :  { %8286 = vmatprep.subr.mxu0 %v2916_v41 }
 0xd8c   :  { %v2914_v17 = vpop.permute.xlu1 %2913  ;;  %8287 = vmatpush3.msra.mxu0 %v2916_v41 }
 0xd8d   :  { %8279 = vmatmul.mubr.msk.f32.gmra.mxu1 %vm282_vm2, %v2657_v36  ;;  %8288 = vmatprep.subr.mxu0 %v2914_v17 }
 0xd8e   :  { %8281 = vmatprep.mubr.msk.f32.mxu1 %vm282_vm2, %v2659_v49  ;;  %8289 = vmatpush3.msra.mxu0 %v2914_v17  ;;  %v2906_v50 = vpop.permute.xlu0 %2905 }
 0xd90   :  { %v2912_v18 = vpop.permute.xlu1 %2911 }
 0xd91   :  { %8282 = vmatmul.mubr.msk.f32.gmra.mxu1 %vm282_vm2, %v2661_v3  ;;  %8290 = vmatprep.subr.mxu0 %v2912_v18 }
 0xd92   :  { %8291 = vmatpush3.msra.mxu0 %v2912_v18  ;;  %v10127_v47 = vpop.permute.xlu0 %3086 }
 0xd93   :  { %8292 = vmatprep.subr.mxu0 %v2910_v16 }
 0xd94   :  { %v2908_v61 = vpop.permute.xlu1 %2907  ;;  %8293 = vmatpush3.msra.mxu0 %v2910_v16 }
 0xd95   :  { %8294 = vmatprep.subr.mxu0 %v2908_v61 }
 0xd96   :  { %8295 = vmatpush3.msra.mxu0 %v2908_v61 }
 0xd97   :  { %8296 = vmatprep.subr.mxu0 %v2906_v50 }
 0xd98   :  { %v2904_v13 = vpop.permute.xlu1 %2903  ;;  %8297 = vmatpush3.msra.mxu0 %v2906_v50 }
 0xd99   :  { %8298 = vmatprep.subr.mxu0 %v2904_v13 }
 0xd9a   :  { %8299 = vmatpush3.msra.mxu0 %v2904_v13 }
 0xd9b   :  { %8312 = vmatprep.subr.msk.mxu0 %vm282_vm2, %v10127_v47 }
 0xe05   :  { %v10131_v54 = vpop.f32.mrf.mxu1 }
 0xe07   :  { %v10133_v22 = vpop.f32.mrf.mxu1 }
 0xe39   :  { %v10135_v15 = vpop.f32.mrf.mxu1 }
 0xe3b   :  { %v10137_v46 = vpop.f32.mrf.mxu1 }
 0xe3d   :  { %v10139_v14 = vpop.f32.mrf.mxu1 }
 0xe3f   :  { %v10141_v20 = vpop.f32.mrf.mxu1 }
 0xe41   :  { %v10143_v19 = vpop.f32.mrf.mxu1 }
 0xe43   :  { %v10145_v59 = vpop.f32.mrf.mxu1 }
 0xe45   :  { %v8274_v56 = vpop.f32.mrf.mxu1 }
 0xe46   :  { %v2782_v57 = vadd.f32 %v8274_v56, %v9790_v52 }
 0xe47   :  { %v2776_v60 = vpop.f32.mrf.mxu1 }
 0xe48   :  { %v2777_v0 = vadd.f32 %v2776_v60, %v9795_v55  ;;  %v2818_v8 = vsel %vm2010_vm15, %v2782_v57, -inf }
 0xe49   :  { %2819 = vmax.xlane.f32.xlu1 %v2818_v8  ;;  %v8277_v63 = vpop.f32.mrf.mxu1 }
 0xe4a   :  { %v2792_v2 = vadd.f32 %v8277_v63, %v9801_v58  ;;  %v2815_v6 = vsel %vm2010_vm15, %v2777_v0, -inf }
 0xe4b   :  { %2816 = vmax.xlane.f32.xlu0 %v2815_v6  ;;  %v2786_v51 = vpop.f32.mrf.mxu1 }
 0xe4c   :  { %v2787_v36 = vadd.f32 %v2786_v51, %v9808_v62  ;;  %v2824_v49 = vsel %vm2010_vm15, %v2792_v2, -inf }
 0xe4d   :  { %v8280_v34 = vpop.f32.mrf.mxu1 }
 0xe4e   :  { %v2802_v41 = vadd.f32 %v8280_v34, %v9815_v4  ;;  %v2821_v1 = vsel %vm2010_vm15, %v2787_v36, -inf  ;;  %v10167_v4 = vpop.permute.xlu1 %3084 }
 0xe4f   :  { %2825 = vmax.xlane.f32.xlu0 %v2824_v49  ;;  %v2796_v52 = vpop.f32.mrf.mxu1 }
 0xe50   :  { %v2797_v3 = vadd.f32 %v2796_v52, %v9822_v9  ;;  %v2830_v18 = vsel %vm2010_vm15, %v2802_v41, -inf }
 0xe51   :  { %v8283_v55 = vpop.f32.mrf.mxu1 }
 0xe52   :  { %v2827_v58 = vsel %vm2010_vm15, %v2797_v3, -inf  ;;  %v2812_v62 = vadd.f32 %v8283_v55, %v9829_v12 }
 0xe53   :  { %2822 = vmax.xlane.f32.xlu0 %v2821_v1  ;;  %2828 = vmax.xlane.f32.xlu1 %v2827_v58  ;;  %v2806_v17 = vpop.f32.mrf.mxu1 }
 0xe54   :  { %v2807_v16 = vadd.f32 %v2806_v17, %v9836_v31  ;;  %v2836_v9 = vsel %vm2010_vm15, %v2812_v62, -inf }
 0xe56   :  { %v2833_v50 = vsel %vm2010_vm15, %v2807_v16, -inf }
 0xe57   :  { %2831 = vmax.xlane.f32.xlu0 %v2830_v18  ;;  %2834 = vmax.xlane.f32.xlu1 %v2833_v50 }
 0xe5b   :  { %2837 = vmax.xlane.f32.xlu0 %v2836_v9 }
 0xe68   :  { %3080 = vrot.lane.b32.xlu1 %v9685_v33, %s9219_s29 }
 0xe71   :  { %3082 = vrot.lane.b32.xlu0 %v9679_v30, %s9219_s29 }
 0xed2   :  { %v2820_v31 = vpop.xlane.xlu1 %2819 }
 0xed3   :  { %v2840_v61 = vsub.f32 %v2782_v57, %v2820_v31 }
 0xed4   :  { %v2817_v12 = vpop.xlane.xlu0 %2816 }
 0xed5   :  { %v2849_v13 = vmul.f32 1.442695, %v2840_v61  ;;  %v2839_v56 = vsub.f32 %v2777_v0, %v2817_v12 }
 0xed7   :  { %8886 = vpow2.f32 %v2849_v13  ;;  %v2847_v60 = vmul.f32 1.442695, %v2839_v56 }
 0xed8   :  { %v2826_v33 = vpop.xlane.xlu0 %2825 }
 0xed9   :  { %8888 = vpow2.f32 %v2847_v60  ;;  %v2842_v49 = vsub.f32 %v2792_v2, %v2826_v33 }
 0xedb   :  { %v2853_v58 = vmul.f32 1.442695, %v2842_v49 }
 0xedc   :  { %v2823_v57 = vpop.xlane.xlu0 %2822  ;;  %v2829_v0 = vpop.xlane.xlu1 %2828 }
 0xedd   :  { %v2841_v51 = vsub.f32 %v2787_v36, %v2823_v57  ;;  %v2843_v52 = vsub.f32 %v2797_v3, %v2829_v0 }
 0xedf   :  { %v2851_v55 = vmul.f32 1.442695, %v2841_v51  ;;  %v2855_v50 = vmul.f32 1.442695, %v2843_v52 }
 0xee0   :  { %v2832_v34 = vpop.xlane.xlu0 %2831  ;;  %v2835_v1 = vpop.xlane.xlu1 %2834 }
 0xee1   :  { %v2844_v17 = vsub.f32 %v2802_v41, %v2832_v34  ;;  %8890 = vpow2.f32 %v2851_v55  ;;  %v2845_v9 = vsub.f32 %v2807_v16, %v2835_v1 }
 0xee2   :  { %8892 = vpow2.f32 %v2853_v58 }
 0xee3   :  { %v2857_v31 = vmul.f32 1.442695, %v2844_v17  ;;  %8894 = vpow2.f32 %v2855_v50  ;;  %v2859_v61 = vmul.f32 1.442695, %v2845_v9 }
 0xee4   :  { %v10169_v8 = vpop.eup %8886  ;;  %v2838_v18 = vpop.xlane.xlu0 %2837 }
 0xee5   :  { %v2866_v63 = vsel %vm2010_vm15, %v10169_v8, 0.0  ;;  %8896 = vpow2.f32 %v2857_v31 }
 0xee6   :  { %v10173_v6 = vpop.eup %8888  ;;  %2867 = vadd.xlane.f32.xlu0 %v2866_v63  ;;  %8898 = vpow2.f32 %v2859_v61 }
 0xee7   :  { %v2863_v30 = vsel %vm2010_vm15, %v10173_v6, 0.0 }
 0xee8   :  { %2864 = vadd.xlane.f32.xlu1 %v2863_v30 }
 0xeee   :  { %v10181_v36 = vpop.eup %8890 }
 0xeef   :  { %v10183_v2 = vpop.eup %8892  ;;  %v2869_v3 = vsel %vm2010_vm15, %v10181_v36, 0.0 }
 0xef0   :  { %v10187_v41 = vpop.eup %8894  ;;  %v2872_v16 = vsel %vm2010_vm15, %v10183_v2, 0.0 }
 0xef1   :  { %v2875_v12 = vsel %vm2010_vm15, %v10187_v41, 0.0 }
 0xef9   :  { %3076 = vrot.lane.b32.xlu1 %v9675_v28, %s9219_s29  ;;  %v2846_v28 = vsub.f32 %v2812_v62, %v2838_v18  ;;  %v10191_v62 = vpop.eup %8896 }
 0xefa   :  { %v10195_v13 = vpop.eup %8898  ;;  %v2878_v56 = vsel %vm2010_vm15, %v10191_v62, 0.0 }
 0xefb   :  { %v2881_v63 = vsel %vm2010_vm15, %v10195_v13, 0.0 }
 0xefc   :  { %3078 = vrot.lane.b32.xlu0 %v9671_v25, %s9219_s29  ;;  %v2861_v25 = vmul.f32 1.442695, %v2846_v28 }
 0xefe   :  { %8900 = vpow2.f32 %v2861_v25 }
 0xf0b   :  { %v10199_v60 = vpop.eup %8900 }
 0xf0c   :  { %v2884_v30 = vsel %vm2010_vm15, %v10199_v60, 0.0 }
 0xf1b   :  { %2870 = vadd.xlane.f32.xlu0 %v2869_v3 }
 0xf1d   :  { %2873 = vadd.xlane.f32.xlu1 %v2872_v16 }
 0xf1f   :  { %2876 = vadd.xlane.f32.xlu0 %v2875_v12 }
 0xf21   :  { %2879 = vadd.xlane.f32.xlu1 %v2878_v56 }
 0xf23   :  { %2882 = vadd.xlane.f32.xlu0 %v2881_v63 }
 0xf25   :  { %2885 = vadd.xlane.f32.xlu1 %v2884_v30 }
 0xf36   :  { %3072 = vrot.lane.b32.xlu1 %v9667_v24, %s9219_s29 }
 0xf39   :  { %3074 = vrot.lane.b32.xlu0 %v9665_v23, %s9219_s29 }
 0xf3a   :  { %3058 = vrot.lane.b32.xlu1 %v9659_v37, %s9219_s29  ;;  %v3083_v37 = vpop.permute.xlu0 %3082 }
 0xf3d   :  { %3056 = vrot.lane.b32.xlu0 %v9661_v39, %s9219_s29  ;;  %v3081_v39 = vpop.permute.xlu1 %3080 }
 0xf3e   :  { %3062 = vrot.lane.b32.xlu1 %v9669_v53, %s9219_s29 }
 0xf41   :  { %3060 = vrot.lane.b32.xlu0 %v9673_v26, %s9219_s29 }
 0xf42   :  { %3066 = vrot.lane.b32.xlu1 %v9677_v29, %s9219_s29 }
 0xf45   :  { %3064 = vrot.lane.b32.xlu0 %v9683_v32, %s9219_s29 }
 0xf46   :  { %3070 = vrot.lane.b32.xlu1 %v9687_v7, %s9219_s29 }
 0xf49   :  { %3068 = vrot.lane.b32.xlu0 %v9695_v35, %s9219_s29 }
 0xf6f   :  { %v2868_v23 = vpop.xlane.xlu0 %2867 }
 0xf70   :  { %8902 = vrcp.f32 %v2868_v23 }
 0xf71   :  { %v2865_v24 = vpop.xlane.xlu1 %2864 }
 0xf72   :  { %8904 = vrcp.f32 %v2865_v24  ;;  %v9166_v24 = vld [vmem:[%s11841_s2 + $0x280] sm:$0xff] }
 0xf73   :  { %v3079_v32 = vpop.permute.xlu0 %3078 }
 0xf75   :  { %v3077_v7 = vpop.permute.xlu1 %3076 }
 0xf7d   :  { %v8903_v53 = vpop.eup %8902 }
 0xf7e   :  { %v2890_v29 = vmul.f32 %v8903_v53, %v10169_v8 }
 0xf7f   :  { %v8905_v26 = vpop.eup %8904 }
 0xf80   :  { %v2888_v33 = vmul.f32 %v8905_v26, %v10173_v6 }
 0xf82   :  { %8300 = vmatprep.mubr.msk.f32.mxu0 %vm2010_vm15, %v2888_v33  ;;  %v9167_v33 = vld [vmem:[%s11841_s2 + $0x278] sm:$0xff] }
 0xf83   :  { %8301 = vmatmul.mubr.msk.f32.vlgmr.msra.gmra.mxu0 %vm2010_vm15, %v2890_v29 }
 0xf84   :  { %8313 = vmatpush3.xpose.msk.msra.mxu0 %vm282_vm2, %v10127_v47 }
 0xf85   :  { %8314 = vmatprep.subr.msk.mxu0 %vm282_vm2, %v10167_v4 }
 0xf88   :  { %8315 = vmatpush3.xpose.msk.msra.mxu0 %vm282_vm2, %v10167_v4 }
 0xf89   :  { %8316 = vmatprep.subr.msk.mxu0 %vm282_vm2, %v3083_v37 }
 0xf8c   :  { %8317 = vmatpush3.xpose.msk.msra.mxu0 %vm282_vm2, %v3083_v37 }
 0xf8d   :  { %8318 = vmatprep.subr.msk.mxu0 %vm282_vm2, %v3081_v39 }
 0xf90   :  { %8319 = vmatpush3.xpose.msk.msra.mxu0 %vm282_vm2, %v3081_v39 }
 0xf91   :  { %8320 = vmatprep.subr.msk.mxu0 %vm282_vm2, %v3079_v32 }
 0xf94   :  { %8321 = vmatpush3.xpose.msk.msra.mxu0 %vm282_vm2, %v3079_v32 }
 0xf95   :  { %8322 = vmatprep.subr.msk.mxu0 %vm282_vm2, %v3077_v7 }
 0xf98   :  { %8323 = vmatpush3.xpose.msk.msra.mxu0 %vm282_vm2, %v3077_v7 }
 0xfa4   :  { %v2871_v35 = vpop.xlane.xlu0 %2870 }
 0xfa5   :  { %8906 = vrcp.f32 %v2871_v35 }
 0xfa6   :  { %v2874_v47 = vpop.xlane.xlu1 %2873 }
 0xfa7   :  { %8908 = vrcp.f32 %v2874_v47 }
 0xfa8   :  { %v2877_v4 = vpop.xlane.xlu0 %2876 }
 0xfa9   :  { %8910 = vrcp.f32 %v2877_v4  ;;  %v9168_v4 = vld [vmem:[%s11841_s2 + $0x288] sm:$0xff] }
 0xfaa   :  { %v2880_v8 = vpop.xlane.xlu1 %2879 }
 0xfab   :  { %8912 = vrcp.f32 %v2880_v8 }
 0xfac   :  { %v2883_v6 = vpop.xlane.xlu0 %2882 }
 0xfad   :  { %8914 = vrcp.f32 %v2883_v6 }
 0xfae   :  { %v2886_v57 = vpop.xlane.xlu1 %2885 }
 0xfaf   :  { %8916 = vrcp.f32 %v2886_v57  ;;  %v9169_v57 = vld [vmem:[%s11841_s2 + $0x290] sm:$0xff] }
 0xfb0   :  { %v3075_v0 = vpop.permute.xlu0 %3074 }
 0xfb1   :  { %8324 = vmatprep.subr.msk.mxu0 %vm282_vm2, %v3075_v0 }
 0xfb2   :  { %v8907_v51 = vpop.eup %8906  ;;  %v3073_v34 = vpop.permute.xlu1 %3072  ;;  %8325 = vmatpush3.xpose.msk.msra.mxu0 %vm282_vm2, %v3075_v0 }
 0xfb3   :  { %8326 = vmatprep.subr.msk.mxu0 %vm282_vm2, %v3073_v34  ;;  %v2892_v49 = vmul.f32 %v8907_v51, %v10181_v36 }
 0xfb4   :  { %v8909_v52 = vpop.eup %8908  ;;  %v3057_v18 = vpop.permute.xlu0 %3056 }
 0xfb5   :  { %8303 = vmatprep.mubr.msk.f32.mxu0 %vm2010_vm15, %v2892_v49  ;;  %v2894_v55 = vmul.f32 %v8909_v52, %v10183_v2  ;;  %v9170_v49 = vld [vmem:[%s11841_s2 + $0x298] sm:$0xff] }
 0xfb6   :  { %v8911_v1 = vpop.eup %8910  ;;  %8327 = vmatpush3.xpose.msk.msra.mxu0 %vm282_vm2, %v3073_v34  ;;  %v3059_v61 = vpop.permute.xlu1 %3058 }
 0xfb7   :  { %8304 = vmatmul.mubr.msk.f32.gmra.mxu0 %vm2010_vm15, %v2894_v55  ;;  %v2896_v58 = vmul.f32 %v8911_v1, %v10187_v41  ;;  %v9171_v55 = vld [vmem:[%s11841_s2 + $0x2a0] sm:$0xff] }
 0xfb8   :  { %v8913_v17 = vpop.eup %8912  ;;  %v3061_v36 = vpop.permute.xlu0 %3060 }
 0xfb9   :  { %8306 = vmatprep.mubr.msk.f32.mxu0 %vm2010_vm15, %v2896_v58  ;;  %v2898_v50 = vmul.f32 %v8913_v17, %v10191_v62 }
 0xfba   :  { %v8915_v9 = vpop.eup %8914  ;;  %v3063_v2 = vpop.permute.xlu1 %3062 }
 0xfbb   :  { %8307 = vmatmul.mubr.msk.f32.gmra.mxu0 %vm2010_vm15, %v2898_v50  ;;  %v2900_v31 = vmul.f32 %v8915_v9, %v10195_v13  ;;  %v9172_v50 = vld [vmem:[%s11841_s2 + $0x2b0] sm:$0xff] }
 0xfbc   :  { %v8917_v28 = vpop.eup %8916  ;;  %v3065_v3 = vpop.permute.xlu0 %3064 }
 0xfbd   :  { %8309 = vmatprep.mubr.msk.f32.mxu0 %vm2010_vm15, %v2900_v31  ;;  %v2902_v25 = vmul.f32 %v8917_v28, %v10199_v60 }
 0xfbe   :  { %v3067_v41 = vpop.permute.xlu1 %3066 }
 0xfbf   :  { %8310 = vmatmul.mubr.msk.f32.gmra.mxu0 %vm2010_vm15, %v2902_v25  ;;  %v9173_v25 = vld [vmem:[%s11841_s2 + $0x2a8] sm:$0xff] }
 0xfc0   :  { %8328 = vmatprep.mubr.msk.f32.mxu0 %vm282_vm2, %v3057_v18  ;;  %v3069_v16 = vpop.permute.xlu0 %3068 }
 0xfc2   :  { %v3071_v62 = vpop.permute.xlu1 %3070 }
 0xfc3   :  { %8329 = vmatmul.mubr.msk.f32.vlgmr.msra.gmra.mxu0 %vm282_vm2, %v3059_v61 }
 0xfc4   :  { %8331 = vmatprep.mubr.msk.f32.mxu0 %vm282_vm2, %v3061_v36 }
 0xfc7   :  { %8332 = vmatmul.mubr.msk.f32.gmra.mxu0 %vm282_vm2, %v3063_v2 }
 0xfc8   :  { %8334 = vmatprep.mubr.msk.f32.mxu0 %vm282_vm2, %v3065_v3 }
 0xfcb   :  { %8335 = vmatmul.mubr.msk.f32.gmra.mxu0 %vm282_vm2, %v3067_v41 }
 0xfcc   :  { %8337 = vmatprep.mubr.msk.f32.mxu0 %vm282_vm2, %v3069_v16 }
 0xfcf   :  { %8338 = vmatmul.mubr.msk.f32.gmra.mxu0 %vm282_vm2, %v3071_v62 }
0x1043   :  { %v10267_v12 = vpop.f32.mrf.mxu0 }
0x1045   :  { %v10269_v13 = vpop.f32.mrf.mxu0 }
0x1077   :  { %v10271_v56 = vpop.f32.mrf.mxu0 }
0x1079   :  { %v10273_v60 = vpop.f32.mrf.mxu0 }
0x107b   :  { %v10275_v63 = vpop.f32.mrf.mxu0 }
0x107d   :  { %v10277_v30 = vpop.f32.mrf.mxu0 }
0x107f   :  { %v10279_v37 = vpop.f32.mrf.mxu0 }
0x1081   :  { %v10281_v39 = vpop.f32.mrf.mxu0 }
0x1083   :  { %v8330_v23 = vpop.f32.mrf.mxu0 }
0x1084   :  { %v3192_v53 = vadd.f32 %v9166_v24, %v8330_v23 }
0x1085   :  { %v3186_v26 = vpop.f32.mrf.mxu0 }
0x1086   :  { %v3187_v29 = vadd.f32 %v9167_v33, %v3186_v26  ;;  %v3228_v32 = vsel %vm2010_vm15, %v3192_v53, -inf }
0x1087   :  { %3229 = vmax.xlane.f32.xlu1 %v3228_v32  ;;  %v8333_v7 = vpop.f32.mrf.mxu0 }
0x1088   :  { %v3225_v35 = vsel %vm2010_vm15, %v3187_v29, -inf  ;;  %v3202_v0 = vadd.f32 %v9169_v57, %v8333_v7 }
0x1089   :  { %3226 = vmax.xlane.f32.xlu0 %v3225_v35  ;;  %v3196_v47 = vpop.f32.mrf.mxu0 }
0x108a   :  { %v3197_v8 = vadd.f32 %v9168_v4, %v3196_v47  ;;  %v3234_v58 = vsel %vm2010_vm15, %v3202_v0, -inf }
0x108b   :  { %v8336_v6 = vpop.f32.mrf.mxu0 }
0x108c   :  { %v3231_v51 = vsel %vm2010_vm15, %v3197_v8, -inf  ;;  %v3212_v1 = vadd.f32 %v9171_v55, %v8336_v6 }
0x108d   :  { %3232 = vmax.xlane.f32.xlu0 %v3231_v51  ;;  %v3206_v34 = vpop.f32.mrf.mxu0 }
0x108e   :  { %v3207_v52 = vadd.f32 %v9170_v49, %v3206_v34  ;;  %v3240_v31 = vsel %vm2010_vm15, %v3212_v1, -inf }
0x108f   :  { %v8339_v18 = vpop.f32.mrf.mxu0 }
0x1090   :  { %v3237_v17 = vsel %vm2010_vm15, %v3207_v52, -inf  ;;  %v3222_v9 = vadd.f32 %v9172_v50, %v8339_v18 }
0x1091   :  { %3235 = vmax.xlane.f32.xlu0 %v3234_v58  ;;  %3238 = vmax.xlane.f32.xlu1 %v3237_v17  ;;  %v3216_v61 = vpop.f32.mrf.mxu0 }
0x1092   :  { %v3246_v28 = vsel %vm2010_vm15, %v3222_v9, -inf  ;;  %v10322_v36 = vadd.f32 %v9173_v25, %v3216_v61 }
0x1094   :  { %v3243_v2 = vsel %vm2010_vm15, %v10322_v36, -inf }
0x1095   :  { %3241 = vmax.xlane.f32.xlu0 %v3240_v31 }
0x1099   :  { %3247 = vmax.xlane.f32.xlu0 %v3246_v28 }
0x10a2   :  { %3327 = vrot.lane.b32.xlu1 %v9731_v27, %s9219_s29 }
0x10a6   :  { %3323 = vrot.lane.b32.xlu1 %v9723_v44, %s9219_s29 }
0x10af   :  { %3325 = vrot.lane.b32.xlu0 %v9734_v48, %s9219_s29 }
0x10b3   :  { %3319 = vrot.lane.b32.xlu0 %v9715_v42, %s9219_s29 }
0x10ca   :  { %3244 = vmax.xlane.f32.xlu1 %v3243_v2 }
0x10db   :  { %3321 = vrot.lane.b32.xlu1 %v9725_v45, %s9219_s29 }
0x10df   :  { %3317 = vrot.lane.b32.xlu1 %v9717_v43, %s9219_s29 }
0x1110   :  { %v3230_v44 = vpop.xlane.xlu1 %3229 }
0x1111   :  { %v3250_v27 = vsub.f32 %v3192_v53, %v3230_v44 }
0x1112   :  { %v3227_v42 = vpop.xlane.xlu0 %3226 }
0x1113   :  { %v3259_v48 = vmul.f32 1.442695, %v3250_v27  ;;  %v3249_v3 = vsub.f32 %v3187_v29, %v3227_v42 }
0x1115   :  { %8918 = vpow2.f32 %v3259_v48  ;;  %v3257_v41 = vmul.f32 1.442695, %v3249_v3 }
0x1116   :  { %v3233_v16 = vpop.xlane.xlu0 %3232 }
0x1117   :  { %8920 = vpow2.f32 %v3257_v41  ;;  %v3251_v62 = vsub.f32 %v3197_v8, %v3233_v16 }
0x1119   :  { %v3261_v23 = vmul.f32 1.442695, %v3251_v62 }
0x111a   :  { %v3239_v24 = vpop.xlane.xlu1 %3238  ;;  %v3236_v26 = vpop.xlane.xlu0 %3235 }
0x111b   :  { %8922 = vpow2.f32 %v3261_v23  ;;  %v3253_v33 = vsub.f32 %v3207_v52, %v3239_v24  ;;  %v3252_v32 = vsub.f32 %v3202_v0, %v3236_v26 }
0x111d   :  { %v3265_v45 = vmul.f32 1.442695, %v3253_v33  ;;  %v3263_v7 = vmul.f32 1.442695, %v3252_v32  ;;  %v3590_v32 = vld [vmem:[%s11841_s2 + $0x130] sm:$0xff] }
0x111e   :  { %v3328_v35 = vpop.permute.xlu1 %3327  ;;  %v3242_v43 = vpop.xlane.xlu0 %3241 }
0x111f   :  { %8924 = vpow2.f32 %v3265_v45  ;;  %v3254_v53 = vsub.f32 %v3212_v1, %v3242_v43  ;;  %8340 = vmatprep.subr.mxu1 %v3328_v35  ;;  %v3589_v45 = vld [vmem:[%s11841_s2 + $0x128] sm:$0xff] }
0x1120   :  { %8926 = vpow2.f32 %v3263_v7  ;;  %8341 = vmatpush3.msra.mxu1 %v3328_v35  ;;  %v3588_v7 = vld [vmem:[%s11841_s2 + $0x120] sm:$0xff]  ;;  %v3587_v35 = vld [vmem:[%s11841_s2 + $0x118] sm:$0xff] }
0x1121   :  { %v3267_v29 = vmul.f32 1.442695, %v3254_v53 }
0x1122   :  { %v10330_v47 = vpop.eup %8918  ;;  %v3248_v4 = vpop.xlane.xlu0 %3247 }
0x1123   :  { %8928 = vpow2.f32 %v3267_v29  ;;  %v3256_v8 = vsub.f32 %v3222_v9, %v3248_v4  ;;  %v3276_v6 = vsel %vm2010_vm15, %v10330_v47, 0.0  ;;  %v3324_v52 = vpop.permute.xlu1 %3323 }
0x1124   :  { %v10334_v57 = vpop.eup %8920  ;;  %3277 = vadd.xlane.f32.xlu0 %v3276_v6 }
0x1125   :  { %v3271_v0 = vmul.f32 1.442695, %v3256_v8  ;;  %v3273_v51 = vsel %vm2010_vm15, %v10334_v57, 0.0 }
0x1126   :  { %3274 = vadd.xlane.f32.xlu1 %v3273_v51  ;;  %v3326_v34 = vpop.permute.xlu0 %3325 }
0x1127   :  { %8930 = vpow2.f32 %v3271_v0  ;;  %8342 = vmatprep.subr.mxu1 %v3326_v34 }
0x1128   :  { %v10338_v49 = vpop.eup %8922  ;;  %8343 = vmatpush3.msra.mxu1 %v3326_v34 }
0x1129   :  { %8344 = vmatprep.subr.mxu1 %v3324_v52  ;;  %v3279_v55 = vsel %vm2010_vm15, %v10338_v49, 0.0 }
0x112a   :  { %3280 = vadd.xlane.f32.xlu1 %v3279_v55  ;;  %8345 = vmatpush3.msra.mxu1 %v3324_v52  ;;  %v3320_v27 = vpop.permute.xlu0 %3319 }
0x112c   :  { %v10342_v1 = vpop.eup %8924 }
0x112d   :  { %v10344_v58 = vpop.eup %8926  ;;  %v3285_v17 = vsel %vm2010_vm15, %v10342_v1, 0.0 }
0x112e   :  { %3286 = vadd.xlane.f32.xlu1 %v3285_v17  ;;  %v3282_v18 = vsel %vm2010_vm15, %v10344_v58, 0.0 }
0x112f   :  { %3283 = vadd.xlane.f32.xlu0 %v3282_v18 }
0x1130   :  { %v10350_v50 = vpop.eup %8928 }
0x1131   :  { %v3288_v9 = vsel %vm2010_vm15, %v10350_v50, 0.0 }
0x1133   :  { %3289 = vadd.xlane.f32.xlu0 %v3288_v9 }
0x1134   :  { %v10354_v31 = vpop.eup %8930 }
0x1135   :  { %v3294_v28 = vsel %vm2010_vm15, %v10354_v31, 0.0 }
0x1137   :  { %3295 = vadd.xlane.f32.xlu0 %v3294_v28 }
0x114d   :  { %3315 = vrot.lane.b32.xlu0 %v9705_v38, %s9219_s29 }
0x1151   :  { %3474 = vrot.lane.b32.xlu0 %v10133_v22, %s9214_s22 }
0x1153   :  { %v3245_v61 = vpop.xlane.xlu1 %3244 }
0x1154   :  { %v3255_v25 = vsub.f32 %v10322_v36, %v3245_v61 }
0x1155   :  { %3506 = vrot.lane.b32.xlu0 %v10269_v13, %s9220_s20 }
0x1156   :  { %v3269_v2 = vmul.f32 1.442695, %v3255_v25 }
0x1157   :  { %v3322_v44 = vpop.permute.xlu1 %3321 }
0x1158   :  { %8932 = vpow2.f32 %v3269_v2  ;;  %8346 = vmatprep.subr.mxu1 %v3322_v44 }
0x1159   :  { %3478 = vrot.lane.b32.xlu0 %v10137_v46, %s9214_s22  ;;  %8347 = vmatpush3.msra.mxu1 %v3322_v44 }
0x115a   :  { %8348 = vmatprep.subr.mxu1 %v3320_v27 }
0x115b   :  { %v3318_v38 = vpop.permute.xlu1 %3317  ;;  %8349 = vmatpush3.msra.mxu1 %v3320_v27 }
0x115c   :  { %8350 = vmatprep.subr.mxu1 %v3318_v38 }
0x115d   :  { %3510 = vrot.lane.b32.xlu0 %v10273_v60, %s9220_s20  ;;  %8351 = vmatpush3.msra.mxu1 %v3318_v38 }
0x1161   :  { %3482 = vrot.lane.b32.xlu0 %v10141_v20, %s9214_s22 }
0x1165   :  { %v8933_v22 = vpop.eup %8932  ;;  %3514 = vrot.lane.b32.xlu0 %v10277_v30, %s9220_s20 }
0x1166   :  { %v3291_v13 = vsel %vm2010_vm15, %v8933_v22, 0.0 }
0x1167   :  { %3292 = vadd.xlane.f32.xlu1 %v3291_v13 }
0x1169   :  { %3486 = vrot.lane.b32.xlu0 %v10145_v59, %s9214_s22 }
0x116d   :  { %3518 = vrot.lane.b32.xlu0 %v10281_v39, %s9220_s20 }
0x1178   :  { %3313 = vrot.lane.b32.xlu1 %v9709_v40, %s9219_s29 }
0x117c   :  { %3476 = vrot.lane.b32.xlu1 %v10131_v54, %s9214_s22 }
0x1180   :  { %3508 = vrot.lane.b32.xlu1 %v10267_v12, %s9220_s20 }
0x1184   :  { %3480 = vrot.lane.b32.xlu1 %v10135_v15, %s9214_s22 }
0x1188   :  { %3512 = vrot.lane.b32.xlu1 %v10271_v56, %s9220_s20 }
0x118c   :  { %3484 = vrot.lane.b32.xlu1 %v10139_v14, %s9214_s22 }
0x1190   :  { %3516 = vrot.lane.b32.xlu1 %v10275_v63, %s9220_s20 }
0x1194   :  { %3488 = vrot.lane.b32.xlu1 %v10143_v19, %s9214_s22 }
0x1198   :  { %3520 = vrot.lane.b32.xlu1 %v10279_v37, %s9220_s20 }
0x11ad   :  { %v3278_v54 = vpop.xlane.xlu0 %3277 }
0x11af   :  { %v3275_v40 = vpop.xlane.xlu1 %3274 }
0x11b0   :  { %8934 = vrcp.f32 %v3275_v40 }
0x11b1   :  { %8936 = vrcp.f32 %v3278_v54 }
0x11b3   :  { %v3281_v56 = vpop.xlane.xlu1 %3280 }
0x11b4   :  { %8938 = vrcp.f32 %v3281_v56 }
0x11b7   :  { %v3287_v19 = vpop.xlane.xlu1 %3286 }
0x11b8   :  { %v3284_v46 = vpop.xlane.xlu0 %3283 }
0x11b9   :  { %8940 = vrcp.f32 %v3284_v46 }
0x11ba   :  { %8942 = vrcp.f32 %v3287_v19  ;;  %v11874_v19 = vld [vmem:[#allocation15_spill] sm:$0xff] }
0x11bc   :  { %v3290_v15 = vpop.xlane.xlu0 %3289 }
0x11bd   :  { %v8935_v20 = vpop.eup %8934  ;;  %8944 = vrcp.f32 %v3290_v15 }
0x11be   :  { %v3298_v59 = vmul.f32 %v8935_v20, %v10334_v57  ;;  %v8937_v63 = vpop.eup %8936 }
0x11bf   :  { %v3300_v39 = vmul.f32 %v8937_v63, %v10330_v47  ;;  %v11875_v63 = vld [vmem:[#allocation14_spill] sm:$0xff] }
0x11c0   :  { %v3296_v12 = vpop.xlane.xlu0 %3295  ;;  %8356 = vmatprep.mubr.msk.f32.mxu1 %vm2010_vm15, %v3298_v59 }
0x11c1   :  { %8946 = vrcp.f32 %v3296_v12  ;;  %v8939_v30 = vpop.eup %8938 }
0x11c2   :  { %v3302_v42 = vmul.f32 %v8939_v30, %v10338_v49 }
0x11c4   :  { %v3316_v14 = vpop.permute.xlu0 %3315 }
0x11c5   :  { %8352 = vmatprep.subr.mxu1 %v3316_v14 }
0x11c6   :  { %8353 = vmatpush3.msra.mxu1 %v3316_v14  ;;  %v8941_v36 = vpop.eup %8940 }
0x11c7   :  { %v8943_v48 = vpop.eup %8942  ;;  %v3304_v3 = vmul.f32 %v8941_v36, %v10344_v58 }
0x11c8   :  { %v3306_v16 = vmul.f32 %v8943_v48, %v10342_v1  ;;  %v3475_v51 = vpop.permute.xlu0 %3474 }
0x11c9   :  { %v3562_v44 = vsel %vm282_vm2, %v9973_v5, %v3475_v51 }
0x11ca   :  { %v8945_v41 = vpop.eup %8944 }
0x11cb   :  { %v3308_v23 = vmul.f32 %v8945_v41, %v10350_v50 }
0x11cc   :  { %v3507_v49 = vpop.permute.xlu0 %3506 }
0x11cd   :  { %v3570_v27 = vsel %vm298_vm4, %v3562_v44, %v3507_v49  ;;  %v11883_v44 = vld [vmem:[#allocation11_spill] sm:$0xff] }
0x11ce   :  { %v8947_v62 = vpop.eup %8946 }
0x11cf   :  { %v3312_v33 = vmul.f32 %v8947_v62, %v10354_v31 }
0x11d0   :  { %v3479_v55 = vpop.permute.xlu0 %3478 }
0x11d1   :  { %v3564_v15 = vsel %vm282_vm2, %v9977_v10, %v3479_v55 }
0x11d4   :  { %v3511_v58 = vpop.permute.xlu0 %3510 }
0x11d5   :  { %v3572_v5 = vsel %vm298_vm4, %v3564_v15, %v3511_v58 }
0x11d8   :  { %v3483_v18 = vpop.permute.xlu0 %3482 }
0x11d9   :  { %v3566_v10 = vsel %vm282_vm2, %v11874_v19, %v3483_v18 }
0x11dc   :  { %v3515_v9 = vpop.permute.xlu0 %3514 }
0x11e0   :  { %v3487_v28 = vpop.permute.xlu0 %3486 }
0x11e4   :  { %v3519_v25 = vpop.permute.xlu0 %3518 }
0x11f0   :  { %v3293_v60 = vpop.xlane.xlu1 %3292 }
0x11f1   :  { %8948 = vrcp.f32 %v3293_v60  ;;  %v3574_v60 = vsel %vm298_vm4, %v3566_v10, %v3515_v9 }
0x11f4   :  { %v3314_v37 = vpop.permute.xlu1 %3313 }
0x11f5   :  { %8354 = vmatprep.subr.mxu1 %v3314_v37 }
0x11f6   :  { %8355 = vmatpush3.msra.mxu1 %v3314_v37 }
0x11f7   :  { %8357 = vmatmul.mubr.msk.f32.vlgmr.msra.gmra.mxu1 %vm2010_vm15, %v3300_v39  ;;  %8368 = vmatprep.subr.mxu1 %v3590_v32 }
0x11f8   :  { %8359 = vmatprep.mubr.msk.f32.mxu1 %vm2010_vm15, %v3302_v42  ;;  %8369 = vmatpush3.msra.mxu1 %v3590_v32  ;;  %v3477_v0 = vpop.permute.xlu1 %3476  ;;  %v11876_v42 = vld [vmem:[#allocation17_spill] sm:$0xff]  ;;  %v7313_v32 = vld [vmem:[%s11842_s3 + $0x8] ss:$0 sm:$0xff] }
0x11f9   :  { %8370 = vmatprep.subr.mxu1 %v3589_v45  ;;  %v3563_v38 = vsel %vm282_vm2, %v9971_v11, %v3477_v0  ;;  %v3568_v48 = vsel %vm282_vm2, %v11876_v42, %v3487_v28  ;;  %v11882_v28 = vld [vmem:[#allocation10_spill] sm:$0xff] }
0x11fa   :  { %8371 = vmatpush3.msra.mxu1 %v3589_v45  ;;  %v3576_v41 = vsel %vm298_vm4, %v3568_v48, %v3519_v25 }
0x11fb   :  { %8360 = vmatmul.mubr.msk.f32.gmra.mxu1 %vm2010_vm15, %v3304_v3  ;;  %8372 = vmatprep.subr.mxu1 %v3588_v7 }
0x11fc   :  { %8362 = vmatprep.mubr.msk.f32.mxu1 %vm2010_vm15, %v3306_v16  ;;  %8373 = vmatpush3.msra.mxu1 %v3588_v7  ;;  %v3509_v34 = vpop.permute.xlu1 %3508  ;;  %v11877_v16 = vld [vmem:[#allocation16_spill] sm:$0xff] }
0x11fd   :  { %8374 = vmatprep.subr.mxu1 %v3587_v35  ;;  %v3571_v13 = vsel %vm298_vm4, %v3563_v38, %v3509_v34 }
0x11fe   :  { %v8949_v24 = vpop.eup %8948  ;;  %8375 = vmatpush3.msra.mxu1 %v3587_v35 }
0x11ff   :  { %8363 = vmatmul.mubr.msk.f32.gmra.mxu1 %vm2010_vm15, %v3308_v23  ;;  %v3310_v26 = vmul.f32 %v8949_v24, %v8933_v22 }
0x1200   :  { %v3481_v52 = vpop.permute.xlu1 %3480 }
0x1201   :  { %8365 = vmatprep.mubr.msk.f32.mxu1 %vm2010_vm15, %v3310_v26  ;;  %v3565_v11 = vsel %vm282_vm2, %v9975_v21, %v3481_v52  ;;  %v11880_v52 = vld [vmem:[#allocation8_spill] sm:$0xff] }
0x1203   :  { %8366 = vmatmul.mubr.msk.f32.gmra.mxu1 %vm2010_vm15, %v3312_v33 }
0x1204   :  { %v3513_v1 = vpop.permute.xlu1 %3512 }
0x1205   :  { %v3573_v59 = vsel %vm298_vm4, %v3565_v11, %v3513_v1  ;;  %v11881_v1 = vld [vmem:[#allocation9_spill] sm:$0xff] }
0x1208   :  { %v3485_v17 = vpop.permute.xlu1 %3484 }
0x1209   :  { %v3567_v21 = vsel %vm282_vm2, %v11875_v63, %v3485_v17 }
0x120c   :  { %v3517_v50 = vpop.permute.xlu1 %3516 }
0x120d   :  { %v3575_v37 = vsel %vm298_vm4, %v3567_v21, %v3517_v50 }
0x1210   :  { %v3489_v31 = vpop.permute.xlu1 %3488 }
0x1211   :  { %v3569_v62 = vsel %vm282_vm2, %v11877_v16, %v3489_v31 }
0x1214   :  { %v3521_v61 = vpop.permute.xlu1 %3520 }
0x1215   :  { %v3577_v24 = vsel %vm298_vm4, %v3569_v62, %v3521_v61 }
0x12b7   :  { %v8358_v43 = vpop.f32.mrf.mxu1 }
0x12b8   :  { %3540 = vrot.lane.b32.xlu1 %v8358_v43, %s9221_s0  ;;  %v11878_v43 = vld [vmem:[#allocation7_spill] sm:$0xff] }
0x12b9   :  { %v3427_v53 = vpop.f32.mrf.mxu1 }
0x12ba   :  { %3538 = vrot.lane.b32.xlu0 %v3427_v53, %s9221_s0 }
0x12bb   :  { %v8361_v29 = vpop.f32.mrf.mxu1 }
0x12bc   :  { %3544 = vrot.lane.b32.xlu1 %v8361_v29, %s9221_s0 }
0x12bd   :  { %v3437_v47 = vpop.f32.mrf.mxu1 }
0x12be   :  { %3542 = vrot.lane.b32.xlu0 %v3437_v47, %s9221_s0 }
0x12bf   :  { %v8364_v4 = vpop.f32.mrf.mxu1 }
0x12c0   :  { %3548 = vrot.lane.b32.xlu1 %v8364_v4, %s9221_s0  ;;  %v11879_v4 = vld [vmem:[#allocation6_spill] sm:$0xff] }
0x12c1   :  { %v3447_v8 = vpop.f32.mrf.mxu1 }
0x12c2   :  { %3546 = vrot.lane.b32.xlu0 %v3447_v8, %s9221_s0 }
0x12c3   :  { %v8367_v6 = vpop.f32.mrf.mxu1 }
0x12c4   :  { %3552 = vrot.lane.b32.xlu1 %v8367_v6, %s9221_s0 }
0x12c5   :  { %v3457_v57 = vpop.f32.mrf.mxu1 }
0x12c6   :  { %3550 = vrot.lane.b32.xlu0 %v3457_v57, %s9221_s0 }
0x132a   :  { %v3541_v2 = vpop.permute.xlu1 %3540 }
0x132b   :  { %v3580_v54 = vsel %vm3578_vm1, %v3571_v13, %v3541_v2 }
0x132c   :  { %v3539_v22 = vpop.permute.xlu0 %3538 }
0x132d   :  { %v3579_v40 = vsel %vm3578_vm1, %v3570_v27, %v3539_v22 }
0x132e   :  { %v3545_v46 = vpop.permute.xlu1 %3544  ;;  %8376 = vmatprep.mubr.msk.f32.mxu1 %vm30_vm0, %v3579_v40  ;;  %v11884_v40 = vld [vmem:[#allocation12_spill] sm:$0xff] }
0x132f   :  { %8377 = vmatmul.mubr.msk.f32.vlgmr.msra.gmra.mxu1 %vm30_vm0, %v3580_v54  ;;  %v3582_v14 = vsel %vm3578_vm1, %v3573_v59, %v3545_v46  ;;  %v11885_v46 = vld [vmem:[#allocation13_spill] sm:$0xff] }
0x1330   :  { %v3543_v20 = vpop.permute.xlu0 %3542 }
0x1331   :  { %v3581_v12 = vsel %vm3578_vm1, %v3572_v5, %v3543_v20 }
0x1332   :  { %v3549_v56 = vpop.permute.xlu1 %3548  ;;  %8379 = vmatprep.mubr.msk.f32.mxu1 %vm30_vm0, %v3581_v12 }
0x1333   :  { %8380 = vmatmul.mubr.msk.f32.gmra.mxu1 %vm30_vm0, %v3582_v14  ;;  %v3584_v36 = vsel %vm3578_vm1, %v3575_v37, %v3549_v56 }
0x1334   :  { %v3547_v30 = vpop.permute.xlu0 %3546 }
0x1335   :  { %v3583_v39 = vsel %vm3578_vm1, %v3574_v60, %v3547_v30 }
0x1336   :  { %8382 = vmatprep.mubr.msk.f32.mxu1 %vm30_vm0, %v3583_v39  ;;  %v3553_v3 = vpop.permute.xlu1 %3552 }
0x1337   :  { %8383 = vmatmul.mubr.msk.f32.gmra.mxu1 %vm30_vm0, %v3584_v36  ;;  %v3586_v33 = vsel %vm3578_vm1, %v3577_v24, %v3553_v3 }
0x1338   :  { %v3551_v23 = vpop.permute.xlu0 %3550 }
0x1339   :  { %v3585_v26 = vsel %vm3578_vm1, %v3576_v41, %v3551_v23 }
0x133a   :  { %8385 = vmatprep.mubr.msk.f32.mxu1 %vm30_vm0, %v3585_v26 }
0x133b   :  { %8386 = vmatmul.mubr.msk.f32.gmra.mxu1 %vm30_vm0, %v3586_v33 }
0x13ef   :  { %v8378_v45 = vpop.f32.mrf.mxu1 }
0x13f0   :  { %v3692_v7 = vadd.f32 %v8378_v45, %v7313_v32 }
0x13f1   :  { %v3686_v35 = vpop.f32.mrf.mxu1 }
0x13f2   :  { %v3726_v53 = vadd.f32 %v3692_v7, %v11878_v43  ;;  %v3687_v29 = vadd.f32 %v7313_v32, %v3686_v35 }
0x13f3   :  { %v8381_v47 = vpop.f32.mrf.mxu1 }
0x13f4   :  { %v3725_v8 = vadd.f32 %v3687_v29, %v11879_v4  ;;  %v3738_v6 = vsel %vm30_vm0, %v3726_v53, 0.0  ;;  %v3702_v57 = vadd.f32 %v8381_v47, %v7313_v32 }
0x13f5   :  { %3739 = vadd.xlane.f32.xlu1 %v3738_v6  ;;  %v3696_v0 = vpop.f32.mrf.mxu1 }
0x13f6   :  { %v3697_v51 = vadd.f32 %v7313_v32, %v3696_v0  ;;  %v3735_v34 = vsel %vm30_vm0, %v3725_v8, 0.0  ;;  %v3728_v58 = vadd.f32 %v3702_v57, %v11881_v1  ;;  %v3865_v1 = vld [vmem:[%s11841_s2 + $0x148] sm:$0xff] }
0x13f7   :  { %3736 = vadd.xlane.f32.xlu0 %v3735_v34  ;;  %v8384_v49 = vpop.f32.mrf.mxu1 }
0x13f8   :  { %v3727_v55 = vadd.f32 %v3697_v51, %v11880_v52  ;;  %v3712_v18 = vadd.f32 %v8384_v49, %v7313_v32  ;;  %v3744_v2 = vsel %vm30_vm0, %v3728_v58, 0.0 }
0x13f9   :  { %v3706_v17 = vpop.f32.mrf.mxu1 }
0x13fa   :  { %v3707_v50 = vadd.f32 %v7313_v32, %v3706_v17  ;;  %v3741_v9 = vsel %vm30_vm0, %v3727_v55, 0.0  ;;  %v3730_v27 = vadd.f32 %v3712_v18, %v11883_v44  ;;  %v3863_v17 = vld [vmem:[%s11841_s2 + $0x138] sm:$0xff] }
0x13fb   :  { %3742 = vadd.xlane.f32.xlu0 %v3741_v9  ;;  %v8387_v31 = vpop.f32.mrf.mxu1 }
0x13fc   :  { %v3729_v61 = vadd.f32 %v3707_v50, %v11882_v28  ;;  %v3722_v38 = vadd.f32 %v8387_v31, %v7313_v32  ;;  %v3750_v5 = vsel %vm30_vm0, %v3730_v27, 0.0 }
0x13fd   :  { %v3716_v25 = vpop.f32.mrf.mxu1 }
0x13fe   :  { %v3717_v22 = vadd.f32 %v7313_v32, %v3716_v25  ;;  %v3747_v13 = vsel %vm30_vm0, %v3729_v61, 0.0  ;;  %v3732_v15 = vadd.f32 %v3722_v38, %v11885_v46 }
0x13ff   :  { %3745 = vadd.xlane.f32.xlu0 %v3744_v2  ;;  %3748 = vadd.xlane.f32.xlu1 %v3747_v13 }
0x1400   :  { %v3731_v54 = vadd.f32 %v3717_v22, %v11884_v40  ;;  %v3756_v20 = vsel %vm30_vm0, %v3732_v15, 0.0 }
0x1402   :  { %v3753_v11 = vsel %vm30_vm0, %v3731_v54, 0.0 }
0x1403   :  { %3751 = vadd.xlane.f32.xlu0 %v3750_v5  ;;  %3754 = vadd.xlane.f32.xlu1 %v3753_v11 }
0x1407   :  { %3757 = vadd.xlane.f32.xlu0 %v3756_v20 }
0x147e   :  { %v3740_v59 = vpop.xlane.xlu1 %3739 }
0x147f   :  { %v3760_v12 = vmul.f32 0.03125, %v3740_v59 }
0x1480   :  { %v3737_v14 = vpop.xlane.xlu0 %3736 }
0x1481   :  { %v10490_v56 = vsub.f32 %v3726_v53, %v3760_v12  ;;  %v3759_v19 = vmul.f32 0.03125, %v3737_v14 }
0x1483   :  { %v10492_v10 = vsub.f32 %v3725_v8, %v3759_v19  ;;  %v3776_v60 = vmul.f32 %v10490_v56, %v10490_v56  ;;  %v7322_v19 = vld [vmem:[%s11842_s3 + $0x9] ss:$0 sm:$0xff] }
0x1484   :  { %v3743_v63 = vpop.xlane.xlu0 %3742 }
0x1485   :  { %v3761_v21 = vmul.f32 0.03125, %v3743_v63  ;;  %v3786_v30 = vsel %vm30_vm0, %v3776_v60, 0.0  ;;  %v3775_v37 = vmul.f32 %v10492_v10, %v10492_v10 }
0x1486   :  { %3787 = vadd.xlane.f32.xlu0 %v3786_v30 }
0x1487   :  { %v10499_v39 = vsub.f32 %v3727_v55, %v3761_v21  ;;  %v3783_v36 = vsel %vm30_vm0, %v3775_v37, 0.0  ;;  %v3866_v55 = vld [vmem:[%s11841_s2 + $0x150] sm:$0xff] }
0x1488   :  { %v3749_v42 = vpop.xlane.xlu1 %3748  ;;  %3784 = vadd.xlane.f32.xlu1 %v3783_v36  ;;  %v3746_v48 = vpop.xlane.xlu0 %3745  ;;  %8388 = vmatprep.subr.mxu0 %v3866_v55 }
0x1489   :  { %v3763_v3 = vmul.f32 0.03125, %v3749_v42  ;;  %v3762_v41 = vmul.f32 0.03125, %v3746_v48  ;;  %v3777_v16 = vmul.f32 %v10499_v39, %v10499_v39  ;;  %8389 = vmatpush3.msra.mxu0 %v3866_v55  ;;  %v7323_v42 = vld [vmem:[%s11842_s3 + $0xa] ss:$0 sm:$0xff]  ;;  %v4078_v55 = vld [vmem:[%s11841_s2 + $0x180] sm:$0xff] }
0x148a   :  { %8390 = vmatprep.subr.mxu0 %v3865_v1 }
0x148b   :  { %v10504_v62 = vsub.f32 %v3729_v61, %v3763_v3  ;;  %v10506_v23 = vsub.f32 %v3728_v58, %v3762_v41  ;;  %v3789_v24 = vsel %vm30_vm0, %v3777_v16, 0.0  ;;  %v3864_v58 = vld [vmem:[%s11841_s2 + $0x140] sm:$0xff]  ;;  %8391 = vmatpush3.msra.mxu0 %v3865_v1  ;;  %v4077_v1 = vld [vmem:[%s11841_s2 + $0x178] sm:$0xff] }
0x148c   :  { %v3755_v26 = vpop.xlane.xlu1 %3754  ;;  %3790 = vadd.xlane.f32.xlu1 %v3789_v24  ;;  %v3752_v33 = vpop.xlane.xlu0 %3751  ;;  %8392 = vmatprep.subr.mxu0 %v3864_v58 }
0x148d   :  { %v3765_v32 = vmul.f32 0.03125, %v3755_v26  ;;  %v3764_v45 = vmul.f32 0.03125, %v3752_v33  ;;  %v3779_v7 = vmul.f32 %v10504_v62, %v10504_v62  ;;  %v3778_v35 = vmul.f32 %v10506_v23, %v10506_v23  ;;  %8393 = vmatpush3.msra.mxu0 %v3864_v58  ;;  %v4076_v58 = vld [vmem:[%s11841_s2 + $0x170] sm:$0xff] }
0x148e   :  { %8394 = vmatprep.subr.mxu0 %v3863_v17 }
0x148f   :  { %v10513_v43 = vsub.f32 %v3731_v54, %v3765_v32  ;;  %v10515_v53 = vsub.f32 %v3730_v27, %v3764_v45  ;;  %v3795_v29 = vsel %vm30_vm0, %v3779_v7, 0.0  ;;  %v3792_v47 = vsel %vm30_vm0, %v3778_v35, 0.0  ;;  %8395 = vmatpush3.msra.mxu0 %v3863_v17  ;;  %v4075_v17 = vld [vmem:[%s11841_s2 + $0x168] sm:$0xff] }
0x1490   :  { %3796 = vadd.xlane.f32.xlu1 %v3795_v29  ;;  %3793 = vadd.xlane.f32.xlu0 %v3792_v47  ;;  %v3758_v4 = vpop.xlane.xlu0 %3757 }
0x1491   :  { %v3766_v8 = vmul.f32 0.03125, %v3758_v4  ;;  %v3781_v6 = vmul.f32 %v10513_v43, %v10513_v43  ;;  %v3780_v57 = vmul.f32 %v10515_v53, %v10515_v53 }
0x1493   :  { %v10523_v0 = vsub.f32 %v3732_v15, %v3766_v8  ;;  %v3801_v51 = vsel %vm30_vm0, %v3781_v6, 0.0  ;;  %v3798_v34 = vsel %vm30_vm0, %v3780_v57, 0.0 }
0x1494   :  { %3802 = vadd.xlane.f32.xlu1 %v3801_v51  ;;  %3799 = vadd.xlane.f32.xlu0 %v3798_v34 }
0x1495   :  { %v3782_v49 = vmul.f32 %v10523_v0, %v10523_v0 }
0x1497   :  { %v3804_v52 = vsel %vm30_vm0, %v3782_v49, 0.0 }
0x1498   :  { %3805 = vadd.xlane.f32.xlu0 %v3804_v52  ;;  %v4080_v52 = vld [vmem:[%s11841_s2 + $0x190] sm:$0xff] }
0x1499   :  { %8408 = vmatprep.subr.mxu1 %v4080_v52 }
0x149a   :  { %8409 = vmatpush3.msra.mxu1 %v4080_v52 }
0x150f   :  { %v3788_v18 = vpop.xlane.xlu0 %3787 }
0x1510   :  { %v3808_v50 = vmul.f32 0.03125, %v3788_v18  ;;  %v4074_v18 = vld [vmem:[%s11841_s2 + $0x160] sm:$0xff] }
0x1511   :  { %v3785_v9 = vpop.xlane.xlu1 %3784 }
0x1512   :  { %v3816_v31 = vadd.f32 1e-06, %v3808_v50  ;;  %v3807_v28 = vmul.f32 0.03125, %v3785_v9  ;;  %v4073_v50 = vld [vmem:[%s11841_s2 + $0x158] sm:$0xff]  ;;  %v7324_v9 = vld [vmem:[%s11842_s3 + $0xb] ss:$0 sm:$0xff] }
0x1514   :  { %8950 = vrsqrt.f32 %v3816_v31  ;;  %v3815_v61 = vadd.f32 1e-06, %v3807_v28 }
0x1515   :  { %v3791_v25 = vpop.xlane.xlu1 %3790 }
0x1516   :  { %8952 = vrsqrt.f32 %v3815_v61  ;;  %v3809_v2 = vmul.f32 0.03125, %v3791_v25 }
0x1518   :  { %v3817_v44 = vadd.f32 1e-06, %v3809_v2 }
0x1519   :  { %v3797_v27 = vpop.xlane.xlu1 %3796  ;;  %v3794_v38 = vpop.xlane.xlu0 %3793 }
0x151a   :  { %8954 = vrsqrt.f32 %v3817_v44  ;;  %v3811_v22 = vmul.f32 0.03125, %v3797_v27  ;;  %v3810_v13 = vmul.f32 0.03125, %v3794_v38 }
0x151c   :  { %v3819_v40 = vadd.f32 1e-06, %v3811_v22  ;;  %v3818_v54 = vadd.f32 1e-06, %v3810_v13 }
0x151d   :  { %v3803_v46 = vpop.xlane.xlu1 %3802  ;;  %v3800_v15 = vpop.xlane.xlu0 %3799 }
0x151e   :  { %8956 = vrsqrt.f32 %v3819_v40  ;;  %v3813_v5 = vmul.f32 0.03125, %v3803_v46  ;;  %v3812_v11 = vmul.f32 0.03125, %v3800_v15 }
0x151f   :  { %8958 = vrsqrt.f32 %v3818_v54 }
0x1520   :  { %v3821_v20 = vadd.f32 1e-06, %v3813_v5  ;;  %v3820_v59 = vadd.f32 1e-06, %v3812_v11 }
0x1521   :  { %v8951_v12 = vpop.eup %8950  ;;  %v3806_v14 = vpop.xlane.xlu0 %3805 }
0x1522   :  { %v3832_v60 = vmul.f32 %v8951_v12, %v10490_v56  ;;  %8960 = vrsqrt.f32 %v3821_v20  ;;  %v3814_v63 = vmul.f32 0.03125, %v3806_v14 }
0x1523   :  { %v8953_v21 = vpop.eup %8952  ;;  %8962 = vrsqrt.f32 %v3820_v59 }
0x1524   :  { %v3822_v30 = vadd.f32 1e-06, %v3814_v63  ;;  %v3831_v37 = vmul.f32 %v8953_v21, %v10492_v10  ;;  %v3844_v36 = vmul.f32 %v7322_v19, %v3832_v60 }
0x1526   :  { %8964 = vrsqrt.f32 %v3822_v30  ;;  %v3843_v48 = vmul.f32 %v7322_v19, %v3831_v37  ;;  %v10553_v56 = vadd.f32 %v7323_v42, %v3844_v36 }
0x1527   :  { %v8955_v3 = vpop.eup %8954 }
0x1528   :  { %v10550_v41 = vadd.f32 %v7323_v42, %v3843_v48  ;;  %v3833_v16 = vmul.f32 %v8955_v3, %v10499_v39 }
0x152a   :  { %8396 = vmatprep.mubr.msk.f32.mxu0 %vm30_vm0, %v10550_v41  ;;  %v3845_v24 = vmul.f32 %v7322_v19, %v3833_v16 }
0x152b   :  { %v8957_v26 = vpop.eup %8956  ;;  %8397 = vmatmul.mubr.msk.f32.vlgmr.msra.gmra.mxu0 %vm30_vm0, %v10553_v56 }
0x152c   :  { %v8959_v10 = vpop.eup %8958  ;;  %v10559_v33 = vadd.f32 %v7323_v42, %v3845_v24  ;;  %v3835_v32 = vmul.f32 %v8957_v26, %v10504_v62 }
0x152d   :  { %v3834_v45 = vmul.f32 %v8959_v10, %v10506_v23 }
0x152e   :  { %8399 = vmatprep.mubr.msk.f32.mxu0 %vm30_vm0, %v10559_v33  ;;  %v3847_v39 = vmul.f32 %v7322_v19, %v3835_v32 }
0x152f   :  { %v8961_v7 = vpop.eup %8960  ;;  %v3846_v35 = vmul.f32 %v7322_v19, %v3834_v45 }
0x1530   :  { %v8963_v29 = vpop.eup %8962  ;;  %v10565_v47 = vadd.f32 %v7323_v42, %v3847_v39  ;;  %v3837_v4 = vmul.f32 %v8961_v7, %v10513_v43 }
0x1531   :  { %v10568_v8 = vadd.f32 %v7323_v42, %v3846_v35  ;;  %v3836_v6 = vmul.f32 %v8963_v29, %v10515_v53 }
0x1532   :  { %v3849_v57 = vmul.f32 %v7322_v19, %v3837_v4 }
0x1533   :  { %v8965_v51 = vpop.eup %8964  ;;  %8400 = vmatmul.mubr.msk.f32.gmra.mxu0 %vm30_vm0, %v10568_v8  ;;  %v3848_v62 = vmul.f32 %v7322_v19, %v3836_v6 }
0x1534   :  { %8402 = vmatprep.mubr.msk.f32.mxu0 %vm30_vm0, %v10565_v47  ;;  %v10575_v23 = vadd.f32 %v7323_v42, %v3849_v57  ;;  %v3838_v34 = vmul.f32 %v8965_v51, %v10523_v0  ;;  %v4079_v0 = vld [vmem:[%s11841_s2 + $0x188] sm:$0xff] }
0x1535   :  { %v10578_v49 = vadd.f32 %v7323_v42, %v3848_v62  ;;  %8410 = vmatprep.subr.mxu1 %v4079_v0 }
0x1536   :  { %v3850_v43 = vmul.f32 %v7322_v19, %v3838_v34  ;;  %8411 = vmatpush3.msra.mxu1 %v4079_v0 }
0x1537   :  { %8403 = vmatmul.mubr.msk.f32.gmra.mxu0 %vm30_vm0, %v10578_v49  ;;  %8412 = vmatprep.subr.mxu1 %v4078_v55 }
0x1538   :  { %8405 = vmatprep.mubr.msk.f32.mxu0 %vm30_vm0, %v10575_v23  ;;  %v10584_v53 = vadd.f32 %v7323_v42, %v3850_v43  ;;  %8413 = vmatpush3.msra.mxu1 %v4078_v55 }
0x1539   :  { %8414 = vmatprep.subr.mxu1 %v4077_v1 }
0x153a   :  { %8415 = vmatpush3.msra.mxu1 %v4077_v1 }
0x153b   :  { %8406 = vmatmul.mubr.msk.f32.gmra.mxu0 %vm30_vm0, %v10584_v53  ;;  %8416 = vmatprep.subr.mxu1 %v4076_v58 }
0x153c   :  { %8417 = vmatpush3.msra.mxu1 %v4076_v58 }
0x153d   :  { %8418 = vmatprep.subr.mxu1 %v4075_v17 }
0x153e   :  { %8419 = vmatpush3.msra.mxu1 %v4075_v17 }
0x153f   :  { %8420 = vmatprep.subr.mxu1 %v4074_v18 }
0x1540   :  { %8421 = vmatpush3.msra.mxu1 %v4074_v18 }
0x1541   :  { %8422 = vmatprep.subr.mxu1 %v4073_v50 }
0x1542   :  { %8423 = vmatpush3.msra.mxu1 %v4073_v50 }
0x15eb   :  { %v8398_v31 = vpop.f32.mrf.mxu0 }
0x15ec   :  { %v10615_v28 = vadd.f32 %v8398_v31, %v7324_v9 }
0x15ed   :  { %v3962_v61 = vpop.f32.mrf.mxu0 }
0x15ee   :  { %v4010_v25 = vmul.f32 0.044715, %v10615_v28  ;;  %v3963_v2 = vadd.f32 %v7324_v9, %v3962_v61 }
0x15f0   :  { %v4018_v44 = vmul.f32 %v4010_v25, %v10615_v28  ;;  %v4009_v27 = vmul.f32 0.044715, %v3963_v2 }
0x15f2   :  { %v4026_v38 = vmul.f32 %v4018_v44, %v10615_v28  ;;  %v4017_v22 = vmul.f32 %v4009_v27, %v3963_v2  ;;  %v4001_v44 = vmul.f32 0.5, %v3963_v2 }
0x15f3   :  { %v8401_v13 = vpop.f32.mrf.mxu0 }
0x15f4   :  { %v4034_v40 = vadd.f32 %v4026_v38, %v10615_v28  ;;  %v4025_v54 = vmul.f32 %v4017_v22, %v3963_v2  ;;  %v10621_v46 = vadd.f32 %v8401_v13, %v7324_v9  ;;  %v4002_v38 = vmul.f32 0.5, %v10615_v28 }
0x15f5   :  { %v3972_v15 = vpop.f32.mrf.mxu0 }
0x15f6   :  { %v4042_v5 = vmul.f32 0.7978846, %v4034_v40  ;;  %v4033_v11 = vadd.f32 %v4025_v54, %v3963_v2  ;;  %v4012_v20 = vmul.f32 0.044715, %v10621_v46  ;;  %v3973_v59 = vadd.f32 %v7324_v9, %v3972_v15 }
0x15f7   :  { %v8404_v12 = vpop.f32.mrf.mxu0 }
0x15f8   :  { %8966 = vtanh.f32 %v4042_v5  ;;  %v4020_v14 = vmul.f32 %v4012_v20, %v10621_v46  ;;  %v4011_v19 = vmul.f32 0.044715, %v3973_v59  ;;  %v10625_v60 = vadd.f32 %v8404_v12, %v7324_v9 }
0x15f9   :  { %v3982_v63 = vpop.f32.mrf.mxu0  ;;  %v4041_v21 = vmul.f32 0.7978846, %v4033_v11  ;;  %v4003_v5 = vmul.f32 0.5, %v3973_v59  ;;  %v4004_v12 = vmul.f32 0.5, %v10621_v46 }
0x15fa   :  { %v4028_v30 = vmul.f32 %v4020_v14, %v10621_v46  ;;  %v4019_v37 = vmul.f32 %v4011_v19, %v3973_v59  ;;  %v4014_v36 = vmul.f32 0.044715, %v10625_v60  ;;  %v3983_v42 = vadd.f32 %v7324_v9, %v3982_v63 }
0x15fb   :  { %v8407_v48 = vpop.f32.mrf.mxu0  ;;  %8968 = vtanh.f32 %v4041_v21 }
0x15fc   :  { %v4036_v3 = vadd.f32 %v4028_v30, %v10621_v46  ;;  %v4027_v16 = vmul.f32 %v4019_v37, %v3973_v59  ;;  %v4022_v24 = vmul.f32 %v4014_v36, %v10625_v60  ;;  %v4013_v26 = vmul.f32 0.044715, %v3983_v42 }
0x15fd   :  { %v10631_v10 = vadd.f32 %v8407_v48, %v7324_v9  ;;  %v3992_v32 = vpop.f32.mrf.mxu0  ;;  %v4005_v28 = vmul.f32 0.5, %v3983_v42  ;;  %v4006_v30 = vmul.f32 0.5, %v10625_v60 }
0x15fe   :  { %v4035_v45 = vadd.f32 %v4027_v16, %v3973_v59  ;;  %v4030_v39 = vmul.f32 %v4022_v24, %v10625_v60  ;;  %v4021_v7 = vmul.f32 %v4013_v26, %v3983_v42  ;;  %v3993_v35 = vadd.f32 %v7324_v9, %v3992_v32 }
0x15ff   :  { %v4016_v29 = vmul.f32 0.044715, %v10631_v10  ;;  %v4044_v4 = vmul.f32 0.7978846, %v4036_v3  ;;  %v4008_v24 = vmul.f32 0.5, %v10631_v10 }
0x1600   :  { %v4038_v6 = vadd.f32 %v4030_v39, %v10625_v60  ;;  %v4029_v57 = vmul.f32 %v4021_v7, %v3983_v42  ;;  %v4015_v51 = vmul.f32 0.044715, %v3993_v35  ;;  %v4043_v62 = vmul.f32 0.7978846, %v4035_v45  ;;  %v7333_v60 = vld [vmem:[%s11842_s3 + $0xc] ss:$0 sm:$0xff] }
0x1601   :  { %v4024_v34 = vmul.f32 %v4016_v29, %v10631_v10  ;;  %8970 = vtanh.f32 %v4044_v4  ;;  %v4007_v46 = vmul.f32 0.5, %v3993_v35 }
0x1602   :  { %v4037_v43 = vadd.f32 %v4029_v57, %v3983_v42  ;;  %v4023_v52 = vmul.f32 %v4015_v51, %v3993_v35  ;;  %8972 = vtanh.f32 %v4043_v62  ;;  %v4046_v0 = vmul.f32 0.7978846, %v4038_v6 }
0x1603   :  { %v4032_v55 = vmul.f32 %v4024_v34, %v10631_v10 }
0x1604   :  { %v4031_v1 = vmul.f32 %v4023_v52, %v3993_v35  ;;  %v4045_v58 = vmul.f32 0.7978846, %v4037_v43  ;;  %8974 = vtanh.f32 %v4046_v0 }
0x1605   :  { %v8967_v17 = vpop.eup %8966  ;;  %v4040_v18 = vadd.f32 %v4032_v55, %v10631_v10 }
0x1606   :  { %v4039_v50 = vadd.f32 %v4031_v1, %v3993_v35  ;;  %8976 = vtanh.f32 %v4045_v58  ;;  %v4058_v61 = vadd.f32 1.0, %v8967_v17 }
0x1607   :  { %v4048_v9 = vmul.f32 0.7978846, %v4040_v18 }
0x1608   :  { %v8969_v31 = vpop.eup %8968  ;;  %v4047_v25 = vmul.f32 0.7978846, %v4039_v50  ;;  %v4066_v13 = vmul.f32 %v4058_v61, %v4002_v38 }
0x1609   :  { %v4057_v27 = vadd.f32 1.0, %v8969_v31  ;;  %8978 = vtanh.f32 %v4048_v9 }
0x160a   :  { %8980 = vtanh.f32 %v4047_v25 }
0x160b   :  { %v4065_v22 = vmul.f32 %v4057_v27, %v4001_v44 }
0x160d   :  { %8424 = vmatprep.mubr.msk.f32.mxu1 %vm2010_vm15, %v4065_v22 }
0x160e   :  { %v8971_v40 = vpop.eup %8970  ;;  %8425 = vmatmul.mubr.msk.f32.vlgmr.msra.gmra.mxu1 %vm2010_vm15, %v4066_v13 }
0x160f   :  { %v8973_v54 = vpop.eup %8972  ;;  %v4060_v15 = vadd.f32 1.0, %v8971_v40 }
0x1610   :  { %v4059_v11 = vadd.f32 1.0, %v8973_v54 }
0x1611   :  { %v8975_v20 = vpop.eup %8974  ;;  %v4068_v19 = vmul.f32 %v4060_v15, %v4004_v12 }
0x1612   :  { %v4067_v2 = vmul.f32 %v4059_v11, %v4003_v5  ;;  %v4062_v63 = vadd.f32 1.0, %v8975_v20 }
0x1613   :  { %v8977_v14 = vpop.eup %8976 }
0x1614   :  { %8427 = vmatprep.mubr.msk.f32.mxu1 %vm2010_vm15, %v4067_v2  ;;  %v4061_v21 = vadd.f32 1.0, %v8977_v14  ;;  %v4070_v59 = vmul.f32 %v4062_v63, %v4006_v30 }
0x1615   :  { %8428 = vmatmul.mubr.msk.f32.gmra.mxu1 %vm2010_vm15, %v4068_v19 }
0x1616   :  { %v8979_v37 = vpop.eup %8978  ;;  %v4069_v36 = vmul.f32 %v4061_v21, %v4005_v28 }
0x1617   :  { %v8981_v48 = vpop.eup %8980  ;;  %v4064_v3 = vadd.f32 1.0, %v8979_v37 }
0x1618   :  { %8430 = vmatprep.mubr.msk.f32.mxu1 %vm2010_vm15, %v4069_v36  ;;  %v4063_v16 = vadd.f32 1.0, %v8981_v48 }
0x1619   :  { %8431 = vmatmul.mubr.msk.f32.gmra.mxu1 %vm2010_vm15, %v4070_v59  ;;  %v4072_v42 = vmul.f32 %v4064_v3, %v4008_v24 }
0x161a   :  { %v4071_v26 = vmul.f32 %v4063_v16, %v4007_v46 }
0x161c   :  { %8433 = vmatprep.mubr.msk.f32.mxu1 %vm2010_vm15, %v4071_v26 }
0x161d   :  { %8434 = vmatmul.mubr.msk.f32.gmra.mxu1 %vm2010_vm15, %v4072_v42 }
0x16ce   :  { %v8426_v32 = vpop.f32.mrf.mxu1 }
0x16cf   :  { %v4182_v45 = vadd.f32 %v8426_v32, %v7333_v60 }
0x16d0   :  { %v4176_v39 = vpop.f32.mrf.mxu1 }
0x16d1   :  { %v4216_v7 = vadd.f32 %v4182_v45, %v10553_v56  ;;  %v4177_v35 = vadd.f32 %v7333_v60, %v4176_v39 }
0x16d3   :  { %v4215_v29 = vadd.f32 %v4177_v35, %v10550_v41  ;;  %v4228_v10 = vsel %vm30_vm0, %v4216_v7, 0.0 }
0x16d4   :  { %4229 = vadd.xlane.f32.xlu0 %v4228_v10 }
0x16d5   :  { %v8429_v4 = vpop.f32.mrf.mxu1  ;;  %v4225_v6 = vsel %vm30_vm0, %v4215_v29, 0.0 }
0x16d6   :  { %v4192_v57 = vadd.f32 %v8429_v4, %v7333_v60  ;;  %4226 = vadd.xlane.f32.xlu1 %v4225_v6  ;;  %v4489_v6 = vld [vmem:[%s11841_s2 + $0x1d0] sm:$0xff] }
0x16d7   :  { %v4186_v51 = vpop.f32.mrf.mxu1  ;;  %8456 = vmatprep.subr.mxu1 %v4489_v6 }
0x16d8   :  { %v4218_v62 = vadd.f32 %v4192_v57, %v10568_v8  ;;  %v4187_v34 = vadd.f32 %v7333_v60, %v4186_v51  ;;  %v4356_v57 = vld [vmem:[%s11841_s2 + $0x1b0] sm:$0xff]  ;;  %8457 = vmatpush3.msra.mxu1 %v4489_v6  ;;  %v4488_v51 = vld [vmem:[%s11841_s2 + $0x1c8] sm:$0xff] }
0x16d9   :  { %v8432_v43 = vpop.f32.mrf.mxu1  ;;  %8436 = vmatprep.subr.mxu0 %v4356_v57  ;;  %8458 = vmatprep.subr.mxu1 %v4488_v51 }
0x16da   :  { %v4217_v52 = vadd.f32 %v4187_v34, %v10559_v33  ;;  %v4202_v0 = vadd.f32 %v8432_v43, %v7333_v60  ;;  %v4234_v56 = vsel %vm30_vm0, %v4218_v62, 0.0  ;;  %8437 = vmatpush3.msra.mxu0 %v4356_v57  ;;  %v4487_v34 = vld [vmem:[%s11841_s2 + $0x1c0] sm:$0xff]  ;;  %8459 = vmatpush3.msra.mxu1 %v4488_v51 }
0x16db   :  { %4235 = vadd.xlane.f32.xlu0 %v4234_v56  ;;  %v4196_v41 = vpop.f32.mrf.mxu1  ;;  %v4354_v43 = vld [vmem:[%s11841_s2 + $0x1a0] sm:$0xff]  ;;  %8460 = vmatprep.subr.mxu1 %v4487_v34  ;;  %v4598_v56 = vld [vmem:[%s11841_s2 + $0x1f0] sm:$0xff] }
0x16dc   :  { %v4220_v55 = vadd.f32 %v4202_v0, %v10578_v49  ;;  %v4197_v1 = vadd.f32 %v7333_v60, %v4196_v41  ;;  %v4231_v58 = vsel %vm30_vm0, %v4217_v52, 0.0  ;;  %v4486_v0 = vld [vmem:[%s11841_s2 + $0x1b8] sm:$0xff]  ;;  %8461 = vmatpush3.msra.mxu1 %v4487_v34 }
0x16dd   :  { %4232 = vadd.xlane.f32.xlu1 %v4231_v58  ;;  %v8435_v17 = vpop.f32.mrf.mxu1  ;;  %8462 = vmatprep.subr.mxu1 %v4486_v0 }
0x16de   :  { %v4219_v18 = vadd.f32 %v4197_v1, %v10565_v47  ;;  %v4212_v50 = vadd.f32 %v8435_v17, %v7333_v60  ;;  %v4240_v8 = vsel %vm30_vm0, %v4220_v55, 0.0  ;;  %8463 = vmatpush3.msra.mxu1 %v4486_v0 }
0x16df   :  { %4241 = vadd.xlane.f32.xlu0 %v4240_v8  ;;  %v4206_v9 = vpop.f32.mrf.mxu1 }
0x16e0   :  { %v4222_v33 = vadd.f32 %v4212_v50, %v10584_v53  ;;  %v4207_v31 = vadd.f32 %v7333_v60, %v4206_v9  ;;  %v4237_v61 = vsel %vm30_vm0, %v4219_v18, 0.0 }
0x16e1   :  { %4238 = vadd.xlane.f32.xlu1 %v4237_v61 }
0x16e2   :  { %v4221_v49 = vadd.f32 %v4207_v31, %v10575_v23  ;;  %v4246_v25 = vsel %vm30_vm0, %v4222_v33, 0.0 }
0x16e3   :  { %4247 = vadd.xlane.f32.xlu0 %v4246_v25 }
0x16e4   :  { %v4243_v44 = vsel %vm30_vm0, %v4221_v49, 0.0 }
0x16e5   :  { %4244 = vadd.xlane.f32.xlu1 %v4243_v44 }
0x175d   :  { %v4230_v47 = vpop.xlane.xlu0 %4229 }
0x175e   :  { %v4250_v27 = vmul.f32 0.03125, %v4230_v47 }
0x175f   :  { %v4227_v38 = vpop.xlane.xlu1 %4226 }
0x1760   :  { %v10670_v22 = vsub.f32 %v4216_v7, %v4250_v27  ;;  %v4249_v13 = vmul.f32 0.03125, %v4227_v38 }
0x1762   :  { %v10672_v40 = vsub.f32 %v4215_v29, %v4249_v13  ;;  %v4266_v53 = vmul.f32 %v10670_v22, %v10670_v22 }
0x1764   :  { %v4236_v54 = vpop.xlane.xlu0 %4235  ;;  %v4276_v23 = vsel %vm30_vm0, %v4266_v53, 0.0  ;;  %v4265_v15 = vmul.f32 %v10672_v40, %v10672_v40 }
0x1765   :  { %v4252_v5 = vmul.f32 0.03125, %v4236_v54  ;;  %4277 = vadd.xlane.f32.xlu0 %v4276_v23 }
0x1766   :  { %v4233_v11 = vpop.xlane.xlu1 %4232  ;;  %v4273_v20 = vsel %vm30_vm0, %v4265_v15, 0.0 }
0x1767   :  { %v10680_v12 = vsub.f32 %v4218_v62, %v4252_v5  ;;  %v4251_v2 = vmul.f32 0.03125, %v4233_v11  ;;  %4274 = vadd.xlane.f32.xlu1 %v4273_v20  ;;  %v4355_v62 = vld [vmem:[%s11841_s2 + $0x1a8] sm:$0xff] }
0x1768   :  { %v4242_v14 = vpop.xlane.xlu0 %4241  ;;  %8438 = vmatprep.subr.mxu0 %v4355_v62  ;;  %v7342_v11 = vld [vmem:[%s11842_s3 + $0xd] ss:$0 sm:$0xff] }
0x1769   :  { %v10682_v19 = vsub.f32 %v4217_v52, %v4251_v2  ;;  %v4254_v63 = vmul.f32 0.03125, %v4242_v14  ;;  %v4268_v28 = vmul.f32 %v10680_v12, %v10680_v12  ;;  %8439 = vmatpush3.msra.mxu0 %v4355_v62  ;;  %v4353_v52 = vld [vmem:[%s11841_s2 + $0x198] sm:$0xff] }
0x176a   :  { %v4239_v21 = vpop.xlane.xlu1 %4238  ;;  %8440 = vmatprep.subr.mxu0 %v4354_v43 }
0x176b   :  { %v10686_v30 = vsub.f32 %v4220_v55, %v4254_v63  ;;  %v4253_v37 = vmul.f32 0.03125, %v4239_v21  ;;  %v4282_v36 = vsel %vm30_vm0, %v4268_v28, 0.0  ;;  %v4267_v48 = vmul.f32 %v10682_v19, %v10682_v19  ;;  %8441 = vmatpush3.msra.mxu0 %v4354_v43  ;;  %v7343_v21 = vld [vmem:[%s11842_s3 + $0xe] ss:$0 sm:$0xff] }
0x176c   :  { %4283 = vadd.xlane.f32.xlu0 %v4282_v36  ;;  %v4248_v59 = vpop.xlane.xlu0 %4247  ;;  %8442 = vmatprep.subr.mxu0 %v4353_v52 }
0x176d   :  { %v10691_v3 = vsub.f32 %v4219_v18, %v4253_v37  ;;  %v4256_v46 = vmul.f32 0.03125, %v4248_v59  ;;  %v4279_v16 = vsel %vm30_vm0, %v4267_v48, 0.0  ;;  %v4270_v24 = vmul.f32 %v10686_v30, %v10686_v30  ;;  %8443 = vmatpush3.msra.mxu0 %v4353_v52 }
0x176e   :  { %4280 = vadd.xlane.f32.xlu1 %v4279_v16  ;;  %v4245_v26 = vpop.xlane.xlu1 %4244  ;;  %8476 = vmatprep.subr.mxu0 %v4598_v56 }
0x176f   :  { %v10696_v42 = vsub.f32 %v4222_v33, %v4256_v46  ;;  %v4255_v60 = vmul.f32 0.03125, %v4245_v26  ;;  %v4288_v32 = vsel %vm30_vm0, %v4270_v24, 0.0  ;;  %v4269_v45 = vmul.f32 %v10691_v3, %v10691_v3  ;;  %v4596_v26 = vld [vmem:[%s11841_s2 + $0x1e0] sm:$0xff] }
0x1770   :  { %4289 = vadd.xlane.f32.xlu0 %v4288_v32 }
0x1771   :  { %v10701_v39 = vsub.f32 %v4221_v49, %v4255_v60  ;;  %v4285_v7 = vsel %vm30_vm0, %v4269_v45, 0.0  ;;  %v4272_v35 = vmul.f32 %v10696_v42, %v10696_v42 }
0x1772   :  { %4286 = vadd.xlane.f32.xlu1 %v4285_v7 }
0x1773   :  { %v4294_v29 = vsel %vm30_vm0, %v4272_v35, 0.0  ;;  %v4271_v10 = vmul.f32 %v10701_v39, %v10701_v39 }
0x1774   :  { %4295 = vadd.xlane.f32.xlu0 %v4294_v29 }
0x1775   :  { %v4291_v4 = vsel %vm30_vm0, %v4271_v10, 0.0 }
0x1776   :  { %4292 = vadd.xlane.f32.xlu1 %v4291_v4  ;;  %v4595_v4 = vld [vmem:[%s11841_s2 + $0x1d8] sm:$0xff] }
0x17ee   :  { %v4278_v41 = vpop.xlane.xlu0 %4277 }
0x17ef   :  { %v4298_v55 = vmul.f32 0.03125, %v4278_v41 }
0x17f0   :  { %v4275_v1 = vpop.xlane.xlu1 %4274 }
0x17f1   :  { %v4306_v58 = vadd.f32 1e-06, %v4298_v55  ;;  %v4297_v17 = vmul.f32 0.03125, %v4275_v1 }
0x17f3   :  { %8982 = vrsqrt.f32 %v4306_v58  ;;  %v4305_v18 = vadd.f32 1e-06, %v4297_v17 }
0x17f5   :  { %8984 = vrsqrt.f32 %v4305_v18  ;;  %v4284_v50 = vpop.xlane.xlu0 %4283 }
0x17f6   :  { %v4300_v8 = vmul.f32 0.03125, %v4284_v50 }
0x17f7   :  { %v4281_v9 = vpop.xlane.xlu1 %4280 }
0x17f8   :  { %v4308_v33 = vadd.f32 1e-06, %v4300_v8  ;;  %v4299_v31 = vmul.f32 0.03125, %v4281_v9 }
0x17f9   :  { %v4290_v61 = vpop.xlane.xlu0 %4289 }
0x17fa   :  { %8986 = vrsqrt.f32 %v4308_v33  ;;  %v4307_v49 = vadd.f32 1e-06, %v4299_v31  ;;  %v4302_v25 = vmul.f32 0.03125, %v4290_v61 }
0x17fb   :  { %v4287_v44 = vpop.xlane.xlu1 %4286 }
0x17fc   :  { %8988 = vrsqrt.f32 %v4307_v49  ;;  %v4310_v47 = vadd.f32 1e-06, %v4302_v25  ;;  %v4301_v27 = vmul.f32 0.03125, %v4287_v44 }
0x17fd   :  { %v4296_v38 = vpop.xlane.xlu0 %4295 }
0x17fe   :  { %8990 = vrsqrt.f32 %v4310_v47  ;;  %v4309_v13 = vadd.f32 1e-06, %v4301_v27  ;;  %v4304_v53 = vmul.f32 0.03125, %v4296_v38 }
0x17ff   :  { %v4293_v54 = vpop.xlane.xlu1 %4292 }
0x1800   :  { %v8983_v23 = vpop.eup %8982  ;;  %8992 = vrsqrt.f32 %v4309_v13  ;;  %v4312_v15 = vadd.f32 1e-06, %v4304_v53  ;;  %v4303_v5 = vmul.f32 0.03125, %v4293_v54 }
0x1801   :  { %v4322_v20 = vmul.f32 %v8983_v23, %v10670_v22 }
0x1802   :  { %v8985_v2 = vpop.eup %8984  ;;  %8994 = vrsqrt.f32 %v4312_v15  ;;  %v4311_v14 = vadd.f32 1e-06, %v4303_v5 }
0x1803   :  { %v4321_v63 = vmul.f32 %v8985_v2, %v10672_v40  ;;  %v4334_v28 = vmul.f32 %v7342_v11, %v4322_v20  ;;  %v4597_v40 = vld [vmem:[%s11841_s2 + $0x1e8] sm:$0xff]  ;;  %v10955_v20 = vld [vmem:[%s11841_s2 + $0x280] sm:$0xff] }
0x1804   :  { %8996 = vrsqrt.f32 %v4311_v14 }
0x1805   :  { %v4333_v37 = vmul.f32 %v7342_v11, %v4321_v63  ;;  %v10747_v59 = vadd.f32 %v7343_v21, %v4334_v28  ;;  %v10961_v63 = vld [vmem:[%s11841_s2 + $0x278] sm:$0xff] }
0x1807   :  { %v8987_v36 = vpop.eup %8986  ;;  %v10745_v48 = vadd.f32 %v7343_v21, %v4333_v37  ;;  %11887 = vst [vmem:[#allocation14_spill] sm:$0xff] %v10747_v59 }
0x1808   :  { %v4324_v46 = vmul.f32 %v8987_v36, %v10680_v12  ;;  %v10968_v36 = vld [vmem:[%s11841_s2 + $0x290] sm:$0xff] }
0x1809   :  { %11886 = vst [vmem:[#allocation15_spill] sm:$0xff] %v10745_v48  ;;  %v8989_v22 = vpop.eup %8988  ;;  %8444 = vmatprep.mubr.msk.f32.mxu0 %vm30_vm0, %v10745_v48  ;;  %8464 = vmatprep.mubr.msk.f32.mxu1 %vm30_vm0, %v10745_v48 }
0x180a   :  { %8445 = vmatmul.mubr.msk.f32.vlgmr.msra.gmra.mxu0 %vm30_vm0, %v10747_v59  ;;  %8465 = vmatmul.mubr.msk.f32.vlgmr.msra.gmra.mxu1 %vm30_vm0, %v10747_v59  ;;  %v4323_v16 = vmul.f32 %v8989_v22, %v10682_v19  ;;  %v4336_v24 = vmul.f32 %v7342_v11, %v4324_v46 }
0x180b   :  { %v8991_v12 = vpop.eup %8990  ;;  %8477 = vmatpush3.msra.mxu0 %v4598_v56 }
0x180c   :  { %v4335_v60 = vmul.f32 %v7342_v11, %v4323_v16  ;;  %v4326_v32 = vmul.f32 %v8991_v12, %v10686_v30  ;;  %8478 = vmatprep.subr.mxu0 %v4597_v40  ;;  %v10769_v19 = vadd.f32 %v7343_v21, %v4336_v24  ;;  %v10975_v16 = vld [vmem:[%s11841_s2 + $0x288] sm:$0xff] }
0x180d   :  { %v8993_v45 = vpop.eup %8992  ;;  %8479 = vmatpush3.msra.mxu0 %v4597_v40 }
0x180e   :  { %v10766_v7 = vadd.f32 %v7343_v21, %v4335_v60  ;;  %v4325_v35 = vmul.f32 %v8993_v45, %v10691_v3  ;;  %8480 = vmatprep.subr.mxu0 %v4596_v26  ;;  %11889 = vst [vmem:[#allocation16_spill] sm:$0xff] %v10769_v19  ;;  %v4338_v10 = vmul.f32 %v7342_v11, %v4326_v32  ;;  %v10982_v60 = vld [vmem:[%s11841_s2 + $0x2a0] sm:$0xff] }
0x180f   :  { %v8995_v29 = vpop.eup %8994  ;;  %8481 = vmatpush3.msra.mxu0 %v4596_v26 }
0x1810   :  { %11888 = vst [vmem:[#allocation17_spill] sm:$0xff] %v10766_v7  ;;  %8447 = vmatprep.mubr.msk.f32.mxu0 %vm30_vm0, %v10766_v7  ;;  %8467 = vmatprep.mubr.msk.f32.mxu1 %vm30_vm0, %v10766_v7  ;;  %v4337_v30 = vmul.f32 %v7342_v11, %v4325_v35  ;;  %v4328_v6 = vmul.f32 %v8995_v29, %v10696_v42  ;;  %v10989_v29 = vld [vmem:[%s11841_s2 + $0x298] sm:$0xff] }
0x1811   :  { %v8997_v3 = vpop.eup %8996  ;;  %8448 = vmatmul.mubr.msk.f32.gmra.mxu0 %vm30_vm0, %v10769_v19  ;;  %8468 = vmatmul.mubr.msk.f32.gmra.mxu1 %vm30_vm0, %v10769_v19  ;;  %v10786_v62 = vadd.f32 %v7343_v21, %v4338_v10 }
0x1812   :  { %v10783_v57 = vadd.f32 %v7343_v21, %v4337_v30  ;;  %v4327_v51 = vmul.f32 %v8997_v3, %v10701_v39  ;;  %8482 = vmatprep.subr.mxu0 %v4595_v4  ;;  %v4340_v34 = vmul.f32 %v7342_v11, %v4328_v6  ;;  %v10996_v6 = vld [vmem:[%s11841_s2 + $0x2b0] sm:$0xff] }
0x1813   :  { %11891 = vst [vmem:[#allocation6_spill] sm:$0xff] %v10786_v62  ;;  %8483 = vmatpush3.msra.mxu0 %v4595_v4 }
0x1814   :  { %11890 = vst [vmem:[#allocation7_spill] sm:$0xff] %v10783_v57  ;;  %8450 = vmatprep.mubr.msk.f32.mxu0 %vm30_vm0, %v10783_v57  ;;  %8470 = vmatprep.mubr.msk.f32.mxu1 %vm30_vm0, %v10783_v57  ;;  %v4339_v42 = vmul.f32 %v7342_v11, %v4327_v51  ;;  %v10798_v39 = vadd.f32 %v7343_v21, %v4340_v34 }
0x1815   :  { %8451 = vmatmul.mubr.msk.f32.gmra.mxu0 %vm30_vm0, %v10786_v62  ;;  %8471 = vmatmul.mubr.msk.f32.gmra.mxu1 %vm30_vm0, %v10786_v62 }
0x1816   :  { %v10796_v43 = vadd.f32 %v7343_v21, %v4339_v42  ;;  %11893 = vst [vmem:[#allocation9_spill] sm:$0xff] %v10798_v39  ;;  %v11003_v42 = vld [vmem:[%s11841_s2 + $0x2a8] sm:$0xff] }
0x1818   :  { %11892 = vst [vmem:[#allocation8_spill] sm:$0xff] %v10796_v43  ;;  %8453 = vmatprep.mubr.msk.f32.mxu0 %vm30_vm0, %v10796_v43  ;;  %8473 = vmatprep.mubr.msk.f32.mxu1 %vm30_vm0, %v10796_v43 }
0x1819   :  { %8454 = vmatmul.mubr.msk.f32.gmra.mxu0 %vm30_vm0, %v10798_v39  ;;  %8474 = vmatmul.mubr.msk.f32.gmra.mxu1 %vm30_vm0, %v10798_v39 }
0x181a   :  { %8484 = vmatprep.mubr.msk.f32.mxu0 %vm30_vm0, %v10745_v48 }
0x181d   :  { %8485 = vmatmul.mubr.msk.f32.vlgmr.msra.gmra.mxu0 %vm30_vm0, %v10747_v59 }
0x181e   :  { %8487 = vmatprep.mubr.msk.f32.mxu0 %vm30_vm0, %v10766_v7 }
0x1821   :  { %8488 = vmatmul.mubr.msk.f32.gmra.mxu0 %vm30_vm0, %v10769_v19 }
0x1822   :  { %8490 = vmatprep.mubr.msk.f32.mxu0 %vm30_vm0, %v10783_v57 }
0x1825   :  { %8491 = vmatmul.mubr.msk.f32.gmra.mxu0 %vm30_vm0, %v10786_v62 }
0x1826   :  { %8493 = vmatprep.mubr.msk.f32.mxu0 %vm30_vm0, %v10796_v43 }
0x1829   :  { %8494 = vmatmul.mubr.msk.f32.gmra.mxu0 %vm30_vm0, %v10798_v39 }
0x18ca   :  { %v10824_v52 = vpop.f32.mrf.mxu0  ;;  %v10826_v0 = vpop.f32.mrf.mxu1 }
0x18cc   :  { %v10828_v56 = vpop.f32.mrf.mxu0  ;;  %v10832_v41 = vpop.f32.mrf.mxu1 }
0x18cd   :  { %8512 = vmatprep.mubr.msk.f32.mxu1 %vm282_vm2, %v10828_v56 }
0x18d1   :  { %v10834_v55 = vpop.f32.mrf.mxu0  ;;  %v10836_v1 = vpop.f32.mrf.mxu1 }
0x18d3   :  { %v10838_v58 = vpop.f32.mrf.mxu0  ;;  %v10840_v17 = vpop.f32.mrf.mxu1 }
0x18d5   :  { %v10842_v18 = vpop.f32.mrf.mxu0  ;;  %v10844_v50 = vpop.f32.mrf.mxu1 }
0x18d6   :  { %5100 = vrot.lane.b32.xlu1 %v10844_v50, %s9217_s11 }
0x18d7   :  { %v10848_v8 = vpop.f32.mrf.mxu0  ;;  %v10850_v9 = vpop.f32.mrf.mxu1 }
0x18d9   :  { %v10852_v33 = vpop.f32.mrf.mxu0  ;;  %v10854_v31 = vpop.f32.mrf.mxu1 }
0x18da   :  { %5098 = vrot.lane.b32.xlu1 %v10850_v9, %s9217_s11  ;;  %8496 = vmatprep.subr.msk.mxu1 %vm282_vm2, %v10854_v31 }
0x18db   :  { %v10860_v61 = vpop.f32.mrf.mxu0  ;;  %v10862_v49 = vpop.f32.mrf.mxu1  ;;  %8497 = vmatpush3.xpose.msk.msra.mxu1 %vm282_vm2, %v10854_v31 }
0x18dc   :  { %5102 = vrot.lane.b32.xlu0 %v10862_v49, %s9217_s11  ;;  %8498 = vmatprep.subr.msk.mxu1 %vm282_vm2, %v10862_v49 }
0x18dd   :  { %v10870_v25 = vpop.f32.mrf.mxu0 }
0x18de   :  { %5104 = vrot.lane.b32.xlu1 %v10854_v31, %s9217_s11 }
0x18df   :  { %v10874_v44 = vpop.f32.mrf.mxu0  ;;  %8499 = vmatpush3.xpose.msk.msra.mxu1 %vm282_vm2, %v10862_v49 }
0x18e0   :  { %8500 = vmatprep.subr.msk.mxu1 %vm282_vm2, %v10844_v50 }
0x18e1   :  { %v10880_v47 = vpop.f32.mrf.mxu0 }
0x18e3   :  { %v10882_v27 = vpop.f32.mrf.mxu0  ;;  %8501 = vmatpush3.xpose.msk.msra.mxu1 %vm282_vm2, %v10844_v50 }
0x18e4   :  { %8502 = vmatprep.subr.msk.mxu1 %vm282_vm2, %v10850_v9 }
0x18e5   :  { %v10888_v38 = vpop.f32.mrf.mxu0 }
0x18e7   :  { %v10890_v13 = vpop.f32.mrf.mxu0  ;;  %8503 = vmatpush3.xpose.msk.msra.mxu1 %vm282_vm2, %v10850_v9 }
0x18e8   :  { %8504 = vmatprep.subr.msk.mxu1 %vm282_vm2, %v10836_v1 }
0x18e9   :  { %v10896_v53 = vpop.f32.mrf.mxu0 }
0x18ea   :  { %8524 = vmatprep.subr.mxu0 %v10896_v53 }
0x18eb   :  { %v10899_v54 = vpop.f32.mrf.mxu0  ;;  %8505 = vmatpush3.xpose.msk.msra.mxu1 %vm282_vm2, %v10836_v1  ;;  %8525 = vmatpush3.msra.mxu0 %v10896_v53 }
0x18ec   :  { %8506 = vmatprep.subr.msk.mxu1 %vm282_vm2, %v10840_v17  ;;  %8526 = vmatprep.subr.mxu0 %v10899_v54 }
0x18ed   :  { %8527 = vmatpush3.msra.mxu0 %v10899_v54 }
0x18ee   :  { %8528 = vmatprep.subr.mxu0 %v10888_v38 }
0x18ef   :  { %8507 = vmatpush3.xpose.msk.msra.mxu1 %vm282_vm2, %v10840_v17  ;;  %8529 = vmatpush3.msra.mxu0 %v10888_v38 }
0x18f0   :  { %8508 = vmatprep.subr.msk.mxu1 %vm282_vm2, %v10826_v0  ;;  %8530 = vmatprep.subr.mxu0 %v10890_v13 }
0x18f1   :  { %8531 = vmatpush3.msra.mxu0 %v10890_v13 }
0x18f2   :  { %8532 = vmatprep.subr.mxu0 %v10880_v47 }
0x18f3   :  { %8509 = vmatpush3.xpose.msk.msra.mxu1 %vm282_vm2, %v10826_v0  ;;  %8533 = vmatpush3.msra.mxu0 %v10880_v47 }
0x18f4   :  { %8510 = vmatprep.subr.msk.mxu1 %vm282_vm2, %v10832_v41  ;;  %8534 = vmatprep.subr.mxu0 %v10882_v27 }
0x18f5   :  { %8535 = vmatpush3.msra.mxu0 %v10882_v27 }
0x18f6   :  { %8536 = vmatprep.subr.mxu0 %v10870_v25 }
0x18f7   :  { %8511 = vmatpush3.xpose.msk.msra.mxu1 %vm282_vm2, %v10832_v41  ;;  %8537 = vmatpush3.msra.mxu0 %v10870_v25 }
0x18f8   :  { %8538 = vmatprep.subr.mxu0 %v10874_v44 }
0x18f9   :  { %8539 = vmatpush3.msra.mxu0 %v10874_v44 }
0x18fa   :  { %8513 = vmatmul.mubr.msk.f32.vlgmr.msra.gmra.mxu1 %vm282_vm2, %v10824_v52 }
0x18fb   :  { %8515 = vmatprep.mubr.msk.f32.mxu1 %vm282_vm2, %v10838_v58 }
0x18fe   :  { %8516 = vmatmul.mubr.msk.f32.gmra.mxu1 %vm282_vm2, %v10834_v55 }
0x18ff   :  { %8518 = vmatprep.mubr.msk.f32.mxu1 %vm282_vm2, %v10848_v8 }
0x1902   :  { %8519 = vmatmul.mubr.msk.f32.gmra.mxu1 %vm282_vm2, %v10842_v18 }
0x1903   :  { %8521 = vmatprep.mubr.msk.f32.mxu1 %vm282_vm2, %v10860_v61 }
0x1906   :  { %8522 = vmatmul.mubr.msk.f32.gmra.mxu1 %vm282_vm2, %v10852_v33 }
0x1948   :  { %v10944_v23 = vpop.permute.xlu1 %5100 }
0x194c   :  { %v10946_v15 = vpop.permute.xlu1 %5098 }
0x1950   :  { %v10948_v5 = vpop.permute.xlu1 %5104 }
0x1951   :  { %8552 = vmatprep.subr.msk.mxu0 %vm282_vm2, %v10948_v5 }
0x19ba   :  { %v8514_v11 = vpop.f32.mrf.mxu1 }
0x19bb   :  { %v4824_v2 = vadd.f32 %v10955_v20, %v8514_v11 }
0x19bc   :  { %v4818_v14 = vpop.f32.mrf.mxu1 }
0x19bd   :  { %v4819_v28 = vadd.f32 %v10961_v63, %v4818_v14  ;;  %v4860_v21 = vsel %vm2010_vm15, %v4824_v2, -inf }
0x19be   :  { %4861 = vmax.xlane.f32.xlu0 %v4860_v21  ;;  %v8517_v37 = vpop.f32.mrf.mxu1 }
0x19bf   :  { %v4834_v46 = vadd.f32 %v10968_v36, %v8517_v37  ;;  %v4857_v22 = vsel %vm2010_vm15, %v4819_v28, -inf  ;;  %v11012_v37 = vpop.permute.xlu0 %5102 }
0x19c0   :  { %v4828_v40 = vpop.f32.mrf.mxu1  ;;  %4858 = vmax.xlane.f32.xlu1 %v4857_v22 }
0x19c1   :  { %v4829_v12 = vadd.f32 %v10975_v16, %v4828_v40  ;;  %v4866_v24 = vsel %vm2010_vm15, %v4834_v46, -inf }
0x19c2   :  { %4867 = vmax.xlane.f32.xlu0 %v4866_v24  ;;  %v8520_v26 = vpop.f32.mrf.mxu1 }
0x19c3   :  { %v4844_v32 = vadd.f32 %v10982_v60, %v8520_v26  ;;  %v4863_v45 = vsel %vm2010_vm15, %v4829_v12, -inf }
0x19c4   :  { %v4838_v35 = vpop.f32.mrf.mxu1  ;;  %4864 = vmax.xlane.f32.xlu1 %v4863_v45 }
0x19c5   :  { %v4839_v10 = vadd.f32 %v10989_v29, %v4838_v35  ;;  %v4872_v4 = vsel %vm2010_vm15, %v4844_v32, -inf }
0x19c6   :  { %4873 = vmax.xlane.f32.xlu0 %v4872_v4  ;;  %v8523_v30 = vpop.f32.mrf.mxu1 }
0x19c7   :  { %v4854_v3 = vadd.f32 %v10996_v6, %v8523_v30  ;;  %v4869_v51 = vsel %vm2010_vm15, %v4839_v10, -inf }
0x19c8   :  { %4870 = vmax.xlane.f32.xlu1 %v4869_v51  ;;  %v4848_v34 = vpop.f32.mrf.mxu1 }
0x19c9   :  { %v4849_v11 = vadd.f32 %v11003_v42, %v4848_v34  ;;  %v4878_v14 = vsel %vm2010_vm15, %v4854_v3, -inf }
0x19ca   :  { %4879 = vmax.xlane.f32.xlu0 %v4878_v14 }
0x19cb   :  { %v4875_v21 = vsel %vm2010_vm15, %v4849_v11, -inf }
0x19cc   :  { %4876 = vmax.xlane.f32.xlu1 %v4875_v21 }
0x19dd   :  { %5094 = vrot.lane.b32.xlu1 %v10840_v17, %s9217_s11 }
0x19e0   :  { %5096 = vrot.lane.b32.xlu0 %v10836_v1, %s9217_s11 }
0x1a47   :  { %v4862_v22 = vpop.xlane.xlu0 %4861 }
0x1a48   :  { %v4882_v40 = vsub.f32 %v4824_v2, %v4862_v22 }
0x1a49   :  { %v4859_v24 = vpop.xlane.xlu1 %4858 }
0x1a4a   :  { %v4891_v26 = vmul.f32 1.442695, %v4882_v40  ;;  %v4881_v45 = vsub.f32 %v4819_v28, %v4859_v24 }
0x1a4b   :  { %v4868_v2 = vpop.xlane.xlu0 %4867 }
0x1a4c   :  { %8998 = vpow2.f32 %v4891_v26  ;;  %v4889_v35 = vmul.f32 1.442695, %v4881_v45  ;;  %v4884_v21 = vsub.f32 %v4834_v46, %v4868_v2 }
0x1a4d   :  { %v4865_v28 = vpop.xlane.xlu1 %4864 }
0x1a4e   :  { %9000 = vpow2.f32 %v4889_v35  ;;  %v4883_v40 = vsub.f32 %v4829_v12, %v4865_v28  ;;  %v4895_v24 = vmul.f32 1.442695, %v4884_v21 }
0x1a4f   :  { %v4874_v14 = vpop.xlane.xlu0 %4873 }
0x1a50   :  { %v4886_v26 = vsub.f32 %v4844_v32, %v4874_v14  ;;  %v4893_v35 = vmul.f32 1.442695, %v4883_v40  ;;  %9002 = vpow2.f32 %v4895_v24 }
0x1a51   :  { %v4871_v22 = vpop.xlane.xlu1 %4870 }
0x1a52   :  { %9004 = vpow2.f32 %v4893_v35 }
0x1a53   :  { %v4880_v45 = vpop.xlane.xlu0 %4879 }
0x1a54   :  { %v4888_v39 = vsub.f32 %v4854_v3, %v4880_v45 }
0x1a55   :  { %v4877_v43 = vpop.xlane.xlu1 %4876 }
0x1a56   :  { %v4887_v57 = vsub.f32 %v4849_v11, %v4877_v43  ;;  %v4903_v19 = vmul.f32 1.442695, %v4888_v39 }
0x1a57   :  { %v5097_v2 = vpop.permute.xlu0 %5096 }
0x1a58   :  { %v4901_v7 = vmul.f32 1.442695, %v4887_v57 }
0x1a59   :  { %v11014_v4 = vpop.eup %8998  ;;  %v5095_v28 = vpop.permute.xlu1 %5094 }
0x1a5a   :  { %v4908_v30 = vsel %vm2010_vm15, %v11014_v4, 0.0 }
0x1a5b   :  { %v11018_v51 = vpop.eup %9000  ;;  %4909 = vadd.xlane.f32.xlu0 %v4908_v30  ;;  %v4885_v30 = vsub.f32 %v4839_v10, %v4871_v22 }
0x1a5c   :  { %v4905_v34 = vsel %vm2010_vm15, %v11018_v51, 0.0 }
0x1a5d   :  { %4906 = vadd.xlane.f32.xlu1 %v4905_v34  ;;  %v4899_v34 = vmul.f32 1.442695, %v4886_v26  ;;  %v4897_v62 = vmul.f32 1.442695, %v4885_v30  ;;  %v11026_v46 = vpop.eup %9002 }
0x1a5e   :  { %v4914_v32 = vsel %vm2010_vm15, %v11026_v46, 0.0 }
0x1a5f   :  { %9006 = vpow2.f32 %v4899_v34  ;;  %v11028_v12 = vpop.eup %9004 }
0x1a60   :  { %9008 = vpow2.f32 %v4897_v62  ;;  %v4911_v3 = vsel %vm2010_vm15, %v11028_v12, 0.0 }
0x1a61   :  { %9010 = vpow2.f32 %v4903_v19 }
0x1a62   :  { %9012 = vpow2.f32 %v4901_v7 }
0x1a6c   :  { %v11032_v10 = vpop.eup %9006 }
0x1a6d   :  { %v11036_v43 = vpop.eup %9008  ;;  %v4920_v19 = vsel %vm2010_vm15, %v11032_v10, 0.0 }
0x1a6e   :  { %5090 = vrot.lane.b32.xlu1 %v10832_v41, %s9217_s11  ;;  %v11040_v7 = vpop.eup %9010  ;;  %v4917_v57 = vsel %vm2010_vm15, %v11036_v43, 0.0 }
0x1a6f   :  { %v11044_v62 = vpop.eup %9012  ;;  %v4926_v39 = vsel %vm2010_vm15, %v11040_v7, 0.0 }
0x1a70   :  { %v4923_v11 = vsel %vm2010_vm15, %v11044_v62, 0.0 }
0x1a71   :  { %5092 = vrot.lane.b32.xlu0 %v10826_v0, %s9217_s11 }
0x1a90   :  { %4915 = vadd.xlane.f32.xlu0 %v4914_v32 }
0x1a92   :  { %4912 = vadd.xlane.f32.xlu1 %v4911_v3 }
0x1a94   :  { %4921 = vadd.xlane.f32.xlu0 %v4920_v19 }
0x1a96   :  { %4918 = vadd.xlane.f32.xlu1 %v4917_v57 }
0x1a98   :  { %4927 = vadd.xlane.f32.xlu0 %v4926_v39 }
0x1a9a   :  { %4924 = vadd.xlane.f32.xlu1 %v4923_v11 }
0x1aab   :  { %5076 = vrot.lane.b32.xlu1 %v10824_v52, %s9217_s11 }
0x1aae   :  { %5074 = vrot.lane.b32.xlu0 %v10828_v56, %s9217_s11 }
0x1aaf   :  { %5080 = vrot.lane.b32.xlu1 %v10834_v55, %s9217_s11 }
0x1ab2   :  { %5078 = vrot.lane.b32.xlu0 %v10838_v58, %s9217_s11 }
0x1ab3   :  { %5084 = vrot.lane.b32.xlu1 %v10842_v18, %s9217_s11 }
0x1ab6   :  { %5082 = vrot.lane.b32.xlu0 %v10848_v8, %s9217_s11 }
0x1ab7   :  { %5088 = vrot.lane.b32.xlu1 %v10852_v33, %s9217_s11 }
0x1aba   :  { %5086 = vrot.lane.b32.xlu0 %v10860_v61, %s9217_s11 }
0x1abb   :  { %5353 = vrot.lane.b32.xlu1 %v10896_v53, %s9217_s11 }
0x1abe   :  { %5351 = vrot.lane.b32.xlu0 %v10899_v54, %s9217_s11 }
0x1abf   :  { %5349 = vrot.lane.b32.xlu1 %v10888_v38, %s9217_s11 }
0x1ac2   :  { %5345 = vrot.lane.b32.xlu0 %v10880_v47, %s9217_s11 }
0x1ac3   :  { %5347 = vrot.lane.b32.xlu1 %v10890_v13, %s9217_s11 }
0x1ac6   :  { %5341 = vrot.lane.b32.xlu0 %v10870_v25, %s9217_s11 }
0x1ac7   :  { %5343 = vrot.lane.b32.xlu1 %v10882_v27, %s9217_s11 }
0x1aca   :  { %5522 = vrot.lane.b32.xlu0 %v10854_v31, %s9218_s1 }
0x1acb   :  { %5339 = vrot.lane.b32.xlu1 %v10874_v44, %s9217_s11 }
0x1acf   :  { %5520 = vrot.lane.b32.xlu1 %v10862_v49, %s9218_s1 }
0x1ae4   :  { %v4910_v14 = vpop.xlane.xlu0 %4909 }
0x1ae5   :  { %9014 = vrcp.f32 %v4910_v14 }
0x1ae6   :  { %v4907_v21 = vpop.xlane.xlu1 %4906 }
0x1ae7   :  { %9016 = vrcp.f32 %v4907_v21 }
0x1af2   :  { %v9015_v22 = vpop.eup %9014 }
0x1af3   :  { %v4932_v26 = vmul.f32 %v9015_v22, %v11014_v4 }
0x1af4   :  { %v9017_v40 = vpop.eup %9016 }
0x1af5   :  { %v4930_v24 = vmul.f32 %v9017_v40, %v11018_v51 }
0x1af7   :  { %8540 = vmatprep.mubr.msk.f32.mxu0 %vm2010_vm15, %v4930_v24 }
0x1af8   :  { %8541 = vmatmul.mubr.msk.f32.vlgmr.msra.gmra.mxu0 %vm2010_vm15, %v4932_v26 }
0x1af9   :  { %8553 = vmatpush3.xpose.msk.msra.mxu0 %vm282_vm2, %v10948_v5  ;;  %v5093_v5 = vpop.permute.xlu0 %5092 }
0x1afa   :  { %8554 = vmatprep.subr.msk.mxu0 %vm282_vm2, %v11012_v37 }
0x1afd   :  { %8555 = vmatpush3.xpose.msk.msra.mxu0 %vm282_vm2, %v11012_v37  ;;  %v5091_v37 = vpop.permute.xlu1 %5090 }
0x1afe   :  { %8556 = vmatprep.subr.msk.mxu0 %vm282_vm2, %v10944_v23 }
0x1b01   :  { %8557 = vmatpush3.xpose.msk.msra.mxu0 %vm282_vm2, %v10944_v23 }
0x1b02   :  { %8558 = vmatprep.subr.msk.mxu0 %vm282_vm2, %v10946_v15 }
0x1b05   :  { %8559 = vmatpush3.xpose.msk.msra.mxu0 %vm282_vm2, %v10946_v15 }
0x1b06   :  { %8560 = vmatprep.subr.msk.mxu0 %vm282_vm2, %v5097_v2 }
0x1b09   :  { %8561 = vmatpush3.xpose.msk.msra.mxu0 %vm282_vm2, %v5097_v2 }
0x1b0a   :  { %8562 = vmatprep.subr.msk.mxu0 %vm282_vm2, %v5095_v28 }
0x1b0d   :  { %8563 = vmatpush3.xpose.msk.msra.mxu0 %vm282_vm2, %v5095_v28 }
0x1b0e   :  { %8564 = vmatprep.subr.msk.mxu0 %vm282_vm2, %v5093_v5 }
0x1b11   :  { %8565 = vmatpush3.xpose.msk.msra.mxu0 %vm282_vm2, %v5093_v5 }
0x1b12   :  { %8566 = vmatprep.subr.msk.mxu0 %vm282_vm2, %v5091_v37 }
0x1b15   :  { %8567 = vmatpush3.xpose.msk.msra.mxu0 %vm282_vm2, %v5091_v37 }
0x1b19   :  { %v4916_v23 = vpop.xlane.xlu0 %4915 }
0x1b1a   :  { %9018 = vrcp.f32 %v4916_v23 }
0x1b1b   :  { %v4913_v15 = vpop.xlane.xlu1 %4912 }
0x1b1c   :  { %9020 = vrcp.f32 %v4913_v15 }
0x1b1d   :  { %v4922_v4 = vpop.xlane.xlu0 %4921 }
0x1b1e   :  { %9022 = vrcp.f32 %v4922_v4 }
0x1b1f   :  { %v4919_v51 = vpop.xlane.xlu1 %4918 }
0x1b20   :  { %9024 = vrcp.f32 %v4919_v51 }
0x1b21   :  { %v4928_v45 = vpop.xlane.xlu0 %4927 }
0x1b22   :  { %9026 = vrcp.f32 %v4928_v45 }
0x1b23   :  { %v4925_v35 = vpop.xlane.xlu1 %4924 }
0x1b24   :  { %9028 = vrcp.f32 %v4925_v35 }
0x1b25   :  { %v5075_v30 = vpop.permute.xlu0 %5074 }
0x1b27   :  { %v5077_v34 = vpop.permute.xlu1 %5076  ;;  %v9019_v32 = vpop.eup %9018 }
0x1b28   :  { %v4936_v11 = vmul.f32 %v9019_v32, %v11026_v46 }
0x1b29   :  { %v9021_v3 = vpop.eup %9020  ;;  %v5079_v19 = vpop.permute.xlu0 %5078 }
0x1b2a   :  { %v4934_v57 = vmul.f32 %v9021_v3, %v11028_v12 }
0x1b2b   :  { %v5081_v39 = vpop.permute.xlu1 %5080  ;;  %v9023_v2 = vpop.eup %9022 }
0x1b2c   :  { %8543 = vmatprep.mubr.msk.f32.mxu0 %vm2010_vm15, %v4934_v57  ;;  %v4940_v40 = vmul.f32 %v9023_v2, %v11032_v10 }
0x1b2d   :  { %v9025_v28 = vpop.eup %9024  ;;  %v5083_v14 = vpop.permute.xlu0 %5082  ;;  %8544 = vmatmul.mubr.msk.f32.gmra.mxu0 %vm2010_vm15, %v4936_v11 }
0x1b2e   :  { %v4938_v21 = vmul.f32 %v9025_v28, %v11036_v43 }
0x1b2f   :  { %v5085_v22 = vpop.permute.xlu1 %5084  ;;  %v9027_v24 = vpop.eup %9026 }
0x1b30   :  { %8546 = vmatprep.mubr.msk.f32.mxu0 %vm2010_vm15, %v4938_v21  ;;  %v4944_v37 = vmul.f32 %v9027_v24, %v11040_v7 }
0x1b31   :  { %v9029_v26 = vpop.eup %9028  ;;  %v5087_v12 = vpop.permute.xlu0 %5086  ;;  %8547 = vmatmul.mubr.msk.f32.gmra.mxu0 %vm2010_vm15, %v4940_v40 }
0x1b32   :  { %v4942_v46 = vmul.f32 %v9029_v26, %v11044_v62 }
0x1b33   :  { %v5089_v5 = vpop.permute.xlu1 %5088 }
0x1b34   :  { %8549 = vmatprep.mubr.msk.f32.mxu0 %vm2010_vm15, %v4942_v46 }
0x1b35   :  { %8550 = vmatmul.mubr.msk.f32.gmra.mxu0 %vm2010_vm15, %v4944_v37  ;;  %v5352_v43 = vpop.permute.xlu0 %5351 }
0x1b36   :  { %8568 = vmatprep.mubr.msk.f32.mxu0 %vm282_vm2, %v5075_v30 }
0x1b37   :  { %v5354_v10 = vpop.permute.xlu1 %5353 }
0x1b38   :  { %8580 = vmatprep.subr.mxu1 %v5354_v10 }
0x1b39   :  { %8581 = vmatpush3.msra.mxu1 %v5354_v10  ;;  %8569 = vmatmul.mubr.msk.f32.vlgmr.msra.gmra.mxu0 %vm282_vm2, %v5077_v34  ;;  %v5346_v62 = vpop.permute.xlu0 %5345 }
0x1b3a   :  { %8571 = vmatprep.mubr.msk.f32.mxu0 %vm282_vm2, %v5079_v19  ;;  %8582 = vmatprep.subr.mxu1 %v5352_v43 }
0x1b3b   :  { %v5350_v23 = vpop.permute.xlu1 %5349  ;;  %8583 = vmatpush3.msra.mxu1 %v5352_v43 }
0x1b3c   :  { %8584 = vmatprep.subr.mxu1 %v5350_v23 }
0x1b3d   :  { %8585 = vmatpush3.msra.mxu1 %v5350_v23  ;;  %8572 = vmatmul.mubr.msk.f32.gmra.mxu0 %vm282_vm2, %v5081_v39  ;;  %v5342_v15 = vpop.permute.xlu0 %5341 }
0x1b3e   :  { %8574 = vmatprep.mubr.msk.f32.mxu0 %vm282_vm2, %v5083_v14 }
0x1b3f   :  { %v5348_v7 = vpop.permute.xlu1 %5347 }
0x1b40   :  { %8586 = vmatprep.subr.mxu1 %v5348_v7 }
0x1b41   :  { %8587 = vmatpush3.msra.mxu1 %v5348_v7  ;;  %8575 = vmatmul.mubr.msk.f32.gmra.mxu0 %vm282_vm2, %v5085_v22  ;;  %v11132_v45 = vpop.permute.xlu0 %5522 }
0x1b42   :  { %8577 = vmatprep.mubr.msk.f32.mxu0 %vm282_vm2, %v5087_v12  ;;  %8588 = vmatprep.subr.mxu1 %v5346_v62 }
0x1b43   :  { %v5344_v4 = vpop.permute.xlu1 %5343  ;;  %8589 = vmatpush3.msra.mxu1 %v5346_v62 }
0x1b44   :  { %8590 = vmatprep.subr.mxu1 %v5344_v4 }
0x1b45   :  { %8578 = vmatmul.mubr.msk.f32.gmra.mxu0 %vm282_vm2, %v5089_v5  ;;  %8591 = vmatpush3.msra.mxu1 %v5344_v4 }
0x1b46   :  { %8592 = vmatprep.subr.mxu1 %v5342_v15 }
0x1b47   :  { %v5340_v51 = vpop.permute.xlu1 %5339  ;;  %8593 = vmatpush3.msra.mxu1 %v5342_v15 }
0x1b48   :  { %8594 = vmatprep.subr.mxu1 %v5340_v51 }
0x1b49   :  { %8595 = vmatpush3.msra.mxu1 %v5340_v51 }
0x1b4a   :  { %8608 = vmatprep.subr.msk.mxu1 %vm282_vm2, %v11132_v45 }
0x1bb8   :  { %v11136_v35 = vpop.f32.mrf.mxu0 }
0x1bba   :  { %v11138_v30 = vpop.f32.mrf.mxu0 }
0x1bed   :  { %v11140_v34 = vpop.f32.mrf.mxu0 }
0x1bef   :  { %v11142_v32 = vpop.f32.mrf.mxu0 }
0x1bf1   :  { %v11144_v3 = vpop.f32.mrf.mxu0 }
0x1bf2   :  { %11894 = vst [vmem:[#allocation10_spill] sm:$0xff] %v11144_v3 }
0x1bf3   :  { %v11146_v19 = vpop.f32.mrf.mxu0 }
0x1bf4   :  { %11895 = vst [vmem:[#allocation11_spill] sm:$0xff] %v11146_v19 }
0x1bf5   :  { %v11148_v57 = vpop.f32.mrf.mxu0 }
0x1bf6   :  { %11896 = vst [vmem:[#allocation12_spill] sm:$0xff] %v11148_v57 }
0x1bf7   :  { %v11150_v39 = vpop.f32.mrf.mxu0 }
0x1bf8   :  { %11897 = vst [vmem:[#allocation13_spill] sm:$0xff] %v11150_v39 }
0x1bf9   :  { %v8570_v11 = vpop.f32.mrf.mxu0 }
0x1bfa   :  { %v5210_v2 = vadd.f32 %v10955_v20, %v8570_v11 }
0x1bfb   :  { %v5204_v28 = vpop.f32.mrf.mxu0 }
0x1bfc   :  { %v5205_v14 = vadd.f32 %v10961_v63, %v5204_v28  ;;  %v5246_v21 = vsel %vm2010_vm15, %v5210_v2, -inf }
0x1bfd   :  { %5247 = vmax.xlane.f32.xlu1 %v5246_v21  ;;  %v8573_v22 = vpop.f32.mrf.mxu0 }
0x1bfe   :  { %v5220_v40 = vadd.f32 %v10968_v36, %v8573_v22  ;;  %v5243_v24 = vsel %vm2010_vm15, %v5205_v14, -inf  ;;  %v11172_v22 = vpop.permute.xlu1 %5520 }
0x1bff   :  { %v5214_v26 = vpop.f32.mrf.mxu0  ;;  %5244 = vmax.xlane.f32.xlu0 %v5243_v24 }
0x1c00   :  { %v5215_v46 = vadd.f32 %v10975_v16, %v5214_v26  ;;  %v5252_v5 = vsel %vm2010_vm15, %v5220_v40, -inf }
0x1c01   :  { %v8576_v12 = vpop.f32.mrf.mxu0 }
0x1c02   :  { %v5230_v23 = vadd.f32 %v10982_v60, %v8576_v12  ;;  %v5249_v7 = vsel %vm2010_vm15, %v5215_v46, -inf }
0x1c03   :  { %v5224_v37 = vpop.f32.mrf.mxu0  ;;  %5253 = vmax.xlane.f32.xlu0 %v5252_v5 }
0x1c04   :  { %v5225_v43 = vadd.f32 %v10989_v29, %v5224_v37  ;;  %v5258_v28 = vsel %vm2010_vm15, %v5230_v23, -inf }
0x1c05   :  { %v8579_v10 = vpop.f32.mrf.mxu0 }
0x1c06   :  { %v5255_v62 = vsel %vm2010_vm15, %v5225_v43, -inf  ;;  %v5240_v51 = vadd.f32 %v10996_v6, %v8579_v10 }
0x1c07   :  { %v5234_v15 = vpop.f32.mrf.mxu0  ;;  %5256 = vmax.xlane.f32.xlu1 %v5255_v62  ;;  %5250 = vmax.xlane.f32.xlu0 %v5249_v7 }
0x1c08   :  { %v5235_v4 = vadd.f32 %v11003_v42, %v5234_v15  ;;  %v5264_v21 = vsel %vm2010_vm15, %v5240_v51, -inf }
0x1c0a   :  { %v5261_v11 = vsel %vm2010_vm15, %v5235_v4, -inf }
0x1c0b   :  { %5262 = vmax.xlane.f32.xlu1 %v5261_v11  ;;  %5259 = vmax.xlane.f32.xlu0 %v5258_v28 }
0x1c0f   :  { %5265 = vmax.xlane.f32.xlu0 %v5264_v21 }
0x1c1c   :  { %5516 = vrot.lane.b32.xlu1 %v10850_v9, %s9218_s1 }
0x1c25   :  { %5518 = vrot.lane.b32.xlu0 %v10844_v50, %s9218_s1 }
0x1c86   :  { %v5248_v24 = vpop.xlane.xlu1 %5247 }
0x1c87   :  { %v5268_v26 = vsub.f32 %v5210_v2, %v5248_v24 }
0x1c88   :  { %v5245_v12 = vpop.xlane.xlu0 %5244 }
0x1c89   :  { %v5277_v5 = vmul.f32 1.442695, %v5268_v26  ;;  %v5267_v37 = vsub.f32 %v5205_v14, %v5245_v12 }
0x1c8b   :  { %9030 = vpow2.f32 %v5277_v5  ;;  %v5275_v10 = vmul.f32 1.442695, %v5267_v37 }
0x1c8c   :  { %v5254_v28 = vpop.xlane.xlu0 %5253 }
0x1c8d   :  { %9032 = vpow2.f32 %v5275_v10  ;;  %v5270_v26 = vsub.f32 %v5220_v40, %v5254_v28 }
0x1c8f   :  { %v5281_v10 = vmul.f32 1.442695, %v5270_v26 }
0x1c90   :  { %v5251_v2 = vpop.xlane.xlu0 %5250  ;;  %v5257_v14 = vpop.xlane.xlu1 %5256 }
0x1c91   :  { %v5269_v21 = vsub.f32 %v5215_v46, %v5251_v2  ;;  %v5271_v12 = vsub.f32 %v5225_v43, %v5257_v14 }
0x1c93   :  { %v5279_v5 = vmul.f32 1.442695, %v5269_v21  ;;  %v5283_v39 = vmul.f32 1.442695, %v5271_v12 }
0x1c94   :  { %v5260_v24 = vpop.xlane.xlu0 %5259  ;;  %v5263_v37 = vpop.xlane.xlu1 %5262 }
0x1c95   :  { %9034 = vpow2.f32 %v5279_v5 }
0x1c96   :  { %9036 = vpow2.f32 %v5281_v10 }
0x1c97   :  { %9038 = vpow2.f32 %v5283_v39 }
0x1c98   :  { %v11174_v62 = vpop.eup %9030  ;;  %v5266_v57 = vpop.xlane.xlu0 %5265 }
0x1c99   :  { %v5294_v7 = vsel %vm2010_vm15, %v11174_v62, 0.0  ;;  %v5274_v59 = vsub.f32 %v5240_v51, %v5266_v57  ;;  %v5517_v2 = vpop.permute.xlu1 %5516 }
0x1c9a   :  { %v11178_v15 = vpop.eup %9032  ;;  %5295 = vadd.xlane.f32.xlu0 %v5294_v7  ;;  %v5272_v7 = vsub.f32 %v5230_v23, %v5260_v24 }
0x1c9b   :  { %v5291_v11 = vsel %vm2010_vm15, %v11178_v15, 0.0  ;;  %v5289_v19 = vmul.f32 1.442695, %v5274_v59 }
0x1c9c   :  { %5292 = vadd.xlane.f32.xlu1 %v5291_v11  ;;  %v5273_v11 = vsub.f32 %v5235_v4, %v5263_v37  ;;  %v5285_v48 = vmul.f32 1.442695, %v5272_v7  ;;  %v5519_v28 = vpop.permute.xlu0 %5518 }
0x1c9e   :  { %v5287_v3 = vmul.f32 1.442695, %v5273_v11  ;;  %9040 = vpow2.f32 %v5285_v48 }
0x1ca0   :  { %9042 = vpow2.f32 %v5287_v3 }
0x1ca1   :  { %9044 = vpow2.f32 %v5289_v19 }
0x1ca2   :  { %v11186_v46 = vpop.eup %9034 }
0x1ca3   :  { %v11188_v40 = vpop.eup %9036  ;;  %v5297_v43 = vsel %vm2010_vm15, %v11186_v46, 0.0 }
0x1ca4   :  { %v11192_v23 = vpop.eup %9038  ;;  %v5300_v4 = vsel %vm2010_vm15, %v11188_v40, 0.0 }
0x1ca5   :  { %v5303_v48 = vsel %vm2010_vm15, %v11192_v23, 0.0 }
0x1cab   :  { %v11196_v57 = vpop.eup %9040 }
0x1cac   :  { %v5306_v3 = vsel %vm2010_vm15, %v11196_v57, 0.0 }
0x1cad   :  { %5512 = vrot.lane.b32.xlu1 %v10840_v17, %s9218_s1  ;;  %v11200_v59 = vpop.eup %9042 }
0x1cae   :  { %v11204_v19 = vpop.eup %9044  ;;  %v5309_v39 = vsel %vm2010_vm15, %v11200_v59, 0.0 }
0x1caf   :  { %v5312_v51 = vsel %vm2010_vm15, %v11204_v19, 0.0 }
0x1cb0   :  { %5514 = vrot.lane.b32.xlu0 %v10836_v1, %s9218_s1 }
0x1ccf   :  { %5298 = vadd.xlane.f32.xlu0 %v5297_v43 }
0x1cd1   :  { %5301 = vadd.xlane.f32.xlu1 %v5300_v4 }
0x1cd3   :  { %5304 = vadd.xlane.f32.xlu0 %v5303_v48 }
0x1cd5   :  { %5307 = vadd.xlane.f32.xlu1 %v5306_v3 }
0x1cd7   :  { %5310 = vadd.xlane.f32.xlu0 %v5309_v39 }
0x1cd9   :  { %5313 = vadd.xlane.f32.xlu1 %v5312_v51 }
0x1cea   :  { %5508 = vrot.lane.b32.xlu1 %v10832_v41, %s9218_s1 }
0x1ced   :  { %5510 = vrot.lane.b32.xlu0 %v10826_v0, %s9218_s1 }
0x1cee   :  { %5494 = vrot.lane.b32.xlu1 %v10824_v52, %s9218_s1 }
0x1cf1   :  { %5492 = vrot.lane.b32.xlu0 %v10828_v56, %s9218_s1 }
0x1cf2   :  { %5498 = vrot.lane.b32.xlu1 %v10834_v55, %s9218_s1 }
0x1cf5   :  { %5496 = vrot.lane.b32.xlu0 %v10838_v58, %s9218_s1 }
0x1cf6   :  { %5502 = vrot.lane.b32.xlu1 %v10842_v18, %s9218_s1 }
0x1cf9   :  { %5500 = vrot.lane.b32.xlu0 %v10848_v8, %s9218_s1 }
0x1cfa   :  { %5506 = vrot.lane.b32.xlu1 %v10852_v33, %s9218_s1 }
0x1cfd   :  { %5504 = vrot.lane.b32.xlu0 %v10860_v61, %s9218_s1 }
0x1cfe   :  { %5763 = vrot.lane.b32.xlu1 %v10896_v53, %s9218_s1 }
0x1d01   :  { %5761 = vrot.lane.b32.xlu0 %v10899_v54, %s9218_s1 }
0x1d02   :  { %5759 = vrot.lane.b32.xlu1 %v10888_v38, %s9218_s1 }
0x1d05   :  { %5755 = vrot.lane.b32.xlu0 %v10880_v47, %s9218_s1 }
0x1d06   :  { %5757 = vrot.lane.b32.xlu1 %v10890_v13, %s9218_s1 }
0x1d09   :  { %5751 = vrot.lane.b32.xlu0 %v10870_v25, %s9218_s1 }
0x1d0a   :  { %5753 = vrot.lane.b32.xlu1 %v10882_v27, %s9218_s1 }
0x1d0d   :  { %5932 = vrot.lane.b32.xlu0 %v10854_v31, %s9219_s29 }
0x1d0e   :  { %5749 = vrot.lane.b32.xlu1 %v10874_v44, %s9218_s1 }
0x1d12   :  { %5930 = vrot.lane.b32.xlu1 %v10862_v49, %s9219_s29 }
0x1d23   :  { %v5296_v14 = vpop.xlane.xlu0 %5295 }
0x1d24   :  { %9046 = vrcp.f32 %v5296_v14 }
0x1d25   :  { %v5293_v21 = vpop.xlane.xlu1 %5292 }
0x1d26   :  { %9048 = vrcp.f32 %v5293_v21 }
0x1d27   :  { %v5515_v31 = vpop.permute.xlu0 %5514 }
0x1d29   :  { %v5513_v49 = vpop.permute.xlu1 %5512 }
0x1d31   :  { %v9047_v24 = vpop.eup %9046 }
0x1d32   :  { %v5318_v5 = vmul.f32 %v9047_v24, %v11174_v62 }
0x1d33   :  { %v9049_v26 = vpop.eup %9048 }
0x1d34   :  { %v5316_v12 = vmul.f32 %v9049_v26, %v11178_v15 }
0x1d36   :  { %8596 = vmatprep.mubr.msk.f32.mxu1 %vm2010_vm15, %v5316_v12 }
0x1d37   :  { %8597 = vmatmul.mubr.msk.f32.vlgmr.msra.gmra.mxu1 %vm2010_vm15, %v5318_v5 }
0x1d38   :  { %8609 = vmatpush3.xpose.msk.msra.mxu1 %vm282_vm2, %v11132_v45 }
0x1d39   :  { %8610 = vmatprep.subr.msk.mxu1 %vm282_vm2, %v11172_v22 }
0x1d3c   :  { %8611 = vmatpush3.xpose.msk.msra.mxu1 %vm282_vm2, %v11172_v22 }
0x1d3d   :  { %8612 = vmatprep.subr.msk.mxu1 %vm282_vm2, %v5519_v28 }
0x1d40   :  { %8613 = vmatpush3.xpose.msk.msra.mxu1 %vm282_vm2, %v5519_v28 }
0x1d41   :  { %8614 = vmatprep.subr.msk.mxu1 %vm282_vm2, %v5517_v2 }
0x1d44   :  { %8615 = vmatpush3.xpose.msk.msra.mxu1 %vm282_vm2, %v5517_v2 }
0x1d45   :  { %8616 = vmatprep.subr.msk.mxu1 %vm282_vm2, %v5515_v31 }
0x1d48   :  { %8617 = vmatpush3.xpose.msk.msra.mxu1 %vm282_vm2, %v5515_v31 }
0x1d49   :  { %8618 = vmatprep.subr.msk.mxu1 %vm282_vm2, %v5513_v49 }
0x1d4c   :  { %8619 = vmatpush3.xpose.msk.msra.mxu1 %vm282_vm2, %v5513_v49 }
0x1d58   :  { %v5299_v45 = vpop.xlane.xlu0 %5298 }
0x1d59   :  { %9050 = vrcp.f32 %v5299_v45 }
0x1d5a   :  { %v5302_v22 = vpop.xlane.xlu1 %5301 }
0x1d5b   :  { %9052 = vrcp.f32 %v5302_v22 }
0x1d5c   :  { %v5305_v62 = vpop.xlane.xlu0 %5304 }
0x1d5d   :  { %9054 = vrcp.f32 %v5305_v62 }
0x1d5e   :  { %v5308_v15 = vpop.xlane.xlu1 %5307 }
0x1d5f   :  { %9056 = vrcp.f32 %v5308_v15 }
0x1d60   :  { %v5311_v37 = vpop.xlane.xlu0 %5310 }
0x1d61   :  { %9058 = vrcp.f32 %v5311_v37 }
0x1d62   :  { %v5314_v10 = vpop.xlane.xlu1 %5313 }
0x1d63   :  { %9060 = vrcp.f32 %v5314_v10 }
0x1d64   :  { %v5511_v7 = vpop.permute.xlu0 %5510 }
0x1d65   :  { %8620 = vmatprep.subr.msk.mxu1 %vm282_vm2, %v5511_v7 }
0x1d66   :  { %v9051_v11 = vpop.eup %9050  ;;  %v5509_v43 = vpop.permute.xlu1 %5508  ;;  %8621 = vmatpush3.xpose.msk.msra.mxu1 %vm282_vm2, %v5511_v7 }
0x1d67   :  { %8622 = vmatprep.subr.msk.mxu1 %vm282_vm2, %v5509_v43  ;;  %v5320_v4 = vmul.f32 %v9051_v11, %v11186_v46 }
0x1d68   :  { %v9053_v48 = vpop.eup %9052  ;;  %v5493_v3 = vpop.permute.xlu0 %5492 }
0x1d69   :  { %8599 = vmatprep.mubr.msk.f32.mxu1 %vm2010_vm15, %v5320_v4  ;;  %v5322_v39 = vmul.f32 %v9053_v48, %v11188_v40 }
0x1d6a   :  { %v9055_v51 = vpop.eup %9054  ;;  %v5495_v28 = vpop.permute.xlu1 %5494  ;;  %8623 = vmatpush3.xpose.msk.msra.mxu1 %vm282_vm2, %v5509_v43 }
0x1d6b   :  { %8600 = vmatmul.mubr.msk.f32.gmra.mxu1 %vm2010_vm15, %v5322_v39  ;;  %v5324_v2 = vmul.f32 %v9055_v51, %v11192_v23 }
0x1d6c   :  { %v9057_v14 = vpop.eup %9056  ;;  %v5497_v21 = vpop.permute.xlu0 %5496 }
0x1d6d   :  { %8602 = vmatprep.mubr.msk.f32.mxu1 %vm2010_vm15, %v5324_v2  ;;  %v5326_v46 = vmul.f32 %v9057_v14, %v11196_v57 }
0x1d6e   :  { %v9059_v24 = vpop.eup %9058  ;;  %v5499_v26 = vpop.permute.xlu1 %5498 }
0x1d6f   :  { %8603 = vmatmul.mubr.msk.f32.gmra.mxu1 %vm2010_vm15, %v5326_v46  ;;  %v5328_v40 = vmul.f32 %v9059_v24, %v11200_v59 }
0x1d70   :  { %v9061_v12 = vpop.eup %9060  ;;  %v5501_v5 = vpop.permute.xlu0 %5500 }
0x1d71   :  { %8605 = vmatprep.mubr.msk.f32.mxu1 %vm2010_vm15, %v5328_v40  ;;  %v5330_v31 = vmul.f32 %v9061_v12, %v11204_v19 }
0x1d72   :  { %v5503_v49 = vpop.permute.xlu1 %5502 }
0x1d73   :  { %8606 = vmatmul.mubr.msk.f32.gmra.mxu1 %vm2010_vm15, %v5330_v31 }
0x1d74   :  { %8624 = vmatprep.mubr.msk.f32.mxu1 %vm282_vm2, %v5493_v3  ;;  %v5505_v23 = vpop.permute.xlu0 %5504 }
0x1d76   :  { %v5507_v45 = vpop.permute.xlu1 %5506 }
0x1d77   :  { %8625 = vmatmul.mubr.msk.f32.vlgmr.msra.gmra.mxu1 %vm282_vm2, %v5495_v28 }
0x1d78   :  { %8627 = vmatprep.mubr.msk.f32.mxu1 %vm282_vm2, %v5497_v21  ;;  %v5762_v57 = vpop.permute.xlu0 %5761 }
0x1d7a   :  { %v5764_v22 = vpop.permute.xlu1 %5763 }
0x1d7b   :  { %8628 = vmatmul.mubr.msk.f32.gmra.mxu1 %vm282_vm2, %v5499_v26  ;;  %8636 = vmatprep.subr.mxu0 %v5764_v22 }
0x1d7c   :  { %8630 = vmatprep.mubr.msk.f32.mxu1 %vm282_vm2, %v5501_v5  ;;  %8637 = vmatpush3.msra.mxu0 %v5764_v22  ;;  %v5756_v19 = vpop.permute.xlu0 %5755 }
0x1d7d   :  { %8638 = vmatprep.subr.mxu0 %v5762_v57 }
0x1d7e   :  { %v5760_v59 = vpop.permute.xlu1 %5759  ;;  %8639 = vmatpush3.msra.mxu0 %v5762_v57 }
0x1d7f   :  { %8631 = vmatmul.mubr.msk.f32.gmra.mxu1 %vm282_vm2, %v5503_v49  ;;  %8640 = vmatprep.subr.mxu0 %v5760_v59 }
0x1d80   :  { %8633 = vmatprep.mubr.msk.f32.mxu1 %vm282_vm2, %v5505_v23  ;;  %8641 = vmatpush3.msra.mxu0 %v5760_v59  ;;  %v5752_v15 = vpop.permute.xlu0 %5751 }
0x1d82   :  { %v5758_v62 = vpop.permute.xlu1 %5757 }
0x1d83   :  { %8634 = vmatmul.mubr.msk.f32.gmra.mxu1 %vm282_vm2, %v5507_v45  ;;  %8642 = vmatprep.subr.mxu0 %v5758_v62 }
0x1d84   :  { %8643 = vmatpush3.msra.mxu0 %v5758_v62  ;;  %v11292_v7 = vpop.permute.xlu0 %5932 }
0x1d85   :  { %8644 = vmatprep.subr.mxu0 %v5756_v19 }
0x1d86   :  { %v5754_v37 = vpop.permute.xlu1 %5753  ;;  %8645 = vmatpush3.msra.mxu0 %v5756_v19 }
0x1d87   :  { %8646 = vmatprep.subr.mxu0 %v5754_v37 }
0x1d88   :  { %8647 = vmatpush3.msra.mxu0 %v5754_v37 }
0x1d89   :  { %8648 = vmatprep.subr.mxu0 %v5752_v15 }
0x1d8a   :  { %v5750_v10 = vpop.permute.xlu1 %5749  ;;  %8649 = vmatpush3.msra.mxu0 %v5752_v15 }
0x1d8b   :  { %8650 = vmatprep.subr.mxu0 %v5750_v10 }
0x1d8c   :  { %8651 = vmatpush3.msra.mxu0 %v5750_v10 }
0x1d8d   :  { %8664 = vmatprep.subr.msk.mxu0 %vm282_vm2, %v11292_v7 }
0x1df7   :  { %v11296_v11 = vpop.f32.mrf.mxu1 }
0x1df9   :  { %v11298_v43 = vpop.f32.mrf.mxu1 }
0x1e2b   :  { %v11300_v4 = vpop.f32.mrf.mxu1 }
0x1e2d   :  { %v11302_v48 = vpop.f32.mrf.mxu1 }
0x1e2f   :  { %v11304_v3 = vpop.f32.mrf.mxu1 }
0x1e31   :  { %v11306_v39 = vpop.f32.mrf.mxu1 }
0x1e33   :  { %v11308_v51 = vpop.f32.mrf.mxu1 }
0x1e35   :  { %v11310_v28 = vpop.f32.mrf.mxu1 }
0x1e37   :  { %v8626_v2 = vpop.f32.mrf.mxu1 }
0x1e38   :  { %v5628_v14 = vadd.f32 %v10955_v20, %v8626_v2 }
0x1e39   :  { %v5622_v21 = vpop.f32.mrf.mxu1 }
0x1e3a   :  { %v5623_v46 = vadd.f32 %v10961_v63, %v5622_v21  ;;  %v5664_v24 = vsel %vm2010_vm15, %v5628_v14, -inf }
0x1e3b   :  { %5665 = vmax.xlane.f32.xlu1 %v5664_v24  ;;  %v8629_v26 = vpop.f32.mrf.mxu1 }
0x1e3c   :  { %v5638_v40 = vadd.f32 %v10968_v36, %v8629_v26  ;;  %v5661_v12 = vsel %vm2010_vm15, %v5623_v46, -inf }
0x1e3d   :  { %5662 = vmax.xlane.f32.xlu0 %v5661_v12  ;;  %v5632_v5 = vpop.f32.mrf.mxu1 }
0x1e3e   :  { %v5633_v49 = vadd.f32 %v10975_v16, %v5632_v5  ;;  %v5670_v23 = vsel %vm2010_vm15, %v5638_v40, -inf }
0x1e3f   :  { %v8632_v31 = vpop.f32.mrf.mxu1 }
0x1e40   :  { %v5648_v57 = vadd.f32 %v10982_v60, %v8632_v31  ;;  %v5667_v22 = vsel %vm2010_vm15, %v5633_v49, -inf  ;;  %v11332_v60 = vpop.permute.xlu1 %5930 }
0x1e41   :  { %5671 = vmax.xlane.f32.xlu0 %v5670_v23  ;;  %v5642_v20 = vpop.f32.mrf.mxu1 }
0x1e42   :  { %v5643_v45 = vadd.f32 %v10989_v29, %v5642_v20  ;;  %v5676_v62 = vsel %vm2010_vm15, %v5648_v57, -inf }
0x1e43   :  { %v8635_v63 = vpop.f32.mrf.mxu1 }
0x1e44   :  { %v5673_v36 = vsel %vm2010_vm15, %v5643_v45, -inf  ;;  %v5658_v16 = vadd.f32 %v10996_v6, %v8635_v63 }
0x1e45   :  { %5668 = vmax.xlane.f32.xlu0 %v5667_v22  ;;  %5674 = vmax.xlane.f32.xlu1 %v5673_v36  ;;  %v5652_v59 = vpop.f32.mrf.mxu1 }
0x1e46   :  { %v5653_v19 = vadd.f32 %v11003_v42, %v5652_v59  ;;  %v5682_v29 = vsel %vm2010_vm15, %v5658_v16, -inf }
0x1e48   :  { %v5679_v15 = vsel %vm2010_vm15, %v5653_v19, -inf }
0x1e49   :  { %5677 = vmax.xlane.f32.xlu0 %v5676_v62  ;;  %5680 = vmax.xlane.f32.xlu1 %v5679_v15 }
0x1e4d   :  { %5683 = vmax.xlane.f32.xlu0 %v5682_v29 }
0x1e5a   :  { %5926 = vrot.lane.b32.xlu1 %v10850_v9, %s9219_s29 }
0x1e63   :  { %5928 = vrot.lane.b32.xlu0 %v10844_v50, %s9219_s29 }
0x1ec4   :  { %v5666_v42 = vpop.xlane.xlu1 %5665 }
0x1ec5   :  { %v5686_v37 = vsub.f32 %v5628_v14, %v5666_v42 }
0x1ec6   :  { %v5663_v6 = vpop.xlane.xlu0 %5662 }
0x1ec7   :  { %v5695_v10 = vmul.f32 1.442695, %v5686_v37  ;;  %v5685_v2 = vsub.f32 %v5623_v46, %v5663_v6 }
0x1ec9   :  { %9062 = vpow2.f32 %v5695_v10  ;;  %v5693_v21 = vmul.f32 1.442695, %v5685_v2 }
0x1eca   :  { %v5672_v9 = vpop.xlane.xlu0 %5671 }
0x1ecb   :  { %9064 = vpow2.f32 %v5693_v21  ;;  %v5688_v23 = vsub.f32 %v5638_v40, %v5672_v9 }
0x1ecd   :  { %v5699_v36 = vmul.f32 1.442695, %v5688_v23 }
0x1ece   :  { %v5669_v14 = vpop.xlane.xlu0 %5668  ;;  %v5675_v46 = vpop.xlane.xlu1 %5674 }
0x1ecf   :  { %v5687_v5 = vsub.f32 %v5633_v49, %v5669_v14  ;;  %v5689_v20 = vsub.f32 %v5643_v45, %v5675_v46 }
0x1ed1   :  { %v5697_v63 = vmul.f32 1.442695, %v5687_v5  ;;  %v5701_v15 = vmul.f32 1.442695, %v5689_v20 }
0x1ed2   :  { %v5678_v31 = vpop.xlane.xlu0 %5677  ;;  %v5681_v22 = vpop.xlane.xlu1 %5680 }
0x1ed3   :  { %v5690_v59 = vsub.f32 %v5648_v57, %v5678_v31  ;;  %9066 = vpow2.f32 %v5697_v63  ;;  %v5691_v29 = vsub.f32 %v5653_v19, %v5681_v22 }
0x1ed4   :  { %9068 = vpow2.f32 %v5699_v36 }
0x1ed5   :  { %v5703_v42 = vmul.f32 1.442695, %v5690_v59  ;;  %9070 = vpow2.f32 %v5701_v15  ;;  %v5705_v37 = vmul.f32 1.442695, %v5691_v29 }
0x1ed6   :  { %v11334_v24 = vpop.eup %9062  ;;  %v5684_v62 = vpop.xlane.xlu0 %5683 }
0x1ed7   :  { %v5712_v26 = vsel %vm2010_vm15, %v11334_v24, 0.0  ;;  %9072 = vpow2.f32 %v5703_v42 }
0x1ed8   :  { %v11338_v12 = vpop.eup %9064  ;;  %5713 = vadd.xlane.f32.xlu0 %v5712_v26  ;;  %9074 = vpow2.f32 %v5705_v37 }
0x1ed9   :  { %v5709_v50 = vsel %vm2010_vm15, %v11338_v12, 0.0 }
0x1eda   :  { %5710 = vadd.xlane.f32.xlu1 %v5709_v50 }
0x1ee0   :  { %v11346_v49 = vpop.eup %9066 }
0x1ee1   :  { %v11348_v40 = vpop.eup %9068  ;;  %v5715_v45 = vsel %vm2010_vm15, %v11346_v49, 0.0 }
0x1ee2   :  { %v11352_v57 = vpop.eup %9070  ;;  %v5718_v19 = vsel %vm2010_vm15, %v11348_v40, 0.0 }
0x1ee3   :  { %v5721_v6 = vsel %vm2010_vm15, %v11352_v57, 0.0 }
0x1eeb   :  { %5922 = vrot.lane.b32.xlu1 %v10840_v17, %s9219_s29  ;;  %v5692_v17 = vsub.f32 %v5658_v16, %v5684_v62  ;;  %v11356_v16 = vpop.eup %9072 }
0x1eec   :  { %v11360_v10 = vpop.eup %9074  ;;  %v5724_v2 = vsel %vm2010_vm15, %v11356_v16, 0.0 }
0x1eed   :  { %v5727_v26 = vsel %vm2010_vm15, %v11360_v10, 0.0 }
0x1eee   :  { %5924 = vrot.lane.b32.xlu0 %v10836_v1, %s9219_s29  ;;  %v5707_v1 = vmul.f32 1.442695, %v5692_v17 }
0x1ef0   :  { %9076 = vpow2.f32 %v5707_v1 }
0x1efd   :  { %v11364_v21 = vpop.eup %9076 }
0x1efe   :  { %v5730_v50 = vsel %vm2010_vm15, %v11364_v21, 0.0 }
0x1f0d   :  { %5716 = vadd.xlane.f32.xlu0 %v5715_v45 }
0x1f0f   :  { %5719 = vadd.xlane.f32.xlu1 %v5718_v19 }
0x1f11   :  { %5722 = vadd.xlane.f32.xlu0 %v5721_v6 }
0x1f13   :  { %5725 = vadd.xlane.f32.xlu1 %v5724_v2 }
0x1f15   :  { %5728 = vadd.xlane.f32.xlu0 %v5727_v26 }
0x1f17   :  { %5731 = vadd.xlane.f32.xlu1 %v5730_v50 }
0x1f28   :  { %5918 = vrot.lane.b32.xlu1 %v10832_v41, %s9219_s29 }
0x1f2b   :  { %5920 = vrot.lane.b32.xlu0 %v10826_v0, %s9219_s29  ;;  %v5927_v0 = vpop.permute.xlu1 %5926 }
0x1f2c   :  { %5904 = vrot.lane.b32.xlu1 %v10824_v52, %s9219_s29  ;;  %v5929_v52 = vpop.permute.xlu0 %5928 }
0x1f2f   :  { %5902 = vrot.lane.b32.xlu0 %v10828_v56, %s9219_s29 }
0x1f30   :  { %5908 = vrot.lane.b32.xlu1 %v10834_v55, %s9219_s29 }
0x1f33   :  { %5906 = vrot.lane.b32.xlu0 %v10838_v58, %s9219_s29 }
0x1f34   :  { %5912 = vrot.lane.b32.xlu1 %v10842_v18, %s9219_s29 }
0x1f37   :  { %5910 = vrot.lane.b32.xlu0 %v10848_v8, %s9219_s29 }
0x1f38   :  { %5916 = vrot.lane.b32.xlu1 %v10852_v33, %s9219_s29 }
0x1f3b   :  { %5914 = vrot.lane.b32.xlu0 %v10860_v61, %s9219_s29 }
0x1f61   :  { %v5714_v56 = vpop.xlane.xlu0 %5713 }
0x1f62   :  { %9078 = vrcp.f32 %v5714_v56 }
0x1f63   :  { %v5711_v41 = vpop.xlane.xlu1 %5710 }
0x1f64   :  { %9080 = vrcp.f32 %v5711_v41  ;;  %v9182_v41 = vld [vmem:[%s11841_s2 + $0x280] sm:$0xff] }
0x1f65   :  { %v5925_v8 = vpop.permute.xlu0 %5924 }
0x1f67   :  { %v5923_v33 = vpop.permute.xlu1 %5922 }
0x1f6f   :  { %v9079_v55 = vpop.eup %9078 }
0x1f70   :  { %v5736_v18 = vmul.f32 %v9079_v55, %v11334_v24 }
0x1f71   :  { %v9081_v58 = vpop.eup %9080 }
0x1f72   :  { %v5734_v9 = vmul.f32 %v9081_v58, %v11338_v12 }
0x1f74   :  { %8652 = vmatprep.mubr.msk.f32.mxu0 %vm2010_vm15, %v5734_v9  ;;  %v9183_v9 = vld [vmem:[%s11841_s2 + $0x278] sm:$0xff] }
0x1f75   :  { %8653 = vmatmul.mubr.msk.f32.vlgmr.msra.gmra.mxu0 %vm2010_vm15, %v5736_v18 }
0x1f76   :  { %8665 = vmatpush3.xpose.msk.msra.mxu0 %vm282_vm2, %v11292_v7 }
0x1f77   :  { %8666 = vmatprep.subr.msk.mxu0 %vm282_vm2, %v11332_v60 }
0x1f7a   :  { %8667 = vmatpush3.xpose.msk.msra.mxu0 %vm282_vm2, %v11332_v60 }
0x1f7b   :  { %8668 = vmatprep.subr.msk.mxu0 %vm282_vm2, %v5929_v52 }
0x1f7e   :  { %8669 = vmatpush3.xpose.msk.msra.mxu0 %vm282_vm2, %v5929_v52 }
0x1f7f   :  { %8670 = vmatprep.subr.msk.mxu0 %vm282_vm2, %v5927_v0 }
0x1f82   :  { %8671 = vmatpush3.xpose.msk.msra.mxu0 %vm282_vm2, %v5927_v0 }
0x1f83   :  { %8672 = vmatprep.subr.msk.mxu0 %vm282_vm2, %v5925_v8 }
0x1f86   :  { %8673 = vmatpush3.xpose.msk.msra.mxu0 %vm282_vm2, %v5925_v8 }
0x1f87   :  { %8674 = vmatprep.subr.msk.mxu0 %vm282_vm2, %v5923_v33 }
0x1f8a   :  { %8675 = vmatpush3.xpose.msk.msra.mxu0 %vm282_vm2, %v5923_v33 }
0x1f96   :  { %v5717_v61 = vpop.xlane.xlu0 %5716 }
0x1f97   :  { %9082 = vrcp.f32 %v5717_v61 }
0x1f98   :  { %v5720_v7 = vpop.xlane.xlu1 %5719 }
0x1f99   :  { %9084 = vrcp.f32 %v5720_v7 }
0x1f9a   :  { %v5723_v60 = vpop.xlane.xlu0 %5722 }
0x1f9b   :  { %9086 = vrcp.f32 %v5723_v60  ;;  %v9184_v60 = vld [vmem:[%s11841_s2 + $0x288] sm:$0xff] }
0x1f9c   :  { %v5726_v24 = vpop.xlane.xlu1 %5725 }
0x1f9d   :  { %9088 = vrcp.f32 %v5726_v24 }
0x1f9e   :  { %v5729_v12 = vpop.xlane.xlu0 %5728 }
0x1f9f   :  { %9090 = vrcp.f32 %v5729_v12 }
0x1fa0   :  { %v5732_v14 = vpop.xlane.xlu1 %5731 }
0x1fa1   :  { %9092 = vrcp.f32 %v5732_v14  ;;  %v9185_v14 = vld [vmem:[%s11841_s2 + $0x290] sm:$0xff] }
0x1fa2   :  { %v5921_v46 = vpop.permute.xlu0 %5920 }
0x1fa3   :  { %8676 = vmatprep.subr.msk.mxu0 %vm282_vm2, %v5921_v46 }
0x1fa4   :  { %v9083_v5 = vpop.eup %9082  ;;  %v5919_v31 = vpop.permute.xlu1 %5918  ;;  %8677 = vmatpush3.xpose.msk.msra.mxu0 %vm282_vm2, %v5921_v46 }
0x1fa5   :  { %8678 = vmatprep.subr.msk.mxu0 %vm282_vm2, %v5919_v31  ;;  %v5738_v23 = vmul.f32 %v9083_v5, %v11346_v49 }
0x1fa6   :  { %v9085_v20 = vpop.eup %9084  ;;  %v5903_v62 = vpop.permute.xlu0 %5902 }
0x1fa7   :  { %8655 = vmatprep.mubr.msk.f32.mxu0 %vm2010_vm15, %v5738_v23  ;;  %v5740_v63 = vmul.f32 %v9085_v20, %v11348_v40  ;;  %v9186_v23 = vld [vmem:[%s11841_s2 + $0x298] sm:$0xff] }
0x1fa8   :  { %v9087_v22 = vpop.eup %9086  ;;  %8679 = vmatpush3.xpose.msk.msra.mxu0 %vm282_vm2, %v5919_v31  ;;  %v5905_v37 = vpop.permute.xlu1 %5904 }
0x1fa9   :  { %8656 = vmatmul.mubr.msk.f32.gmra.mxu0 %vm2010_vm15, %v5740_v63  ;;  %v5742_v36 = vmul.f32 %v9087_v22, %v11352_v57  ;;  %v9187_v63 = vld [vmem:[%s11841_s2 + $0x2a0] sm:$0xff] }
0x1faa   :  { %v9089_v59 = vpop.eup %9088  ;;  %v5907_v49 = vpop.permute.xlu0 %5906 }
0x1fab   :  { %8658 = vmatprep.mubr.msk.f32.mxu0 %vm2010_vm15, %v5742_v36  ;;  %v5744_v15 = vmul.f32 %v9089_v59, %v11356_v16 }
0x1fac   :  { %v9091_v29 = vpop.eup %9090  ;;  %v5909_v40 = vpop.permute.xlu1 %5908 }
0x1fad   :  { %8659 = vmatmul.mubr.msk.f32.gmra.mxu0 %vm2010_vm15, %v5744_v15  ;;  %v5746_v42 = vmul.f32 %v9091_v29, %v11360_v10 }
0x1fae   :  { %v9093_v17 = vpop.eup %9092  ;;  %v5911_v45 = vpop.permute.xlu0 %5910 }
0x1faf   :  { %8661 = vmatprep.mubr.msk.f32.mxu0 %vm2010_vm15, %v5746_v42  ;;  %v5748_v1 = vmul.f32 %v9093_v17, %v11364_v21 }
0x1fb0   :  { %v5913_v57 = vpop.permute.xlu1 %5912 }
0x1fb1   :  { %8662 = vmatmul.mubr.msk.f32.gmra.mxu0 %vm2010_vm15, %v5748_v1 }
0x1fb2   :  { %8680 = vmatprep.mubr.msk.f32.mxu0 %vm282_vm2, %v5903_v62  ;;  %v5915_v19 = vpop.permute.xlu0 %5914 }
0x1fb4   :  { %v5917_v16 = vpop.permute.xlu1 %5916 }
0x1fb5   :  { %8681 = vmatmul.mubr.msk.f32.vlgmr.msra.gmra.mxu0 %vm282_vm2, %v5905_v37 }
0x1fb6   :  { %8683 = vmatprep.mubr.msk.f32.mxu0 %vm282_vm2, %v5907_v49 }
0x1fb9   :  { %8684 = vmatmul.mubr.msk.f32.gmra.mxu0 %vm282_vm2, %v5909_v40 }
0x1fba   :  { %8686 = vmatprep.mubr.msk.f32.mxu0 %vm282_vm2, %v5911_v45 }
0x1fbd   :  { %8687 = vmatmul.mubr.msk.f32.gmra.mxu0 %vm282_vm2, %v5913_v57 }
0x1fbe   :  { %8689 = vmatprep.mubr.msk.f32.mxu0 %vm282_vm2, %v5915_v19 }
0x1fc1   :  { %8690 = vmatmul.mubr.msk.f32.gmra.mxu0 %vm282_vm2, %v5917_v16 }
0x2035   :  { %v11432_v6 = vpop.f32.mrf.mxu0 }
0x2037   :  { %v11434_v10 = vpop.f32.mrf.mxu0 }
0x2069   :  { %v11436_v2 = vpop.f32.mrf.mxu0 }
0x206b   :  { %v11438_v21 = vpop.f32.mrf.mxu0 }
0x206d   :  { %v11440_v26 = vpop.f32.mrf.mxu0 }
0x206f   :  { %v11442_v50 = vpop.f32.mrf.mxu0 }
0x2071   :  { %v11444_v52 = vpop.f32.mrf.mxu0 }
0x2073   :  { %v11446_v0 = vpop.f32.mrf.mxu0 }
0x2075   :  { %v8682_v56 = vpop.f32.mrf.mxu0 }
0x2076   :  { %v6038_v55 = vadd.f32 %v9182_v41, %v8682_v56 }
0x2077   :  { %v6032_v58 = vpop.f32.mrf.mxu0 }
0x2078   :  { %v6033_v18 = vadd.f32 %v9183_v9, %v6032_v58  ;;  %v6074_v8 = vsel %vm2010_vm15, %v6038_v55, -inf }
0x2079   :  { %6075 = vmax.xlane.f32.xlu1 %v6074_v8  ;;  %v8685_v33 = vpop.f32.mrf.mxu0 }
0x207a   :  { %v6071_v61 = vsel %vm2010_vm15, %v6033_v18, -inf  ;;  %v6048_v46 = vadd.f32 %v9185_v14, %v8685_v33 }
0x207b   :  { %6072 = vmax.xlane.f32.xlu0 %v6071_v61  ;;  %v6042_v7 = vpop.f32.mrf.mxu0 }
0x207c   :  { %v6043_v24 = vadd.f32 %v9184_v60, %v6042_v7  ;;  %v6080_v36 = vsel %vm2010_vm15, %v6048_v46, -inf }
0x207d   :  { %v8688_v12 = vpop.f32.mrf.mxu0 }
0x207e   :  { %v6077_v5 = vsel %vm2010_vm15, %v6043_v24, -inf  ;;  %v6058_v22 = vadd.f32 %v9187_v63, %v8688_v12  ;;  %v9188_v63 = vld [vmem:[%s11841_s2 + $0x2b0] sm:$0xff] }
0x207f   :  { %6078 = vmax.xlane.f32.xlu0 %v6077_v5  ;;  %v6052_v31 = vpop.f32.mrf.mxu0 }
0x2080   :  { %v6053_v20 = vadd.f32 %v9186_v23, %v6052_v31  ;;  %v6086_v62 = vsel %vm2010_vm15, %v6058_v22, -inf }
0x2082   :  { %v6083_v59 = vsel %vm2010_vm15, %v6053_v20, -inf }
0x2083   :  { %6081 = vmax.xlane.f32.xlu0 %v6080_v36  ;;  %6084 = vmax.xlane.f32.xlu1 %v6083_v59 }
0x2087   :  { %6087 = vmax.xlane.f32.xlu0 %v6086_v62  ;;  %v9189_v62 = vld [vmem:[%s11841_s2 + $0x2a8] sm:$0xff] }
0x2094   :  { %6173 = vrot.lane.b32.xlu1 %v10896_v53, %s9219_s29 }
0x2098   :  { %6169 = vrot.lane.b32.xlu1 %v10888_v38, %s9219_s29 }
0x209c   :  { %6167 = vrot.lane.b32.xlu1 %v10890_v13, %s9219_s29 }
0x209d   :  { %6171 = vrot.lane.b32.xlu0 %v10899_v54, %s9219_s29 }
0x20a0   :  { %6163 = vrot.lane.b32.xlu1 %v10882_v27, %s9219_s29 }
0x20a1   :  { %6165 = vrot.lane.b32.xlu0 %v10880_v47, %s9219_s29 }
0x2102   :  { %v6076_v15 = vpop.xlane.xlu1 %6075 }
0x2103   :  { %v6096_v29 = vsub.f32 %v6038_v55, %v6076_v15 }
0x2104   :  { %v6073_v42 = vpop.xlane.xlu0 %6072 }
0x2105   :  { %v6105_v17 = vmul.f32 1.442695, %v6096_v29  ;;  %v6095_v53 = vsub.f32 %v6033_v18, %v6073_v42 }
0x2107   :  { %9094 = vpow2.f32 %v6105_v17  ;;  %v6103_v37 = vmul.f32 1.442695, %v6095_v53 }
0x2108   :  { %v6079_v38 = vpop.xlane.xlu0 %6078 }
0x2109   :  { %9096 = vpow2.f32 %v6103_v37  ;;  %v6097_v1 = vsub.f32 %v6043_v24, %v6079_v38 }
0x210b   :  { %v6107_v13 = vmul.f32 1.442695, %v6097_v1 }
0x210c   :  { %v6085_v49 = vpop.xlane.xlu1 %6084  ;;  %v6082_v40 = vpop.xlane.xlu0 %6081 }
0x210d   :  { %9098 = vpow2.f32 %v6107_v13  ;;  %v6099_v54 = vsub.f32 %v6053_v20, %v6085_v49  ;;  %v6098_v45 = vsub.f32 %v6048_v46, %v6082_v40  ;;  %v8691_v20 = vpop.f32.mrf.mxu0 }
0x210f   :  { %v6111_v27 = vmul.f32 1.442695, %v6099_v54  ;;  %v6109_v57 = vmul.f32 1.442695, %v6098_v45  ;;  %v6062_v36 = vpop.f32.mrf.mxu0 }
0x2110   :  { %v6174_v19 = vpop.permute.xlu1 %6173  ;;  %v6088_v47 = vpop.xlane.xlu0 %6087  ;;  %v6063_v15 = vadd.f32 %v9189_v62, %v6062_v36 }
0x2111   :  { %9100 = vpow2.f32 %v6111_v27  ;;  %v6100_v16 = vsub.f32 %v6058_v22, %v6088_v47  ;;  %8692 = vmatprep.subr.mxu1 %v6174_v19  ;;  %v6068_v22 = vadd.f32 %v9188_v63, %v8691_v20 }
0x2112   :  { %9102 = vpow2.f32 %v6109_v57  ;;  %8693 = vmatpush3.msra.mxu1 %v6174_v19 }
0x2113   :  { %v6113_v56 = vmul.f32 1.442695, %v6100_v16  ;;  %v6092_v59 = vsel %vm2010_vm15, %v6068_v22, -inf }
0x2114   :  { %v11484_v41 = vpop.eup %9094  ;;  %v6170_v55 = vpop.permute.xlu1 %6169 }
0x2115   :  { %v6172_v58 = vpop.permute.xlu0 %6171  ;;  %9104 = vpow2.f32 %v6113_v56  ;;  %v6122_v9 = vsel %vm2010_vm15, %v11484_v41, 0.0 }
0x2116   :  { %8694 = vmatprep.subr.mxu1 %v6172_v58  ;;  %v9097_v18 = vpop.eup %9096  ;;  %6123 = vadd.xlane.f32.xlu0 %v6122_v9 }
0x2117   :  { %8695 = vmatpush3.msra.mxu1 %v6172_v58  ;;  %v6119_v8 = vsel %vm2010_vm15, %v9097_v18, 0.0 }
0x2118   :  { %8696 = vmatprep.subr.mxu1 %v6170_v55  ;;  %v6168_v33 = vpop.permute.xlu1 %6167  ;;  %6120 = vadd.xlane.f32.xlu1 %v6119_v8  ;;  %v6434_v8 = vld [vmem:[%s11841_s2 + $0x208] sm:$0xff] }
0x2119   :  { %8697 = vmatpush3.msra.mxu1 %v6170_v55  ;;  %v6166_v7 = vpop.permute.xlu0 %6165 }
0x211a   :  { %8698 = vmatprep.subr.mxu1 %v6168_v33  ;;  %v9099_v61 = vpop.eup %9098 }
0x211b   :  { %8699 = vmatpush3.msra.mxu1 %v6168_v33  ;;  %v6125_v60 = vsel %vm2010_vm15, %v9099_v61, 0.0 }
0x211c   :  { %8700 = vmatprep.subr.mxu1 %v6166_v7  ;;  %v6164_v24 = vpop.permute.xlu1 %6163  ;;  %6126 = vadd.xlane.f32.xlu1 %v6125_v60 }
0x211d   :  { %8701 = vmatpush3.msra.mxu1 %v6166_v7 }
0x211e   :  { %8702 = vmatprep.subr.mxu1 %v6164_v24  ;;  %v9101_v12 = vpop.eup %9100 }
0x211f   :  { %8703 = vmatpush3.msra.mxu1 %v6164_v24  ;;  %v9103_v14 = vpop.eup %9102  ;;  %v6131_v46 = vsel %vm2010_vm15, %v9101_v12, 0.0 }
0x2120   :  { %6132 = vadd.xlane.f32.xlu1 %v6131_v46  ;;  %v6128_v5 = vsel %vm2010_vm15, %v9103_v14, 0.0 }
0x2121   :  { %6129 = vadd.xlane.f32.xlu0 %v6128_v5 }
0x2122   :  { %v9105_v31 = vpop.eup %9104 }
0x2123   :  { %v6134_v23 = vsel %vm2010_vm15, %v9105_v31, 0.0 }
0x2125   :  { %6135 = vadd.xlane.f32.xlu0 %v6134_v23 }
0x2131   :  { %6159 = vrot.lane.b32.xlu1 %v10874_v44, %s9219_s29  ;;  %v6089_v44 = vsel %vm2010_vm15, %v6063_v15, -inf }
0x213b   :  { %6161 = vrot.lane.b32.xlu0 %v10870_v25, %s9219_s29 }
0x2155   :  { %6093 = vmax.xlane.f32.xlu1 %v6092_v59 }
0x215a   :  { %6090 = vmax.xlane.f32.xlu0 %v6089_v44 }
0x2166   :  { %6320 = vrot.lane.b32.xlu1 %v11298_v43, %s9214_s22 }
0x216a   :  { %6352 = vrot.lane.b32.xlu1 %v11434_v10, %s9220_s20 }
0x216e   :  { %6354 = vrot.lane.b32.xlu1 %v11432_v6, %s9220_s20 }
0x2172   :  { %6326 = vrot.lane.b32.xlu1 %v11300_v4, %s9214_s22 }
0x2176   :  { %6358 = vrot.lane.b32.xlu1 %v11436_v2, %s9220_s20 }
0x217a   :  { %6330 = vrot.lane.b32.xlu1 %v11304_v3, %s9214_s22 }
0x217e   :  { %6362 = vrot.lane.b32.xlu1 %v11440_v26, %s9220_s20 }
0x219f   :  { %v6124_v43 = vpop.xlane.xlu0 %6123 }
0x21a1   :  { %v6121_v25 = vpop.xlane.xlu1 %6120 }
0x21a2   :  { %9106 = vrcp.f32 %v6121_v25 }
0x21a3   :  { %9108 = vrcp.f32 %v6124_v43 }
0x21a5   :  { %v6127_v10 = vpop.xlane.xlu1 %6126 }
0x21a6   :  { %9110 = vrcp.f32 %v6127_v10 }
0x21a9   :  { %v6133_v29 = vpop.xlane.xlu1 %6132 }
0x21aa   :  { %9112 = vrcp.f32 %v6133_v29  ;;  %v6130_v6 = vpop.xlane.xlu0 %6129 }
0x21ab   :  { %9114 = vrcp.f32 %v6130_v6 }
0x21ad   :  { %v6160_v26 = vpop.permute.xlu1 %6159 }
0x21ae   :  { %v6136_v4 = vpop.xlane.xlu0 %6135 }
0x21af   :  { %v9107_v42 = vpop.eup %9106  ;;  %9116 = vrcp.f32 %v6136_v4 }
0x21b0   :  { %v6144_v2 = vmul.f32 %v9107_v42, %v9097_v18  ;;  %v9109_v17 = vpop.eup %9108  ;;  %v6435_v18 = vld [vmem:[%s11841_s2 + $0x210] sm:$0xff] }
0x21b1   :  { %v6146_v38 = vmul.f32 %v9109_v17, %v11484_v41 }
0x21b2   :  { %v6162_v53 = vpop.permute.xlu0 %6161  ;;  %8708 = vmatprep.mubr.msk.f32.mxu1 %vm2010_vm15, %v6144_v2 }
0x21b3   :  { %v9111_v3 = vpop.eup %9110  ;;  %8704 = vmatprep.subr.mxu1 %v6162_v53 }
0x21b4   :  { %8705 = vmatpush3.msra.mxu1 %v6162_v53  ;;  %v6148_v37 = vmul.f32 %v9111_v3, %v9099_v61 }
0x21b5   :  { %8706 = vmatprep.subr.mxu1 %v6160_v26 }
0x21b6   :  { %8707 = vmatpush3.msra.mxu1 %v6160_v26 }
0x21b7   :  { %v9113_v1 = vpop.eup %9112  ;;  %8709 = vmatmul.mubr.msk.f32.vlgmr.msra.gmra.mxu1 %vm2010_vm15, %v6146_v38  ;;  %8720 = vmatprep.subr.mxu1 %v6435_v18 }
0x21b8   :  { %v9115_v13 = vpop.eup %9114  ;;  %8711 = vmatprep.mubr.msk.f32.mxu1 %vm2010_vm15, %v6148_v37  ;;  %v6152_v49 = vmul.f32 %v9113_v1, %v9101_v12  ;;  %8721 = vmatpush3.msra.mxu1 %v6435_v18  ;;  %v11898_v37 = vld [vmem:[#allocation11_spill] sm:$0xff]  ;;  %v11899_v1 = vld [vmem:[#allocation10_spill] sm:$0xff] }
0x21b9   :  { %v6150_v40 = vmul.f32 %v9115_v13, %v9103_v14  ;;  %8722 = vmatprep.subr.mxu1 %v6434_v8  ;;  %v11901_v18 = vld [vmem:[#allocation15_spill] sm:$0xff] }
0x21ba   :  { %8723 = vmatpush3.msra.mxu1 %v6434_v8 }
0x21bb   :  { %8712 = vmatmul.mubr.msk.f32.gmra.mxu1 %vm2010_vm15, %v6150_v40 }
0x21bc   :  { %v9117_v54 = vpop.eup %9116  ;;  %8714 = vmatprep.mubr.msk.f32.mxu1 %vm2010_vm15, %v6152_v49 }
0x21bd   :  { %v6154_v45 = vmul.f32 %v9117_v54, %v9105_v31 }
0x21bf   :  { %8715 = vmatmul.mubr.msk.f32.gmra.mxu1 %vm2010_vm15, %v6154_v45 }
0x21de   :  { %v6094_v27 = vpop.xlane.xlu1 %6093 }
0x21df   :  { %v6102_v57 = vsub.f32 %v6068_v22, %v6094_v27 }
0x21e1   :  { %v6117_v16 = vmul.f32 1.442695, %v6102_v57 }
0x21e3   :  { %v6091_v19 = vpop.xlane.xlu0 %6090 }
0x21e4   :  { %v6101_v47 = vsub.f32 %v6063_v15, %v6091_v19  ;;  %v11601_v19 = vld [vmem:[%s11842_s3 + $0xf] ss:$0 sm:$0xff] }
0x21e6   :  { %v6115_v56 = vmul.f32 1.442695, %v6101_v47 }
0x21e8   :  { %9118 = vpow2.f32 %v6115_v56 }
0x21e9   :  { %9120 = vpow2.f32 %v6117_v16 }
0x21f5   :  { %v9119_v41 = vpop.eup %9118 }
0x21f6   :  { %v6137_v55 = vsel %vm2010_vm15, %v9119_v41, 0.0  ;;  %v9121_v58 = vpop.eup %9120 }
0x21f7   :  { %6138 = vadd.xlane.f32.xlu0 %v6137_v55  ;;  %v6140_v9 = vsel %vm2010_vm15, %v9121_v58, 0.0 }
0x21fb   :  { %6141 = vadd.xlane.f32.xlu0 %v6140_v9 }
0x2211   :  { %6322 = vrot.lane.b32.xlu0 %v11296_v11, %s9214_s22  ;;  %v6433_v11 = vld [vmem:[%s11841_s2 + $0x200] sm:$0xff] }
0x2212   :  { %8724 = vmatprep.subr.mxu1 %v6433_v11 }
0x2213   :  { %8725 = vmatpush3.msra.mxu1 %v6433_v11 }
0x2215   :  { %6324 = vrot.lane.b32.xlu0 %v11302_v48, %s9214_s22  ;;  %v6432_v48 = vld [vmem:[%s11841_s2 + $0x1f8] sm:$0xff] }
0x2216   :  { %8726 = vmatprep.subr.mxu1 %v6432_v48 }
0x2217   :  { %8727 = vmatpush3.msra.mxu1 %v6432_v48 }
0x2219   :  { %6356 = vrot.lane.b32.xlu0 %v11438_v21, %s9220_s20 }
0x221d   :  { %6328 = vrot.lane.b32.xlu0 %v11306_v39, %s9214_s22 }
0x2221   :  { %6360 = vrot.lane.b32.xlu0 %v11442_v50, %s9220_s20 }
0x2277   :  { %v8710_v21 = vpop.f32.mrf.mxu1 }
0x2278   :  { %6386 = vrot.lane.b32.xlu1 %v8710_v21, %s9221_s0 }
0x2279   :  { %v6273_v33 = vpop.f32.mrf.mxu1 }
0x227a   :  { %6384 = vrot.lane.b32.xlu0 %v6273_v33, %s9221_s0 }
0x227b   :  { %v8713_v61 = vpop.f32.mrf.mxu1 }
0x227c   :  { %6390 = vrot.lane.b32.xlu1 %v8713_v61, %s9221_s0 }
0x227d   :  { %v6283_v39 = vpop.f32.mrf.mxu1 }
0x227e   :  { %6388 = vrot.lane.b32.xlu0 %v6283_v39, %s9221_s0 }
0x227f   :  { %v8716_v7 = vpop.f32.mrf.mxu1 }
0x2280   :  { %6394 = vrot.lane.b32.xlu1 %v8716_v7, %s9221_s0  ;;  %v6139_v50 = vpop.xlane.xlu0 %6138  ;;  %v11902_v7 = vld [vmem:[#allocation17_spill] sm:$0xff] }
0x2281   :  { %9122 = vrcp.f32 %v6139_v50  ;;  %v6293_v60 = vpop.f32.mrf.mxu1 }
0x2282   :  { %6392 = vrot.lane.b32.xlu0 %v6293_v60, %s9221_s0 }
0x2284   :  { %6334 = vrot.lane.b32.xlu1 %v11308_v51, %s9214_s22  ;;  %v6142_v24 = vpop.xlane.xlu0 %6141  ;;  %v6321_v51 = vpop.permute.xlu1 %6320 }
0x2285   :  { %9124 = vrcp.f32 %v6142_v24  ;;  %v6408_v25 = vsel %vm282_vm2, %v11138_v30, %v6321_v51  ;;  %v11903_v24 = vld [vmem:[#allocation16_spill] sm:$0xff]  ;;  %v11904_v51 = vld [vmem:[#allocation7_spill] sm:$0xff] }
0x2286   :  { %6332 = vrot.lane.b32.xlu0 %v11310_v28, %s9214_s22 }
0x2288   :  { %6366 = vrot.lane.b32.xlu1 %v11444_v52, %s9220_s20  ;;  %v6353_v31 = vpop.permute.xlu1 %6352  ;;  %v6323_v20 = vpop.permute.xlu0 %6322 }
0x2289   :  { %v6409_v15 = vsel %vm282_vm2, %v11136_v35, %v6323_v20  ;;  %v6416_v43 = vsel %vm298_vm4, %v6408_v25, %v6353_v31  ;;  %v11907_v25 = vld [vmem:[#allocation12_spill] sm:$0xff] }
0x228a   :  { %6364 = vrot.lane.b32.xlu0 %v11446_v0, %s9220_s20 }
0x228c   :  { %v6355_v23 = vpop.permute.xlu1 %6354  ;;  %v6325_v28 = vpop.permute.xlu0 %6324 }
0x228d   :  { %v6417_v29 = vsel %vm298_vm4, %v6409_v15, %v6355_v23  ;;  %v6410_v2 = vsel %vm282_vm2, %v11142_v32, %v6325_v28  ;;  %v11905_v23 = vld [vmem:[#allocation6_spill] sm:$0xff] }
0x228e   :  { %v9123_v12 = vpop.eup %9122 }
0x228f   :  { %v6156_v14 = vmul.f32 %v9123_v12, %v9119_v41  ;;  %v11900_v41 = vld [vmem:[#allocation14_spill] sm:$0xff] }
0x2290   :  { %v6327_v63 = vpop.permute.xlu1 %6326  ;;  %v6357_v36 = vpop.permute.xlu0 %6356 }
0x2291   :  { %8717 = vmatprep.mubr.msk.f32.mxu1 %vm2010_vm15, %v6156_v14  ;;  %v6411_v35 = vsel %vm282_vm2, %v11140_v34, %v6327_v63  ;;  %v6418_v30 = vsel %vm298_vm4, %v6410_v2, %v6357_v36 }
0x2292   :  { %v9125_v46 = vpop.eup %9124 }
0x2293   :  { %v6158_v5 = vmul.f32 %v9125_v46, %v9121_v58 }
0x2294   :  { %v6359_v22 = vpop.permute.xlu1 %6358  ;;  %v6329_v59 = vpop.permute.xlu0 %6328 }
0x2295   :  { %8718 = vmatmul.mubr.msk.f32.gmra.mxu1 %vm2010_vm15, %v6158_v5  ;;  %v6419_v53 = vsel %vm298_vm4, %v6411_v35, %v6359_v22  ;;  %v6412_v38 = vsel %vm282_vm2, %v11898_v37, %v6329_v59 }
0x2298   :  { %v6331_v52 = vpop.permute.xlu1 %6330  ;;  %v6361_v0 = vpop.permute.xlu0 %6360 }
0x2299   :  { %v6413_v34 = vsel %vm282_vm2, %v11899_v1, %v6331_v52  ;;  %v6420_v13 = vsel %vm298_vm4, %v6412_v38, %v6361_v0  ;;  %v11906_v0 = vld [vmem:[#allocation13_spill] sm:$0xff] }
0x229c   :  { %v6363_v62 = vpop.permute.xlu1 %6362 }
0x229d   :  { %v6421_v40 = vsel %vm298_vm4, %v6413_v34, %v6363_v62 }
0x22ea   :  { %v6387_v44 = vpop.permute.xlu1 %6386 }
0x22eb   :  { %v6425_v4 = vsel %vm3578_vm1, %v6417_v29, %v6387_v44 }
0x22ec   :  { %v6385_v10 = vpop.permute.xlu0 %6384 }
0x22ed   :  { %v6424_v6 = vsel %vm3578_vm1, %v6416_v43, %v6385_v10 }
0x22ee   :  { %v6391_v42 = vpop.permute.xlu1 %6390  ;;  %8728 = vmatprep.mubr.msk.f32.mxu1 %vm30_vm0, %v6424_v6 }
0x22ef   :  { %8729 = vmatmul.mubr.msk.f32.vlgmr.msra.gmra.mxu1 %vm30_vm0, %v6425_v4  ;;  %v6427_v26 = vsel %vm3578_vm1, %v6419_v53, %v6391_v42 }
0x22f0   :  { %v6389_v17 = vpop.permute.xlu0 %6388 }
0x22f1   :  { %v6426_v3 = vsel %vm3578_vm1, %v6418_v30, %v6389_v17 }
0x22f2   :  { %8731 = vmatprep.mubr.msk.f32.mxu1 %vm30_vm0, %v6426_v3  ;;  %v6395_v32 = vpop.permute.xlu1 %6394 }
0x22f3   :  { %8732 = vmatmul.mubr.msk.f32.gmra.mxu1 %vm30_vm0, %v6427_v26  ;;  %v6429_v45 = vsel %vm3578_vm1, %v6421_v40, %v6395_v32 }
0x22f4   :  { %v6393_v49 = vpop.permute.xlu0 %6392 }
0x22f5   :  { %v6428_v54 = vsel %vm3578_vm1, %v6420_v13, %v6393_v49 }
0x22f6   :  { %8734 = vmatprep.mubr.msk.f32.mxu1 %vm30_vm0, %v6428_v54  ;;  %v6335_v22 = vpop.permute.xlu1 %6334 }
0x22f7   :  { %8735 = vmatmul.mubr.msk.f32.gmra.mxu1 %vm30_vm0, %v6429_v45  ;;  %v6415_v43 = vsel %vm282_vm2, %v11907_v25, %v6335_v22 }
0x22f8   :  { %v6333_v36 = vpop.permute.xlu0 %6332 }
0x22f9   :  { %v6414_v15 = vsel %vm282_vm2, %v11906_v0, %v6333_v36 }
0x22fa   :  { %v6367_v59 = vpop.permute.xlu1 %6366 }
0x22fb   :  { %v6423_v6 = vsel %vm298_vm4, %v6415_v43, %v6367_v59 }
0x22fc   :  { %v6365_v62 = vpop.permute.xlu0 %6364 }
0x22fd   :  { %v6422_v10 = vsel %vm298_vm4, %v6414_v15, %v6365_v62 }
0x2355   :  { %v8719_v27 = vpop.f32.mrf.mxu1 }
0x2356   :  { %6398 = vrot.lane.b32.xlu1 %v8719_v27, %s9221_s0 }
0x2357   :  { %v6303_v57 = vpop.f32.mrf.mxu1 }
0x2358   :  { %6396 = vrot.lane.b32.xlu0 %v6303_v57, %s9221_s0 }
0x23af   :  { %v8730_v47 = vpop.f32.mrf.mxu1 }
0x23b0   :  { %v6537_v16 = vadd.f32 %v8730_v47, %v11601_v19 }
0x23b1   :  { %v6531_v56 = vpop.f32.mrf.mxu1 }
0x23b2   :  { %v6571_v55 = vadd.f32 %v6537_v16, %v11900_v41  ;;  %v6532_v58 = vadd.f32 %v11601_v19, %v6531_v56 }
0x23b3   :  { %v8733_v9 = vpop.f32.mrf.mxu1 }
0x23b4   :  { %v6570_v8 = vadd.f32 %v6532_v58, %v11901_v18  ;;  %v6583_v11 = vsel %vm30_vm0, %v6571_v55, 0.0  ;;  %v6547_v21 = vadd.f32 %v8733_v9, %v11601_v19 }
0x23b5   :  { %6584 = vadd.xlane.f32.xlu1 %v6583_v11  ;;  %v6541_v48 = vpop.f32.mrf.mxu1 }
0x23b6   :  { %v6542_v33 = vadd.f32 %v11601_v19, %v6541_v48  ;;  %v6580_v61 = vsel %vm30_vm0, %v6570_v8, 0.0  ;;  %v6573_v12 = vadd.f32 %v6547_v21, %v11903_v24  ;;  %v6711_v21 = vld [vmem:[%s11841_s2 + $0x230] sm:$0xff]  ;;  %v11908_v24 = vld [vmem:[#allocation9_spill] sm:$0xff] }
0x23b7   :  { %6581 = vadd.xlane.f32.xlu0 %v6580_v61  ;;  %v8736_v39 = vpop.f32.mrf.mxu1  ;;  %8740 = vmatprep.subr.mxu0 %v6711_v21  ;;  %v6709_v61 = vld [vmem:[%s11841_s2 + $0x220] sm:$0xff] }
0x23b8   :  { %v6572_v50 = vadd.f32 %v6542_v33, %v11902_v7  ;;  %v6557_v14 = vadd.f32 %v8736_v39, %v11601_v19  ;;  %v6589_v63 = vsel %vm30_vm0, %v6573_v12, 0.0  ;;  %8741 = vmatpush3.msra.mxu0 %v6711_v21  ;;  %v6710_v33 = vld [vmem:[%s11841_s2 + $0x228] sm:$0xff]  ;;  %v6708_v39 = vld [vmem:[%s11841_s2 + $0x218] sm:$0xff] }
0x23b9   :  { %v6551_v60 = vpop.f32.mrf.mxu1  ;;  %8742 = vmatprep.subr.mxu0 %v6710_v33 }
0x23ba   :  { %v6552_v46 = vadd.f32 %v11601_v19, %v6551_v60  ;;  %v6586_v5 = vsel %vm30_vm0, %v6572_v50, 0.0  ;;  %v6575_v20 = vadd.f32 %v6557_v14, %v11905_v23  ;;  %8743 = vmatpush3.msra.mxu0 %v6710_v33 }
0x23bb   :  { %6587 = vadd.xlane.f32.xlu0 %v6586_v5  ;;  %8744 = vmatprep.subr.mxu0 %v6709_v61 }
0x23bc   :  { %v6574_v31 = vadd.f32 %v6552_v46, %v11904_v51  ;;  %v6595_v52 = vsel %vm30_vm0, %v6575_v20, 0.0  ;;  %8745 = vmatpush3.msra.mxu0 %v6709_v61  ;;  %v11909_v46 = vld [vmem:[#allocation8_spill] sm:$0xff] }
0x23bd   :  { %8746 = vmatprep.subr.mxu0 %v6708_v39 }
0x23be   :  { %v6592_v28 = vsel %vm30_vm0, %v6574_v31, 0.0  ;;  %8747 = vmatpush3.msra.mxu0 %v6708_v39 }
0x23bf   :  { %6590 = vadd.xlane.f32.xlu0 %v6589_v63  ;;  %6593 = vadd.xlane.f32.xlu1 %v6592_v28 }
0x23c3   :  { %6596 = vadd.xlane.f32.xlu0 %v6595_v52 }
0x23c8   :  { %v6399_v44 = vpop.permute.xlu1 %6398 }
0x23c9   :  { %v6431_v42 = vsel %vm3578_vm1, %v6423_v6, %v6399_v44 }
0x23ca   :  { %v6397_v29 = vpop.permute.xlu0 %6396 }
0x23cb   :  { %v6430_v4 = vsel %vm3578_vm1, %v6422_v10, %v6397_v29 }
0x23cc   :  { %8737 = vmatprep.mubr.msk.f32.mxu1 %vm30_vm0, %v6430_v4 }
0x23cd   :  { %8738 = vmatmul.mubr.msk.f32.gmra.mxu1 %vm30_vm0, %v6431_v42  ;;  %v11688_v42 = vld [vmem:[%s11842_s3 + $0x10] ss:$0 sm:$0xff] }
0x243e   :  { %v6585_v2 = vpop.xlane.xlu1 %6584 }
0x243f   :  { %v6605_v35 = vmul.f32 0.03125, %v6585_v2 }
0x2440   :  { %v6582_v30 = vpop.xlane.xlu0 %6581 }
0x2441   :  { %v11631_v17 = vsub.f32 %v6571_v55, %v6605_v35  ;;  %v6604_v53 = vmul.f32 0.03125, %v6582_v30 }
0x2443   :  { %v11633_v3 = vsub.f32 %v6570_v8, %v6604_v53  ;;  %v6621_v26 = vmul.f32 %v11631_v17, %v11631_v17 }
0x2444   :  { %v6588_v37 = vpop.xlane.xlu0 %6587 }
0x2445   :  { %v6606_v38 = vmul.f32 0.03125, %v6588_v37  ;;  %v6631_v32 = vsel %vm30_vm0, %v6621_v26, 0.0  ;;  %v6620_v1 = vmul.f32 %v11633_v3, %v11633_v3  ;;  %v11696_v26 = vld [vmem:[%s11842_s3 + $0x11] ss:$0 sm:$0xff] }
0x2446   :  { %6632 = vadd.xlane.f32.xlu0 %v6631_v32 }
0x2447   :  { %v11640_v34 = vsub.f32 %v6572_v50, %v6606_v38  ;;  %v6628_v13 = vsel %vm30_vm0, %v6620_v1, 0.0 }
0x2448   :  { %v6594_v49 = vpop.xlane.xlu1 %6593  ;;  %6629 = vadd.xlane.f32.xlu1 %v6628_v13  ;;  %v6591_v40 = vpop.xlane.xlu0 %6590 }
0x2449   :  { %v6608_v54 = vmul.f32 0.03125, %v6594_v49  ;;  %v6607_v45 = vmul.f32 0.03125, %v6591_v40  ;;  %v6622_v27 = vmul.f32 %v11640_v34, %v11640_v34 }
0x244b   :  { %v11645_v57 = vsub.f32 %v6574_v31, %v6608_v54  ;;  %v11647_v47 = vsub.f32 %v6573_v12, %v6607_v45  ;;  %v6634_v16 = vsel %vm30_vm0, %v6622_v27, 0.0 }
0x244c   :  { %6635 = vadd.xlane.f32.xlu1 %v6634_v16  ;;  %v6597_v56 = vpop.xlane.xlu0 %6596 }
0x244d   :  { %v6609_v41 = vmul.f32 0.03125, %v6597_v56  ;;  %v6624_v55 = vmul.f32 %v11645_v57, %v11645_v57  ;;  %v6623_v58 = vmul.f32 %v11647_v47, %v11647_v47 }
0x244f   :  { %v11654_v9 = vsub.f32 %v6575_v20, %v6609_v41  ;;  %v6640_v18 = vsel %vm30_vm0, %v6624_v55, 0.0  ;;  %v6637_v8 = vsel %vm30_vm0, %v6623_v58, 0.0 }
0x2450   :  { %6641 = vadd.xlane.f32.xlu1 %v6640_v18  ;;  %6638 = vadd.xlane.f32.xlu0 %v6637_v8 }
0x2451   :  { %v6625_v11 = vmul.f32 %v11654_v9, %v11654_v9 }
0x2453   :  { %v6643_v48 = vsel %vm30_vm0, %v6625_v11, 0.0 }
0x2454   :  { %6644 = vadd.xlane.f32.xlu0 %v6643_v48 }
0x248d   :  { %v8739_v7 = vpop.f32.mrf.mxu1 }
0x248e   :  { %v6567_v50 = vadd.f32 %v8739_v7, %v11601_v19  ;;  %v6925_v7 = vld [vmem:[%s11841_s2 + $0x270] sm:$0xff] }
0x248f   :  { %v6561_v60 = vpop.f32.mrf.mxu1  ;;  %8760 = vmatprep.subr.mxu1 %v6925_v7 }
0x2490   :  { %v11675_v12 = vadd.f32 %v6567_v50, %v11908_v24  ;;  %v6562_v14 = vadd.f32 %v11601_v19, %v6561_v60  ;;  %8761 = vmatpush3.msra.mxu1 %v6925_v7  ;;  %v6924_v50 = vld [vmem:[%s11841_s2 + $0x268] sm:$0xff]  ;;  %v6923_v60 = vld [vmem:[%s11841_s2 + $0x260] sm:$0xff]  ;;  %v6922_v24 = vld [vmem:[%s11841_s2 + $0x258] sm:$0xff] }
0x2491   :  { %8762 = vmatprep.subr.mxu1 %v6924_v50 }
0x2492   :  { %v11679_v5 = vadd.f32 %v6562_v14, %v11909_v46  ;;  %v6601_v51 = vsel %vm30_vm0, %v11675_v12, 0.0  ;;  %8763 = vmatpush3.msra.mxu1 %v6924_v50  ;;  %v6920_v14 = vld [vmem:[%s11841_s2 + $0x248] sm:$0xff]  ;;  %v6919_v46 = vld [vmem:[%s11841_s2 + $0x240] sm:$0xff] }
0x2493   :  { %6602 = vadd.xlane.f32.xlu0 %v6601_v51  ;;  %8764 = vmatprep.subr.mxu1 %v6923_v60  ;;  %v11770_v51 = vld [vmem:[%s11842_s3 + $0x12] ss:$0 sm:$0xff] }
0x2494   :  { %v6598_v31 = vsel %vm30_vm0, %v11679_v5, 0.0  ;;  %8765 = vmatpush3.msra.mxu1 %v6923_v60 }
0x2495   :  { %6599 = vadd.xlane.f32.xlu1 %v6598_v31  ;;  %8766 = vmatprep.subr.mxu1 %v6922_v24 }
0x2496   :  { %8767 = vmatpush3.msra.mxu1 %v6922_v24 }
0x24cf   :  { %v6633_v23 = vpop.xlane.xlu0 %6632 }
0x24d0   :  { %v6653_v20 = vmul.f32 0.03125, %v6633_v23 }
0x24d1   :  { %v6630_v63 = vpop.xlane.xlu1 %6629 }
0x24d2   :  { %v6661_v28 = vadd.f32 1e-06, %v6653_v20  ;;  %v6652_v22 = vmul.f32 0.03125, %v6630_v63 }
0x24d4   :  { %9126 = vrsqrt.f32 %v6661_v28  ;;  %v6660_v36 = vadd.f32 1e-06, %v6652_v22 }
0x24d5   :  { %v6636_v52 = vpop.xlane.xlu1 %6635 }
0x24d6   :  { %9128 = vrsqrt.f32 %v6660_v36  ;;  %v6654_v19 = vmul.f32 0.03125, %v6636_v52 }
0x24d8   :  { %v6662_v59 = vadd.f32 1e-06, %v6654_v19 }
0x24d9   :  { %v6642_v62 = vpop.xlane.xlu1 %6641  ;;  %v6639_v0 = vpop.xlane.xlu0 %6638 }
0x24da   :  { %9130 = vrsqrt.f32 %v6662_v59  ;;  %v6656_v15 = vmul.f32 0.03125, %v6642_v62  ;;  %v6655_v44 = vmul.f32 0.03125, %v6639_v0 }
0x24dc   :  { %v6664_v25 = vadd.f32 1e-06, %v6656_v15  ;;  %v6663_v43 = vadd.f32 1e-06, %v6655_v44 }
0x24dd   :  { %v6645_v10 = vpop.xlane.xlu0 %6644 }
0x24de   :  { %9132 = vrsqrt.f32 %v6664_v25  ;;  %v6657_v29 = vmul.f32 0.03125, %v6645_v10 }
0x24df   :  { %9134 = vrsqrt.f32 %v6663_v43 }
0x24e0   :  { %v6665_v6 = vadd.f32 1e-06, %v6657_v29 }
0x24e1   :  { %v9127_v4 = vpop.eup %9126 }
0x24e2   :  { %v6677_v2 = vmul.f32 %v9127_v4, %v11631_v17  ;;  %9136 = vrsqrt.f32 %v6665_v6 }
0x24e3   :  { %v9129_v35 = vpop.eup %9128 }
0x24e4   :  { %v6676_v30 = vmul.f32 %v9129_v35, %v11633_v3  ;;  %v6689_v53 = vmul.f32 %v11688_v42, %v6677_v2 }
0x24e6   :  { %v6688_v37 = vmul.f32 %v11688_v42, %v6676_v30  ;;  %v11704_v17 = vadd.f32 %v11696_v26, %v6689_v53 }
0x24e7   :  { %v9131_v38 = vpop.eup %9130 }
0x24e8   :  { %v11700_v32 = vadd.f32 %v11696_v26, %v6688_v37  ;;  %v6678_v1 = vmul.f32 %v9131_v38, %v11640_v34 }
0x24ea   :  { %8748 = vmatprep.mubr.msk.f32.mxu0 %vm30_vm0, %v11700_v32  ;;  %v6690_v3 = vmul.f32 %v11688_v42, %v6678_v1 }
0x24eb   :  { %v9133_v13 = vpop.eup %9132  ;;  %8749 = vmatmul.mubr.msk.f32.vlgmr.msra.gmra.mxu0 %vm30_vm0, %v11704_v17 }
0x24ec   :  { %v9135_v49 = vpop.eup %9134  ;;  %v6702_v40 = vadd.f32 %v11696_v26, %v6690_v3  ;;  %v6680_v54 = vmul.f32 %v9133_v13, %v11645_v57 }
0x24ed   :  { %v6679_v45 = vmul.f32 %v9135_v49, %v11647_v47 }
0x24ee   :  { %8751 = vmatprep.mubr.msk.f32.mxu0 %vm30_vm0, %v6702_v40  ;;  %v6692_v34 = vmul.f32 %v11688_v42, %v6680_v54 }
0x24ef   :  { %v9137_v27 = vpop.eup %9136  ;;  %v6691_v16 = vmul.f32 %v11688_v42, %v6679_v45 }
0x24f0   :  { %v6681_v56 = vmul.f32 %v9137_v27, %v11654_v9  ;;  %v11719_v41 = vadd.f32 %v11696_v26, %v6692_v34 }
0x24f1   :  { %v6703_v55 = vadd.f32 %v11696_v26, %v6691_v16 }
0x24f2   :  { %v6693_v58 = vmul.f32 %v11688_v42, %v6681_v56 }
0x24f3   :  { %8752 = vmatmul.mubr.msk.f32.gmra.mxu0 %vm30_vm0, %v6703_v55 }
0x24f4   :  { %8754 = vmatprep.mubr.msk.f32.mxu0 %vm30_vm0, %v11719_v41  ;;  %v11727_v57 = vadd.f32 %v11696_v26, %v6693_v58 }
0x24f7   :  { %8755 = vmatmul.mubr.msk.f32.gmra.mxu0 %vm30_vm0, %v11727_v57 }
0x251c   :  { %v6603_v47 = vpop.xlane.xlu0 %6602 }
0x251d   :  { %v6611_v9 = vmul.f32 0.03125, %v6603_v47 }
0x251e   :  { %v6600_v18 = vpop.xlane.xlu1 %6599 }
0x251f   :  { %v11732_v8 = vsub.f32 %v11675_v12, %v6611_v9  ;;  %v6610_v11 = vmul.f32 0.03125, %v6600_v18  ;;  %v6921_v12 = vld [vmem:[%s11841_s2 + $0x250] sm:$0xff] }
0x2520   :  { %8768 = vmatprep.subr.mxu1 %v6921_v12 }
0x2521   :  { %v11735_v48 = vsub.f32 %v11679_v5, %v6610_v11  ;;  %v6627_v21 = vmul.f32 %v11732_v8, %v11732_v8  ;;  %8769 = vmatpush3.msra.mxu1 %v6921_v12  ;;  %v6918_v5 = vld [vmem:[%s11841_s2 + $0x238] sm:$0xff] }
0x2522   :  { %8770 = vmatprep.subr.mxu1 %v6920_v14 }
0x2523   :  { %v6649_v33 = vsel %vm30_vm0, %v6627_v21, 0.0  ;;  %v6626_v61 = vmul.f32 %v11735_v48, %v11735_v48  ;;  %8771 = vmatpush3.msra.mxu1 %v6920_v14 }
0x2524   :  { %6650 = vadd.xlane.f32.xlu0 %v6649_v33  ;;  %8772 = vmatprep.subr.mxu1 %v6919_v46 }
0x2525   :  { %v6646_v39 = vsel %vm30_vm0, %v6626_v61, 0.0  ;;  %8773 = vmatpush3.msra.mxu1 %v6919_v46 }
0x2526   :  { %6647 = vadd.xlane.f32.xlu1 %v6646_v39  ;;  %8774 = vmatprep.subr.mxu1 %v6918_v5 }
0x2527   :  { %8775 = vmatpush3.msra.mxu1 %v6918_v5 }
0x25ab   :  { %v8750_v31 = vpop.f32.mrf.mxu0 }
0x25ac   :  { %v11773_v23 = vadd.f32 %v8750_v31, %v11770_v51 }
0x25ad   :  { %v6807_v20 = vpop.f32.mrf.mxu0  ;;  %v6651_v63 = vpop.xlane.xlu0 %6650 }
0x25ae   :  { %v6855_v28 = vmul.f32 0.044715, %v11773_v23  ;;  %v11777_v22 = vadd.f32 %v11770_v51, %v6807_v20  ;;  %v6659_v36 = vmul.f32 0.03125, %v6651_v63 }
0x25af   :  { %v6648_v52 = vpop.xlane.xlu1 %6647 }
0x25b0   :  { %v6863_v19 = vmul.f32 %v6855_v28, %v11773_v23  ;;  %v6854_v59 = vmul.f32 0.044715, %v11777_v22  ;;  %v6667_v62 = vadd.f32 1e-06, %v6659_v36  ;;  %v6658_v0 = vmul.f32 0.03125, %v6648_v52 }
0x25b1   :  { %v6847_v36 = vmul.f32 0.5, %v11773_v23 }
0x25b2   :  { %v6871_v15 = vmul.f32 %v6863_v19, %v11773_v23  ;;  %v6862_v44 = vmul.f32 %v6854_v59, %v11777_v22  ;;  %9138 = vrsqrt.f32 %v6667_v62  ;;  %v6666_v25 = vadd.f32 1e-06, %v6658_v0 }
0x25b3   :  { %v8753_v43 = vpop.f32.mrf.mxu0 }
0x25b4   :  { %v6879_v10 = vadd.f32 %v6871_v15, %v11773_v23  ;;  %v6870_v29 = vmul.f32 %v6862_v44, %v11777_v22  ;;  %9140 = vrsqrt.f32 %v6666_v25  ;;  %v6823_v6 = vadd.f32 %v8753_v43, %v11770_v51 }
0x25b5   :  { %v6817_v4 = vpop.f32.mrf.mxu0 }
0x25b6   :  { %v6887_v2 = vmul.f32 0.7978846, %v6879_v10  ;;  %v6878_v35 = vadd.f32 %v6870_v29, %v11777_v22  ;;  %v6857_v30 = vmul.f32 0.044715, %v6823_v6  ;;  %v6818_v53 = vadd.f32 %v11770_v51, %v6817_v4 }
0x25b7   :  { %v8756_v37 = vpop.f32.mrf.mxu0  ;;  %v6849_v44 = vmul.f32 0.5, %v6823_v6 }
0x25b8   :  { %9142 = vtanh.f32 %v6887_v2  ;;  %v6865_v38 = vmul.f32 %v6857_v30, %v6823_v6  ;;  %v6833_v1 = vadd.f32 %v8756_v37, %v11770_v51  ;;  %v6886_v3 = vmul.f32 0.7978846, %v6878_v35 }
0x25b9   :  { %v6856_v13 = vmul.f32 0.044715, %v6818_v53  ;;  %v6827_v49 = vpop.f32.mrf.mxu0  ;;  %v6848_v0 = vmul.f32 0.5, %v6818_v53 }
0x25ba   :  { %v6873_v40 = vmul.f32 %v6865_v38, %v6823_v6  ;;  %v6859_v54 = vmul.f32 0.044715, %v6833_v1  ;;  %v6828_v45 = vadd.f32 %v11770_v51, %v6827_v49  ;;  %9144 = vtanh.f32 %v6886_v3  ;;  %v7484_v3 = vld [vmem:[%s11842_s3 + $0x13] ss:$0 sm:$0xff] }
0x25bb   :  { %v6864_v34 = vmul.f32 %v6856_v13, %v6818_v53  ;;  %v6851_v23 = vmul.f32 0.5, %v6833_v1 }
0x25bc   :  { %v6881_v27 = vadd.f32 %v6873_v40, %v6823_v6  ;;  %v6867_v16 = vmul.f32 %v6859_v54, %v6833_v1  ;;  %v6858_v56 = vmul.f32 0.044715, %v6828_v45 }
0x25bd   :  { %v6872_v55 = vmul.f32 %v6864_v34, %v6818_v53 }
0x25be   :  { %v6889_v58 = vmul.f32 0.7978846, %v6881_v27  ;;  %v6875_v47 = vmul.f32 %v6867_v16, %v6833_v1  ;;  %v6866_v9 = vmul.f32 %v6858_v56, %v6828_v45 }
0x25bf   :  { %v9139_v18 = vpop.eup %9138  ;;  %v6880_v11 = vadd.f32 %v6872_v55, %v6818_v53 }
0x25c0   :  { %v6683_v21 = vmul.f32 %v9139_v18, %v11732_v8  ;;  %9146 = vtanh.f32 %v6889_v58  ;;  %v6883_v33 = vadd.f32 %v6875_v47, %v6833_v1  ;;  %v6874_v61 = vmul.f32 %v6866_v9, %v6828_v45 }
0x25c1   :  { %v9141_v39 = vpop.eup %9140  ;;  %v6888_v7 = vmul.f32 0.7978846, %v6880_v11 }
0x25c2   :  { %v6891_v50 = vmul.f32 0.7978846, %v6883_v33  ;;  %v6882_v60 = vadd.f32 %v6874_v61, %v6828_v45  ;;  %v6682_v24 = vmul.f32 %v9141_v39, %v11735_v48  ;;  %v6695_v12 = vmul.f32 %v11688_v42, %v6683_v21 }
0x25c3   :  { %9148 = vtanh.f32 %v6888_v7  ;;  %v6846_v48 = vmul.f32 0.5, %v11777_v22  ;;  %v6850_v22 = vmul.f32 0.5, %v6828_v45 }
0x25c4   :  { %9150 = vtanh.f32 %v6891_v50  ;;  %v6694_v14 = vmul.f32 %v11688_v42, %v6682_v24  ;;  %v6890_v46 = vmul.f32 0.7978846, %v6882_v60  ;;  %v6707_v8 = vadd.f32 %v11696_v26, %v6695_v12 }
0x25c5   :  { %v9143_v5 = vpop.eup %9142 }
0x25c6   :  { %v6706_v31 = vadd.f32 %v11696_v26, %v6694_v14  ;;  %9152 = vtanh.f32 %v6890_v46  ;;  %v6903_v63 = vadd.f32 1.0, %v9143_v5 }
0x25c7   :  { %v9145_v20 = vpop.eup %9144 }
0x25c8   :  { %8757 = vmatprep.mubr.msk.f32.mxu0 %vm30_vm0, %v6706_v31  ;;  %v6902_v28 = vadd.f32 1.0, %v9145_v20  ;;  %v6911_v42 = vmul.f32 %v6903_v63, %v6847_v36 }
0x25c9   :  { %8758 = vmatmul.mubr.msk.f32.gmra.mxu0 %vm30_vm0, %v6707_v8 }
0x25ca   :  { %v6910_v52 = vmul.f32 %v6902_v28, %v6846_v48 }
0x25cc   :  { %8776 = vmatprep.mubr.msk.f32.mxu1 %vm2010_vm15, %v6910_v52 }
0x25cd   :  { %v9147_v19 = vpop.eup %9146  ;;  %8777 = vmatmul.mubr.msk.f32.vlgmr.msra.gmra.mxu1 %vm2010_vm15, %v6911_v42 }
0x25ce   :  { %v6905_v26 = vadd.f32 1.0, %v9147_v19 }
0x25d0   :  { %v9149_v59 = vpop.eup %9148  ;;  %v6913_v10 = vmul.f32 %v6905_v26, %v6849_v44 }
0x25d1   :  { %v9151_v62 = vpop.eup %9150  ;;  %v6904_v15 = vadd.f32 1.0, %v9149_v59 }
0x25d2   :  { %v6907_v4 = vadd.f32 1.0, %v9151_v62 }
0x25d3   :  { %v9153_v25 = vpop.eup %9152  ;;  %v6912_v43 = vmul.f32 %v6904_v15, %v6848_v0 }
0x25d4   :  { %v6906_v29 = vadd.f32 1.0, %v9153_v25  ;;  %v6915_v35 = vmul.f32 %v6907_v4, %v6851_v23 }
0x25d5   :  { %8779 = vmatprep.mubr.msk.f32.mxu1 %vm2010_vm15, %v6912_v43 }
0x25d6   :  { %8780 = vmatmul.mubr.msk.f32.gmra.mxu1 %vm2010_vm15, %v6913_v10  ;;  %v6914_v2 = vmul.f32 %v6906_v29, %v6850_v22 }
0x25d8   :  { %8782 = vmatprep.mubr.msk.f32.mxu1 %vm2010_vm15, %v6914_v2 }
0x25da   :  { %8783 = vmatmul.mubr.msk.f32.gmra.mxu1 %vm2010_vm15, %v6915_v35 }
0x2689   :  { %v8759_v30 = vpop.f32.mrf.mxu0 }
0x268a   :  { %v6843_v6 = vadd.f32 %v8759_v30, %v11770_v51 }
0x268b   :  { %v6837_v53 = vpop.f32.mrf.mxu0 }
0x268c   :  { %v6861_v37 = vmul.f32 0.044715, %v6843_v6  ;;  %v6838_v38 = vadd.f32 %v11770_v51, %v6837_v53  ;;  %v6853_v8 = vmul.f32 0.5, %v6843_v6 }
0x268d   :  { %v8778_v49 = vpop.f32.mrf.mxu1 }
0x268e   :  { %v6869_v1 = vmul.f32 %v6861_v37, %v6843_v6  ;;  %v6860_v13 = vmul.f32 0.044715, %v6838_v38  ;;  %v7027_v40 = vadd.f32 %v8778_v49, %v7484_v3  ;;  %v6852_v5 = vmul.f32 0.5, %v6838_v38 }
0x268f   :  { %v7021_v34 = vpop.f32.mrf.mxu1 }
0x2690   :  { %v6877_v54 = vmul.f32 %v6869_v1, %v6843_v6  ;;  %v6868_v45 = vmul.f32 %v6860_v13, %v6838_v38  ;;  %v7057_v27 = vadd.f32 %v7027_v40, %v11704_v17  ;;  %v7022_v16 = vadd.f32 %v7484_v3, %v7021_v34  ;;  %v7493_v34 = vld [vmem:[%s11842_s3 + $0x14] ss:$0 sm:$0xff] }
0x2692   :  { %v6885_v56 = vadd.f32 %v6877_v54, %v6843_v6  ;;  %v6876_v55 = vmul.f32 %v6868_v45, %v6838_v38  ;;  %v7056_v58 = vadd.f32 %v7022_v16, %v11700_v32  ;;  %v7065_v51 = vsel %vm30_vm0, %v7057_v27, 0.0 }
0x2693   :  { %7066 = vadd.xlane.f32.xlu0 %v7065_v51 }
0x2694   :  { %v6893_v47 = vmul.f32 0.7978846, %v6885_v56  ;;  %v6884_v9 = vadd.f32 %v6876_v55, %v6838_v38  ;;  %v7062_v18 = vsel %vm30_vm0, %v7056_v58, 0.0  ;;  %v7494_v56 = vld [vmem:[%s11842_s3 + $0x15] ss:$0 sm:$0xff]  ;;  %s9190_s3 = scalar_lea.vmem %s7141_s26, 512 }
0x2695   :  { %7063 = vadd.xlane.f32.xlu1 %v7062_v18  ;;  %p9191_p0 = scmp.ne.s32.totalorder %s7141_s26, %s9190_s3  ;;  %p9196_p2 = scmp.lt.s32.totalorder %s9190_s3, %s9190_s3 }
0x2696   :  { %9154 = vtanh.f32 %v6893_v47  ;;  %v8781_v11 = vpop.f32.mrf.mxu1  ;;  %v6892_v21 = vmul.f32 0.7978846, %v6884_v9 }
0x2697   :  { %p9197_p3 = por %p9196_p2, %p9195_p1 }
0x2698   :  { %v7031_v33 = vpop.f32.mrf.mxu1  ;;  %9156 = vtanh.f32 %v6892_v21 }
0x2699   :  { %p9198_p4 = pnand %p9197_p3, %p9191_p0 }
0x269a   :  { %v8784_v61 = vpop.f32.mrf.mxu1 }
0x269b   :  { %v7045_v17 = vadd.f32 %v8784_v61, %v7484_v3 }
0x269c   :  { %v7039_v39 = vpop.f32.mrf.mxu1 }
0x269d   :  { %v7059_v7 = vadd.f32 %v7045_v17, %v11727_v57  ;;  %v7040_v50 = vadd.f32 %v7484_v3, %v7039_v39 }
0x269f   :  { %v7058_v32 = vadd.f32 %v7040_v50, %v11719_v41  ;;  %v7071_v60 = vsel %vm30_vm0, %v7059_v7, 0.0 }
0x26a0   :  { %7072 = vadd.xlane.f32.xlu0 %v7071_v60 }
0x26a1   :  { %v7068_v24 = vsel %vm30_vm0, %v7058_v32, 0.0 }
0x26a2   :  { %7069 = vadd.xlane.f32.xlu1 %v7068_v24 }
0x26a3   :  { %v9155_v12 = vpop.eup %9154 }
0x26a4   :  { %v6909_v46 = vadd.f32 1.0, %v9155_v12 }
0x26a5   :  { %v9157_v14 = vpop.eup %9156 }
0x26a6   :  { %v6908_v31 = vadd.f32 1.0, %v9157_v14  ;;  %v6917_v63 = vmul.f32 %v6909_v46, %v6853_v8 }
0x26a8   :  { %v6916_v20 = vmul.f32 %v6908_v31, %v6852_v5 }
0x26aa   :  { %8785 = vmatprep.mubr.msk.f32.mxu1 %vm2010_vm15, %v6916_v20 }
0x26ab   :  { %8786 = vmatmul.mubr.msk.f32.gmra.mxu1 %vm2010_vm15, %v6917_v63 }
0x271c   :  { %v7067_v57 = vpop.xlane.xlu0 %7066 }
0x271d   :  { %v7075_v41 = vmul.f32 0.03125, %v7067_v57 }
0x271e   :  { %v7064_v48 = vpop.xlane.xlu1 %7063 }
0x271f   :  { %v7079_v28 = vsub.f32 %v7057_v27, %v7075_v41  ;;  %v7074_v36 = vmul.f32 0.03125, %v7064_v48 }
0x2721   :  { %v7078_v52 = vsub.f32 %v7056_v58, %v7074_v36  ;;  %v7083_v42 = vmul.f32 %v7079_v28, %v7079_v28 }
0x2723   :  { %v7089_v19 = vsel %vm30_vm0, %v7083_v42, 0.0  ;;  %v7082_v59 = vmul.f32 %v7078_v52, %v7078_v52 }
0x2724   :  { %7090 = vadd.xlane.f32.xlu0 %v7089_v19 }
0x2725   :  { %v7086_v26 = vsel %vm30_vm0, %v7082_v59, 0.0 }
0x2726   :  { %7087 = vadd.xlane.f32.xlu1 %v7086_v26 }
0x2729   :  { %v7073_v62 = vpop.xlane.xlu0 %7072 }
0x272a   :  { %v7077_v0 = vmul.f32 0.03125, %v7073_v62 }
0x272b   :  { %v7070_v15 = vpop.xlane.xlu1 %7069 }
0x272c   :  { %v7081_v44 = vsub.f32 %v7059_v7, %v7077_v0  ;;  %v7076_v25 = vmul.f32 0.03125, %v7070_v15 }
0x272e   :  { %v7080_v43 = vsub.f32 %v7058_v32, %v7076_v25  ;;  %v7085_v10 = vmul.f32 %v7081_v44, %v7081_v44 }
0x2730   :  { %v7095_v22 = vsel %vm30_vm0, %v7085_v10, 0.0  ;;  %v7084_v29 = vmul.f32 %v7080_v43, %v7080_v43 }
0x2731   :  { %7096 = vadd.xlane.f32.xlu0 %v7095_v22 }
0x2732   :  { %v7092_v4 = vsel %vm30_vm0, %v7084_v29, 0.0 }
0x2733   :  { %7093 = vadd.xlane.f32.xlu1 %v7092_v4 }
0x276b   :  { %v8787_v23 = vpop.f32.mrf.mxu1 }
0x276d   :  { %v7049_v2 = vpop.f32.mrf.mxu1 }
0x27ad   :  { %v7091_v35 = vpop.xlane.xlu0 %7090 }
0x27ae   :  { %v7099_v30 = vmul.f32 0.03125, %v7091_v35 }
0x27af   :  { %v7088_v6 = vpop.xlane.xlu1 %7087 }
0x27b0   :  { %v7103_v53 = vadd.f32 1e-06, %v7099_v30  ;;  %v7098_v37 = vmul.f32 0.03125, %v7088_v6 }
0x27b2   :  { %9158 = vrsqrt.f32 %v7103_v53  ;;  %v7102_v38 = vadd.f32 1e-06, %v7098_v37 }
0x27b4   :  { %9160 = vrsqrt.f32 %v7102_v38 }
0x27ba   :  { %v7097_v3 = vpop.xlane.xlu0 %7096 }
0x27bb   :  { %v7101_v1 = vmul.f32 0.03125, %v7097_v3 }
0x27bc   :  { %v7094_v13 = vpop.xlane.xlu1 %7093 }
0x27bd   :  { %v7105_v49 = vadd.f32 1e-06, %v7101_v1  ;;  %v7100_v40 = vmul.f32 0.03125, %v7094_v13 }
0x27bf   :  { %9162 = vrsqrt.f32 %v7105_v49  ;;  %v7104_v54 = vadd.f32 1e-06, %v7100_v40  ;;  %v9159_v45 = vpop.eup %9158 }
0x27c0   :  { %v7111_v27 = vmul.f32 %v9159_v45, %v7079_v28 }
0x27c1   :  { %9164 = vrsqrt.f32 %v7104_v54  ;;  %v9161_v16 = vpop.eup %9160 }
0x27c2   :  { %v7119_v55 = vmul.f32 %v7493_v34, %v7111_v27  ;;  %v7110_v58 = vmul.f32 %v9161_v16, %v7078_v52 }
0x27c4   :  { %v7118_v51 = vmul.f32 %v7493_v34, %v7110_v58  ;;  %v7127_v47 = vadd.f32 %v7494_v56, %v7119_v55 }
0x27c6   :  { %v7126_v9 = vadd.f32 %v7494_v56, %v7118_v51  ;;  %7131 = vst.msk [vmem:[#allocation3 + $0x8] sm:$0xff] %vm30_vm0, %v7127_v47 }
0x27c8   :  { %7130 = vst.msk [vmem:[#allocation3] sm:$0xff] %vm30_vm0, %v7126_v9 }
0x27cc   :  { %v9163_v18 = vpop.eup %9162 }
0x27cd   :  { %v7113_v11 = vmul.f32 %v9163_v18, %v7081_v44 }
0x27ce   :  { %v9165_v21 = vpop.eup %9164 }
0x27cf   :  { %v7121_v33 = vmul.f32 %v7493_v34, %v7113_v11  ;;  %v7112_v61 = vmul.f32 %v9165_v21, %v7080_v43 }
0x27d1   :  { %v7120_v17 = vmul.f32 %v7493_v34, %v7112_v61  ;;  %v7129_v39 = vadd.f32 %v7494_v56, %v7121_v33 }
0x27d3   :  { %v7128_v7 = vadd.f32 %v7494_v56, %v7120_v17  ;;  %7134 = vst.msk [vmem:[#allocation3 + $0x18] sm:$0xff] %vm30_vm0, %v7129_v39 }
0x27d5   :  { %7133 = vst.msk [vmem:[#allocation3 + $0x10] sm:$0xff] %vm30_vm0, %v7128_v7 }
0x27d6   :  { %9201 = shalt.err (!%p9198_p4)
}
0x27d7   :  { %s9223_s27 = smov 128  }
0x27d8   :  { %7146 = dma.vmem_to_hbm [thread:$0]  %s7141_s26, 512, %s11843_s4, [#allocation4], %s9223_s27, %s9223_s27, %s9214_s22  }
0x27d9   :  { %9210 = dma.done.wait [#allocation4], 512  }
0x27da   :  { %9211 = vsyncadd [#allocation4], 4294966784 }
0x27db   :  { %7150 = vsyncpa [#allocation4], 1 }

</bundles_post_ra>
